<compile_context>
chip_gen: v6e
topology: v6e:2x2x1
jax: 0.10.0
libtpu: 0.0.40
codegen_flags: <defaults>
</compile_context>

<pallas_src>
import numpy as np
import jax
import jax.numpy as jnp
from jax import lax
from jax.experimental import pallas as pl
from jax.experimental.pallas import tpu as pltpu

C1P = 128            # conv1 output channels, padded 20 -> 128 (lane dense)
C2P = 128            # conv2 output channels, padded 50 -> 128
NHID = 512           # fc1 hidden, padded 500 -> 512
NLOG = 128           # logits, padded 10 -> 128
TAPP = 32            # conv1 taps, padded 25 -> 32 (patch lane dim)
WPAD = 16            # pooled conv1 width, padded 12 -> 16 (8-aligned sublanes)
NPATCH = 12 * 2 * 2 * WPAD   # 768 patch rows / image, pool-window-major order


# ----------------------------- Pallas kernels --------------------------------

def _conv_fused_kernel(p_ref, w1_ref, b1_ref, w2_ref, b2_ref, sel2_ref,
                       o_ref, h1_ref, im2_ref):
    # p:   (Bt, 768, 32) bf16   conv1 patches, pool-window-major rows
    # w1:  (32, C1P) bf16       b1: (1, C1P) f32
    # w2:  (25*C1P, C2P) bf16   b2: (1, C2P) f32
    # sel2:(32, 32) f32         o:  (Bt, 16, C2P) bf16
    # h1:  VMEM (Bt, 12, 16, C1P) f32      im2: VMEM (Bt*64, 25*C1P) bf16
    bt = p_ref.shape[0]

    # ---- conv1: one MXU dot over the prebuilt patches -----------------------
    pm = p_ref[...].reshape(bt * NPATCH, TAPP)
    c1 = jnp.dot(pm, w1_ref[...], preferred_element_type=jnp.float32)
    c1 = jnp.maximum(c1 + b1_ref[...], 0.0)                  # (bt*768, C1P)

    # ---- conv1 2x2 maxpool: both pool partners are leading axes (pure VPU) --
    c1 = c1.reshape(bt, 12, 2, 2, WPAD, C1P)   # (b, ph, oh_lo, ow_lo, pw(16), c)
    pooled = jnp.maximum(jnp.maximum(c1[:, :, 0, 0], c1[:, :, 0, 1]),
                         jnp.maximum(c1[:, :, 1, 0], c1[:, :, 1, 1]))
    h1_ref[...] = pooled                        # (bt, 12, 16, C1P); cols 12..15 unused

    # ---- conv2: in-VMEM im2col (5 sublane-offset loads) + one big-K MXU dot --
    for kj in range(5):
        slab = h1_ref[:, :, kj:kj + 8, :]                      # (bt, 12, 8, C1P) f32
        for ki in range(5):
            tap = slab[:, ki:ki + 8, :, :].reshape(bt * 64, C1P)
            t = ki * 5 + kj
            im2_ref[:, t * C1P:(t + 1) * C1P] = tap.astype(jnp.bfloat16)
    acc = jnp.dot(im2_ref[...], w2_ref[...],
                  preferred_element_type=jnp.float32)          # (bt*64, C2P)
    acc = jnp.maximum(acc + b2_ref[...], 0.0)

    # ---- conv2 2x2 maxpool: H via leading-axis max, W via tiny selection dot --
    r = acc.reshape(bt, 4, 2, 8, C2P)
    hp = jnp.maximum(r[:, :, 0], r[:, :, 1]).reshape(bt, 32, C2P)   # (b, h*8+w, c)
    sel = jnp.broadcast_to(sel2_ref[...], (bt, 32, 32))
    sw = jnp.einsum('bij,bjc->bic', sel, hp,
                    preferred_element_type=jnp.float32)        # even/odd col pick
    sw = sw.reshape(bt, 2, 16, C2P)
    o_ref[...] = jnp.maximum(sw[:, 0], sw[:, 1]).astype(o_ref.dtype)  # rows = h*4+w


def _fc_fused_kernel(x_ref, w1_ref, b1_ref, w2_ref, b2_ref, o_ref):
    # x: (bt,2048) bf16  w1: (2048,512) bf16  b1: (1,512) f32
    # w2: (512,128) f32  b2: (1,128) f32 (-1e30 on padded logits)
    h = jnp.dot(x_ref[...], w1_ref[...], preferred_element_type=jnp.float32)
    h = jnp.maximum(h + b1_ref[...], 0.0)
    z = jnp.dot(h, w2_ref[...], preferred_element_type=jnp.float32) + b2_ref[...]
    m = jnp.max(z, axis=-1, keepdims=True)
    lse = m + jnp.log(jnp.sum(jnp.exp(z - m), axis=-1, keepdims=True))
    o_ref[...] = z - lse


# ------------------------------ wrappers --------------------------------------

def _cparams():
    # ~11 MiB peak per conv step / ~8 MiB per fc step at the default tiles:
    # fits the scoped budget on v5e/v6e and leaves headroom on v7x (64 MiB/TC).
    return pltpu.CompilerParams(dimension_semantics=("parallel",),
                                vmem_limit_bytes=32 * 1024 * 1024)


def _conv1_patches(x3):
    # x3: (B, 28, 28) f32  ->  (B, 768, 32) bf16 im2col, pool-window-major rows:
    #   row = oh_hi*64 + oh_lo*32 + ow_lo*16 + ow_hi   (ow_hi padded 12 -> 16)
    b = x3.shape[0]
    taps = [x3[:, ki:ki + 24, kj:kj + 24] for ki in range(5) for kj in range(5)]
    pat = jnp.stack(taps, axis=-1)                              # (B,24,24,25)
    pat = jnp.pad(pat, ((0, 0), (0, 0), (0, 0), (0, TAPP - 25)))
    pat = pat.reshape(b, 12, 2, 12, 2, TAPP)                    # oh->(hi,lo) ow->(hi,lo)
    pat = jnp.transpose(pat, (0, 1, 2, 4, 3, 5))                # (b,oh_hi,oh_lo,ow_lo,ow_hi,t)
    pat = jnp.pad(pat, ((0, 0),) * 4 + ((0, WPAD - 12), (0, 0)))
    return pat.reshape(b, NPATCH, TAPP).astype(jnp.bfloat16)


def _conv_stage(patches, prep, bt):
    b = patches.shape[0]
    return pl.pallas_call(
        _conv_fused_kernel,
        out_shape=jax.ShapeDtypeStruct((b, 16, C2P), jnp.bfloat16),
        grid=(b // bt,),
        in_specs=[
            pl.BlockSpec((bt, NPATCH, TAPP), lambda i: (i, 0, 0)),
            pl.BlockSpec((TAPP, C1P), lambda i: (0, 0)),          # resident weights
            pl.BlockSpec((1, C1P), lambda i: (0, 0)),
            pl.BlockSpec((25 * C1P, C2P), lambda i: (0, 0)),
            pl.BlockSpec((1, C2P), lambda i: (0, 0)),
            pl.BlockSpec((32, 32), lambda i: (0, 0)),
        ],
        out_specs=pl.BlockSpec((bt, 16, C2P), lambda i: (i, 0, 0)),
        scratch_shapes=[
            pltpu.VMEM((bt, 12, WPAD, C1P), jnp.float32),          # pooled conv1
            pltpu.VMEM((bt * 64, 25 * C1P), jnp.bfloat16),         # conv2 im2col
        ],
        compiler_params=_cparams(),
    )(patches, prep["w1"], prep["b1"], prep["w2"], prep["b2"], prep["sel2"])


def _fc_stage(x, prep, block_rows=256):
    # block_rows: 256 suits v6e/v5e (128 MiB VMEM); keep 128-256 on v7x.
    b = x.shape[0]
    bt = min(block_rows, max(8, ((b + 7) // 8) * 8))
    bp = ((b + bt - 1) // bt) * bt
    if bp != b:
        x = jnp.pad(x, ((0, bp - b), (0, 0)))
    out = pl.pallas_call(
        _fc_fused_kernel,
        out_shape=jax.ShapeDtypeStruct((bp, NLOG), jnp.float32),
        grid=(bp // bt,),
        in_specs=[
            pl.BlockSpec((bt, 16 * C2P), lambda i: (i, 0)),
            pl.BlockSpec((16 * C2P, NHID), lambda i: (0, 0)),      # fc1 W resident
            pl.BlockSpec((1, NHID), lambda i: (0, 0)),
            pl.BlockSpec((NHID, NLOG), lambda i: (0, 0)),          # fc2 W resident
            pl.BlockSpec((1, NLOG), lambda i: (0, 0)),
        ],
        out_specs=pl.BlockSpec((bt, NLOG), lambda i: (i, 0)),
        compiler_params=_cparams(),
    )(x, prep["fw1"], prep["fb1"], prep["fw2"], prep["fb2"])
    return out[:b]


@jax.jit
def net_forward(x_nchw, prep):
    b = x_nchw.shape[0]
    bt = min(8, b)                              # images per conv grid step
    bp = ((b + bt - 1) // bt) * bt
    x3 = x_nchw.reshape(b, 28, 28)              # C=1 -> pure reshape
    if bp != b:
        x3 = jnp.pad(x3, ((0, bp - b), (0, 0), (0, 0)))
    patches = _conv1_patches(x3)                # (bp, 768, 32) bf16, XLA im2col
    h2 = _conv_stage(patches, prep, bt)[:b]     # (b, 16, C2P) bf16, rows = h*4+w
    feats = h2.reshape(b, 16 * C2P)             # lane-dense fc input (pos*C2P + c)
    logp = _fc_stage(feats, prep)               # (b, 128) padded log-probs
    return logp[:, :10]


# ------------------------ one-time parameter prep ------------------------------

def _make_wpool_sel(poh, pow_, ow):
    # sel[s*poh*pow + h*pow + j, h*ow + 2*j + s] = 1  (even/odd column selection)
    n_out = poh * pow_
    sel = np.zeros((2 * n_out, poh * ow), np.float32)
    for s in (0, 1):
        for h in range(poh):
            for j in range(pow_):
                sel[s * n_out + h * pow_ + j, h * ow + 2 * j + s] = 1.0
    return jnp.asarray(sel)


def prepare_params(p):
    f32, bf16 = jnp.float32, jnp.bfloat16
    # conv1: (20,1,5,5) -> (32, C1P), tap-major rows (t = ki*5+kj), channels on lanes.
    w1 = p["conv1_w"][:, 0, :, :].reshape(20, 25).T               # (25, 20)
    w1p = jnp.zeros((TAPP, C1P), f32).at[:25, :20].set(w1).astype(bf16)
    b1p = jnp.zeros((1, C1P), f32).at[0, :20].set(p["conv1_b"])
    # conv2: (50,20,5,5) -> (25*C1P, C2P), row = (ki*5+kj)*C1P + in_channel.
    w2 = jnp.transpose(p["conv2_w"], (2, 3, 1, 0)).reshape(25, 20, 50)
    w2p = jnp.zeros((25, C1P, C2P), f32).at[:, :20, :50].set(w2)
    w2p = w2p.reshape(25 * C1P, C2P).astype(bf16)
    b2p = jnp.zeros((1, C2P), f32).at[0, :50].set(p["conv2_b"])
    # fc1: torch flatten is NCHW (index = c*16 + pos); our features are pos*C2P + c.
    fw = p["fc1_w"].reshape(500, 50, 16)                          # [n, c, pos]
    fw = jnp.transpose(fw, (2, 1, 0))                             # [pos, c, n]
    fw1p = jnp.zeros((16, C2P, NHID), f32).at[:, :50, :500].set(fw)
    fw1p = fw1p.reshape(16 * C2P, NHID).astype(bf16)              # (2048, 512) bf16
    fb1p = jnp.zeros((1, NHID), f32).at[0, :500].set(p["fc1_b"])
    # fc2: (10, 500) -> (512, 128) f32 (tiny, kept full precision for the logits);
    # padded logits get -1e30 bias so they never contribute to log_softmax.
    fw2p = jnp.zeros((NHID, NLOG), f32).at[:500, :10].set(p["fc2_w"].T)
    fb2p = jnp.full((1, NLOG), -1e30, f32).at[0, :10].set(p["fc2_b"])
    return {
        "w1": w1p, "b1": b1p, "w2": w2p, "b2": b2p,
        "sel2": _make_wpool_sel(4, 4, 8),
        "fw1": fw1p, "fb1": fb1p, "fw2": fw2p, "fb2": fb2p,
    }


# --------------------------- pure-JAX reference --------------------------------

def net_forward_reference(x, p):
    hi = lax.Precision.HIGHEST
    y = lax.conv_general_dilated(x, p["conv1_w"], (1, 1), "VALID",
                                 dimension_numbers=("NCHW", "OIHW", "NCHW"),
                                 precision=hi)
    y = jnp.maximum(y + p["conv1_b"][None, :, None, None], 0.0)
    y = lax.reduce_window(y, -jnp.inf, lax.max, (1, 1, 2, 2), (1, 1, 2, 2), "VALID")
    y = lax.conv_general_dilated(y, p["conv2_w"], (1, 1), "VALID",
                                 dimension_numbers=("NCHW", "OIHW", "NCHW"),
                                 precision=hi)
    y = jnp.maximum(y + p["conv2_b"][None, :, None, None], 0.0)
    y = lax.reduce_window(y, -jnp.inf, lax.max, (1, 1, 2, 2), (1, 1, 2, 2), "VALID")
    y = y.reshape(y.shape[0], -1)
    y = jnp.maximum(jnp.dot(y, p["fc1_w"].T, precision=hi) + p["fc1_b"], 0.0)
    z = jnp.dot(y, p["fc2_w"].T, precision=hi) + p["fc2_b"]
    return jax.nn.log_softmax(z, axis=1)


def init_params(key):
    ks = jax.random.split(key, 8)

    def w(k, shape, fan_in):
        return (jax.random.normal(k, shape, jnp.float32) / np.sqrt(fan_in)).astype(jnp.float32)

    return {
        "conv1_w": w(ks[0], (20, 1, 5, 5), 25),       # torch Conv2d(1, 20, 5)
        "conv1_b": w(ks[1], (20,), 25),
        "conv2_w": w(ks[2], (50, 20, 5, 5), 500),     # torch Conv2d(20, 50, 5)
        "conv2_b": w(ks[3], (50,), 500),
        "fc1_w":  w(ks[4], (500, 800), 800),          # torch Linear(800, 500)
        "fc1_b":  w(ks[5], (500,), 800),
        "fc2_w":  w(ks[6], (10, 500), 500),           # torch Linear(500, 10)
        "fc2_b":  w(ks[7], (10,), 500),
    }


if __name__ == "__main__":
    root = jax.random.PRNGKey(0)
    pkey, xkey = jax.random.split(root)
    params = init_params(pkey)
    prep = prepare_params(params)                     # one-time weight prep
    # flatten to 4*4*50 in the module implies 28x28 spatial input (MNIST).
    x = jax.random.normal(xkey, (2, 1, 28, 28), jnp.float32)

    out = jax.block_until_ready(net_forward(x, prep))
    ref = jax.block_until_ready(net_forward_reference(x, params))

    assert out.shape == (2, 10) and out.dtype == jnp.float32
    np.testing.assert_allclose(np.asarray(out), np.asarray(ref), rtol=2e-2, atol=2e-2)
    print("KERNEL_OK")
</pallas_src>

<mosaic_0001>
module attributes {stable_mosaic.version = 11 : i64} {
  func.func @_conv_fused_kernel(%arg0: i32, %arg1: memref<2x768x32xbf16, #tpu.memory_space<vmem>>, %arg2: memref<32x128xbf16, #tpu.memory_space<vmem>>, %arg3: memref<1x128xf32, #tpu.memory_space<vmem>>, %arg4: memref<3200x128xbf16, #tpu.memory_space<vmem>>, %arg5: memref<1x128xf32, #tpu.memory_space<vmem>>, %arg6: memref<32x32xf32, #tpu.memory_space<vmem>>, %arg7: memref<2x16x128xbf16, #tpu.memory_space<vmem>>, %arg8: memref<2x12x16x128xf32, #tpu.memory_space<vmem>>, %arg9: memref<128x3200xbf16, #tpu.memory_space<vmem>>) attributes {dimension_semantics = [#tpu.dimension_semantics<parallel>], iteration_bounds = array<i64: 1>, scalar_prefetch = 0 : i64, scratch_operands = 2 : i64, tpu.core_type = #tpu.core_type<tc>, window_params = [{transform_indices = @transform_0, window_bounds = array<i64: 2, 768, 32>}, {pipeline_mode = #tpu.pipeline_mode<synchronous>, transform_indices = @transform_1, window_bounds = array<i64: 32, 128>}, {pipeline_mode = #tpu.pipeline_mode<synchronous>, transform_indices = @transform_2, window_bounds = array<i64: 1, 128>}, {pipeline_mode = #tpu.pipeline_mode<synchronous>, transform_indices = @transform_3, window_bounds = array<i64: 3200, 128>}, {pipeline_mode = #tpu.pipeline_mode<synchronous>, transform_indices = @transform_4, window_bounds = array<i64: 1, 128>}, {pipeline_mode = #tpu.pipeline_mode<synchronous>, transform_indices = @transform_5, window_bounds = array<i64: 32, 32>}, {transform_indices = @transform_6, window_bounds = array<i64: 2, 16, 128>}]} {
    %c0 = arith.constant 0 : index
    %c0_0 = arith.constant 0 : index
    %c0_1 = arith.constant 0 : index
    %0 = vector.load %arg1[%c0, %c0_0, %c0_1] : memref<2x768x32xbf16, #tpu.memory_space<vmem>>, vector<2x768x32xbf16>
    %1 = vector.shape_cast %0 : vector<2x768x32xbf16> to vector<1536x32xbf16>
    %c0_2 = arith.constant 0 : index
    %c0_3 = arith.constant 0 : index
    %2 = vector.load %arg2[%c0_2, %c0_3] : memref<32x128xbf16, #tpu.memory_space<vmem>>, vector<32x128xbf16>
    %cst = arith.constant dense<0.000000e+00> : vector<1536x128xf32>
    %3 = tpu.matmul %1, %2, %cst {dimension_numbers = #tpu.dot_dimension_numbers<[1], [0], [0], [1], [0, 0, 1, 1], [], []>} : vector<1536x32xbf16>, vector<32x128xbf16>, vector<1536x128xf32> -> vector<1536x128xf32>
    %c0_4 = arith.constant 0 : index
    %c0_5 = arith.constant 0 : index
    %4 = vector.load %arg3[%c0_4, %c0_5] : memref<1x128xf32, #tpu.memory_space<vmem>>, vector<1x128xf32>
    %5 = vector.broadcast %4 : vector<1x128xf32> to vector<1536x128xf32>
    %6 = arith.addf %3, %5 : vector<1536x128xf32>
    %cst_6 = arith.constant 0.000000e+00 : f32
    %7 = vector.broadcast %cst_6 : f32 to vector<1536x128xf32>
    %8 = arith.maximumf %6, %7 : vector<1536x128xf32>
    %9 = vector.shape_cast %8 : vector<1536x128xf32> to vector<2x12x2x2x16x128xf32>
    %10 = vector.extract_strided_slice %9 {offsets = [0, 0, 0, 0, 0, 0], sizes = [2, 12, 1, 1, 16, 128], strides = [1, 1, 1, 1, 1, 1]} : vector<2x12x2x2x16x128xf32> to vector<2x12x1x1x16x128xf32>
    %11 = vector.shape_cast %10 : vector<2x12x1x1x16x128xf32> to vector<2x12x16x128xf32>
    %12 = vector.extract_strided_slice %9 {offsets = [0, 0, 0, 1, 0, 0], sizes = [2, 12, 1, 1, 16, 128], strides = [1, 1, 1, 1, 1, 1]} : vector<2x12x2x2x16x128xf32> to vector<2x12x1x1x16x128xf32>
    %13 = vector.shape_cast %12 : vector<2x12x1x1x16x128xf32> to vector<2x12x16x128xf32>
    %14 = arith.maximumf %11, %13 : vector<2x12x16x128xf32>
    %15 = vector.extract_strided_slice %9 {offsets = [0, 0, 1, 0, 0, 0], sizes = [2, 12, 1, 1, 16, 128], strides = [1, 1, 1, 1, 1, 1]} : vector<2x12x2x2x16x128xf32> to vector<2x12x1x1x16x128xf32>
    %16 = vector.shape_cast %15 : vector<2x12x1x1x16x128xf32> to vector<2x12x16x128xf32>
    %17 = vector.extract_strided_slice %9 {offsets = [0, 0, 1, 1, 0, 0], sizes = [2, 12, 1, 1, 16, 128], strides = [1, 1, 1, 1, 1, 1]} : vector<2x12x2x2x16x128xf32> to vector<2x12x1x1x16x128xf32>
    %18 = vector.shape_cast %17 : vector<2x12x1x1x16x128xf32> to vector<2x12x16x128xf32>
    %19 = arith.maximumf %16, %18 : vector<2x12x16x128xf32>
    %20 = arith.maximumf %14, %19 : vector<2x12x16x128xf32>
    %c0_7 = arith.constant 0 : index
    %c0_8 = arith.constant 0 : index
    %c0_9 = arith.constant 0 : index
    %c0_10 = arith.constant 0 : index
    %21 = vector.load %arg8[%c0_7, %c0_8, %c0_9, %c0_10] : memref<2x12x16x128xf32, #tpu.memory_space<vmem>>, vector<2x12x16x128xf32>
    tpu.vector_store %arg8[%c0_7, %c0_8, %c0_9, %c0_10], %20 {strides = array<i32>} : memref<2x12x16x128xf32, #tpu.memory_space<vmem>>, vector<2x12x16x128xf32>,
    %c0_11 = arith.constant 0 : index
    %c0_12 = arith.constant 0 : index
    %c0_13 = arith.constant 0 : index
    %c0_14 = arith.constant 0 : index
    %22 = vector.load %arg8[%c0_11, %c0_12, %c0_13, %c0_14] : memref<2x12x16x128xf32, #tpu.memory_space<vmem>>, vector<2x12x8x128xf32>
    %23 = vector.extract_strided_slice %22 {offsets = [0, 0, 0, 0], sizes = [2, 8, 8, 128], strides = [1, 1, 1, 1]} : vector<2x12x8x128xf32> to vector<2x8x8x128xf32>
    %24 = vector.shape_cast %23 : vector<2x8x8x128xf32> to vector<128x128xf32>
    %25 = arith.truncf %24 : vector<128x128xf32> to vector<128x128xbf16>
    %c0_15 = arith.constant 0 : index
    %c0_16 = arith.constant 0 : index
    %26 = vector.load %arg9[%c0_15, %c0_16] : memref<128x3200xbf16, #tpu.memory_space<vmem>>, vector<128x128xbf16>
    tpu.vector_store %arg9[%c0_15, %c0_16], %25 {strides = array<i32>} : memref<128x3200xbf16, #tpu.memory_space<vmem>>, vector<128x128xbf16>,
    %27 = vector.extract_strided_slice %22 {offsets = [0, 1, 0, 0], sizes = [2, 8, 8, 128], strides = [1, 1, 1, 1]} : vector<2x12x8x128xf32> to vector<2x8x8x128xf32>
    %28 = vector.shape_cast %27 : vector<2x8x8x128xf32> to vector<128x128xf32>
    %29 = arith.truncf %28 : vector<128x128xf32> to vector<128x128xbf16>
    %c0_17 = arith.constant 0 : index
    %c640 = arith.constant 640 : index
    %30 = vector.load %arg9[%c0_17, %c640] : memref<128x3200xbf16, #tpu.memory_space<vmem>>, vector<128x128xbf16>
    tpu.vector_store %arg9[%c0_17, %c640], %29 {strides = array<i32>} : memref<128x3200xbf16, #tpu.memory_space<vmem>>, vector<128x128xbf16>,
    %31 = vector.extract_strided_slice %22 {offsets = [0, 2, 0, 0], sizes = [2, 8, 8, 128], strides = [1, 1, 1, 1]} : vector<2x12x8x128xf32> to vector<2x8x8x128xf32>
    %32 = vector.shape_cast %31 : vector<2x8x8x128xf32> to vector<128x128xf32>
    %33 = arith.truncf %32 : vector<128x128xf32> to vector<128x128xbf16>
    %c0_18 = arith.constant 0 : index
    %c1280 = arith.constant 1280 : index
    %34 = vector.load %arg9[%c0_18, %c1280] : memref<128x3200xbf16, #tpu.memory_space<vmem>>, vector<128x128xbf16>
    tpu.vector_store %arg9[%c0_18, %c1280], %33 {strides = array<i32>} : memref<128x3200xbf16, #tpu.memory_space<vmem>>, vector<128x128xbf16>,
    %35 = vector.extract_strided_slice %22 {offsets = [0, 3, 0, 0], sizes = [2, 8, 8, 128], strides = [1, 1, 1, 1]} : vector<2x12x8x128xf32> to vector<2x8x8x128xf32>
    %36 = vector.shape_cast %35 : vector<2x8x8x128xf32> to vector<128x128xf32>
    %37 = arith.truncf %36 : vector<128x128xf32> to vector<128x128xbf16>
    %c0_19 = arith.constant 0 : index
    %c1920 = arith.constant 1920 : index
    %38 = vector.load %arg9[%c0_19, %c1920] : memref<128x3200xbf16, #tpu.memory_space<vmem>>, vector<128x128xbf16>
    tpu.vector_store %arg9[%c0_19, %c1920], %37 {strides = array<i32>} : memref<128x3200xbf16, #tpu.memory_space<vmem>>, vector<128x128xbf16>,
    %39 = vector.extract_strided_slice %22 {offsets = [0, 4, 0, 0], sizes = [2, 8, 8, 128], strides = [1, 1, 1, 1]} : vector<2x12x8x128xf32> to vector<2x8x8x128xf32>
    %40 = vector.shape_cast %39 : vector<2x8x8x128xf32> to vector<128x128xf32>
    %41 = arith.truncf %40 : vector<128x128xf32> to vector<128x128xbf16>
    %c0_20 = arith.constant 0 : index
    %c2560 = arith.constant 2560 : index
    %42 = vector.load %arg9[%c0_20, %c2560] : memref<128x3200xbf16, #tpu.memory_space<vmem>>, vector<128x128xbf16>
    tpu.vector_store %arg9[%c0_20, %c2560], %41 {strides = array<i32>} : memref<128x3200xbf16, #tpu.memory_space<vmem>>, vector<128x128xbf16>,
    %c0_21 = arith.constant 0 : index
    %c0_22 = arith.constant 0 : index
    %c1 = arith.constant 1 : index
    %c0_23 = arith.constant 0 : index
    %43 = vector.load %arg8[%c0_21, %c0_22, %c1, %c0_23] : memref<2x12x16x128xf32, #tpu.memory_space<vmem>>, vector<2x12x8x128xf32>
    %44 = vector.extract_strided_slice %43 {offsets = [0, 0, 0, 0], sizes = [2, 8, 8, 128], strides = [1, 1, 1, 1]} : vector<2x12x8x128xf32> to vector<2x8x8x128xf32>
    %45 = vector.shape_cast %44 : vector<2x8x8x128xf32> to vector<128x128xf32>
    %46 = arith.truncf %45 : vector<128x128xf32> to vector<128x128xbf16>
    %c0_24 = arith.constant 0 : index
    %c128 = arith.constant 128 : index
    %47 = vector.load %arg9[%c0_24, %c128] : memref<128x3200xbf16, #tpu.memory_space<vmem>>, vector<128x128xbf16>
    tpu.vector_store %arg9[%c0_24, %c128], %46 {strides = array<i32>} : memref<128x3200xbf16, #tpu.memory_space<vmem>>, vector<128x128xbf16>,
    %48 = vector.extract_strided_slice %43 {offsets = [0, 1, 0, 0], sizes = [2, 8, 8, 128], strides = [1, 1, 1, 1]} : vector<2x12x8x128xf32> to vector<2x8x8x128xf32>
    %49 = vector.shape_cast %48 : vector<2x8x8x128xf32> to vector<128x128xf32>
    %50 = arith.truncf %49 : vector<128x128xf32> to vector<128x128xbf16>
    %c0_25 = arith.constant 0 : index
    %c768 = arith.constant 768 : index
    %51 = vector.load %arg9[%c0_25, %c768] : memref<128x3200xbf16, #tpu.memory_space<vmem>>, vector<128x128xbf16>
    tpu.vector_store %arg9[%c0_25, %c768], %50 {strides = array<i32>} : memref<128x3200xbf16, #tpu.memory_space<vmem>>, vector<128x128xbf16>,
    %52 = vector.extract_strided_slice %43 {offsets = [0, 2, 0, 0], sizes = [2, 8, 8, 128], strides = [1, 1, 1, 1]} : vector<2x12x8x128xf32> to vector<2x8x8x128xf32>
    %53 = vector.shape_cast %52 : vector<2x8x8x128xf32> to vector<128x128xf32>
    %54 = arith.truncf %53 : vector<128x128xf32> to vector<128x128xbf16>
    %c0_26 = arith.constant 0 : index
    %c1408 = arith.constant 1408 : index
    %55 = vector.load %arg9[%c0_26, %c1408] : memref<128x3200xbf16, #tpu.memory_space<vmem>>, vector<128x128xbf16>
    tpu.vector_store %arg9[%c0_26, %c1408], %54 {strides = array<i32>} : memref<128x3200xbf16, #tpu.memory_space<vmem>>, vector<128x128xbf16>,
    %56 = vector.extract_strided_slice %43 {offsets = [0, 3, 0, 0], sizes = [2, 8, 8, 128], strides = [1, 1, 1, 1]} : vector<2x12x8x128xf32> to vector<2x8x8x128xf32>
    %57 = vector.shape_cast %56 : vector<2x8x8x128xf32> to vector<128x128xf32>
    %58 = arith.truncf %57 : vector<128x128xf32> to vector<128x128xbf16>
    %c0_27 = arith.constant 0 : index
    %c2048 = arith.constant 2048 : index
    %59 = vector.load %arg9[%c0_27, %c2048] : memref<128x3200xbf16, #tpu.memory_space<vmem>>, vector<128x128xbf16>
    tpu.vector_store %arg9[%c0_27, %c2048], %58 {strides = array<i32>} : memref<128x3200xbf16, #tpu.memory_space<vmem>>, vector<128x128xbf16>,
    %60 = vector.extract_strided_slice %43 {offsets = [0, 4, 0, 0], sizes = [2, 8, 8, 128], strides = [1, 1, 1, 1]} : vector<2x12x8x128xf32> to vector<2x8x8x128xf32>
    %61 = vector.shape_cast %60 : vector<2x8x8x128xf32> to vector<128x128xf32>
    %62 = arith.truncf %61 : vector<128x128xf32> to vector<128x128xbf16>
    %c0_28 = arith.constant 0 : index
    %c2688 = arith.constant 2688 : index
    %63 = vector.load %arg9[%c0_28, %c2688] : memref<128x3200xbf16, #tpu.memory_space<vmem>>, vector<128x128xbf16>
    tpu.vector_store %arg9[%c0_28, %c2688], %62 {strides = array<i32>} : memref<128x3200xbf16, #tpu.memory_space<vmem>>, vector<128x128xbf16>,
    %c0_29 = arith.constant 0 : index
    %c0_30 = arith.constant 0 : index
    %c2 = arith.constant 2 : index
    %c0_31 = arith.constant 0 : index
    %64 = vector.load %arg8[%c0_29, %c0_30, %c2, %c0_31] : memref<2x12x16x128xf32, #tpu.memory_space<vmem>>, vector<2x12x8x128xf32>
    %65 = vector.extract_strided_slice %64 {offsets = [0, 0, 0, 0], sizes = [2, 8, 8, 128], strides = [1, 1, 1, 1]} : vector<2x12x8x128xf32> to vector<2x8x8x128xf32>
    %66 = vector.shape_cast %65 : vector<2x8x8x128xf32> to vector<128x128xf32>
    %67 = arith.truncf %66 : vector<128x128xf32> to vector<128x128xbf16>
    %c0_32 = arith.constant 0 : index
    %c256 = arith.constant 256 : index
    %68 = vector.load %arg9[%c0_32, %c256] : memref<128x3200xbf16, #tpu.memory_space<vmem>>, vector<128x128xbf16>
    tpu.vector_store %arg9[%c0_32, %c256], %67 {strides = array<i32>} : memref<128x3200xbf16, #tpu.memory_space<vmem>>, vector<128x128xbf16>,
    %69 = vector.extract_strided_slice %64 {offsets = [0, 1, 0, 0], sizes = [2, 8, 8, 128], strides = [1, 1, 1, 1]} : vector<2x12x8x128xf32> to vector<2x8x8x128xf32>
    %70 = vector.shape_cast %69 : vector<2x8x8x128xf32> to vector<128x128xf32>
    %71 = arith.truncf %70 : vector<128x128xf32> to vector<128x128xbf16>
    %c0_33 = arith.constant 0 : index
    %c896 = arith.constant 896 : index
    %72 = vector.load %arg9[%c0_33, %c896] : memref<128x3200xbf16, #tpu.memory_space<vmem>>, vector<128x128xbf16>
    tpu.vector_store %arg9[%c0_33, %c896], %71 {strides = array<i32>} : memref<128x3200xbf16, #tpu.memory_space<vmem>>, vector<128x128xbf16>,
    %73 = vector.extract_strided_slice %64 {offsets = [0, 2, 0, 0], sizes = [2, 8, 8, 128], strides = [1, 1, 1, 1]} : vector<2x12x8x128xf32> to vector<2x8x8x128xf32>
    %74 = vector.shape_cast %73 : vector<2x8x8x128xf32> to vector<128x128xf32>
    %75 = arith.truncf %74 : vector<128x128xf32> to vector<128x128xbf16>
    %c0_34 = arith.constant 0 : index
    %c1536 = arith.constant 1536 : index
    %76 = vector.load %arg9[%c0_34, %c1536] : memref<128x3200xbf16, #tpu.memory_space<vmem>>, vector<128x128xbf16>
    tpu.vector_store %arg9[%c0_34, %c1536], %75 {strides = array<i32>} : memref<128x3200xbf16, #tpu.memory_space<vmem>>, vector<128x128xbf16>,
    %77 = vector.extract_strided_slice %64 {offsets = [0, 3, 0, 0], sizes = [2, 8, 8, 128], strides = [1, 1, 1, 1]} : vector<2x12x8x128xf32> to vector<2x8x8x128xf32>
    %78 = vector.shape_cast %77 : vector<2x8x8x128xf32> to vector<128x128xf32>
    %79 = arith.truncf %78 : vector<128x128xf32> to vector<128x128xbf16>
    %c0_35 = arith.constant 0 : index
    %c2176 = arith.constant 2176 : index
    %80 = vector.load %arg9[%c0_35, %c2176] : memref<128x3200xbf16, #tpu.memory_space<vmem>>, vector<128x128xbf16>
    tpu.vector_store %arg9[%c0_35, %c2176], %79 {strides = array<i32>} : memref<128x3200xbf16, #tpu.memory_space<vmem>>, vector<128x128xbf16>,
    %81 = vector.extract_strided_slice %64 {offsets = [0, 4, 0, 0], sizes = [2, 8, 8, 128], strides = [1, 1, 1, 1]} : vector<2x12x8x128xf32> to vector<2x8x8x128xf32>
    %82 = vector.shape_cast %81 : vector<2x8x8x128xf32> to vector<128x128xf32>
    %83 = arith.truncf %82 : vector<128x128xf32> to vector<128x128xbf16>
    %c0_36 = arith.constant 0 : index
    %c2816 = arith.constant 2816 : index
    %84 = vector.load %arg9[%c0_36, %c2816] : memref<128x3200xbf16, #tpu.memory_space<vmem>>, vector<128x128xbf16>
    tpu.vector_store %arg9[%c0_36, %c2816], %83 {strides = array<i32>} : memref<128x3200xbf16, #tpu.memory_space<vmem>>, vector<128x128xbf16>,
    %c0_37 = arith.constant 0 : index
    %c0_38 = arith.constant 0 : index
    %c3 = arith.constant 3 : index
    %c0_39 = arith.constant 0 : index
    %85 = vector.load %arg8[%c0_37, %c0_38, %c3, %c0_39] : memref<2x12x16x128xf32, #tpu.memory_space<vmem>>, vector<2x12x8x128xf32>
    %86 = vector.extract_strided_slice %85 {offsets = [0, 0, 0, 0], sizes = [2, 8, 8, 128], strides = [1, 1, 1, 1]} : vector<2x12x8x128xf32> to vector<2x8x8x128xf32>
    %87 = vector.shape_cast %86 : vector<2x8x8x128xf32> to vector<128x128xf32>
    %88 = arith.truncf %87 : vector<128x128xf32> to vector<128x128xbf16>
    %c0_40 = arith.constant 0 : index
    %c384 = arith.constant 384 : index
    %89 = vector.load %arg9[%c0_40, %c384] : memref<128x3200xbf16, #tpu.memory_space<vmem>>, vector<128x128xbf16>
    tpu.vector_store %arg9[%c0_40, %c384], %88 {strides = array<i32>} : memref<128x3200xbf16, #tpu.memory_space<vmem>>, vector<128x128xbf16>,
    %90 = vector.extract_strided_slice %85 {offsets = [0, 1, 0, 0], sizes = [2, 8, 8, 128], strides = [1, 1, 1, 1]} : vector<2x12x8x128xf32> to vector<2x8x8x128xf32>
    %91 = vector.shape_cast %90 : vector<2x8x8x128xf32> to vector<128x128xf32>
    %92 = arith.truncf %91 : vector<128x128xf32> to vector<128x128xbf16>
    %c0_41 = arith.constant 0 : index
    %c1024 = arith.constant 1024 : index
    %93 = vector.load %arg9[%c0_41, %c1024] : memref<128x3200xbf16, #tpu.memory_space<vmem>>, vector<128x128xbf16>
    tpu.vector_store %arg9[%c0_41, %c1024], %92 {strides = array<i32>} : memref<128x3200xbf16, #tpu.memory_space<vmem>>, vector<128x128xbf16>,
    %94 = vector.extract_strided_slice %85 {offsets = [0, 2, 0, 0], sizes = [2, 8, 8, 128], strides = [1, 1, 1, 1]} : vector<2x12x8x128xf32> to vector<2x8x8x128xf32>
    %95 = vector.shape_cast %94 : vector<2x8x8x128xf32> to vector<128x128xf32>
    %96 = arith.truncf %95 : vector<128x128xf32> to vector<128x128xbf16>
    %c0_42 = arith.constant 0 : index
    %c1664 = arith.constant 1664 : index
    %97 = vector.load %arg9[%c0_42, %c1664] : memref<128x3200xbf16, #tpu.memory_space<vmem>>, vector<128x128xbf16>
    tpu.vector_store %arg9[%c0_42, %c1664], %96 {strides = array<i32>} : memref<128x3200xbf16, #tpu.memory_space<vmem>>, vector<128x128xbf16>,
    %98 = vector.extract_strided_slice %85 {offsets = [0, 3, 0, 0], sizes = [2, 8, 8, 128], strides = [1, 1, 1, 1]} : vector<2x12x8x128xf32> to vector<2x8x8x128xf32>
    %99 = vector.shape_cast %98 : vector<2x8x8x128xf32> to vector<128x128xf32>
    %100 = arith.truncf %99 : vector<128x128xf32> to vector<128x128xbf16>
    %c0_43 = arith.constant 0 : index
    %c2304 = arith.constant 2304 : index
    %101 = vector.load %arg9[%c0_43, %c2304] : memref<128x3200xbf16, #tpu.memory_space<vmem>>, vector<128x128xbf16>
    tpu.vector_store %arg9[%c0_43, %c2304], %100 {strides = array<i32>} : memref<128x3200xbf16, #tpu.memory_space<vmem>>, vector<128x128xbf16>,
    %102 = vector.extract_strided_slice %85 {offsets = [0, 4, 0, 0], sizes = [2, 8, 8, 128], strides = [1, 1, 1, 1]} : vector<2x12x8x128xf32> to vector<2x8x8x128xf32>
    %103 = vector.shape_cast %102 : vector<2x8x8x128xf32> to vector<128x128xf32>
    %104 = arith.truncf %103 : vector<128x128xf32> to vector<128x128xbf16>
    %c0_44 = arith.constant 0 : index
    %c2944 = arith.constant 2944 : index
    %105 = vector.load %arg9[%c0_44, %c2944] : memref<128x3200xbf16, #tpu.memory_space<vmem>>, vector<128x128xbf16>
    tpu.vector_store %arg9[%c0_44, %c2944], %104 {strides = array<i32>} : memref<128x3200xbf16, #tpu.memory_space<vmem>>, vector<128x128xbf16>,
    %c0_45 = arith.constant 0 : index
    %c0_46 = arith.constant 0 : index
    %c4 = arith.constant 4 : index
    %c0_47 = arith.constant 0 : index
    %106 = vector.load %arg8[%c0_45, %c0_46, %c4, %c0_47] : memref<2x12x16x128xf32, #tpu.memory_space<vmem>>, vector<2x12x8x128xf32>
    %107 = vector.extract_strided_slice %106 {offsets = [0, 0, 0, 0], sizes = [2, 8, 8, 128], strides = [1, 1, 1, 1]} : vector<2x12x8x128xf32> to vector<2x8x8x128xf32>
    %108 = vector.shape_cast %107 : vector<2x8x8x128xf32> to vector<128x128xf32>
    %109 = arith.truncf %108 : vector<128x128xf32> to vector<128x128xbf16>
    %c0_48 = arith.constant 0 : index
    %c512 = arith.constant 512 : index
    %110 = vector.load %arg9[%c0_48, %c512] : memref<128x3200xbf16, #tpu.memory_space<vmem>>, vector<128x128xbf16>
    tpu.vector_store %arg9[%c0_48, %c512], %109 {strides = array<i32>} : memref<128x3200xbf16, #tpu.memory_space<vmem>>, vector<128x128xbf16>,
    %111 = vector.extract_strided_slice %106 {offsets = [0, 1, 0, 0], sizes = [2, 8, 8, 128], strides = [1, 1, 1, 1]} : vector<2x12x8x128xf32> to vector<2x8x8x128xf32>
    %112 = vector.shape_cast %111 : vector<2x8x8x128xf32> to vector<128x128xf32>
    %113 = arith.truncf %112 : vector<128x128xf32> to vector<128x128xbf16>
    %c0_49 = arith.constant 0 : index
    %c1152 = arith.constant 1152 : index
    %114 = vector.load %arg9[%c0_49, %c1152] : memref<128x3200xbf16, #tpu.memory_space<vmem>>, vector<128x128xbf16>
    tpu.vector_store %arg9[%c0_49, %c1152], %113 {strides = array<i32>} : memref<128x3200xbf16, #tpu.memory_space<vmem>>, vector<128x128xbf16>,
    %115 = vector.extract_strided_slice %106 {offsets = [0, 2, 0, 0], sizes = [2, 8, 8, 128], strides = [1, 1, 1, 1]} : vector<2x12x8x128xf32> to vector<2x8x8x128xf32>
    %116 = vector.shape_cast %115 : vector<2x8x8x128xf32> to vector<128x128xf32>
    %117 = arith.truncf %116 : vector<128x128xf32> to vector<128x128xbf16>
    %c0_50 = arith.constant 0 : index
    %c1792 = arith.constant 1792 : index
    %118 = vector.load %arg9[%c0_50, %c1792] : memref<128x3200xbf16, #tpu.memory_space<vmem>>, vector<128x128xbf16>
    tpu.vector_store %arg9[%c0_50, %c1792], %117 {strides = array<i32>} : memref<128x3200xbf16, #tpu.memory_space<vmem>>, vector<128x128xbf16>,
    %119 = vector.extract_strided_slice %106 {offsets = [0, 3, 0, 0], sizes = [2, 8, 8, 128], strides = [1, 1, 1, 1]} : vector<2x12x8x128xf32> to vector<2x8x8x128xf32>
    %120 = vector.shape_cast %119 : vector<2x8x8x128xf32> to vector<128x128xf32>
    %121 = arith.truncf %120 : vector<128x128xf32> to vector<128x128xbf16>
    %c0_51 = arith.constant 0 : index
    %c2432 = arith.constant 2432 : index
    %122 = vector.load %arg9[%c0_51, %c2432] : memref<128x3200xbf16, #tpu.memory_space<vmem>>, vector<128x128xbf16>
    tpu.vector_store %arg9[%c0_51, %c2432], %121 {strides = array<i32>} : memref<128x3200xbf16, #tpu.memory_space<vmem>>, vector<128x128xbf16>,
    %123 = vector.extract_strided_slice %106 {offsets = [0, 4, 0, 0], sizes = [2, 8, 8, 128], strides = [1, 1, 1, 1]} : vector<2x12x8x128xf32> to vector<2x8x8x128xf32>
    %124 = vector.shape_cast %123 : vector<2x8x8x128xf32> to vector<128x128xf32>
    %125 = arith.truncf %124 : vector<128x128xf32> to vector<128x128xbf16>
    %c0_52 = arith.constant 0 : index
    %c3072 = arith.constant 3072 : index
    %126 = vector.load %arg9[%c0_52, %c3072] : memref<128x3200xbf16, #tpu.memory_space<vmem>>, vector<128x128xbf16>
    tpu.vector_store %arg9[%c0_52, %c3072], %125 {strides = array<i32>} : memref<128x3200xbf16, #tpu.memory_space<vmem>>, vector<128x128xbf16>,
    %c0_53 = arith.constant 0 : index
    %c0_54 = arith.constant 0 : index
    %127 = vector.load %arg9[%c0_53, %c0_54] : memref<128x3200xbf16, #tpu.memory_space<vmem>>, vector<128x3200xbf16>
    %c0_55 = arith.constant 0 : index
    %c0_56 = arith.constant 0 : index
    %128 = vector.load %arg4[%c0_55, %c0_56] : memref<3200x128xbf16, #tpu.memory_space<vmem>>, vector<3200x128xbf16>
    %cst_57 = arith.constant dense<0.000000e+00> : vector<128x128xf32>
    %129 = tpu.matmul %127, %128, %cst_57 {dimension_numbers = #tpu.dot_dimension_numbers<[1], [0], [0], [1], [0, 0, 1, 1], [], []>} : vector<128x3200xbf16>, vector<3200x128xbf16>, vector<128x128xf32> -> vector<128x128xf32>
    %c0_58 = arith.constant 0 : index
    %c0_59 = arith.constant 0 : index
    %130 = vector.load %arg5[%c0_58, %c0_59] : memref<1x128xf32, #tpu.memory_space<vmem>>, vector<1x128xf32>
    %131 = vector.broadcast %130 : vector<1x128xf32> to vector<128x128xf32>
    %132 = arith.addf %129, %131 : vector<128x128xf32>
    %cst_60 = arith.constant 0.000000e+00 : f32
    %133 = vector.broadcast %cst_60 : f32 to vector<128x128xf32>
    %134 = arith.maximumf %132, %133 : vector<128x128xf32>
    %135 = vector.shape_cast %134 : vector<128x128xf32> to vector<2x4x2x8x128xf32>
    %136 = vector.extract_strided_slice %135 {offsets = [0, 0, 0, 0, 0], sizes = [2, 4, 1, 8, 128], strides = [1, 1, 1, 1, 1]} : vector<2x4x2x8x128xf32> to vector<2x4x1x8x128xf32>
    %137 = vector.shape_cast %136 : vector<2x4x1x8x128xf32> to vector<2x4x8x128xf32>
    %138 = vector.extract_strided_slice %135 {offsets = [0, 0, 1, 0, 0], sizes = [2, 4, 1, 8, 128], strides = [1, 1, 1, 1, 1]} : vector<2x4x2x8x128xf32> to vector<2x4x1x8x128xf32>
    %139 = vector.shape_cast %138 : vector<2x4x1x8x128xf32> to vector<2x4x8x128xf32>
    %140 = arith.maximumf %137, %139 : vector<2x4x8x128xf32>
    %141 = vector.shape_cast %140 : vector<2x4x8x128xf32> to vector<2x32x128xf32>
    %c0_61 = arith.constant 0 : index
    %c0_62 = arith.constant 0 : index
    %142 = vector.load %arg6[%c0_61, %c0_62] : memref<32x32xf32, #tpu.memory_space<vmem>>, vector<32x32xf32>
    %143 = vector.shape_cast %142 : vector<32x32xf32> to vector<1x32x32xf32>
    %144 = vector.broadcast %143 : vector<1x32x32xf32> to vector<2x32x32xf32>
    "tpu.trace_start"() <{level = 10 : i32, message = "bij,bjc->bic"}> : () -> ()
    %cst_63 = arith.constant dense<0.000000e+00> : vector<2x32x128xf32>
    %145 = tpu.matmul %144, %141, %cst_63 {dimension_numbers = #tpu.dot_dimension_numbers<[2], [1], [1], [2], [0, 0, 0, 1, 1, 2], [0], [0]>} : vector<2x32x32xf32>, vector<2x32x128xf32>, vector<2x32x128xf32> -> vector<2x32x128xf32>
    "tpu.trace_stop"() : () -> ()
    %146 = vector.shape_cast %145 : vector<2x32x128xf32> to vector<2x2x16x128xf32>
    %147 = vector.extract_strided_slice %146 {offsets = [0, 0, 0, 0], sizes = [2, 1, 16, 128], strides = [1, 1, 1, 1]} : vector<2x2x16x128xf32> to vector<2x1x16x128xf32>
    %148 = vector.shape_cast %147 : vector<2x1x16x128xf32> to vector<2x16x128xf32>
    %149 = vector.extract_strided_slice %146 {offsets = [0, 1, 0, 0], sizes = [2, 1, 16, 128], strides = [1, 1, 1, 1]} : vector<2x2x16x128xf32> to vector<2x1x16x128xf32>
    %150 = vector.shape_cast %149 : vector<2x1x16x128xf32> to vector<2x16x128xf32>
    %151 = arith.maximumf %148, %150 : vector<2x16x128xf32>
    %152 = arith.truncf %151 : vector<2x16x128xf32> to vector<2x16x128xbf16>
    %c0_64 = arith.constant 0 : index
    %c0_65 = arith.constant 0 : index
    %c0_66 = arith.constant 0 : index
    %153 = vector.load %arg7[%c0_64, %c0_65, %c0_66] : memref<2x16x128xbf16, #tpu.memory_space<vmem>>, vector<2x16x128xbf16>
    tpu.vector_store %arg7[%c0_64, %c0_65, %c0_66], %152 {strides = array<i32>} : memref<2x16x128xbf16, #tpu.memory_space<vmem>>, vector<2x16x128xbf16>,
    return
  }
  func.func @transform_0(%arg0: i32) -> (i32, i32, i32) {
    %c0_i32 = arith.constant 0 : i32
    %c0_i32_0 = arith.constant 0 : i32
    %c0_i32_1 = arith.constant 0 : i32
    return %arg0, %c0_i32, %c0_i32_0 : i32, i32, i32
  }
  func.func @transform_1(%arg0: i32) -> (i32, i32) {
    %c0_i32 = arith.constant 0 : i32
    %c0_i32_0 = arith.constant 0 : i32
    %c0_i32_1 = arith.constant 0 : i32
    return %c0_i32, %c0_i32_0 : i32, i32
  }
  func.func @transform_2(%arg0: i32) -> (i32, i32) {
    %c0_i32 = arith.constant 0 : i32
    %c0_i32_0 = arith.constant 0 : i32
    %c0_i32_1 = arith.constant 0 : i32
    return %c0_i32, %c0_i32_0 : i32, i32
  }
  func.func @transform_3(%arg0: i32) -> (i32, i32) {
    %c0_i32 = arith.constant 0 : i32
    %c0_i32_0 = arith.constant 0 : i32
    %c0_i32_1 = arith.constant 0 : i32
    return %c0_i32, %c0_i32_0 : i32, i32
  }
  func.func @transform_4(%arg0: i32) -> (i32, i32) {
    %c0_i32 = arith.constant 0 : i32
    %c0_i32_0 = arith.constant 0 : i32
    %c0_i32_1 = arith.constant 0 : i32
    return %c0_i32, %c0_i32_0 : i32, i32
  }
  func.func @transform_5(%arg0: i32) -> (i32, i32) {
    %c0_i32 = arith.constant 0 : i32
    %c0_i32_0 = arith.constant 0 : i32
    %c0_i32_1 = arith.constant 0 : i32
    return %c0_i32, %c0_i32_0 : i32, i32
  }
  func.func @transform_6(%arg0: i32) -> (i32, i32, i32) {
    %c0_i32 = arith.constant 0 : i32
    %c0_i32_0 = arith.constant 0 : i32
    %c0_i32_1 = arith.constant 0 : i32
    return %arg0, %c0_i32, %c0_i32_0 : i32, i32, i32
  }
}

module attributes {stable_mosaic.version = 11 : i64} {
  func.func @_fc_fused_kernel(%arg0: i32, %arg1: memref<8x2048xbf16, #tpu.memory_space<vmem>>, %arg2: memref<2048x512xbf16, #tpu.memory_space<vmem>>, %arg3: memref<1x512xf32, #tpu.memory_space<vmem>>, %arg4: memref<512x128xf32, #tpu.memory_space<vmem>>, %arg5: memref<1x128xf32, #tpu.memory_space<vmem>>, %arg6: memref<8x128xf32, #tpu.memory_space<vmem>>) attributes {dimension_semantics = [#tpu.dimension_semantics<parallel>], iteration_bounds = array<i64: 1>, scalar_prefetch = 0 : i64, scratch_operands = 0 : i64, tpu.core_type = #tpu.core_type<tc>, window_params = [{transform_indices = @transform_0, window_bounds = array<i64: 8, 2048>}, {pipeline_mode = #tpu.pipeline_mode<synchronous>, transform_indices = @transform_1, window_bounds = array<i64: 2048, 512>}, {pipeline_mode = #tpu.pipeline_mode<synchronous>, transform_indices = @transform_2, window_bounds = array<i64: 1, 512>}, {pipeline_mode = #tpu.pipeline_mode<synchronous>, transform_indices = @transform_3, window_bounds = array<i64: 512, 128>}, {pipeline_mode = #tpu.pipeline_mode<synchronous>, transform_indices = @transform_4, window_bounds = array<i64: 1, 128>}, {transform_indices = @transform_5, window_bounds = array<i64: 8, 128>}]} {
    %c0 = arith.constant 0 : index
    %c0_0 = arith.constant 0 : index
    %0 = vector.load %arg1[%c0, %c0_0] : memref<8x2048xbf16, #tpu.memory_space<vmem>>, vector<8x2048xbf16>
    %c0_1 = arith.constant 0 : index
    %c0_2 = arith.constant 0 : index
    %1 = vector.load %arg2[%c0_1, %c0_2] : memref<2048x512xbf16, #tpu.memory_space<vmem>>, vector<2048x512xbf16>
    %cst = arith.constant dense<0.000000e+00> : vector<8x512xf32>
    %2 = tpu.matmul %0, %1, %cst {dimension_numbers = #tpu.dot_dimension_numbers<[1], [0], [0], [1], [0, 0, 1, 1], [], []>} : vector<8x2048xbf16>, vector<2048x512xbf16>, vector<8x512xf32> -> vector<8x512xf32>
    %c0_3 = arith.constant 0 : index
    %c0_4 = arith.constant 0 : index
    %3 = vector.load %arg3[%c0_3, %c0_4] : memref<1x512xf32, #tpu.memory_space<vmem>>, vector<1x512xf32>
    %4 = vector.broadcast %3 : vector<1x512xf32> to vector<8x512xf32>
    %5 = arith.addf %2, %4 : vector<8x512xf32>
    %cst_5 = arith.constant 0.000000e+00 : f32
    %6 = vector.broadcast %cst_5 : f32 to vector<8x512xf32>
    %7 = arith.maximumf %5, %6 : vector<8x512xf32>
    %c0_6 = arith.constant 0 : index
    %c0_7 = arith.constant 0 : index
    %8 = vector.load %arg4[%c0_6, %c0_7] : memref<512x128xf32, #tpu.memory_space<vmem>>, vector<512x128xf32>
    %cst_8 = arith.constant dense<0.000000e+00> : vector<8x128xf32>
    %9 = tpu.matmul %7, %8, %cst_8 {dimension_numbers = #tpu.dot_dimension_numbers<[1], [0], [0], [1], [0, 0, 1, 1], [], []>} : vector<8x512xf32>, vector<512x128xf32>, vector<8x128xf32> -> vector<8x128xf32>
    %c0_9 = arith.constant 0 : index
    %c0_10 = arith.constant 0 : index
    %10 = vector.load %arg5[%c0_9, %c0_10] : memref<1x128xf32, #tpu.memory_space<vmem>>, vector<1x128xf32>
    %11 = vector.broadcast %10 : vector<1x128xf32> to vector<8x128xf32>
    %12 = arith.addf %9, %11 : vector<8x128xf32>
    %cst_11 = arith.constant dense<0xFF800000> : vector<8xf32>
    %13 = vector.multi_reduction <maximumf>, %12, %cst_11 [1] : vector<8x128xf32> to vector<8xf32>
    %14 = vector.shape_cast %13 : vector<8xf32> to vector<8x1xf32>
    %15 = vector.broadcast %14 : vector<8x1xf32> to vector<8x128xf32>
    %16 = arith.subf %12, %15 : vector<8x128xf32>
    %17 = math.exp %16 : vector<8x128xf32>
    %cst_12 = arith.constant dense<0.000000e+00> : vector<8xf32>
    %18 = vector.multi_reduction <add>, %17, %cst_12 [1] : vector<8x128xf32> to vector<8xf32>
    %19 = vector.shape_cast %18 : vector<8xf32> to vector<8x1xf32>
    %20 = math.log %19 : vector<8x1xf32>
    %21 = arith.addf %14, %20 : vector<8x1xf32>
    %22 = vector.broadcast %21 : vector<8x1xf32> to vector<8x128xf32>
    %23 = arith.subf %12, %22 : vector<8x128xf32>
    %c0_13 = arith.constant 0 : index
    %c0_14 = arith.constant 0 : index
    %24 = vector.load %arg6[%c0_13, %c0_14] : memref<8x128xf32, #tpu.memory_space<vmem>>, vector<8x128xf32>
    tpu.vector_store %arg6[%c0_13, %c0_14], %23 {strides = array<i32>} : memref<8x128xf32, #tpu.memory_space<vmem>>, vector<8x128xf32>,
    return
  }
  func.func @transform_0(%arg0: i32) -> (i32, i32) {
    %c0_i32 = arith.constant 0 : i32
    %c0_i32_0 = arith.constant 0 : i32
    return %arg0, %c0_i32 : i32, i32
  }
  func.func @transform_1(%arg0: i32) -> (i32, i32) {
    %c0_i32 = arith.constant 0 : i32
    %c0_i32_0 = arith.constant 0 : i32
    %c0_i32_1 = arith.constant 0 : i32
    return %c0_i32, %c0_i32_0 : i32, i32
  }
  func.func @transform_2(%arg0: i32) -> (i32, i32) {
    %c0_i32 = arith.constant 0 : i32
    %c0_i32_0 = arith.constant 0 : i32
    %c0_i32_1 = arith.constant 0 : i32
    return %c0_i32, %c0_i32_0 : i32, i32
  }
  func.func @transform_3(%arg0: i32) -> (i32, i32) {
    %c0_i32 = arith.constant 0 : i32
    %c0_i32_0 = arith.constant 0 : i32
    %c0_i32_1 = arith.constant 0 : i32
    return %c0_i32, %c0_i32_0 : i32, i32
  }
  func.func @transform_4(%arg0: i32) -> (i32, i32) {
    %c0_i32 = arith.constant 0 : i32
    %c0_i32_0 = arith.constant 0 : i32
    %c0_i32_1 = arith.constant 0 : i32
    return %c0_i32, %c0_i32_0 : i32, i32
  }
  func.func @transform_5(%arg0: i32) -> (i32, i32) {
    %c0_i32 = arith.constant 0 : i32
    %c0_i32_0 = arith.constant 0 : i32
    return %arg0, %c0_i32 : i32, i32
  }
}

</mosaic_0001>

<bundles_post_ra>
// kernel: net_forward.3
= control target key start
LH: loop header
LB: loop body
LE: loop exit
PB: predicated region body
PF: predicated region fallthrough
CT: control target
= control target key end

     0   :  { %s7386_s1 = inlined_call_operand.vmem [shape: bf16[2048,512], index: 1, kind: input, shape index: {}]   ;;  %s7387_s0 = inlined_call_operand.vmem [shape: bf16[8,2048], index: 0, kind: input, shape index: {}]   ;;  %s7388_s2 = inlined_call_operand.vmem [shape: f32[1,512], index: 2, kind: input, shape index: {}]   ;;  %s7389_s3 = inlined_call_operand.vmem [shape: f32[512,128], index: 3, kind: input, shape index: {}]   ;;  %s7390_s4 = inlined_call_operand.vmem [shape: f32[1,128], index: 4, kind: input, shape index: {}]   ;;  %s7391_s5 = inlined_call_operand.vmem [shape: f32[8,128], index: 5, kind: output, shape index: {}]  }
   0x1   :  { %v4664_v0 = vld [vmem:[%s7386_s1 + $0xe4] ss:$16 sps:$4 sm:$0xff]   ;;  %v4668_v2 = vld [vmem:[%s7386_s1 + $0xe0] ss:$16 sps:$4 sm:$0xff]   ;;  %v21_v48 = vld [vmem:[%s7387_s0 + $0x8] sm:$0xff] }
   0x2   :  { %v4666_v1 = vld [vmem:[%s7386_s1 + $0x2e4] ss:$16 sps:$4 sm:$0xff]   ;;  %3178 = vmatprep.subr.bf16.mxu0 %v4664_v0  ;;  %v4669_v3 = vld [vmem:[%s7386_s1 + $0x2e0] ss:$16 sps:$4 sm:$0xff]   ;;  %v5635_v51 = vcombine.high %v21_v48, %v21_v48 }
   0x3   :  { %3219 = vmatprep.subr.bf16.mxu1 %v4666_v1  ;;  %v4670_v4 = vld [vmem:[%s7386_s1 + $0xc4] ss:$16 sps:$4 sm:$0xff]   ;;  %3179 = vmatpush1.bf16.msra.mxu0 %v4668_v2  ;;  %v4674_v6 = vld [vmem:[%s7386_s1 + $0xc0] ss:$16 sps:$4 sm:$0xff]  }
   0x4   :  { %3220 = vmatpush1.bf16.msra.mxu1 %v4669_v3  ;;  %v4672_v5 = vld [vmem:[%s7386_s1 + $0x2c4] ss:$16 sps:$4 sm:$0xff]   ;;  %3180 = vmatprep.subr.bf16.mxu0 %v4670_v4  ;;  %v4675_v7 = vld [vmem:[%s7386_s1 + $0x2c0] ss:$16 sps:$4 sm:$0xff]  }
   0x5   :  { %3221 = vmatprep.subr.bf16.mxu1 %v4672_v5  ;;  %v4676_v8 = vld [vmem:[%s7386_s1 + $0xa4] ss:$16 sps:$4 sm:$0xff]   ;;  %v4680_v10 = vld [vmem:[%s7386_s1 + $0xa0] ss:$16 sps:$4 sm:$0xff]   ;;  %3251 = vmatprep.mubr.bf16.mxu1 %v5635_v51 }
   0x6   :  { %v4678_v9 = vld [vmem:[%s7386_s1 + $0x2a4] ss:$16 sps:$4 sm:$0xff]   ;;  %v4681_v11 = vld [vmem:[%s7386_s1 + $0x2a0] ss:$16 sps:$4 sm:$0xff]  }
   0x7   :  { %3181 = vmatpush1.bf16.msra.mxu0 %v4674_v6  ;;  %v4682_v12 = vld [vmem:[%s7386_s1 + $0x84] ss:$16 sps:$4 sm:$0xff]   ;;  %v4686_v14 = vld [vmem:[%s7386_s1 + $0x80] ss:$16 sps:$4 sm:$0xff]  }
   0x8   :  { %3222 = vmatpush1.bf16.msra.mxu1 %v4675_v7  ;;  %3182 = vmatprep.subr.bf16.mxu0 %v4676_v8  ;;  %v4684_v13 = vld [vmem:[%s7386_s1 + $0x284] ss:$16 sps:$4 sm:$0xff]   ;;  %v4687_v15 = vld [vmem:[%s7386_s1 + $0x280] ss:$16 sps:$4 sm:$0xff]   ;;  %v5695_v7 = vcombine.low %v21_v48, %v21_v48 }
   0x9   :  { %3223 = vmatprep.subr.bf16.mxu1 %v4678_v9  ;;  %v4688_v16 = vld [vmem:[%s7386_s1 + $0x64] ss:$16 sps:$4 sm:$0xff]   ;;  %v4692_v18 = vld [vmem:[%s7386_s1 + $0x60] ss:$16 sps:$4 sm:$0xff]  }
   0xa   :  { %v4690_v17 = vld [vmem:[%s7386_s1 + $0x264] ss:$16 sps:$4 sm:$0xff]   ;;  %v4693_v19 = vld [vmem:[%s7386_s1 + $0x260] ss:$16 sps:$4 sm:$0xff]  }
   0xb   :  { %3183 = vmatpush1.bf16.msra.mxu0 %v4680_v10  ;;  %v4694_v20 = vld [vmem:[%s7386_s1 + $0x44] ss:$16 sps:$4 sm:$0xff]   ;;  %v4698_v22 = vld [vmem:[%s7386_s1 + $0x40] ss:$16 sps:$4 sm:$0xff]  }
   0xc   :  { %3224 = vmatpush1.bf16.msra.mxu1 %v4681_v11  ;;  %3184 = vmatprep.subr.bf16.mxu0 %v4682_v12  ;;  %v4696_v21 = vld [vmem:[%s7386_s1 + $0x244] ss:$16 sps:$4 sm:$0xff]   ;;  %v4699_v23 = vld [vmem:[%s7386_s1 + $0x240] ss:$16 sps:$4 sm:$0xff]  }
   0xd   :  { %3225 = vmatprep.subr.bf16.mxu1 %v4684_v13  ;;  %v4700_v24 = vld [vmem:[%s7386_s1 + $0x24] ss:$16 sps:$4 sm:$0xff]   ;;  %v4704_v26 = vld [vmem:[%s7386_s1 + $0x20] ss:$16 sps:$4 sm:$0xff]  }
   0xe   :  { %v4702_v25 = vld [vmem:[%s7386_s1 + $0x224] ss:$16 sps:$4 sm:$0xff]   ;;  %v4705_v27 = vld [vmem:[%s7386_s1 + $0x220] ss:$16 sps:$4 sm:$0xff]  }
   0xf   :  { %3185 = vmatpush1.bf16.msra.mxu0 %v4686_v14  ;;  %v4706_v28 = vld [vmem:[%s7386_s1 + $0x4] ss:$16 sps:$4 sm:$0xff]   ;;  %v4710_v30 = vld [vmem:[%s7386_s1] ss:$16 sps:$4 sm:$0xff]  }
  0x10   :  { %3226 = vmatpush1.bf16.msra.mxu1 %v4687_v15  ;;  %3186 = vmatprep.subr.bf16.mxu0 %v4688_v16  ;;  %v4708_v29 = vld [vmem:[%s7386_s1 + $0x204] ss:$16 sps:$4 sm:$0xff]   ;;  %v4711_v31 = vld [vmem:[%s7386_s1 + $0x200] ss:$16 sps:$4 sm:$0xff]  }
  0x11   :  { %3227 = vmatprep.subr.bf16.mxu1 %v4690_v17  ;;  %v4712_v32 = vld [vmem:[%s7386_s1 + $0x1e4] ss:$16 sps:$4 sm:$0xff]   ;;  %v4716_v34 = vld [vmem:[%s7386_s1 + $0x1e0] ss:$16 sps:$4 sm:$0xff]  }
  0x12   :  { %v4714_v33 = vld [vmem:[%s7386_s1 + $0x3e4] ss:$16 sps:$4 sm:$0xff]   ;;  %v4717_v35 = vld [vmem:[%s7386_s1 + $0x3e0] ss:$16 sps:$4 sm:$0xff]  }
  0x13   :  { %3187 = vmatpush1.bf16.msra.mxu0 %v4692_v18  ;;  %v4718_v36 = vld [vmem:[%s7386_s1 + $0x1c4] ss:$16 sps:$4 sm:$0xff]   ;;  %v4722_v38 = vld [vmem:[%s7386_s1 + $0x1c0] ss:$16 sps:$4 sm:$0xff]  }
  0x14   :  { %3228 = vmatpush1.bf16.msra.mxu1 %v4693_v19  ;;  %3188 = vmatprep.subr.bf16.mxu0 %v4694_v20  ;;  %v4720_v37 = vld [vmem:[%s7386_s1 + $0x3c4] ss:$16 sps:$4 sm:$0xff]   ;;  %v4723_v39 = vld [vmem:[%s7386_s1 + $0x3c0] ss:$16 sps:$4 sm:$0xff]  }
  0x15   :  { %3229 = vmatprep.subr.bf16.mxu1 %v4696_v21  ;;  %v4724_v40 = vld [vmem:[%s7386_s1 + $0x1a4] ss:$16 sps:$4 sm:$0xff]   ;;  %v4728_v42 = vld [vmem:[%s7386_s1 + $0x1a0] ss:$16 sps:$4 sm:$0xff]  }
  0x16   :  { %v4726_v41 = vld [vmem:[%s7386_s1 + $0x3a4] ss:$16 sps:$4 sm:$0xff]   ;;  %v4729_v43 = vld [vmem:[%s7386_s1 + $0x3a0] ss:$16 sps:$4 sm:$0xff]  }
  0x17   :  { %3189 = vmatpush1.bf16.msra.mxu0 %v4698_v22  ;;  %v4730_v44 = vld [vmem:[%s7386_s1 + $0x184] ss:$16 sps:$4 sm:$0xff]   ;;  %v4734_v49 = vld [vmem:[%s7386_s1 + $0x180] ss:$16 sps:$4 sm:$0xff]  }
  0x18   :  { %3230 = vmatpush1.bf16.msra.mxu1 %v4699_v23  ;;  %3190 = vmatprep.subr.bf16.mxu0 %v4700_v24  ;;  %v4732_v45 = vld [vmem:[%s7386_s1 + $0x384] ss:$16 sps:$4 sm:$0xff]   ;;  %v4735_v50 = vld [vmem:[%s7386_s1 + $0x380] ss:$16 sps:$4 sm:$0xff]  }
  0x19   :  { %3231 = vmatprep.subr.bf16.mxu1 %v4702_v25  ;;  %v20_v46 = vld [vmem:[%s7387_s0] sm:$0xff] }
  0x1a   :  { %v5624_v47 = vcombine.high %v20_v46, %v20_v46  ;;  %v4736_v52 = vld [vmem:[%s7386_s1 + $0x164] ss:$16 sps:$4 sm:$0xff]   ;;  %v4740_v54 = vld [vmem:[%s7386_s1 + $0x160] ss:$16 sps:$4 sm:$0xff]   ;;  %v5693_v6 = vcombine.low %v20_v46, %v20_v46 }
  0x1b   :  { %3191 = vmatpush1.bf16.msra.mxu0 %v4704_v26  ;;  %v4738_v53 = vld [vmem:[%s7386_s1 + $0x364] ss:$16 sps:$4 sm:$0xff]   ;;  %v4741_v55 = vld [vmem:[%s7386_s1 + $0x360] ss:$16 sps:$4 sm:$0xff]  }
  0x1c   :  { %3232 = vmatpush1.bf16.msra.mxu1 %v4705_v27  ;;  %3192 = vmatprep.subr.bf16.mxu0 %v4706_v28  ;;  %v4742_v56 = vld [vmem:[%s7386_s1 + $0x144] ss:$16 sps:$4 sm:$0xff]   ;;  %v4746_v58 = vld [vmem:[%s7386_s1 + $0x140] ss:$16 sps:$4 sm:$0xff]  }
  0x1d   :  { %3233 = vmatprep.subr.bf16.mxu1 %v4708_v29  ;;  %3210 = vmatprep.mubr.bf16.mxu0 %v5624_v47  ;;  %v4744_v57 = vld [vmem:[%s7386_s1 + $0x344] ss:$16 sps:$4 sm:$0xff]   ;;  %v4747_v59 = vld [vmem:[%s7386_s1 + $0x340] ss:$16 sps:$4 sm:$0xff]  }
  0x1e   :  { %v4748_v60 = vld [vmem:[%s7386_s1 + $0x124] ss:$16 sps:$4 sm:$0xff]   ;;  %v4752_v62 = vld [vmem:[%s7386_s1 + $0x120] ss:$16 sps:$4 sm:$0xff]  }
  0x1f   :  { %3193 = vmatpush1.bf16.msra.mxu0 %v4710_v30  ;;  %v4750_v61 = vld [vmem:[%s7386_s1 + $0x324] ss:$16 sps:$4 sm:$0xff]   ;;  %v4753_v63 = vld [vmem:[%s7386_s1 + $0x320] ss:$16 sps:$4 sm:$0xff]  }
  0x20   :  { %3234 = vmatpush1.bf16.msra.mxu1 %v4711_v31  ;;  %3194 = vmatprep.subr.bf16.mxu0 %v4712_v32  ;;  %v4754_v0 = vld [vmem:[%s7386_s1 + $0x104] ss:$16 sps:$4 sm:$0xff]   ;;  %v4758_v2 = vld [vmem:[%s7386_s1 + $0x100] ss:$16 sps:$4 sm:$0xff]  }
  0x21   :  { %3235 = vmatprep.subr.bf16.mxu1 %v4714_v33  ;;  %v4756_v1 = vld [vmem:[%s7386_s1 + $0x304] ss:$16 sps:$4 sm:$0xff]   ;;  %v4759_v3 = vld [vmem:[%s7386_s1 + $0x300] ss:$16 sps:$4 sm:$0xff]   ;;  %v5779_v33 = vld [vmem:[%s7387_s0 + $0x18] sm:$0xff] }
  0x22   :  { %v4766_v4 = vld [vmem:[%s7386_s1 + $0x4e4] ss:$16 sps:$4 sm:$0xff]   ;;  %v4764_v8 = vld [vmem:[%s7386_s1 + $0x4e0] ss:$16 sps:$4 sm:$0xff]  }
  0x23   :  { %3195 = vmatpush2.bf16.msra.mxu0 %v4716_v34  ;;  %v4769_v5 = vld [vmem:[%s7386_s1 + $0x6e4] ss:$16 sps:$4 sm:$0xff]   ;;  %v4767_v9 = vld [vmem:[%s7386_s1 + $0x6e0] ss:$16 sps:$4 sm:$0xff]  }
  0x24   :  { %3236 = vmatpush2.bf16.msra.mxu1 %v4717_v35  ;;  %3196 = vmatprep.subr.bf16.mxu0 %v4718_v36  ;;  %v4772_v10 = vld [vmem:[%s7386_s1 + $0x4c4] ss:$16 sps:$4 sm:$0xff]   ;;  %v4770_v12 = vld [vmem:[%s7386_s1 + $0x4c0] ss:$16 sps:$4 sm:$0xff]  }
  0x25   :  { %3237 = vmatprep.subr.bf16.mxu1 %v4720_v37  ;;  %v4775_v11 = vld [vmem:[%s7386_s1 + $0x6c4] ss:$16 sps:$4 sm:$0xff]   ;;  %v4773_v13 = vld [vmem:[%s7386_s1 + $0x6c0] ss:$16 sps:$4 sm:$0xff]   ;;  %v5793_v37 = vcombine.high %v5779_v33, %v5779_v33 }
  0x26   :  { %v4778_v14 = vld [vmem:[%s7386_s1 + $0x4a4] ss:$16 sps:$4 sm:$0xff]   ;;  %v4776_v16 = vld [vmem:[%s7386_s1 + $0x4a0] ss:$16 sps:$4 sm:$0xff]  }
  0x27   :  { %3197 = vmatpush2.bf16.msra.mxu0 %v4722_v38  ;;  %v4781_v15 = vld [vmem:[%s7386_s1 + $0x6a4] ss:$16 sps:$4 sm:$0xff]   ;;  %v4779_v17 = vld [vmem:[%s7386_s1 + $0x6a0] ss:$16 sps:$4 sm:$0xff]  }
  0x28   :  { %3238 = vmatpush2.bf16.msra.mxu1 %v4723_v39  ;;  %3198 = vmatprep.subr.bf16.mxu0 %v4724_v40  ;;  %v4784_v18 = vld [vmem:[%s7386_s1 + $0x484] ss:$16 sps:$4 sm:$0xff]   ;;  %v4782_v20 = vld [vmem:[%s7386_s1 + $0x480] ss:$16 sps:$4 sm:$0xff]  }
  0x29   :  { %3239 = vmatprep.subr.bf16.mxu1 %v4726_v41  ;;  %v4787_v19 = vld [vmem:[%s7386_s1 + $0x684] ss:$16 sps:$4 sm:$0xff]   ;;  %v4785_v21 = vld [vmem:[%s7386_s1 + $0x680] ss:$16 sps:$4 sm:$0xff]  }
  0x2a   :  { %v4790_v22 = vld [vmem:[%s7386_s1 + $0x464] ss:$16 sps:$4 sm:$0xff]   ;;  %v4788_v24 = vld [vmem:[%s7386_s1 + $0x460] ss:$16 sps:$4 sm:$0xff]  }
  0x2b   :  { %3199 = vmatpush2.bf16.msra.mxu0 %v4728_v42  ;;  %v4793_v23 = vld [vmem:[%s7386_s1 + $0x664] ss:$16 sps:$4 sm:$0xff]   ;;  %v4791_v25 = vld [vmem:[%s7386_s1 + $0x660] ss:$16 sps:$4 sm:$0xff]  }
  0x2c   :  { %3240 = vmatpush2.bf16.msra.mxu1 %v4729_v43  ;;  %3200 = vmatprep.subr.bf16.mxu0 %v4730_v44  ;;  %v4796_v26 = vld [vmem:[%s7386_s1 + $0x444] ss:$16 sps:$4 sm:$0xff]   ;;  %v4794_v28 = vld [vmem:[%s7386_s1 + $0x440] ss:$16 sps:$4 sm:$0xff]  }
  0x2d   :  { %3241 = vmatprep.subr.bf16.mxu1 %v4732_v45  ;;  %v4799_v27 = vld [vmem:[%s7386_s1 + $0x644] ss:$16 sps:$4 sm:$0xff]   ;;  %v4797_v29 = vld [vmem:[%s7386_s1 + $0x640] ss:$16 sps:$4 sm:$0xff]  }
  0x2e   :  { %v4802_v30 = vld [vmem:[%s7386_s1 + $0x424] ss:$16 sps:$4 sm:$0xff]   ;;  %v4800_v34 = vld [vmem:[%s7386_s1 + $0x420] ss:$16 sps:$4 sm:$0xff]  }
  0x2f   :  { %3201 = vmatpush2.bf16.msra.mxu0 %v4734_v49  ;;  %v4805_v31 = vld [vmem:[%s7386_s1 + $0x624] ss:$16 sps:$4 sm:$0xff]   ;;  %v4803_v35 = vld [vmem:[%s7386_s1 + $0x620] ss:$16 sps:$4 sm:$0xff]  }
  0x30   :  { %3242 = vmatpush2.bf16.msra.mxu1 %v4735_v50  ;;  %3202 = vmatprep.subr.bf16.mxu0 %v4736_v52  ;;  %v5774_v32 = vld [vmem:[%s7387_s0 + $0x10] sm:$0xff] }
  0x31   :  { %3243 = vmatprep.subr.bf16.mxu1 %v4738_v53  ;;  %v5789_v36 = vcombine.high %v5774_v32, %v5774_v32  ;;  %v4808_v38 = vld [vmem:[%s7386_s1 + $0x404] ss:$16 sps:$4 sm:$0xff]   ;;  %v4806_v40 = vld [vmem:[%s7386_s1 + $0x400] ss:$16 sps:$4 sm:$0xff]  }
  0x32   :  { %v4811_v39 = vld [vmem:[%s7386_s1 + $0x604] ss:$16 sps:$4 sm:$0xff]   ;;  %v4809_v41 = vld [vmem:[%s7386_s1 + $0x600] ss:$16 sps:$4 sm:$0xff]  }
  0x33   :  { %3203 = vmatpush2.bf16.msra.mxu0 %v4740_v54  ;;  %v4814_v42 = vld [vmem:[%s7386_s1 + $0x5e4] ss:$16 sps:$4 sm:$0xff]   ;;  %v4812_v44 = vld [vmem:[%s7386_s1 + $0x5e0] ss:$16 sps:$4 sm:$0xff]  }
  0x34   :  { %3244 = vmatpush2.bf16.msra.mxu1 %v4741_v55  ;;  %3204 = vmatprep.subr.bf16.mxu0 %v4742_v56  ;;  %v4817_v43 = vld [vmem:[%s7386_s1 + $0x7e4] ss:$16 sps:$4 sm:$0xff]   ;;  %v4815_v45 = vld [vmem:[%s7386_s1 + $0x7e0] ss:$16 sps:$4 sm:$0xff]  }
  0x35   :  { %3245 = vmatprep.subr.bf16.mxu1 %v4744_v57  ;;  %v4820_v46 = vld [vmem:[%s7386_s1 + $0x5c4] ss:$16 sps:$4 sm:$0xff]   ;;  %v4818_v49 = vld [vmem:[%s7386_s1 + $0x5c0] ss:$16 sps:$4 sm:$0xff]  }
  0x36   :  { %v4823_v48 = vld [vmem:[%s7386_s1 + $0x7c4] ss:$16 sps:$4 sm:$0xff]   ;;  %v4821_v50 = vld [vmem:[%s7386_s1 + $0x7c0] ss:$16 sps:$4 sm:$0xff]  }
  0x37   :  { %3205 = vmatpush2.bf16.msra.mxu0 %v4746_v58  ;;  %v4826_v52 = vld [vmem:[%s7386_s1 + $0x5a4] ss:$16 sps:$4 sm:$0xff]   ;;  %v4824_v54 = vld [vmem:[%s7386_s1 + $0x5a0] ss:$16 sps:$4 sm:$0xff]  }
  0x38   :  { %3246 = vmatpush2.bf16.msra.mxu1 %v4747_v59  ;;  %3206 = vmatprep.subr.bf16.mxu0 %v4748_v60  ;;  %v4829_v53 = vld [vmem:[%s7386_s1 + $0x7a4] ss:$16 sps:$4 sm:$0xff]   ;;  %v4827_v55 = vld [vmem:[%s7386_s1 + $0x7a0] ss:$16 sps:$4 sm:$0xff]  }
  0x39   :  { %3247 = vmatprep.subr.bf16.mxu1 %v4750_v61  ;;  %v4832_v56 = vld [vmem:[%s7386_s1 + $0x584] ss:$16 sps:$4 sm:$0xff]   ;;  %v4830_v58 = vld [vmem:[%s7386_s1 + $0x580] ss:$16 sps:$4 sm:$0xff]  }
  0x3a   :  { %v4835_v57 = vld [vmem:[%s7386_s1 + $0x784] ss:$16 sps:$4 sm:$0xff]   ;;  %v4833_v59 = vld [vmem:[%s7386_s1 + $0x780] ss:$16 sps:$4 sm:$0xff]  }
  0x3b   :  { %3207 = vmatpush2.bf16.msra.mxu0 %v4752_v62  ;;  %v4838_v60 = vld [vmem:[%s7386_s1 + $0x564] ss:$16 sps:$4 sm:$0xff]   ;;  %v4836_v62 = vld [vmem:[%s7386_s1 + $0x560] ss:$16 sps:$4 sm:$0xff]  }
  0x3c   :  { %3248 = vmatpush2.bf16.msra.mxu1 %v4753_v63  ;;  %3208 = vmatprep.subr.bf16.mxu0 %v4754_v0  ;;  %v4841_v61 = vld [vmem:[%s7386_s1 + $0x764] ss:$16 sps:$4 sm:$0xff]   ;;  %v4839_v63 = vld [vmem:[%s7386_s1 + $0x760] ss:$16 sps:$4 sm:$0xff]  }
  0x3d   :  { %3249 = vmatprep.subr.bf16.mxu1 %v4756_v1  ;;  %v4844_v0 = vld [vmem:[%s7386_s1 + $0x544] ss:$16 sps:$4 sm:$0xff]  }
  0x3e   :  { %v4847_v1 = vld [vmem:[%s7386_s1 + $0x744] ss:$16 sps:$4 sm:$0xff]  }
  0x3f   :  { %3209 = vmatpush2.bf16.msra.mxu0 %v4758_v2  ;;  %v4842_v2 = vld [vmem:[%s7386_s1 + $0x540] ss:$16 sps:$4 sm:$0xff]  }
  0x40   :  { %3250 = vmatpush2.bf16.msra.mxu1 %v4759_v3  ;;  %3260 = vmatprep.subr.bf16.mxu0 %v4766_v4  ;;  %v4845_v3 = vld [vmem:[%s7386_s1 + $0x740] ss:$16 sps:$4 sm:$0xff]   ;;  %v4850_v4 = vld [vmem:[%s7386_s1 + $0x524] ss:$16 sps:$4 sm:$0xff]  }
  0x41   :  { %3301 = vmatprep.subr.bf16.mxu1 %v4769_v5  ;;  %v4853_v5 = vld [vmem:[%s7386_s1 + $0x724] ss:$16 sps:$4 sm:$0xff]  }
  0x42   :  { %3211 = vmatmul.mubr.bf16.vlgmr.msra.gmra.mxu0 %v5693_v6 }
  0x43   :  { %3252 = vmatmul.mubr.bf16.vlgmr.msra.gmra.mxu1 %v5695_v7  ;;  %3261 = vmatpush1.bf16.msra.mxu0 %v4764_v8  ;;  %v4848_v8 = vld [vmem:[%s7386_s1 + $0x520] ss:$16 sps:$4 sm:$0xff]  }
  0x44   :  { %3302 = vmatpush1.bf16.msra.mxu1 %v4767_v9  ;;  %3262 = vmatprep.subr.bf16.mxu0 %v4772_v10  ;;  %v4851_v9 = vld [vmem:[%s7386_s1 + $0x720] ss:$16 sps:$4 sm:$0xff]   ;;  %v4856_v10 = vld [vmem:[%s7386_s1 + $0x504] ss:$16 sps:$4 sm:$0xff]  }
  0x45   :  { %3303 = vmatprep.subr.bf16.mxu1 %v4775_v11  ;;  %3292 = vmatprep.mubr.bf16.mxu0 %v5789_v36  ;;  %v4859_v11 = vld [vmem:[%s7386_s1 + $0x704] ss:$16 sps:$4 sm:$0xff]  }
  0x46   :  { %3333 = vmatprep.mubr.bf16.mxu1 %v5793_v37 }
  0x47   :  { %3263 = vmatpush1.bf16.msra.mxu0 %v4770_v12  ;;  %v4854_v12 = vld [vmem:[%s7386_s1 + $0x500] ss:$16 sps:$4 sm:$0xff]  }
  0x48   :  { %3304 = vmatpush1.bf16.msra.mxu1 %v4773_v13  ;;  %3264 = vmatprep.subr.bf16.mxu0 %v4778_v14  ;;  %v4857_v13 = vld [vmem:[%s7386_s1 + $0x700] ss:$16 sps:$4 sm:$0xff]   ;;  %v4866_v14 = vld [vmem:[%s7386_s1 + $0x8e4] ss:$16 sps:$4 sm:$0xff]  }
  0x49   :  { %3305 = vmatprep.subr.bf16.mxu1 %v4781_v15  ;;  %v4869_v15 = vld [vmem:[%s7386_s1 + $0xae4] ss:$16 sps:$4 sm:$0xff]  }
  0x4b   :  { %3265 = vmatpush1.bf16.msra.mxu0 %v4776_v16  ;;  %v5913_v16 = vcombine.low %v5774_v32, %v5774_v32  ;;  %v4884_v32 = vld [vmem:[%s7386_s1 + $0x884] ss:$16 sps:$4 sm:$0xff]  }
  0x4c   :  { %3306 = vmatpush1.bf16.msra.mxu1 %v4779_v17  ;;  %3266 = vmatprep.subr.bf16.mxu0 %v4784_v18  ;;  %v5917_v17 = vcombine.low %v5779_v33, %v5779_v33  ;;  %v4864_v18 = vld [vmem:[%s7386_s1 + $0x8e0] ss:$16 sps:$4 sm:$0xff]   ;;  %v4887_v33 = vld [vmem:[%s7386_s1 + $0xa84] ss:$16 sps:$4 sm:$0xff]  }
  0x4d   :  { %3307 = vmatprep.subr.bf16.mxu1 %v4787_v19  ;;  %v4867_v19 = vld [vmem:[%s7386_s1 + $0xae0] ss:$16 sps:$4 sm:$0xff]  }
  0x4f   :  { %3267 = vmatpush1.bf16.msra.mxu0 %v4782_v20  ;;  %v4872_v20 = vld [vmem:[%s7386_s1 + $0x8c4] ss:$16 sps:$4 sm:$0xff]  }
  0x50   :  { %3308 = vmatpush1.bf16.msra.mxu1 %v4785_v21  ;;  %3268 = vmatprep.subr.bf16.mxu0 %v4790_v22  ;;  %v4875_v21 = vld [vmem:[%s7386_s1 + $0xac4] ss:$16 sps:$4 sm:$0xff]  }
  0x51   :  { %3309 = vmatprep.subr.bf16.mxu1 %v4793_v23  ;;  %v5934_v22 = vld [vmem:[%s7387_s0 + $0x20] sm:$0xff]  ;;  %v5939_v23 = vld [vmem:[%s7387_s0 + $0x28] sm:$0xff] }
  0x53   :  { %3269 = vmatpush1.bf16.msra.mxu0 %v4788_v24  ;;  %v5943_v24 = vcombine.high %v5934_v22, %v5934_v22 }
  0x54   :  { %3310 = vmatpush1.bf16.msra.mxu1 %v4791_v25  ;;  %3270 = vmatprep.subr.bf16.mxu0 %v4796_v26  ;;  %v5947_v25 = vcombine.high %v5939_v23, %v5939_v23  ;;  %v4870_v26 = vld [vmem:[%s7386_s1 + $0x8c0] ss:$16 sps:$4 sm:$0xff]  }
  0x55   :  { %3311 = vmatprep.subr.bf16.mxu1 %v4799_v27  ;;  %v4873_v27 = vld [vmem:[%s7386_s1 + $0xac0] ss:$16 sps:$4 sm:$0xff]  }
  0x57   :  { %3271 = vmatpush1.bf16.msra.mxu0 %v4794_v28  ;;  %v4878_v28 = vld [vmem:[%s7386_s1 + $0x8a4] ss:$16 sps:$4 sm:$0xff]  }
  0x58   :  { %3312 = vmatpush1.bf16.msra.mxu1 %v4797_v29  ;;  %3272 = vmatprep.subr.bf16.mxu0 %v4802_v30  ;;  %v4881_v29 = vld [vmem:[%s7386_s1 + $0xaa4] ss:$16 sps:$4 sm:$0xff]   ;;  %v4876_v30 = vld [vmem:[%s7386_s1 + $0x8a0] ss:$16 sps:$4 sm:$0xff]  }
  0x59   :  { %3313 = vmatprep.subr.bf16.mxu1 %v4805_v31  ;;  %v4879_v31 = vld [vmem:[%s7386_s1 + $0xaa0] ss:$16 sps:$4 sm:$0xff]  }
  0x5b   :  { %3273 = vmatpush1.bf16.msra.mxu0 %v4800_v34  ;;  %v4882_v34 = vld [vmem:[%s7386_s1 + $0x880] ss:$16 sps:$4 sm:$0xff]  }
  0x5c   :  { %3314 = vmatpush1.bf16.msra.mxu1 %v4803_v35  ;;  %3274 = vmatprep.subr.bf16.mxu0 %v4808_v38  ;;  %v4885_v35 = vld [vmem:[%s7386_s1 + $0xa80] ss:$16 sps:$4 sm:$0xff]   ;;  %v4890_v38 = vld [vmem:[%s7386_s1 + $0x864] ss:$16 sps:$4 sm:$0xff]  }
  0x5d   :  { %3315 = vmatprep.subr.bf16.mxu1 %v4811_v39  ;;  %v4893_v39 = vld [vmem:[%s7386_s1 + $0xa64] ss:$16 sps:$4 sm:$0xff]  }
  0x5f   :  { %3275 = vmatpush1.bf16.msra.mxu0 %v4806_v40  ;;  %v4888_v40 = vld [vmem:[%s7386_s1 + $0x860] ss:$16 sps:$4 sm:$0xff]  }
  0x60   :  { %3316 = vmatpush1.bf16.msra.mxu1 %v4809_v41  ;;  %3276 = vmatprep.subr.bf16.mxu0 %v4814_v42  ;;  %v4891_v41 = vld [vmem:[%s7386_s1 + $0xa60] ss:$16 sps:$4 sm:$0xff]   ;;  %v4896_v42 = vld [vmem:[%s7386_s1 + $0x844] ss:$16 sps:$4 sm:$0xff]  }
  0x61   :  { %3317 = vmatprep.subr.bf16.mxu1 %v4817_v43  ;;  %v4899_v43 = vld [vmem:[%s7386_s1 + $0xa44] ss:$16 sps:$4 sm:$0xff]  }
  0x63   :  { %3277 = vmatpush2.bf16.msra.mxu0 %v4812_v44  ;;  %v4894_v44 = vld [vmem:[%s7386_s1 + $0x840] ss:$16 sps:$4 sm:$0xff]  }
  0x64   :  { %3318 = vmatpush2.bf16.msra.mxu1 %v4815_v45  ;;  %3278 = vmatprep.subr.bf16.mxu0 %v4820_v46  ;;  %v4897_v45 = vld [vmem:[%s7386_s1 + $0xa40] ss:$16 sps:$4 sm:$0xff]   ;;  %v4902_v46 = vld [vmem:[%s7386_s1 + $0x824] ss:$16 sps:$4 sm:$0xff]  }
  0x65   :  { %3319 = vmatprep.subr.bf16.mxu1 %v4823_v48  ;;  %v4905_v48 = vld [vmem:[%s7386_s1 + $0xa24] ss:$16 sps:$4 sm:$0xff]  }
  0x67   :  { %3279 = vmatpush2.bf16.msra.mxu0 %v4818_v49  ;;  %v4900_v49 = vld [vmem:[%s7386_s1 + $0x820] ss:$16 sps:$4 sm:$0xff]  }
  0x68   :  { %3320 = vmatpush2.bf16.msra.mxu1 %v4821_v50  ;;  %3280 = vmatprep.subr.bf16.mxu0 %v4826_v52  ;;  %v4903_v50 = vld [vmem:[%s7386_s1 + $0xa20] ss:$16 sps:$4 sm:$0xff]   ;;  %v4908_v52 = vld [vmem:[%s7386_s1 + $0x804] ss:$16 sps:$4 sm:$0xff]  }
  0x69   :  { %3321 = vmatprep.subr.bf16.mxu1 %v4829_v53  ;;  %v4911_v53 = vld [vmem:[%s7386_s1 + $0xa04] ss:$16 sps:$4 sm:$0xff]  }
  0x6b   :  { %3281 = vmatpush2.bf16.msra.mxu0 %v4824_v54  ;;  %v4906_v54 = vld [vmem:[%s7386_s1 + $0x800] ss:$16 sps:$4 sm:$0xff]  }
  0x6c   :  { %3322 = vmatpush2.bf16.msra.mxu1 %v4827_v55  ;;  %3282 = vmatprep.subr.bf16.mxu0 %v4832_v56  ;;  %v4909_v55 = vld [vmem:[%s7386_s1 + $0xa00] ss:$16 sps:$4 sm:$0xff]   ;;  %v4914_v56 = vld [vmem:[%s7386_s1 + $0x9e4] ss:$16 sps:$4 sm:$0xff]  }
  0x6d   :  { %3323 = vmatprep.subr.bf16.mxu1 %v4835_v57  ;;  %v4917_v57 = vld [vmem:[%s7386_s1 + $0xbe4] ss:$16 sps:$4 sm:$0xff]  }
  0x6f   :  { %3283 = vmatpush2.bf16.msra.mxu0 %v4830_v58  ;;  %v4912_v58 = vld [vmem:[%s7386_s1 + $0x9e0] ss:$16 sps:$4 sm:$0xff]  }
  0x70   :  { %3324 = vmatpush2.bf16.msra.mxu1 %v4833_v59  ;;  %3284 = vmatprep.subr.bf16.mxu0 %v4838_v60  ;;  %v4915_v59 = vld [vmem:[%s7386_s1 + $0xbe0] ss:$16 sps:$4 sm:$0xff]   ;;  %v4920_v60 = vld [vmem:[%s7386_s1 + $0x9c4] ss:$16 sps:$4 sm:$0xff]  }
  0x71   :  { %3325 = vmatprep.subr.bf16.mxu1 %v4841_v61  ;;  %v4923_v61 = vld [vmem:[%s7386_s1 + $0xbc4] ss:$16 sps:$4 sm:$0xff]  }
  0x73   :  { %3285 = vmatpush2.bf16.msra.mxu0 %v4836_v62  ;;  %v4918_v62 = vld [vmem:[%s7386_s1 + $0x9c0] ss:$16 sps:$4 sm:$0xff]  }
  0x74   :  { %3326 = vmatpush2.bf16.msra.mxu1 %v4839_v63  ;;  %3286 = vmatprep.subr.bf16.mxu0 %v4844_v0  ;;  %v4921_v63 = vld [vmem:[%s7386_s1 + $0xbc0] ss:$16 sps:$4 sm:$0xff]   ;;  %v4926_v0 = vld [vmem:[%s7386_s1 + $0x9a4] ss:$16 sps:$4 sm:$0xff]  }
  0x75   :  { %3327 = vmatprep.subr.bf16.mxu1 %v4847_v1  ;;  %v4929_v1 = vld [vmem:[%s7386_s1 + $0xba4] ss:$16 sps:$4 sm:$0xff]  }
  0x77   :  { %3287 = vmatpush2.bf16.msra.mxu0 %v4842_v2  ;;  %v4924_v2 = vld [vmem:[%s7386_s1 + $0x9a0] ss:$16 sps:$4 sm:$0xff]  }
  0x78   :  { %3328 = vmatpush2.bf16.msra.mxu1 %v4845_v3  ;;  %3288 = vmatprep.subr.bf16.mxu0 %v4850_v4  ;;  %v4927_v3 = vld [vmem:[%s7386_s1 + $0xba0] ss:$16 sps:$4 sm:$0xff]   ;;  %v4932_v4 = vld [vmem:[%s7386_s1 + $0x984] ss:$16 sps:$4 sm:$0xff]  }
  0x79   :  { %3329 = vmatprep.subr.bf16.mxu1 %v4853_v5  ;;  %v4935_v5 = vld [vmem:[%s7386_s1 + $0xb84] ss:$16 sps:$4 sm:$0xff]  }
  0x7b   :  { %3289 = vmatpush2.bf16.msra.mxu0 %v4848_v8  ;;  %v4930_v8 = vld [vmem:[%s7386_s1 + $0x980] ss:$16 sps:$4 sm:$0xff]  }
  0x7c   :  { %3330 = vmatpush2.bf16.msra.mxu1 %v4851_v9  ;;  %3290 = vmatprep.subr.bf16.mxu0 %v4856_v10  ;;  %v4933_v9 = vld [vmem:[%s7386_s1 + $0xb80] ss:$16 sps:$4 sm:$0xff]   ;;  %v4938_v10 = vld [vmem:[%s7386_s1 + $0x964] ss:$16 sps:$4 sm:$0xff]  }
  0x7d   :  { %3331 = vmatprep.subr.bf16.mxu1 %v4859_v11  ;;  %v4941_v11 = vld [vmem:[%s7386_s1 + $0xb64] ss:$16 sps:$4 sm:$0xff]  }
  0x7f   :  { %3291 = vmatpush2.bf16.msra.mxu0 %v4854_v12  ;;  %v4936_v12 = vld [vmem:[%s7386_s1 + $0x960] ss:$16 sps:$4 sm:$0xff]  }
  0x80   :  { %3332 = vmatpush2.bf16.msra.mxu1 %v4857_v13  ;;  %3342 = vmatprep.subr.bf16.mxu0 %v4866_v14  ;;  %v4939_v13 = vld [vmem:[%s7386_s1 + $0xb60] ss:$16 sps:$4 sm:$0xff]   ;;  %v4944_v14 = vld [vmem:[%s7386_s1 + $0x944] ss:$16 sps:$4 sm:$0xff]  }
  0x81   :  { %3383 = vmatprep.subr.bf16.mxu1 %v4869_v15  ;;  %v4947_v15 = vld [vmem:[%s7386_s1 + $0xb44] ss:$16 sps:$4 sm:$0xff]  }
  0x82   :  { %3293 = vmatmul.mubr.bf16.vlgmr.msra.gmra.mxu0 %v5913_v16 }
  0x83   :  { %3334 = vmatmul.mubr.bf16.vlgmr.msra.gmra.mxu1 %v5917_v17  ;;  %3343 = vmatpush1.bf16.msra.mxu0 %v4864_v18  ;;  %v4942_v18 = vld [vmem:[%s7386_s1 + $0x940] ss:$16 sps:$4 sm:$0xff]  }
  0x84   :  { %3384 = vmatpush1.bf16.msra.mxu1 %v4867_v19  ;;  %3344 = vmatprep.subr.bf16.mxu0 %v4872_v20  ;;  %v4945_v19 = vld [vmem:[%s7386_s1 + $0xb40] ss:$16 sps:$4 sm:$0xff]   ;;  %v4950_v20 = vld [vmem:[%s7386_s1 + $0x924] ss:$16 sps:$4 sm:$0xff]  }
  0x85   :  { %3385 = vmatprep.subr.bf16.mxu1 %v4875_v21  ;;  %3374 = vmatprep.mubr.bf16.mxu0 %v5943_v24  ;;  %v4953_v21 = vld [vmem:[%s7386_s1 + $0xb24] ss:$16 sps:$4 sm:$0xff]  }
  0x86   :  { %3415 = vmatprep.mubr.bf16.mxu1 %v5947_v25 }
  0x87   :  { %3345 = vmatpush1.bf16.msra.mxu0 %v4870_v26  ;;  %v4948_v26 = vld [vmem:[%s7386_s1 + $0x920] ss:$16 sps:$4 sm:$0xff]  }
  0x88   :  { %3386 = vmatpush1.bf16.msra.mxu1 %v4873_v27  ;;  %3346 = vmatprep.subr.bf16.mxu0 %v4878_v28  ;;  %v4951_v27 = vld [vmem:[%s7386_s1 + $0xb20] ss:$16 sps:$4 sm:$0xff]   ;;  %v4956_v28 = vld [vmem:[%s7386_s1 + $0x904] ss:$16 sps:$4 sm:$0xff]  }
  0x89   :  { %3387 = vmatprep.subr.bf16.mxu1 %v4881_v29  ;;  %v4959_v29 = vld [vmem:[%s7386_s1 + $0xb04] ss:$16 sps:$4 sm:$0xff]  }
  0x8b   :  { %3347 = vmatpush1.bf16.msra.mxu0 %v4876_v30  ;;  %v4954_v30 = vld [vmem:[%s7386_s1 + $0x900] ss:$16 sps:$4 sm:$0xff]  }
  0x8c   :  { %3388 = vmatpush1.bf16.msra.mxu1 %v4879_v31  ;;  %3348 = vmatprep.subr.bf16.mxu0 %v4884_v32  ;;  %v4957_v31 = vld [vmem:[%s7386_s1 + $0xb00] ss:$16 sps:$4 sm:$0xff]   ;;  %v4966_v32 = vld [vmem:[%s7386_s1 + $0xce4] ss:$16 sps:$4 sm:$0xff]  }
  0x8d   :  { %3389 = vmatprep.subr.bf16.mxu1 %v4887_v33  ;;  %v4969_v33 = vld [vmem:[%s7386_s1 + $0xee4] ss:$16 sps:$4 sm:$0xff]  }
  0x8f   :  { %3349 = vmatpush1.bf16.msra.mxu0 %v4882_v34  ;;  %v4964_v34 = vld [vmem:[%s7386_s1 + $0xce0] ss:$16 sps:$4 sm:$0xff]  }
  0x90   :  { %3390 = vmatpush1.bf16.msra.mxu1 %v4885_v35  ;;  %3350 = vmatprep.subr.bf16.mxu0 %v4890_v38  ;;  %v6139_v35 = vld [vmem:[%s7387_s0 + $0x30] sm:$0xff]  ;;  %v6143_v38 = vcombine.low %v5934_v22, %v5934_v22 }
  0x91   :  { %3391 = vmatprep.subr.bf16.mxu1 %v4893_v39  ;;  %v6147_v39 = vcombine.low %v5939_v23, %v5939_v23  ;;  %v4972_v22 = vld [vmem:[%s7386_s1 + $0xcc4] ss:$16 sps:$4 sm:$0xff]  }
  0x92   :  { %v4975_v23 = vld [vmem:[%s7386_s1 + $0xec4] ss:$16 sps:$4 sm:$0xff]  }
  0x93   :  { %3351 = vmatpush1.bf16.msra.mxu0 %v4888_v40  ;;  %v6152_v40 = vld [vmem:[%s7387_s0 + $0x38] sm:$0xff] }
  0x94   :  { %3392 = vmatpush1.bf16.msra.mxu1 %v4891_v41  ;;  %3352 = vmatprep.subr.bf16.mxu0 %v4896_v42  ;;  %v4967_v41 = vld [vmem:[%s7386_s1 + $0xee0] ss:$16 sps:$4 sm:$0xff]   ;;  %v6165_v42 = vcombine.high %v6139_v35, %v6139_v35 }
  0x95   :  { %3393 = vmatprep.subr.bf16.mxu1 %v4899_v43  ;;  %v6169_v43 = vcombine.high %v6152_v40, %v6152_v40 }
  0x97   :  { %3353 = vmatpush1.bf16.msra.mxu0 %v4894_v44  ;;  %v4970_v44 = vld [vmem:[%s7386_s1 + $0xcc0] ss:$16 sps:$4 sm:$0xff]  }
  0x98   :  { %3394 = vmatpush1.bf16.msra.mxu1 %v4897_v45  ;;  %3354 = vmatprep.subr.bf16.mxu0 %v4902_v46  ;;  %v4973_v45 = vld [vmem:[%s7386_s1 + $0xec0] ss:$16 sps:$4 sm:$0xff]   ;;  %v4978_v46 = vld [vmem:[%s7386_s1 + $0xca4] ss:$16 sps:$4 sm:$0xff]  }
  0x99   :  { %3395 = vmatprep.subr.bf16.mxu1 %v4905_v48  ;;  %v4981_v48 = vld [vmem:[%s7386_s1 + $0xea4] ss:$16 sps:$4 sm:$0xff]  }
  0x9b   :  { %3355 = vmatpush1.bf16.msra.mxu0 %v4900_v49  ;;  %v4976_v49 = vld [vmem:[%s7386_s1 + $0xca0] ss:$16 sps:$4 sm:$0xff]  }
  0x9c   :  { %3396 = vmatpush1.bf16.msra.mxu1 %v4903_v50  ;;  %3356 = vmatprep.subr.bf16.mxu0 %v4908_v52  ;;  %v4979_v50 = vld [vmem:[%s7386_s1 + $0xea0] ss:$16 sps:$4 sm:$0xff]   ;;  %v4984_v52 = vld [vmem:[%s7386_s1 + $0xc84] ss:$16 sps:$4 sm:$0xff]  }
  0x9d   :  { %3397 = vmatprep.subr.bf16.mxu1 %v4911_v53  ;;  %v4987_v53 = vld [vmem:[%s7386_s1 + $0xe84] ss:$16 sps:$4 sm:$0xff]  }
  0x9f   :  { %3357 = vmatpush1.bf16.msra.mxu0 %v4906_v54  ;;  %v4982_v54 = vld [vmem:[%s7386_s1 + $0xc80] ss:$16 sps:$4 sm:$0xff]  }
  0xa0   :  { %3398 = vmatpush1.bf16.msra.mxu1 %v4909_v55  ;;  %3358 = vmatprep.subr.bf16.mxu0 %v4914_v56  ;;  %v4985_v55 = vld [vmem:[%s7386_s1 + $0xe80] ss:$16 sps:$4 sm:$0xff]   ;;  %v4990_v56 = vld [vmem:[%s7386_s1 + $0xc64] ss:$16 sps:$4 sm:$0xff]  }
  0xa1   :  { %3399 = vmatprep.subr.bf16.mxu1 %v4917_v57  ;;  %v4993_v57 = vld [vmem:[%s7386_s1 + $0xe64] ss:$16 sps:$4 sm:$0xff]  }
  0xa3   :  { %3359 = vmatpush2.bf16.msra.mxu0 %v4912_v58  ;;  %v4988_v58 = vld [vmem:[%s7386_s1 + $0xc60] ss:$16 sps:$4 sm:$0xff]  }
  0xa4   :  { %3400 = vmatpush2.bf16.msra.mxu1 %v4915_v59  ;;  %3360 = vmatprep.subr.bf16.mxu0 %v4920_v60  ;;  %v4991_v59 = vld [vmem:[%s7386_s1 + $0xe60] ss:$16 sps:$4 sm:$0xff]   ;;  %v4996_v60 = vld [vmem:[%s7386_s1 + $0xc44] ss:$16 sps:$4 sm:$0xff]  }
  0xa5   :  { %3401 = vmatprep.subr.bf16.mxu1 %v4923_v61  ;;  %v4999_v61 = vld [vmem:[%s7386_s1 + $0xe44] ss:$16 sps:$4 sm:$0xff]  }
  0xa7   :  { %3361 = vmatpush2.bf16.msra.mxu0 %v4918_v62  ;;  %v4994_v62 = vld [vmem:[%s7386_s1 + $0xc40] ss:$16 sps:$4 sm:$0xff]  }
  0xa8   :  { %3402 = vmatpush2.bf16.msra.mxu1 %v4921_v63  ;;  %3362 = vmatprep.subr.bf16.mxu0 %v4926_v0  ;;  %v4997_v63 = vld [vmem:[%s7386_s1 + $0xe40] ss:$16 sps:$4 sm:$0xff]   ;;  %v5002_v0 = vld [vmem:[%s7386_s1 + $0xc24] ss:$16 sps:$4 sm:$0xff]  }
  0xa9   :  { %3403 = vmatprep.subr.bf16.mxu1 %v4929_v1  ;;  %v5005_v1 = vld [vmem:[%s7386_s1 + $0xe24] ss:$16 sps:$4 sm:$0xff]  }
  0xab   :  { %3363 = vmatpush2.bf16.msra.mxu0 %v4924_v2  ;;  %v5000_v2 = vld [vmem:[%s7386_s1 + $0xc20] ss:$16 sps:$4 sm:$0xff]  }
  0xac   :  { %3404 = vmatpush2.bf16.msra.mxu1 %v4927_v3  ;;  %3364 = vmatprep.subr.bf16.mxu0 %v4932_v4  ;;  %v5003_v3 = vld [vmem:[%s7386_s1 + $0xe20] ss:$16 sps:$4 sm:$0xff]   ;;  %v5008_v4 = vld [vmem:[%s7386_s1 + $0xc04] ss:$16 sps:$4 sm:$0xff]  }
  0xad   :  { %3405 = vmatprep.subr.bf16.mxu1 %v4935_v5  ;;  %v5011_v5 = vld [vmem:[%s7386_s1 + $0xe04] ss:$16 sps:$4 sm:$0xff]  }
  0xaf   :  { %3365 = vmatpush2.bf16.msra.mxu0 %v4930_v8  ;;  %v5006_v8 = vld [vmem:[%s7386_s1 + $0xc00] ss:$16 sps:$4 sm:$0xff]  }
  0xb0   :  { %3406 = vmatpush2.bf16.msra.mxu1 %v4933_v9  ;;  %3366 = vmatprep.subr.bf16.mxu0 %v4938_v10  ;;  %v5009_v9 = vld [vmem:[%s7386_s1 + $0xe00] ss:$16 sps:$4 sm:$0xff]   ;;  %v5014_v10 = vld [vmem:[%s7386_s1 + $0xde4] ss:$16 sps:$4 sm:$0xff]  }
  0xb1   :  { %3407 = vmatprep.subr.bf16.mxu1 %v4941_v11  ;;  %v5017_v11 = vld [vmem:[%s7386_s1 + $0xfe4] ss:$16 sps:$4 sm:$0xff]  }
  0xb3   :  { %3367 = vmatpush2.bf16.msra.mxu0 %v4936_v12  ;;  %v5012_v12 = vld [vmem:[%s7386_s1 + $0xde0] ss:$16 sps:$4 sm:$0xff]  }
  0xb4   :  { %3408 = vmatpush2.bf16.msra.mxu1 %v4939_v13  ;;  %3368 = vmatprep.subr.bf16.mxu0 %v4944_v14  ;;  %v5015_v13 = vld [vmem:[%s7386_s1 + $0xfe0] ss:$16 sps:$4 sm:$0xff]   ;;  %v5020_v14 = vld [vmem:[%s7386_s1 + $0xdc4] ss:$16 sps:$4 sm:$0xff]  }
  0xb5   :  { %3409 = vmatprep.subr.bf16.mxu1 %v4947_v15  ;;  %v5023_v15 = vld [vmem:[%s7386_s1 + $0xfc4] ss:$16 sps:$4 sm:$0xff]  }
  0xb7   :  { %3369 = vmatpush2.bf16.msra.mxu0 %v4942_v18  ;;  %v5018_v18 = vld [vmem:[%s7386_s1 + $0xdc0] ss:$16 sps:$4 sm:$0xff]  }
  0xb8   :  { %3410 = vmatpush2.bf16.msra.mxu1 %v4945_v19  ;;  %3370 = vmatprep.subr.bf16.mxu0 %v4950_v20  ;;  %v5021_v19 = vld [vmem:[%s7386_s1 + $0xfc0] ss:$16 sps:$4 sm:$0xff]   ;;  %v5026_v20 = vld [vmem:[%s7386_s1 + $0xda4] ss:$16 sps:$4 sm:$0xff]  }
  0xb9   :  { %3411 = vmatprep.subr.bf16.mxu1 %v4953_v21  ;;  %v5029_v21 = vld [vmem:[%s7386_s1 + $0xfa4] ss:$16 sps:$4 sm:$0xff]  }
  0xbb   :  { %3371 = vmatpush2.bf16.msra.mxu0 %v4948_v26  ;;  %v5024_v26 = vld [vmem:[%s7386_s1 + $0xda0] ss:$16 sps:$4 sm:$0xff]  }
  0xbc   :  { %3412 = vmatpush2.bf16.msra.mxu1 %v4951_v27  ;;  %3372 = vmatprep.subr.bf16.mxu0 %v4956_v28  ;;  %v5027_v27 = vld [vmem:[%s7386_s1 + $0xfa0] ss:$16 sps:$4 sm:$0xff]   ;;  %v5032_v28 = vld [vmem:[%s7386_s1 + $0xd84] ss:$16 sps:$4 sm:$0xff]  }
  0xbd   :  { %3413 = vmatprep.subr.bf16.mxu1 %v4959_v29  ;;  %v5035_v29 = vld [vmem:[%s7386_s1 + $0xf84] ss:$16 sps:$4 sm:$0xff]  }
  0xbf   :  { %3373 = vmatpush2.bf16.msra.mxu0 %v4954_v30  ;;  %v5030_v30 = vld [vmem:[%s7386_s1 + $0xd80] ss:$16 sps:$4 sm:$0xff]  }
  0xc0   :  { %3414 = vmatpush2.bf16.msra.mxu1 %v4957_v31  ;;  %3424 = vmatprep.subr.bf16.mxu0 %v4966_v32  ;;  %v5033_v31 = vld [vmem:[%s7386_s1 + $0xf80] ss:$16 sps:$4 sm:$0xff]   ;;  %v5038_v32 = vld [vmem:[%s7386_s1 + $0xd64] ss:$16 sps:$4 sm:$0xff]  }
  0xc1   :  { %3465 = vmatprep.subr.bf16.mxu1 %v4969_v33  ;;  %v5041_v33 = vld [vmem:[%s7386_s1 + $0xf64] ss:$16 sps:$4 sm:$0xff]  }
  0xc2   :  { %3375 = vmatmul.mubr.bf16.vlgmr.msra.gmra.mxu0 %v6143_v38 }
  0xc3   :  { %3416 = vmatmul.mubr.bf16.vlgmr.msra.gmra.mxu1 %v6147_v39  ;;  %3425 = vmatpush1.bf16.msra.mxu0 %v4964_v34  ;;  %v5036_v34 = vld [vmem:[%s7386_s1 + $0xd60] ss:$16 sps:$4 sm:$0xff]  }
  0xc4   :  { %3466 = vmatpush1.bf16.msra.mxu1 %v4967_v41  ;;  %3426 = vmatprep.subr.bf16.mxu0 %v4972_v22  ;;  %v5039_v41 = vld [vmem:[%s7386_s1 + $0xf60] ss:$16 sps:$4 sm:$0xff]   ;;  %v5044_v22 = vld [vmem:[%s7386_s1 + $0xd44] ss:$16 sps:$4 sm:$0xff]  }
  0xc5   :  { %3467 = vmatprep.subr.bf16.mxu1 %v4975_v23  ;;  %3456 = vmatprep.mubr.bf16.mxu0 %v6165_v42  ;;  %v5047_v23 = vld [vmem:[%s7386_s1 + $0xf44] ss:$16 sps:$4 sm:$0xff]  }
  0xc6   :  { %3497 = vmatprep.mubr.bf16.mxu1 %v6169_v43 }
  0xc7   :  { %3427 = vmatpush1.bf16.msra.mxu0 %v4970_v44  ;;  %v5042_v44 = vld [vmem:[%s7386_s1 + $0xd40] ss:$16 sps:$4 sm:$0xff]  }
  0xc8   :  { %3468 = vmatpush1.bf16.msra.mxu1 %v4973_v45  ;;  %3428 = vmatprep.subr.bf16.mxu0 %v4978_v46  ;;  %v5045_v45 = vld [vmem:[%s7386_s1 + $0xf40] ss:$16 sps:$4 sm:$0xff]   ;;  %v542_v46 = vlaneseq }
  0xc9   :  { %3469 = vmatprep.subr.bf16.mxu1 %v4981_v48  ;;  %v5050_v48 = vld [vmem:[%s7386_s1 + $0xd24] ss:$16 sps:$4 sm:$0xff]  }
  0xcb   :  { %3429 = vmatpush1.bf16.msra.mxu0 %v4976_v49  ;;  %v5053_v49 = vld [vmem:[%s7386_s1 + $0xf24] ss:$16 sps:$4 sm:$0xff]  }
  0xcc   :  { %3470 = vmatpush1.bf16.msra.mxu1 %v4979_v50  ;;  %3430 = vmatprep.subr.bf16.mxu0 %v4984_v52  ;;  %v5048_v50 = vld [vmem:[%s7386_s1 + $0xd20] ss:$16 sps:$4 sm:$0xff]  }
  0xcd   :  { %3471 = vmatprep.subr.bf16.mxu1 %v4987_v53  ;;  %v5051_v52 = vld [vmem:[%s7386_s1 + $0xf20] ss:$16 sps:$4 sm:$0xff]   ;;  %v6337_v53 = vshrl.u32 %v542_v46, 7  ;;  %v5097_v46 = vld [vmem:[%s7386_s1 + $0x248] ss:$16 sps:$4 sm:$0xff]  }
  0xcf   :  { %3431 = vmatpush1.bf16.msra.mxu0 %v4982_v54  ;;  %v5056_v54 = vld [vmem:[%s7386_s1 + $0xd04] ss:$16 sps:$4 sm:$0xff]  }
  0xd0   :  { %3472 = vmatpush1.bf16.msra.mxu1 %v4985_v55  ;;  %3432 = vmatprep.subr.bf16.mxu0 %v4990_v56  ;;  %v5059_v55 = vld [vmem:[%s7386_s1 + $0xf04] ss:$16 sps:$4 sm:$0xff]   ;;  %v5054_v56 = vld [vmem:[%s7386_s1 + $0xd00] ss:$16 sps:$4 sm:$0xff]  }
  0xd1   :  { %3473 = vmatprep.subr.bf16.mxu1 %v4993_v57  ;;  %v5057_v57 = vld [vmem:[%s7386_s1 + $0xf00] ss:$16 sps:$4 sm:$0xff]  }
  0xd3   :  { %3433 = vmatpush1.bf16.msra.mxu0 %v4988_v58  ;;  %v540_v58 = vld [vmem:[%s7388_s2] sm:$0xf] }
  0xd4   :  { %3474 = vmatpush1.bf16.msra.mxu1 %v4991_v59  ;;  %3434 = vmatprep.subr.bf16.mxu0 %v4996_v60  ;;  %v544_v59 = vsub.s32 0, %v6337_v53  ;;  %v5066_v60 = vld [vmem:[%s7386_s1 + $0xec] ss:$16 sps:$4 sm:$0xff]  }
  0xd5   :  { %3475 = vmatprep.subr.bf16.mxu1 %v4999_v61  ;;  %v5069_v61 = vld [vmem:[%s7386_s1 + $0x2ec] ss:$16 sps:$4 sm:$0xff]  }
  0xd7   :  { %3435 = vmatpush1.bf16.msra.mxu0 %v4994_v62  ;;  %v548_v62 = vsub.s32 1, %v6337_v53 }
  0xd8   :  { %3476 = vmatpush1.bf16.msra.mxu1 %v4997_v63  ;;  %3436 = vmatprep.subr.bf16.mxu0 %v5002_v0  ;;  %v6364_v63 = vcombine.low %v6139_v35, %v6139_v35  ;;  %v6368_v0 = vcombine.low %v6152_v40, %v6152_v40  ;;  %v5072_v35 = vld [vmem:[%s7386_s1 + $0xcc] ss:$16 sps:$4 sm:$0xff]  }
  0xd9   :  { %3477 = vmatprep.subr.bf16.mxu1 %v5005_v1  ;;  %v5064_v1 = vld [vmem:[%s7386_s1 + $0xe8] ss:$16 sps:$4 sm:$0xff]   ;;  %v5075_v40 = vld [vmem:[%s7386_s1 + $0x2cc] ss:$16 sps:$4 sm:$0xff]  }
  0xdb   :  { %3437 = vmatpush1.bf16.msra.mxu0 %v5000_v2  ;;  %v545_v2 = vrot.slane %v540_v58, %v544_v59  ;;  %v5117_v59 = vld [vmem:[%s7386_s1 + $0x3ec] ss:$16 sps:$4 sm:$0xff]  }
  0xdc   :  { %3478 = vmatpush1.bf16.msra.mxu1 %v5003_v3  ;;  %3438 = vmatprep.subr.bf16.mxu0 %v5008_v4  ;;  %v5067_v3 = vld [vmem:[%s7386_s1 + $0x2e8] ss:$16 sps:$4 sm:$0xff]   ;;  %v549_v4 = vrot.slane %v540_v58, %v548_v62  ;;  %v5114_v58 = vld [vmem:[%s7386_s1 + $0x1ec] ss:$16 sps:$4 sm:$0xff]  }
  0xdd   :  { %3479 = vmatprep.subr.bf16.mxu1 %v5011_v5  ;;  %v5120_v62 = vld [vmem:[%s7386_s1 + $0x1cc] ss:$16 sps:$4 sm:$0xff]  }
  0xdf   :  { %3439 = vmatpush1.bf16.msra.mxu0 %v5006_v8 }
  0xe0   :  { %3480 = vmatpush1.bf16.msra.mxu1 %v5009_v9  ;;  %3440 = vmatprep.subr.bf16.mxu0 %v5014_v10  ;;  %v5070_v9 = vld [vmem:[%s7386_s1 + $0xc8] ss:$16 sps:$4 sm:$0xff]  }
  0xe1   :  { %3481 = vmatprep.subr.bf16.mxu1 %v5017_v11  ;;  %v5073_v11 = vld [vmem:[%s7386_s1 + $0x2c8] ss:$16 sps:$4 sm:$0xff]  }
  0xe3   :  { %3441 = vmatpush2.bf16.msra.mxu0 %v5012_v12 }
  0xe4   :  { %3482 = vmatpush2.bf16.msra.mxu1 %v5015_v13  ;;  %3442 = vmatprep.subr.bf16.mxu0 %v5020_v14  ;;  %v5078_v14 = vld [vmem:[%s7386_s1 + $0xac] ss:$16 sps:$4 sm:$0xff]  }
  0xe5   :  { %3483 = vmatprep.subr.bf16.mxu1 %v5023_v15  ;;  %v5081_v15 = vld [vmem:[%s7386_s1 + $0x2ac] ss:$16 sps:$4 sm:$0xff]  }
  0xe7   :  { %3443 = vmatpush2.bf16.msra.mxu0 %v5018_v18 }
  0xe8   :  { %3484 = vmatpush2.bf16.msra.mxu1 %v5021_v19  ;;  %3444 = vmatprep.subr.bf16.mxu0 %v5026_v20 }
  0xe9   :  { %3485 = vmatprep.subr.bf16.mxu1 %v5029_v21 }
  0xeb   :  { %3445 = vmatpush2.bf16.msra.mxu0 %v5024_v26  ;;  %v5076_v26 = vld [vmem:[%s7386_s1 + $0xa8] ss:$16 sps:$4 sm:$0xff]  }
  0xec   :  { %3486 = vmatpush2.bf16.msra.mxu1 %v5027_v27  ;;  %3446 = vmatprep.subr.bf16.mxu0 %v5032_v28  ;;  %v5079_v28 = vld [vmem:[%s7386_s1 + $0x2a8] ss:$16 sps:$4 sm:$0xff]  }
  0xed   :  { %3487 = vmatprep.subr.bf16.mxu1 %v5035_v29 }
  0xef   :  { %3447 = vmatpush2.bf16.msra.mxu0 %v5030_v30 }
  0xf0   :  { %3488 = vmatpush2.bf16.msra.mxu1 %v5033_v31  ;;  %3448 = vmatprep.subr.bf16.mxu0 %v5038_v32  ;;  %v5082_v31 = vld [vmem:[%s7386_s1 + $0x88] ss:$16 sps:$4 sm:$0xff]  }
  0xf1   :  { %3489 = vmatprep.subr.bf16.mxu1 %v5041_v33  ;;  %v5085_v32 = vld [vmem:[%s7386_s1 + $0x288] ss:$16 sps:$4 sm:$0xff]   ;;  %v5090_v33 = vld [vmem:[%s7386_s1 + $0x6c] ss:$16 sps:$4 sm:$0xff]  }
  0xf3   :  { %3449 = vmatpush2.bf16.msra.mxu0 %v5036_v34  ;;  %v5093_v34 = vld [vmem:[%s7386_s1 + $0x26c] ss:$16 sps:$4 sm:$0xff]  }
  0xf4   :  { %3490 = vmatpush2.bf16.msra.mxu1 %v5039_v41  ;;  %3450 = vmatprep.subr.bf16.mxu0 %v5044_v22  ;;  %v5088_v41 = vld [vmem:[%s7386_s1 + $0x68] ss:$16 sps:$4 sm:$0xff]  }
  0xf5   :  { %3491 = vmatprep.subr.bf16.mxu1 %v5047_v23  ;;  %v5091_v22 = vld [vmem:[%s7386_s1 + $0x268] ss:$16 sps:$4 sm:$0xff]   ;;  %v5096_v23 = vld [vmem:[%s7386_s1 + $0x4c] ss:$16 sps:$4 sm:$0xff]  }
  0xf7   :  { %3451 = vmatpush2.bf16.msra.mxu0 %v5042_v44  ;;  %v5099_v44 = vld [vmem:[%s7386_s1 + $0x24c] ss:$16 sps:$4 sm:$0xff]  }
  0xf8   :  { %3492 = vmatpush2.bf16.msra.mxu1 %v5045_v45  ;;  %3452 = vmatprep.subr.bf16.mxu0 %v5050_v48  ;;  %v5094_v45 = vld [vmem:[%s7386_s1 + $0x48] ss:$16 sps:$4 sm:$0xff]   ;;  %v5102_v48 = vld [vmem:[%s7386_s1 + $0x2c] ss:$16 sps:$4 sm:$0xff]  }
  0xf9   :  { %3493 = vmatprep.subr.bf16.mxu1 %v5053_v49  ;;  %v5105_v49 = vld [vmem:[%s7386_s1 + $0x22c] ss:$16 sps:$4 sm:$0xff]  }
  0xfb   :  { %3453 = vmatpush2.bf16.msra.mxu0 %v5048_v50  ;;  %v5100_v50 = vld [vmem:[%s7386_s1 + $0x28] ss:$16 sps:$4 sm:$0xff]  }
  0xfc   :  { %3494 = vmatpush2.bf16.msra.mxu1 %v5051_v52  ;;  %3454 = vmatprep.subr.bf16.mxu0 %v5056_v54  ;;  %v5103_v52 = vld [vmem:[%s7386_s1 + $0x228] ss:$16 sps:$4 sm:$0xff]   ;;  %v5108_v54 = vld [vmem:[%s7386_s1 + $0xc] ss:$16 sps:$4 sm:$0xff]  }
  0xfd   :  { %3495 = vmatprep.subr.bf16.mxu1 %v5059_v55  ;;  %v5111_v55 = vld [vmem:[%s7386_s1 + $0x20c] ss:$16 sps:$4 sm:$0xff]  }
  0xff   :  { %3455 = vmatpush2.bf16.msra.mxu0 %v5054_v56  ;;  %v5106_v56 = vld [vmem:[%s7386_s1 + $0x8] ss:$16 sps:$4 sm:$0xff]  }
 0x100   :  { %3496 = vmatpush2.bf16.msra.mxu1 %v5057_v57  ;;  %3506 = vmatprep.subr.bf16.mxu0 %v5066_v60  ;;  %v5109_v57 = vld [vmem:[%s7386_s1 + $0x208] ss:$16 sps:$4 sm:$0xff]  }
 0x101   :  { %3547 = vmatprep.subr.bf16.mxu1 %v5069_v61  ;;  %v5112_v60 = vld [vmem:[%s7386_s1 + $0x1e8] ss:$16 sps:$4 sm:$0xff]  }
 0x102   :  { %v3212_v5 = vpop.f32.mrf.mxu0  ;;  %3457 = vmatmul.mubr.bf16.vlgmr.msra.gmra.mxu0 %v6364_v63  ;;  %v5115_v61 = vld [vmem:[%s7386_s1 + $0x3e8] ss:$16 sps:$4 sm:$0xff]  }
 0x103   :  { %v3253_v8 = vpop.f32.mrf.mxu1  ;;  %3498 = vmatmul.mubr.bf16.vlgmr.msra.gmra.mxu1 %v6368_v0  ;;  %v3213_v10 = vadd.f32 %v3212_v5, %v545_v2  ;;  %3507 = vmatpush1.bf16.msra.mxu0 %v5064_v1  ;;  %v5123_v1 = vld [vmem:[%s7386_s1 + $0x3cc] ss:$16 sps:$4 sm:$0xff]   ;;  %v5118_v2 = vld [vmem:[%s7386_s1 + $0x1c8] ss:$16 sps:$4 sm:$0xff]  }
 0x104   :  { %3548 = vmatpush1.bf16.msra.mxu1 %v5067_v3  ;;  %v3214_v12 = vpop.f32.mrf.mxu0  ;;  %3508 = vmatprep.subr.bf16.mxu0 %v5072_v35  ;;  %v5121_v3 = vld [vmem:[%s7386_s1 + $0x3c8] ss:$16 sps:$4 sm:$0xff]   ;;  %v5126_v35 = vld [vmem:[%s7386_s1 + $0x1ac] ss:$16 sps:$4 sm:$0xff]  }
 0x105   :  { %v3255_v13 = vpop.f32.mrf.mxu1  ;;  %3549 = vmatprep.subr.bf16.mxu1 %v5075_v40  ;;  %v6396_v18 = vadd.f32 %v3253_v8, %v3213_v10  ;;  %v3215_v19 = vadd.f32 %v3214_v12, %v549_v4  ;;  %3538 = vmatprep.mubr.bf16.mxu0 %v5624_v47  ;;  %v5084_v47 = vld [vmem:[%s7386_s1 + $0x8c] ss:$16 sps:$4 sm:$0xff]   ;;  %v5124_v4 = vld [vmem:[%s7386_s1 + $0x1a8] ss:$16 sps:$4 sm:$0xff]  }
 0x106   :  { %3579 = vmatprep.mubr.bf16.mxu1 %v5635_v51  ;;  %v3216_v20 = vpop.f32.mrf.mxu0  ;;  %v5087_v51 = vld [vmem:[%s7386_s1 + $0x28c] ss:$16 sps:$4 sm:$0xff]   ;;  %v5127_v5 = vld [vmem:[%s7386_s1 + $0x3a8] ss:$16 sps:$4 sm:$0xff]  }
 0x107   :  { %v3257_v21 = vpop.f32.mrf.mxu1  ;;  %v6403_v27 = vadd.f32 %v3255_v13, %v3215_v19  ;;  %3509 = vmatpush1.bf16.msra.mxu0 %v5070_v9  ;;  %v5129_v40 = vld [vmem:[%s7386_s1 + $0x3ac] ss:$16 sps:$4 sm:$0xff]   ;;  %v5130_v10 = vld [vmem:[%s7386_s1 + $0x188] ss:$16 sps:$4 sm:$0xff]  }
 0x108   :  { %3550 = vmatpush1.bf16.msra.mxu1 %v5073_v11  ;;  %v3217_v29 = vpop.f32.mrf.mxu0  ;;  %3510 = vmatprep.subr.bf16.mxu0 %v5078_v14  ;;  %v5132_v8 = vld [vmem:[%s7386_s1 + $0x18c] ss:$16 sps:$4 sm:$0xff]   ;;  %v5133_v11 = vld [vmem:[%s7386_s1 + $0x388] ss:$16 sps:$4 sm:$0xff]  }
 0x109   :  { %v3258_v30 = vpop.f32.mrf.mxu1  ;;  %3551 = vmatprep.subr.bf16.mxu1 %v5081_v15  ;;  %v5135_v9 = vld [vmem:[%s7386_s1 + $0x38c] ss:$16 sps:$4 sm:$0xff]   ;;  %v5136_v14 = vld [vmem:[%s7386_s1 + $0x168] ss:$16 sps:$4 sm:$0xff]  }
 0x10a   :  { %v5138_v12 = vld [vmem:[%s7386_s1 + $0x16c] ss:$16 sps:$4 sm:$0xff]   ;;  %v5139_v15 = vld [vmem:[%s7386_s1 + $0x368] ss:$16 sps:$4 sm:$0xff]  }
 0x10b   :  { %3511 = vmatpush1.bf16.msra.mxu0 %v5076_v26  ;;  %v5141_v13 = vld [vmem:[%s7386_s1 + $0x36c] ss:$16 sps:$4 sm:$0xff]   ;;  %v5142_v21 = vld [vmem:[%s7386_s1 + $0x148] ss:$16 sps:$4 sm:$0xff]  }
 0x10c   :  { %3552 = vmatpush1.bf16.msra.mxu1 %v5079_v28  ;;  %3512 = vmatprep.subr.bf16.mxu0 %v5084_v47  ;;  %v5144_v19 = vld [vmem:[%s7386_s1 + $0x14c] ss:$16 sps:$4 sm:$0xff]   ;;  %v5145_v26 = vld [vmem:[%s7386_s1 + $0x348] ss:$16 sps:$4 sm:$0xff]  }
 0x10d   :  { %3553 = vmatprep.subr.bf16.mxu1 %v5087_v51  ;;  %v5147_v20 = vld [vmem:[%s7386_s1 + $0x34c] ss:$16 sps:$4 sm:$0xff]   ;;  %v5148_v30 = vld [vmem:[%s7386_s1 + $0x128] ss:$16 sps:$4 sm:$0xff]  }
 0x10e   :  { %v5150_v28 = vld [vmem:[%s7386_s1 + $0x12c] ss:$16 sps:$4 sm:$0xff]   ;;  %v5151_v47 = vld [vmem:[%s7386_s1 + $0x328] ss:$16 sps:$4 sm:$0xff]  }
 0x10f   :  { %3513 = vmatpush1.bf16.msra.mxu0 %v5082_v31  ;;  %v5153_v29 = vld [vmem:[%s7386_s1 + $0x32c] ss:$16 sps:$4 sm:$0xff]  }
 0x110   :  { %3554 = vmatpush1.bf16.msra.mxu1 %v5085_v32  ;;  %3514 = vmatprep.subr.bf16.mxu0 %v5090_v33  ;;  %v5156_v51 = vld [vmem:[%s7386_s1 + $0x10c] ss:$16 sps:$4 sm:$0xff]   ;;  %v5154_v32 = vld [vmem:[%s7386_s1 + $0x108] ss:$16 sps:$4 sm:$0xff]  }
 0x111   :  { %3555 = vmatprep.subr.bf16.mxu1 %v5093_v34  ;;  %v5159_v31 = vld [vmem:[%s7386_s1 + $0x30c] ss:$16 sps:$4 sm:$0xff]   ;;  %v5157_v33 = vld [vmem:[%s7386_s1 + $0x308] ss:$16 sps:$4 sm:$0xff]  }
 0x112   :  { %v5162_v34 = vld [vmem:[%s7386_s1 + $0x4ec] ss:$16 sps:$4 sm:$0xff]  }
 0x113   :  { %3515 = vmatpush1.bf16.msra.mxu0 %v5088_v41  ;;  %v5165_v41 = vld [vmem:[%s7386_s1 + $0x6ec] ss:$16 sps:$4 sm:$0xff]  }
 0x114   :  { %3556 = vmatpush1.bf16.msra.mxu1 %v5091_v22  ;;  %3516 = vmatprep.subr.bf16.mxu0 %v5096_v23  ;;  %v5160_v22 = vld [vmem:[%s7386_s1 + $0x4e8] ss:$16 sps:$4 sm:$0xff]  }
 0x115   :  { %3557 = vmatprep.subr.bf16.mxu1 %v5099_v44  ;;  %v5163_v23 = vld [vmem:[%s7386_s1 + $0x6e8] ss:$16 sps:$4 sm:$0xff]   ;;  %v5168_v44 = vld [vmem:[%s7386_s1 + $0x4cc] ss:$16 sps:$4 sm:$0xff]  }
 0x117   :  { %3517 = vmatpush1.bf16.msra.mxu0 %v5094_v45  ;;  %v5171_v45 = vld [vmem:[%s7386_s1 + $0x6cc] ss:$16 sps:$4 sm:$0xff]  }
 0x118   :  { %3558 = vmatpush1.bf16.msra.mxu1 %v5097_v46  ;;  %3518 = vmatprep.subr.bf16.mxu0 %v5102_v48 }
 0x119   :  { %3559 = vmatprep.subr.bf16.mxu1 %v5105_v49 }
 0x11b   :  { %3519 = vmatpush1.bf16.msra.mxu0 %v5100_v50  ;;  %v5166_v50 = vld [vmem:[%s7386_s1 + $0x4c8] ss:$16 sps:$4 sm:$0xff]  }
 0x11c   :  { %3560 = vmatpush1.bf16.msra.mxu1 %v5103_v52  ;;  %3520 = vmatprep.subr.bf16.mxu0 %v5108_v54  ;;  %v5169_v52 = vld [vmem:[%s7386_s1 + $0x6c8] ss:$16 sps:$4 sm:$0xff]  }
 0x11d   :  { %3561 = vmatprep.subr.bf16.mxu1 %v5111_v55 }
 0x11f   :  { %3521 = vmatpush1.bf16.msra.mxu0 %v5106_v56 }
 0x120   :  { %3562 = vmatpush1.bf16.msra.mxu1 %v5109_v57  ;;  %3522 = vmatprep.subr.bf16.mxu0 %v5114_v58 }
 0x121   :  { %3563 = vmatprep.subr.bf16.mxu1 %v5117_v59 }
 0x123   :  { %3523 = vmatpush2.bf16.msra.mxu0 %v5112_v60  ;;  %v5172_v60 = vld [vmem:[%s7386_s1 + $0x4a8] ss:$16 sps:$4 sm:$0xff]  }
 0x124   :  { %3564 = vmatpush2.bf16.msra.mxu1 %v5115_v61  ;;  %3524 = vmatprep.subr.bf16.mxu0 %v5120_v62  ;;  %v5175_v61 = vld [vmem:[%s7386_s1 + $0x6a8] ss:$16 sps:$4 sm:$0xff]  }
 0x125   :  { %3565 = vmatprep.subr.bf16.mxu1 %v5123_v1  ;;  %v5178_v1 = vld [vmem:[%s7386_s1 + $0x488] ss:$16 sps:$4 sm:$0xff]  }
 0x127   :  { %3525 = vmatpush2.bf16.msra.mxu0 %v5118_v2  ;;  %v5181_v2 = vld [vmem:[%s7386_s1 + $0x688] ss:$16 sps:$4 sm:$0xff]  }
 0x128   :  { %3566 = vmatpush2.bf16.msra.mxu1 %v5121_v3  ;;  %3526 = vmatprep.subr.bf16.mxu0 %v5126_v35  ;;  %v5186_v3 = vld [vmem:[%s7386_s1 + $0x46c] ss:$16 sps:$4 sm:$0xff]  }
 0x129   :  { %3567 = vmatprep.subr.bf16.mxu1 %v5129_v40  ;;  %v5189_v35 = vld [vmem:[%s7386_s1 + $0x66c] ss:$16 sps:$4 sm:$0xff]   ;;  %v5184_v40 = vld [vmem:[%s7386_s1 + $0x468] ss:$16 sps:$4 sm:$0xff]  }
 0x12b   :  { %3527 = vmatpush2.bf16.msra.mxu0 %v5124_v4  ;;  %v5187_v4 = vld [vmem:[%s7386_s1 + $0x668] ss:$16 sps:$4 sm:$0xff]  }
 0x12c   :  { %3568 = vmatpush2.bf16.msra.mxu1 %v5127_v5  ;;  %3528 = vmatprep.subr.bf16.mxu0 %v5132_v8  ;;  %v5192_v5 = vld [vmem:[%s7386_s1 + $0x44c] ss:$16 sps:$4 sm:$0xff]  }
 0x12d   :  { %3569 = vmatprep.subr.bf16.mxu1 %v5135_v9  ;;  %v5195_v8 = vld [vmem:[%s7386_s1 + $0x64c] ss:$16 sps:$4 sm:$0xff]   ;;  %v5190_v9 = vld [vmem:[%s7386_s1 + $0x448] ss:$16 sps:$4 sm:$0xff]  }
 0x12f   :  { %3529 = vmatpush2.bf16.msra.mxu0 %v5130_v10  ;;  %v5193_v10 = vld [vmem:[%s7386_s1 + $0x648] ss:$16 sps:$4 sm:$0xff]  }
 0x130   :  { %3570 = vmatpush2.bf16.msra.mxu1 %v5133_v11  ;;  %3530 = vmatprep.subr.bf16.mxu0 %v5138_v12  ;;  %v5198_v11 = vld [vmem:[%s7386_s1 + $0x42c] ss:$16 sps:$4 sm:$0xff]  }
 0x131   :  { %3571 = vmatprep.subr.bf16.mxu1 %v5141_v13  ;;  %v5201_v12 = vld [vmem:[%s7386_s1 + $0x62c] ss:$16 sps:$4 sm:$0xff]   ;;  %v5196_v13 = vld [vmem:[%s7386_s1 + $0x428] ss:$16 sps:$4 sm:$0xff]  }
 0x133   :  { %3531 = vmatpush2.bf16.msra.mxu0 %v5136_v14  ;;  %v5199_v14 = vld [vmem:[%s7386_s1 + $0x628] ss:$16 sps:$4 sm:$0xff]  }
 0x134   :  { %3572 = vmatpush2.bf16.msra.mxu1 %v5139_v15  ;;  %3532 = vmatprep.subr.bf16.mxu0 %v5144_v19  ;;  %v5204_v15 = vld [vmem:[%s7386_s1 + $0x40c] ss:$16 sps:$4 sm:$0xff]  }
 0x135   :  { %3573 = vmatprep.subr.bf16.mxu1 %v5147_v20  ;;  %v5207_v19 = vld [vmem:[%s7386_s1 + $0x60c] ss:$16 sps:$4 sm:$0xff]   ;;  %v5202_v20 = vld [vmem:[%s7386_s1 + $0x408] ss:$16 sps:$4 sm:$0xff]  }
 0x137   :  { %3533 = vmatpush2.bf16.msra.mxu0 %v5142_v21  ;;  %v5205_v21 = vld [vmem:[%s7386_s1 + $0x608] ss:$16 sps:$4 sm:$0xff]  }
 0x138   :  { %3574 = vmatpush2.bf16.msra.mxu1 %v5145_v26  ;;  %3534 = vmatprep.subr.bf16.mxu0 %v5150_v28  ;;  %v5210_v26 = vld [vmem:[%s7386_s1 + $0x5ec] ss:$16 sps:$4 sm:$0xff]  }
 0x139   :  { %3575 = vmatprep.subr.bf16.mxu1 %v5153_v29  ;;  %v5213_v28 = vld [vmem:[%s7386_s1 + $0x7ec] ss:$16 sps:$4 sm:$0xff]   ;;  %v5208_v29 = vld [vmem:[%s7386_s1 + $0x5e8] ss:$16 sps:$4 sm:$0xff]  }
 0x13b   :  { %3535 = vmatpush2.bf16.msra.mxu0 %v5148_v30  ;;  %v5211_v30 = vld [vmem:[%s7386_s1 + $0x7e8] ss:$16 sps:$4 sm:$0xff]  }
 0x13c   :  { %3576 = vmatpush2.bf16.msra.mxu1 %v5151_v47  ;;  %3536 = vmatprep.subr.bf16.mxu0 %v5156_v51  ;;  %v5216_v47 = vld [vmem:[%s7386_s1 + $0x5cc] ss:$16 sps:$4 sm:$0xff]  }
 0x13d   :  { %3577 = vmatprep.subr.bf16.mxu1 %v5159_v31  ;;  %v5219_v51 = vld [vmem:[%s7386_s1 + $0x7cc] ss:$16 sps:$4 sm:$0xff]   ;;  %v5214_v31 = vld [vmem:[%s7386_s1 + $0x5c8] ss:$16 sps:$4 sm:$0xff]  }
 0x13f   :  { %3537 = vmatpush2.bf16.msra.mxu0 %v5154_v32  ;;  %v5217_v32 = vld [vmem:[%s7386_s1 + $0x7c8] ss:$16 sps:$4 sm:$0xff]  }
 0x140   :  { %3578 = vmatpush2.bf16.msra.mxu1 %v5157_v33  ;;  %3588 = vmatprep.subr.bf16.mxu0 %v5162_v34  ;;  %v5222_v33 = vld [vmem:[%s7386_s1 + $0x5ac] ss:$16 sps:$4 sm:$0xff]  }
 0x141   :  { %3629 = vmatprep.subr.bf16.mxu1 %v5165_v41  ;;  %v5225_v34 = vld [vmem:[%s7386_s1 + $0x7ac] ss:$16 sps:$4 sm:$0xff]   ;;  %v5220_v41 = vld [vmem:[%s7386_s1 + $0x5a8] ss:$16 sps:$4 sm:$0xff]  }
 0x142   :  { %v3294_v46 = vpop.f32.mrf.mxu0  ;;  %3539 = vmatmul.mubr.bf16.vlgmr.msra.gmra.mxu0 %v5693_v6  ;;  %v5174_v6 = vld [vmem:[%s7386_s1 + $0x4ac] ss:$16 sps:$4 sm:$0xff]  }
 0x143   :  { %v3335_v48 = vpop.f32.mrf.mxu1  ;;  %3580 = vmatmul.mubr.bf16.vlgmr.msra.gmra.mxu1 %v5695_v7  ;;  %v3295_v49 = vadd.f32 %v3294_v46, %v6396_v18  ;;  %3589 = vmatpush1.bf16.msra.mxu0 %v5160_v22  ;;  %v5177_v7 = vld [vmem:[%s7386_s1 + $0x6ac] ss:$16 sps:$4 sm:$0xff]   ;;  %v5223_v22 = vld [vmem:[%s7386_s1 + $0x7a8] ss:$16 sps:$4 sm:$0xff]  }
 0x144   :  { %3630 = vmatpush1.bf16.msra.mxu1 %v5163_v23  ;;  %v3296_v54 = vpop.f32.mrf.mxu0  ;;  %3590 = vmatprep.subr.bf16.mxu0 %v5168_v44  ;;  %v5228_v23 = vld [vmem:[%s7386_s1 + $0x58c] ss:$16 sps:$4 sm:$0xff]   ;;  %v5229_v46 = vld [vmem:[%s7386_s1 + $0x788] ss:$16 sps:$4 sm:$0xff]  }
 0x145   :  { %v3337_v55 = vpop.f32.mrf.mxu1  ;;  %3631 = vmatprep.subr.bf16.mxu1 %v5171_v45  ;;  %v6597_v18 = vadd.f32 %v3335_v48, %v3295_v49  ;;  %v3297_v56 = vadd.f32 %v3296_v54, %v6403_v27  ;;  %3620 = vmatprep.mubr.bf16.mxu0 %v5789_v36  ;;  %v5180_v36 = vld [vmem:[%s7386_s1 + $0x48c] ss:$16 sps:$4 sm:$0xff]   ;;  %v5226_v45 = vld [vmem:[%s7386_s1 + $0x588] ss:$16 sps:$4 sm:$0xff]  }
 0x146   :  { %3661 = vmatprep.mubr.bf16.mxu1 %v5793_v37  ;;  %v3298_v57 = vpop.f32.mrf.mxu0  ;;  %v5183_v37 = vld [vmem:[%s7386_s1 + $0x68c] ss:$16 sps:$4 sm:$0xff]  }
 0x147   :  { %v3339_v58 = vpop.f32.mrf.mxu1  ;;  %v6602_v59 = vadd.f32 %v3337_v55, %v3297_v56  ;;  %3591 = vmatpush1.bf16.msra.mxu0 %v5166_v50  ;;  %v5231_v44 = vld [vmem:[%s7386_s1 + $0x78c] ss:$16 sps:$4 sm:$0xff]   ;;  %v5232_v50 = vld [vmem:[%s7386_s1 + $0x568] ss:$16 sps:$4 sm:$0xff]  }
 0x148   :  { %3632 = vmatpush1.bf16.msra.mxu1 %v5169_v52  ;;  %v3299_v62 = vpop.f32.mrf.mxu0  ;;  %3592 = vmatprep.subr.bf16.mxu0 %v5174_v6  ;;  %v5234_v48 = vld [vmem:[%s7386_s1 + $0x56c] ss:$16 sps:$4 sm:$0xff]   ;;  %v5235_v52 = vld [vmem:[%s7386_s1 + $0x768] ss:$16 sps:$4 sm:$0xff]  }
 0x149   :  { %v3340_v27 = vpop.f32.mrf.mxu1  ;;  %3633 = vmatprep.subr.bf16.mxu1 %v5177_v7  ;;  %v5237_v49 = vld [vmem:[%s7386_s1 + $0x76c] ss:$16 sps:$4 sm:$0xff]   ;;  %v5238_v6 = vld [vmem:[%s7386_s1 + $0x548] ss:$16 sps:$4 sm:$0xff]  }
 0x14a   :  { %v5240_v54 = vld [vmem:[%s7386_s1 + $0x54c] ss:$16 sps:$4 sm:$0xff]   ;;  %v5241_v7 = vld [vmem:[%s7386_s1 + $0x748] ss:$16 sps:$4 sm:$0xff]  }
 0x14b   :  { %3593 = vmatpush1.bf16.msra.mxu0 %v5172_v60  ;;  %v5243_v55 = vld [vmem:[%s7386_s1 + $0x74c] ss:$16 sps:$4 sm:$0xff]   ;;  %v5244_v58 = vld [vmem:[%s7386_s1 + $0x528] ss:$16 sps:$4 sm:$0xff]  }
 0x14c   :  { %3634 = vmatpush1.bf16.msra.mxu1 %v5175_v61  ;;  %3594 = vmatprep.subr.bf16.mxu0 %v5180_v36  ;;  %v5246_v56 = vld [vmem:[%s7386_s1 + $0x52c] ss:$16 sps:$4 sm:$0xff]   ;;  %v5247_v60 = vld [vmem:[%s7386_s1 + $0x728] ss:$16 sps:$4 sm:$0xff]  }
 0x14d   :  { %3635 = vmatprep.subr.bf16.mxu1 %v5183_v37  ;;  %v5249_v57 = vld [vmem:[%s7386_s1 + $0x72c] ss:$16 sps:$4 sm:$0xff]   ;;  %v5250_v27 = vld [vmem:[%s7386_s1 + $0x508] ss:$16 sps:$4 sm:$0xff]  }
 0x14e   :  { %v5252_v61 = vld [vmem:[%s7386_s1 + $0x50c] ss:$16 sps:$4 sm:$0xff]   ;;  %v5253_v36 = vld [vmem:[%s7386_s1 + $0x708] ss:$16 sps:$4 sm:$0xff]  }
 0x14f   :  { %3595 = vmatpush1.bf16.msra.mxu0 %v5178_v1  ;;  %v5255_v62 = vld [vmem:[%s7386_s1 + $0x70c] ss:$16 sps:$4 sm:$0xff]  }
 0x150   :  { %3636 = vmatpush1.bf16.msra.mxu1 %v5181_v2  ;;  %3596 = vmatprep.subr.bf16.mxu0 %v5186_v3  ;;  %v5258_v37 = vld [vmem:[%s7386_s1 + $0x8ec] ss:$16 sps:$4 sm:$0xff]   ;;  %v5256_v2 = vld [vmem:[%s7386_s1 + $0x8e8] ss:$16 sps:$4 sm:$0xff]  }
 0x151   :  { %3637 = vmatprep.subr.bf16.mxu1 %v5189_v35  ;;  %v5261_v1 = vld [vmem:[%s7386_s1 + $0xaec] ss:$16 sps:$4 sm:$0xff]   ;;  %v5259_v3 = vld [vmem:[%s7386_s1 + $0xae8] ss:$16 sps:$4 sm:$0xff]  }
 0x152   :  { %v5264_v35 = vld [vmem:[%s7386_s1 + $0x8cc] ss:$16 sps:$4 sm:$0xff]  }
 0x153   :  { %3597 = vmatpush1.bf16.msra.mxu0 %v5184_v40  ;;  %v5267_v40 = vld [vmem:[%s7386_s1 + $0xacc] ss:$16 sps:$4 sm:$0xff]  }
 0x154   :  { %3638 = vmatpush1.bf16.msra.mxu1 %v5187_v4  ;;  %3598 = vmatprep.subr.bf16.mxu0 %v5192_v5 }
 0x155   :  { %3639 = vmatprep.subr.bf16.mxu1 %v5195_v8 }
 0x157   :  { %3599 = vmatpush1.bf16.msra.mxu0 %v5190_v9  ;;  %v5262_v9 = vld [vmem:[%s7386_s1 + $0x8c8] ss:$16 sps:$4 sm:$0xff]  }
 0x158   :  { %3640 = vmatpush1.bf16.msra.mxu1 %v5193_v10  ;;  %3600 = vmatprep.subr.bf16.mxu0 %v5198_v11  ;;  %v5265_v10 = vld [vmem:[%s7386_s1 + $0xac8] ss:$16 sps:$4 sm:$0xff]  }
 0x159   :  { %3641 = vmatprep.subr.bf16.mxu1 %v5201_v12 }
 0x15b   :  { %3601 = vmatpush1.bf16.msra.mxu0 %v5196_v13 }
 0x15c   :  { %3642 = vmatpush1.bf16.msra.mxu1 %v5199_v14  ;;  %3602 = vmatprep.subr.bf16.mxu0 %v5204_v15 }
 0x15d   :  { %3643 = vmatprep.subr.bf16.mxu1 %v5207_v19 }
 0x15f   :  { %3603 = vmatpush1.bf16.msra.mxu0 %v5202_v20  ;;  %v5268_v20 = vld [vmem:[%s7386_s1 + $0x8a8] ss:$16 sps:$4 sm:$0xff]  }
 0x160   :  { %3644 = vmatpush1.bf16.msra.mxu1 %v5205_v21  ;;  %3604 = vmatprep.subr.bf16.mxu0 %v5210_v26  ;;  %v5271_v21 = vld [vmem:[%s7386_s1 + $0xaa8] ss:$16 sps:$4 sm:$0xff]  }
 0x161   :  { %3645 = vmatprep.subr.bf16.mxu1 %v5213_v28  ;;  %v5274_v28 = vld [vmem:[%s7386_s1 + $0x888] ss:$16 sps:$4 sm:$0xff]  }
 0x163   :  { %3605 = vmatpush2.bf16.msra.mxu0 %v5208_v29  ;;  %v5277_v29 = vld [vmem:[%s7386_s1 + $0xa88] ss:$16 sps:$4 sm:$0xff]  }
 0x164   :  { %3646 = vmatpush2.bf16.msra.mxu1 %v5211_v30  ;;  %3606 = vmatprep.subr.bf16.mxu0 %v5216_v47  ;;  %v5282_v30 = vld [vmem:[%s7386_s1 + $0x86c] ss:$16 sps:$4 sm:$0xff]  }
 0x165   :  { %3647 = vmatprep.subr.bf16.mxu1 %v5219_v51  ;;  %v5285_v47 = vld [vmem:[%s7386_s1 + $0xa6c] ss:$16 sps:$4 sm:$0xff]   ;;  %v5280_v51 = vld [vmem:[%s7386_s1 + $0x868] ss:$16 sps:$4 sm:$0xff]  }
 0x167   :  { %3607 = vmatpush2.bf16.msra.mxu0 %v5214_v31  ;;  %v5283_v31 = vld [vmem:[%s7386_s1 + $0xa68] ss:$16 sps:$4 sm:$0xff]  }
 0x168   :  { %3648 = vmatpush2.bf16.msra.mxu1 %v5217_v32  ;;  %3608 = vmatprep.subr.bf16.mxu0 %v5222_v33  ;;  %v5288_v32 = vld [vmem:[%s7386_s1 + $0x84c] ss:$16 sps:$4 sm:$0xff]  }
 0x169   :  { %3649 = vmatprep.subr.bf16.mxu1 %v5225_v34  ;;  %v5291_v33 = vld [vmem:[%s7386_s1 + $0xa4c] ss:$16 sps:$4 sm:$0xff]   ;;  %v5286_v34 = vld [vmem:[%s7386_s1 + $0x848] ss:$16 sps:$4 sm:$0xff]  }
 0x16b   :  { %3609 = vmatpush2.bf16.msra.mxu0 %v5220_v41  ;;  %v5289_v41 = vld [vmem:[%s7386_s1 + $0xa48] ss:$16 sps:$4 sm:$0xff]  }
 0x16c   :  { %3650 = vmatpush2.bf16.msra.mxu1 %v5223_v22  ;;  %3610 = vmatprep.subr.bf16.mxu0 %v5228_v23  ;;  %v5294_v22 = vld [vmem:[%s7386_s1 + $0x82c] ss:$16 sps:$4 sm:$0xff]  }
 0x16d   :  { %3651 = vmatprep.subr.bf16.mxu1 %v5231_v44  ;;  %v5297_v23 = vld [vmem:[%s7386_s1 + $0xa2c] ss:$16 sps:$4 sm:$0xff]   ;;  %v5292_v44 = vld [vmem:[%s7386_s1 + $0x828] ss:$16 sps:$4 sm:$0xff]  }
 0x16f   :  { %3611 = vmatpush2.bf16.msra.mxu0 %v5226_v45  ;;  %v5295_v45 = vld [vmem:[%s7386_s1 + $0xa28] ss:$16 sps:$4 sm:$0xff]  }
 0x170   :  { %3652 = vmatpush2.bf16.msra.mxu1 %v5229_v46  ;;  %3612 = vmatprep.subr.bf16.mxu0 %v5234_v48  ;;  %v5300_v46 = vld [vmem:[%s7386_s1 + $0x80c] ss:$16 sps:$4 sm:$0xff]  }
 0x171   :  { %3653 = vmatprep.subr.bf16.mxu1 %v5237_v49  ;;  %v5303_v48 = vld [vmem:[%s7386_s1 + $0xa0c] ss:$16 sps:$4 sm:$0xff]   ;;  %v5298_v49 = vld [vmem:[%s7386_s1 + $0x808] ss:$16 sps:$4 sm:$0xff]  }
 0x173   :  { %3613 = vmatpush2.bf16.msra.mxu0 %v5232_v50  ;;  %v5301_v50 = vld [vmem:[%s7386_s1 + $0xa08] ss:$16 sps:$4 sm:$0xff]  }
 0x174   :  { %3654 = vmatpush2.bf16.msra.mxu1 %v5235_v52  ;;  %3614 = vmatprep.subr.bf16.mxu0 %v5240_v54  ;;  %v5306_v52 = vld [vmem:[%s7386_s1 + $0x9ec] ss:$16 sps:$4 sm:$0xff]  }
 0x175   :  { %3655 = vmatprep.subr.bf16.mxu1 %v5243_v55  ;;  %v5309_v54 = vld [vmem:[%s7386_s1 + $0xbec] ss:$16 sps:$4 sm:$0xff]   ;;  %v5304_v55 = vld [vmem:[%s7386_s1 + $0x9e8] ss:$16 sps:$4 sm:$0xff]  }
 0x177   :  { %3615 = vmatpush2.bf16.msra.mxu0 %v5238_v6  ;;  %v5307_v6 = vld [vmem:[%s7386_s1 + $0xbe8] ss:$16 sps:$4 sm:$0xff]  }
 0x178   :  { %3656 = vmatpush2.bf16.msra.mxu1 %v5241_v7  ;;  %3616 = vmatprep.subr.bf16.mxu0 %v5246_v56  ;;  %v5312_v7 = vld [vmem:[%s7386_s1 + $0x9cc] ss:$16 sps:$4 sm:$0xff]  }
 0x179   :  { %3657 = vmatprep.subr.bf16.mxu1 %v5249_v57  ;;  %v5315_v56 = vld [vmem:[%s7386_s1 + $0xbcc] ss:$16 sps:$4 sm:$0xff]   ;;  %v5310_v57 = vld [vmem:[%s7386_s1 + $0x9c8] ss:$16 sps:$4 sm:$0xff]  }
 0x17b   :  { %3617 = vmatpush2.bf16.msra.mxu0 %v5244_v58  ;;  %v5313_v58 = vld [vmem:[%s7386_s1 + $0xbc8] ss:$16 sps:$4 sm:$0xff]  }
 0x17c   :  { %3658 = vmatpush2.bf16.msra.mxu1 %v5247_v60  ;;  %3618 = vmatprep.subr.bf16.mxu0 %v5252_v61  ;;  %v5318_v60 = vld [vmem:[%s7386_s1 + $0x9ac] ss:$16 sps:$4 sm:$0xff]  }
 0x17d   :  { %3659 = vmatprep.subr.bf16.mxu1 %v5255_v62  ;;  %v5321_v61 = vld [vmem:[%s7386_s1 + $0xbac] ss:$16 sps:$4 sm:$0xff]   ;;  %v5316_v62 = vld [vmem:[%s7386_s1 + $0x9a8] ss:$16 sps:$4 sm:$0xff]  }
 0x17f   :  { %3619 = vmatpush2.bf16.msra.mxu0 %v5250_v27  ;;  %v5319_v27 = vld [vmem:[%s7386_s1 + $0xba8] ss:$16 sps:$4 sm:$0xff]  }
 0x180   :  { %3660 = vmatpush2.bf16.msra.mxu1 %v5253_v36  ;;  %3670 = vmatprep.subr.bf16.mxu0 %v5258_v37  ;;  %v5324_v36 = vld [vmem:[%s7386_s1 + $0x98c] ss:$16 sps:$4 sm:$0xff]  }
 0x181   :  { %3711 = vmatprep.subr.bf16.mxu1 %v5261_v1  ;;  %v5327_v37 = vld [vmem:[%s7386_s1 + $0xb8c] ss:$16 sps:$4 sm:$0xff]   ;;  %v5322_v1 = vld [vmem:[%s7386_s1 + $0x988] ss:$16 sps:$4 sm:$0xff]  }
 0x182   :  { %v3376_v4 = vpop.f32.mrf.mxu0  ;;  %3621 = vmatmul.mubr.bf16.vlgmr.msra.gmra.mxu0 %v5913_v16  ;;  %v5270_v16 = vld [vmem:[%s7386_s1 + $0x8ac] ss:$16 sps:$4 sm:$0xff]  }
 0x183   :  { %v3417_v5 = vpop.f32.mrf.mxu1  ;;  %3662 = vmatmul.mubr.bf16.vlgmr.msra.gmra.mxu1 %v5917_v17  ;;  %v3377_v8 = vadd.f32 %v3376_v4, %v6597_v18  ;;  %3671 = vmatpush1.bf16.msra.mxu0 %v5256_v2  ;;  %v5273_v17 = vld [vmem:[%s7386_s1 + $0xaac] ss:$16 sps:$4 sm:$0xff]   ;;  %v5325_v2 = vld [vmem:[%s7386_s1 + $0xb88] ss:$16 sps:$4 sm:$0xff]  }
 0x184   :  { %3712 = vmatpush1.bf16.msra.mxu1 %v5259_v3  ;;  %v3378_v11 = vpop.f32.mrf.mxu0  ;;  %3672 = vmatprep.subr.bf16.mxu0 %v5264_v35  ;;  %v5330_v3 = vld [vmem:[%s7386_s1 + $0x96c] ss:$16 sps:$4 sm:$0xff]   ;;  %v5331_v4 = vld [vmem:[%s7386_s1 + $0xb68] ss:$16 sps:$4 sm:$0xff]  }
 0x185   :  { %v3419_v12 = vpop.f32.mrf.mxu1  ;;  %3713 = vmatprep.subr.bf16.mxu1 %v5267_v40  ;;  %v6799_v18 = vadd.f32 %v3417_v5, %v3377_v8  ;;  %v3379_v13 = vadd.f32 %v3378_v11, %v6602_v59  ;;  %3702 = vmatprep.mubr.bf16.mxu0 %v5943_v24  ;;  %v5276_v24 = vld [vmem:[%s7386_s1 + $0x88c] ss:$16 sps:$4 sm:$0xff]   ;;  %v5328_v40 = vld [vmem:[%s7386_s1 + $0x968] ss:$16 sps:$4 sm:$0xff]  }
 0x186   :  { %3743 = vmatprep.mubr.bf16.mxu1 %v5947_v25  ;;  %v3380_v14 = vpop.f32.mrf.mxu0  ;;  %v5279_v25 = vld [vmem:[%s7386_s1 + $0xa8c] ss:$16 sps:$4 sm:$0xff]  }
 0x187   :  { %v3421_v15 = vpop.f32.mrf.mxu1  ;;  %v6804_v19 = vadd.f32 %v3419_v12, %v3379_v13  ;;  %3673 = vmatpush1.bf16.msra.mxu0 %v5262_v9  ;;  %v5333_v35 = vld [vmem:[%s7386_s1 + $0xb6c] ss:$16 sps:$4 sm:$0xff]   ;;  %v5334_v9 = vld [vmem:[%s7386_s1 + $0x948] ss:$16 sps:$4 sm:$0xff]  }
 0x188   :  { %3714 = vmatpush1.bf16.msra.mxu1 %v5265_v10  ;;  %v3381_v26 = vpop.f32.mrf.mxu0  ;;  %3674 = vmatprep.subr.bf16.mxu0 %v5270_v16  ;;  %v5336_v5 = vld [vmem:[%s7386_s1 + $0x94c] ss:$16 sps:$4 sm:$0xff]   ;;  %v5337_v10 = vld [vmem:[%s7386_s1 + $0xb48] ss:$16 sps:$4 sm:$0xff]  }
 0x189   :  { %v3422_v59 = vpop.f32.mrf.mxu1  ;;  %3715 = vmatprep.subr.bf16.mxu1 %v5273_v17  ;;  %v5339_v8 = vld [vmem:[%s7386_s1 + $0xb4c] ss:$16 sps:$4 sm:$0xff]   ;;  %v5340_v16 = vld [vmem:[%s7386_s1 + $0x928] ss:$16 sps:$4 sm:$0xff]  }
 0x18a   :  { %v5342_v11 = vld [vmem:[%s7386_s1 + $0x92c] ss:$16 sps:$4 sm:$0xff]   ;;  %v5343_v17 = vld [vmem:[%s7386_s1 + $0xb28] ss:$16 sps:$4 sm:$0xff]  }
 0x18b   :  { %3675 = vmatpush1.bf16.msra.mxu0 %v5268_v20  ;;  %v5345_v12 = vld [vmem:[%s7386_s1 + $0xb2c] ss:$16 sps:$4 sm:$0xff]   ;;  %v5346_v15 = vld [vmem:[%s7386_s1 + $0x908] ss:$16 sps:$4 sm:$0xff]  }
 0x18c   :  { %3716 = vmatpush1.bf16.msra.mxu1 %v5271_v21  ;;  %3676 = vmatprep.subr.bf16.mxu0 %v5276_v24  ;;  %v5348_v13 = vld [vmem:[%s7386_s1 + $0x90c] ss:$16 sps:$4 sm:$0xff]   ;;  %v5349_v20 = vld [vmem:[%s7386_s1 + $0xb08] ss:$16 sps:$4 sm:$0xff]  }
 0x18d   :  { %3717 = vmatprep.subr.bf16.mxu1 %v5279_v25  ;;  %v5351_v14 = vld [vmem:[%s7386_s1 + $0xb0c] ss:$16 sps:$4 sm:$0xff]   ;;  %v5352_v59 = vld [vmem:[%s7386_s1 + $0xce8] ss:$16 sps:$4 sm:$0xff]  }
 0x18e   :  { %v5354_v21 = vld [vmem:[%s7386_s1 + $0xcec] ss:$16 sps:$4 sm:$0xff]   ;;  %v5355_v24 = vld [vmem:[%s7386_s1 + $0xee8] ss:$16 sps:$4 sm:$0xff]  }
 0x18f   :  { %3677 = vmatpush1.bf16.msra.mxu0 %v5274_v28  ;;  %v5357_v26 = vld [vmem:[%s7386_s1 + $0xeec] ss:$16 sps:$4 sm:$0xff]  }
 0x190   :  { %3718 = vmatpush1.bf16.msra.mxu1 %v5277_v29  ;;  %3678 = vmatprep.subr.bf16.mxu0 %v5282_v30  ;;  %v5360_v25 = vld [vmem:[%s7386_s1 + $0xccc] ss:$16 sps:$4 sm:$0xff]  }
 0x191   :  { %3719 = vmatprep.subr.bf16.mxu1 %v5285_v47  ;;  %v5363_v28 = vld [vmem:[%s7386_s1 + $0xecc] ss:$16 sps:$4 sm:$0xff]  }
 0x193   :  { %3679 = vmatpush1.bf16.msra.mxu0 %v5280_v51  ;;  %v5358_v51 = vld [vmem:[%s7386_s1 + $0xcc8] ss:$16 sps:$4 sm:$0xff]  }
 0x194   :  { %3720 = vmatpush1.bf16.msra.mxu1 %v5283_v31  ;;  %3680 = vmatprep.subr.bf16.mxu0 %v5288_v32  ;;  %v5361_v31 = vld [vmem:[%s7386_s1 + $0xec8] ss:$16 sps:$4 sm:$0xff]  }
 0x195   :  { %3721 = vmatprep.subr.bf16.mxu1 %v5291_v33 }
 0x197   :  { %3681 = vmatpush1.bf16.msra.mxu0 %v5286_v34 }
 0x198   :  { %3722 = vmatpush1.bf16.msra.mxu1 %v5289_v41  ;;  %3682 = vmatprep.subr.bf16.mxu0 %v5294_v22  ;;  %v5364_v22 = vld [vmem:[%s7386_s1 + $0xca8] ss:$16 sps:$4 sm:$0xff]  }
 0x199   :  { %3723 = vmatprep.subr.bf16.mxu1 %v5297_v23  ;;  %v5367_v23 = vld [vmem:[%s7386_s1 + $0xea8] ss:$16 sps:$4 sm:$0xff]  }
 0x19b   :  { %3683 = vmatpush1.bf16.msra.mxu0 %v5292_v44 }
 0x19c   :  { %3724 = vmatpush1.bf16.msra.mxu1 %v5295_v45  ;;  %3684 = vmatprep.subr.bf16.mxu0 %v5300_v46  ;;  %v5370_v46 = vld [vmem:[%s7386_s1 + $0xc88] ss:$16 sps:$4 sm:$0xff]  }
 0x19d   :  { %3725 = vmatprep.subr.bf16.mxu1 %v5303_v48  ;;  %v5373_v48 = vld [vmem:[%s7386_s1 + $0xe88] ss:$16 sps:$4 sm:$0xff]  }
 0x19f   :  { %3685 = vmatpush1.bf16.msra.mxu0 %v5298_v49  ;;  %v5378_v49 = vld [vmem:[%s7386_s1 + $0xc6c] ss:$16 sps:$4 sm:$0xff]  }
 0x1a0   :  { %3726 = vmatpush1.bf16.msra.mxu1 %v5301_v50  ;;  %3686 = vmatprep.subr.bf16.mxu0 %v5306_v52  ;;  %v5381_v50 = vld [vmem:[%s7386_s1 + $0xe6c] ss:$16 sps:$4 sm:$0xff]   ;;  %v5376_v52 = vld [vmem:[%s7386_s1 + $0xc68] ss:$16 sps:$4 sm:$0xff]  }
 0x1a1   :  { %3727 = vmatprep.subr.bf16.mxu1 %v5309_v54  ;;  %v5379_v54 = vld [vmem:[%s7386_s1 + $0xe68] ss:$16 sps:$4 sm:$0xff]  }
 0x1a3   :  { %3687 = vmatpush2.bf16.msra.mxu0 %v5304_v55  ;;  %v5384_v55 = vld [vmem:[%s7386_s1 + $0xc4c] ss:$16 sps:$4 sm:$0xff]  }
 0x1a4   :  { %3728 = vmatpush2.bf16.msra.mxu1 %v5307_v6  ;;  %3688 = vmatprep.subr.bf16.mxu0 %v5312_v7  ;;  %v5387_v6 = vld [vmem:[%s7386_s1 + $0xe4c] ss:$16 sps:$4 sm:$0xff]   ;;  %v5382_v7 = vld [vmem:[%s7386_s1 + $0xc48] ss:$16 sps:$4 sm:$0xff]  }
 0x1a5   :  { %3729 = vmatprep.subr.bf16.mxu1 %v5315_v56  ;;  %v5385_v56 = vld [vmem:[%s7386_s1 + $0xe48] ss:$16 sps:$4 sm:$0xff]  }
 0x1a7   :  { %3689 = vmatpush2.bf16.msra.mxu0 %v5310_v57  ;;  %v5390_v57 = vld [vmem:[%s7386_s1 + $0xc2c] ss:$16 sps:$4 sm:$0xff]  }
 0x1a8   :  { %3730 = vmatpush2.bf16.msra.mxu1 %v5313_v58  ;;  %3690 = vmatprep.subr.bf16.mxu0 %v5318_v60  ;;  %v5393_v58 = vld [vmem:[%s7386_s1 + $0xe2c] ss:$16 sps:$4 sm:$0xff]   ;;  %v5388_v60 = vld [vmem:[%s7386_s1 + $0xc28] ss:$16 sps:$4 sm:$0xff]  }
 0x1a9   :  { %3731 = vmatprep.subr.bf16.mxu1 %v5321_v61  ;;  %v5391_v61 = vld [vmem:[%s7386_s1 + $0xe28] ss:$16 sps:$4 sm:$0xff]  }
 0x1ab   :  { %3691 = vmatpush2.bf16.msra.mxu0 %v5316_v62  ;;  %v5396_v62 = vld [vmem:[%s7386_s1 + $0xc0c] ss:$16 sps:$4 sm:$0xff]  }
 0x1ac   :  { %3732 = vmatpush2.bf16.msra.mxu1 %v5319_v27  ;;  %3692 = vmatprep.subr.bf16.mxu0 %v5324_v36  ;;  %v5399_v27 = vld [vmem:[%s7386_s1 + $0xe0c] ss:$16 sps:$4 sm:$0xff]   ;;  %v5394_v36 = vld [vmem:[%s7386_s1 + $0xc08] ss:$16 sps:$4 sm:$0xff]  }
 0x1ad   :  { %3733 = vmatprep.subr.bf16.mxu1 %v5327_v37  ;;  %v5397_v37 = vld [vmem:[%s7386_s1 + $0xe08] ss:$16 sps:$4 sm:$0xff]  }
 0x1af   :  { %3693 = vmatpush2.bf16.msra.mxu0 %v5322_v1  ;;  %v5402_v1 = vld [vmem:[%s7386_s1 + $0xdec] ss:$16 sps:$4 sm:$0xff]  }
 0x1b0   :  { %3734 = vmatpush2.bf16.msra.mxu1 %v5325_v2  ;;  %3694 = vmatprep.subr.bf16.mxu0 %v5330_v3  ;;  %v5405_v2 = vld [vmem:[%s7386_s1 + $0xfec] ss:$16 sps:$4 sm:$0xff]   ;;  %v5400_v3 = vld [vmem:[%s7386_s1 + $0xde8] ss:$16 sps:$4 sm:$0xff]  }
 0x1b1   :  { %3735 = vmatprep.subr.bf16.mxu1 %v5333_v35  ;;  %v5403_v35 = vld [vmem:[%s7386_s1 + $0xfe8] ss:$16 sps:$4 sm:$0xff]  }
 0x1b3   :  { %3695 = vmatpush2.bf16.msra.mxu0 %v5328_v40  ;;  %v5408_v40 = vld [vmem:[%s7386_s1 + $0xdcc] ss:$16 sps:$4 sm:$0xff]  }
 0x1b4   :  { %3736 = vmatpush2.bf16.msra.mxu1 %v5331_v4  ;;  %3696 = vmatprep.subr.bf16.mxu0 %v5336_v5  ;;  %v5411_v4 = vld [vmem:[%s7386_s1 + $0xfcc] ss:$16 sps:$4 sm:$0xff]   ;;  %v5406_v5 = vld [vmem:[%s7386_s1 + $0xdc8] ss:$16 sps:$4 sm:$0xff]  }
 0x1b5   :  { %3737 = vmatprep.subr.bf16.mxu1 %v5339_v8  ;;  %v5409_v8 = vld [vmem:[%s7386_s1 + $0xfc8] ss:$16 sps:$4 sm:$0xff]  }
 0x1b7   :  { %3697 = vmatpush2.bf16.msra.mxu0 %v5334_v9  ;;  %v5414_v9 = vld [vmem:[%s7386_s1 + $0xdac] ss:$16 sps:$4 sm:$0xff]  }
 0x1b8   :  { %3738 = vmatpush2.bf16.msra.mxu1 %v5337_v10  ;;  %3698 = vmatprep.subr.bf16.mxu0 %v5342_v11  ;;  %v5417_v10 = vld [vmem:[%s7386_s1 + $0xfac] ss:$16 sps:$4 sm:$0xff]   ;;  %v5412_v11 = vld [vmem:[%s7386_s1 + $0xda8] ss:$16 sps:$4 sm:$0xff]  }
 0x1b9   :  { %3739 = vmatprep.subr.bf16.mxu1 %v5345_v12  ;;  %v5415_v12 = vld [vmem:[%s7386_s1 + $0xfa8] ss:$16 sps:$4 sm:$0xff]  }
 0x1bb   :  { %3699 = vmatpush2.bf16.msra.mxu0 %v5340_v16  ;;  %v5420_v16 = vld [vmem:[%s7386_s1 + $0xd8c] ss:$16 sps:$4 sm:$0xff]  }
 0x1bc   :  { %3740 = vmatpush2.bf16.msra.mxu1 %v5343_v17  ;;  %3700 = vmatprep.subr.bf16.mxu0 %v5348_v13  ;;  %v5423_v17 = vld [vmem:[%s7386_s1 + $0xf8c] ss:$16 sps:$4 sm:$0xff]   ;;  %v5418_v13 = vld [vmem:[%s7386_s1 + $0xd88] ss:$16 sps:$4 sm:$0xff]  }
 0x1bd   :  { %3741 = vmatprep.subr.bf16.mxu1 %v5351_v14  ;;  %v5421_v14 = vld [vmem:[%s7386_s1 + $0xf88] ss:$16 sps:$4 sm:$0xff]  }
 0x1bf   :  { %3701 = vmatpush2.bf16.msra.mxu0 %v5346_v15  ;;  %v5426_v15 = vld [vmem:[%s7386_s1 + $0xd6c] ss:$16 sps:$4 sm:$0xff]  }
 0x1c0   :  { %3742 = vmatpush2.bf16.msra.mxu1 %v5349_v20  ;;  %3752 = vmatprep.subr.bf16.mxu0 %v5354_v21  ;;  %v5429_v20 = vld [vmem:[%s7386_s1 + $0xf6c] ss:$16 sps:$4 sm:$0xff]   ;;  %v5424_v21 = vld [vmem:[%s7386_s1 + $0xd68] ss:$16 sps:$4 sm:$0xff]  }
 0x1c1   :  { %3793 = vmatprep.subr.bf16.mxu1 %v5357_v26  ;;  %v5427_v26 = vld [vmem:[%s7386_s1 + $0xf68] ss:$16 sps:$4 sm:$0xff]  }
 0x1c2   :  { %v3458_v29 = vpop.f32.mrf.mxu0  ;;  %3703 = vmatmul.mubr.bf16.vlgmr.msra.gmra.mxu0 %v6143_v38  ;;  %v5366_v38 = vld [vmem:[%s7386_s1 + $0xcac] ss:$16 sps:$4 sm:$0xff]  }
 0x1c3   :  { %v3499_v30 = vpop.f32.mrf.mxu1  ;;  %3744 = vmatmul.mubr.bf16.vlgmr.msra.gmra.mxu1 %v6147_v39  ;;  %v3459_v47 = vadd.f32 %v3458_v29, %v6799_v18  ;;  %3753 = vmatpush1.bf16.msra.mxu0 %v5352_v59  ;;  %v5369_v39 = vld [vmem:[%s7386_s1 + $0xeac] ss:$16 sps:$4 sm:$0xff]  }
 0x1c4   :  { %3794 = vmatpush1.bf16.msra.mxu1 %v5355_v24  ;;  %v6995_v32 = vpop.f32.mrf.mxu0  ;;  %3754 = vmatprep.subr.bf16.mxu0 %v5360_v25  ;;  %v5432_v59 = vld [vmem:[%s7386_s1 + $0xd4c] ss:$16 sps:$4 sm:$0xff]   ;;  %v5430_v25 = vld [vmem:[%s7386_s1 + $0xd48] ss:$16 sps:$4 sm:$0xff]  }
 0x1c5   :  { %v6997_v33 = vpop.f32.mrf.mxu1  ;;  %3795 = vmatprep.subr.bf16.mxu1 %v5363_v28  ;;  %v7005_v18 = vadd.f32 %v3499_v30, %v3459_v47  ;;  %3784 = vmatprep.mubr.bf16.mxu0 %v6165_v42  ;;  %v5372_v42 = vld [vmem:[%s7386_s1 + $0xc8c] ss:$16 sps:$4 sm:$0xff]   ;;  %v5433_v28 = vld [vmem:[%s7386_s1 + $0xf48] ss:$16 sps:$4 sm:$0xff]  }
 0x1c6   :  { %3825 = vmatprep.mubr.bf16.mxu1 %v6169_v43  ;;  %v3462_v34 = vpop.f32.mrf.mxu0  ;;  %v5375_v43 = vld [vmem:[%s7386_s1 + $0xe8c] ss:$16 sps:$4 sm:$0xff]   ;;  %v5436_v47 = vld [vmem:[%s7386_s1 + $0xd28] ss:$16 sps:$4 sm:$0xff]  }
 0x1c7   :  { %v3503_v41 = vpop.f32.mrf.mxu1  ;;  %3755 = vmatpush1.bf16.msra.mxu0 %v5358_v51  ;;  %v5435_v24 = vld [vmem:[%s7386_s1 + $0xf4c] ss:$16 sps:$4 sm:$0xff]   ;;  %v5439_v51 = vld [vmem:[%s7386_s1 + $0xf28] ss:$16 sps:$4 sm:$0xff]  }
 0x1c8   :  { %3796 = vmatpush1.bf16.msra.mxu1 %v5361_v31  ;;  %v3463_v44 = vpop.f32.mrf.mxu0  ;;  %3756 = vmatprep.subr.bf16.mxu0 %v5366_v38  ;;  %v5438_v29 = vld [vmem:[%s7386_s1 + $0xd2c] ss:$16 sps:$4 sm:$0xff]   ;;  %v5442_v34 = vld [vmem:[%s7386_s1 + $0xd08] ss:$16 sps:$4 sm:$0xff]  }
 0x1c9   :  { %v3504_v45 = vpop.f32.mrf.mxu1  ;;  %3797 = vmatprep.subr.bf16.mxu1 %v5369_v39  ;;  %v5441_v30 = vld [vmem:[%s7386_s1 + $0xf2c] ss:$16 sps:$4 sm:$0xff]   ;;  %v3461_v39 = vadd.f32 %v6995_v32, %v6804_v19  ;;  %v5445_v41 = vld [vmem:[%s7386_s1 + $0xf08] ss:$16 sps:$4 sm:$0xff]   ;;  %v556_v32 = vsub.s32 3, %v6337_v53 }
 0x1ca   :  { %v5444_v31 = vld [vmem:[%s7386_s1 + $0xd0c] ss:$16 sps:$4 sm:$0xff]   ;;  %v5452_v44 = vld [vmem:[%s7388_s2] sm:$0xf] }
 0x1cb   :  { %3757 = vmatpush1.bf16.msra.mxu0 %v5364_v22  ;;  %v5447_v38 = vld [vmem:[%s7386_s1 + $0xf0c] ss:$16 sps:$4 sm:$0xff]   ;;  %v552_v22 = vsub.s32 2, %v6337_v53 }
 0x1cc   :  { %3798 = vmatpush1.bf16.msra.mxu1 %v5367_v23  ;;  %3758 = vmatprep.subr.bf16.mxu0 %v5372_v42  ;;  %v3502_v23 = vadd.f32 %v6997_v33, %v3461_v39  ;;  %v3869_v19 = vld [vmem:[%s7389_s3 + $0xf8] sm:$0xff]  ;;  %v557_v33 = vrot.slane %v5452_v44, %v556_v32  ;;  %v3840_v32 = vld [vmem:[%s7389_s3 + $0x10] sm:$0xff] }
 0x1cd   :  { %3799 = vmatprep.subr.bf16.mxu1 %v5375_v43  ;;  %v553_v45 = vrot.slane %v5452_v44, %v552_v22  ;;  %v3853_v42 = vld [vmem:[%s7389_s3 + $0x78] sm:$0xff]  ;;  %v3892_v22 = vld [vmem:[%s7389_s3 + $0x1b0] sm:$0xff]  ;;  %v3891_v44 = vld [vmem:[%s7389_s3 + $0x1a8] sm:$0xff] }
 0x1ce   :  { %v3835_v43 = vmax.f32 %v3502_v23, 0.0  ;;  %v3857_v39 = vld [vmem:[%s7389_s3 + $0x98] sm:$0xff]  ;;  %v3856_v23 = vld [vmem:[%s7389_s3 + $0x90] sm:$0xff] }
 0x1cf   :  { %3759 = vmatpush1.bf16.msra.mxu0 %v5370_v46  ;;  %v3868_v46 = vld [vmem:[%s7389_s3 + $0xf0] sm:$0xff] }
 0x1d0   :  { %3800 = vmatpush1.bf16.msra.mxu1 %v5373_v48  ;;  %3760 = vmatprep.subr.bf16.mxu0 %v5378_v49  ;;  %v3852_v49 = vld [vmem:[%s7389_s3 + $0x70] sm:$0xff] }
 0x1d1   :  { %3801 = vmatprep.subr.bf16.mxu1 %v5381_v50 }
 0x1d3   :  { %3761 = vmatpush1.bf16.msra.mxu0 %v5376_v52  ;;  %v3867_v52 = vld [vmem:[%s7389_s3 + $0xe8] sm:$0xff] }
 0x1d4   :  { %3802 = vmatpush1.bf16.msra.mxu1 %v5379_v54  ;;  %3762 = vmatprep.subr.bf16.mxu0 %v5384_v55 }
 0x1d5   :  { %3803 = vmatprep.subr.bf16.mxu1 %v5387_v6 }
 0x1d7   :  { %3763 = vmatpush1.bf16.msra.mxu0 %v5382_v7  ;;  %v3866_v7 = vld [vmem:[%s7389_s3 + $0xe0] sm:$0xff] }
 0x1d8   :  { %3804 = vmatpush1.bf16.msra.mxu1 %v5385_v56  ;;  %3764 = vmatprep.subr.bf16.mxu0 %v5390_v57 }
 0x1d9   :  { %3805 = vmatprep.subr.bf16.mxu1 %v5393_v58  ;;  %v3850_v58 = vld [vmem:[%s7389_s3 + $0x60] sm:$0xff] }
 0x1db   :  { %3765 = vmatpush1.bf16.msra.mxu0 %v5388_v60 }
 0x1dc   :  { %3806 = vmatpush1.bf16.msra.mxu1 %v5391_v61  ;;  %3766 = vmatprep.subr.bf16.mxu0 %v5396_v62  ;;  %v3865_v61 = vld [vmem:[%s7389_s3 + $0xd8] sm:$0xff] }
 0x1dd   :  { %3807 = vmatprep.subr.bf16.mxu1 %v5399_v27  ;;  %v3849_v62 = vld [vmem:[%s7389_s3 + $0x58] sm:$0xff] }
 0x1df   :  { %3767 = vmatpush1.bf16.msra.mxu0 %v5394_v36 }
 0x1e0   :  { %3808 = vmatpush1.bf16.msra.mxu1 %v5397_v37  ;;  %3768 = vmatprep.subr.bf16.mxu0 %v5402_v1  ;;  %v3901_v37 = vld [vmem:[%s7389_s3 + $0x1f8] sm:$0xff] }
 0x1e1   :  { %3809 = vmatprep.subr.bf16.mxu1 %v5405_v2  ;;  %v3885_v1 = vld [vmem:[%s7389_s3 + $0x178] sm:$0xff]  ;;  %v3900_v2 = vld [vmem:[%s7389_s3 + $0x1f0] sm:$0xff] }
 0x1e3   :  { %3769 = vmatpush2.bf16.msra.mxu0 %v5400_v3  ;;  %v3864_v3 = vld [vmem:[%s7389_s3 + $0xd0] sm:$0xff] }
 0x1e4   :  { %3810 = vmatpush2.bf16.msra.mxu1 %v5403_v35  ;;  %3770 = vmatprep.subr.bf16.mxu0 %v5408_v40  ;;  %v3884_v35 = vld [vmem:[%s7389_s3 + $0x170] sm:$0xff] }
 0x1e5   :  { %3811 = vmatprep.subr.bf16.mxu1 %v5411_v4  ;;  %v3848_v40 = vld [vmem:[%s7389_s3 + $0x50] sm:$0xff]  ;;  %v3899_v4 = vld [vmem:[%s7389_s3 + $0x1e8] sm:$0xff] }
 0x1e7   :  { %3771 = vmatpush2.bf16.msra.mxu0 %v5406_v5  ;;  %v3863_v5 = vld [vmem:[%s7389_s3 + $0xc8] sm:$0xff] }
 0x1e8   :  { %3812 = vmatpush2.bf16.msra.mxu1 %v5409_v8  ;;  %3772 = vmatprep.subr.bf16.mxu0 %v5414_v9  ;;  %v3883_v8 = vld [vmem:[%s7389_s3 + $0x168] sm:$0xff] }
 0x1e9   :  { %3813 = vmatprep.subr.bf16.mxu1 %v5417_v10  ;;  %v3847_v9 = vld [vmem:[%s7389_s3 + $0x48] sm:$0xff]  ;;  %v3898_v10 = vld [vmem:[%s7389_s3 + $0x1e0] sm:$0xff] }
 0x1eb   :  { %3773 = vmatpush2.bf16.msra.mxu0 %v5412_v11  ;;  %v3862_v11 = vld [vmem:[%s7389_s3 + $0xc0] sm:$0xff] }
 0x1ec   :  { %3814 = vmatpush2.bf16.msra.mxu1 %v5415_v12  ;;  %3774 = vmatprep.subr.bf16.mxu0 %v5420_v16  ;;  %v3882_v12 = vld [vmem:[%s7389_s3 + $0x160] sm:$0xff] }
 0x1ed   :  { %3815 = vmatprep.subr.bf16.mxu1 %v5423_v17  ;;  %v3846_v16 = vld [vmem:[%s7389_s3 + $0x40] sm:$0xff]  ;;  %v3897_v17 = vld [vmem:[%s7389_s3 + $0x1d8] sm:$0xff] }
 0x1ef   :  { %3775 = vmatpush2.bf16.msra.mxu0 %v5418_v13  ;;  %v3861_v13 = vld [vmem:[%s7389_s3 + $0xb8] sm:$0xff] }
 0x1f0   :  { %3816 = vmatpush2.bf16.msra.mxu1 %v5421_v14  ;;  %3776 = vmatprep.subr.bf16.mxu0 %v5426_v15  ;;  %v3881_v14 = vld [vmem:[%s7389_s3 + $0x158] sm:$0xff] }
 0x1f1   :  { %3817 = vmatprep.subr.bf16.mxu1 %v5429_v20  ;;  %v3845_v15 = vld [vmem:[%s7389_s3 + $0x38] sm:$0xff]  ;;  %v3896_v20 = vld [vmem:[%s7389_s3 + $0x1d0] sm:$0xff] }
 0x1f3   :  { %3777 = vmatpush2.bf16.msra.mxu0 %v5424_v21  ;;  %v3860_v21 = vld [vmem:[%s7389_s3 + $0xb0] sm:$0xff] }
 0x1f4   :  { %3818 = vmatpush2.bf16.msra.mxu1 %v5427_v26  ;;  %3778 = vmatprep.subr.bf16.mxu0 %v5432_v59  ;;  %v3880_v26 = vld [vmem:[%s7389_s3 + $0x150] sm:$0xff] }
 0x1f5   :  { %3819 = vmatprep.subr.bf16.mxu1 %v5435_v24  ;;  %v3844_v59 = vld [vmem:[%s7389_s3 + $0x30] sm:$0xff]  ;;  %v3895_v24 = vld [vmem:[%s7389_s3 + $0x1c8] sm:$0xff] }
 0x1f7   :  { %3779 = vmatpush2.bf16.msra.mxu0 %v5430_v25  ;;  %v3859_v25 = vld [vmem:[%s7389_s3 + $0xa8] sm:$0xff] }
 0x1f8   :  { %3820 = vmatpush2.bf16.msra.mxu1 %v5433_v28  ;;  %3780 = vmatprep.subr.bf16.mxu0 %v5438_v29  ;;  %v3879_v28 = vld [vmem:[%s7389_s3 + $0x148] sm:$0xff] }
 0x1f9   :  { %3821 = vmatprep.subr.bf16.mxu1 %v5441_v30  ;;  %v3843_v29 = vld [vmem:[%s7389_s3 + $0x28] sm:$0xff]  ;;  %v3894_v30 = vld [vmem:[%s7389_s3 + $0x1c0] sm:$0xff] }
 0x1fb   :  { %3781 = vmatpush2.bf16.msra.mxu0 %v5436_v47  ;;  %v3858_v47 = vld [vmem:[%s7389_s3 + $0xa0] sm:$0xff] }
 0x1fc   :  { %3822 = vmatpush2.bf16.msra.mxu1 %v5439_v51  ;;  %3782 = vmatprep.subr.bf16.mxu0 %v5444_v31  ;;  %v3878_v51 = vld [vmem:[%s7389_s3 + $0x140] sm:$0xff] }
 0x1fd   :  { %3823 = vmatprep.subr.bf16.mxu1 %v5447_v38  ;;  %v3842_v31 = vld [vmem:[%s7389_s3 + $0x20] sm:$0xff]  ;;  %v3893_v38 = vld [vmem:[%s7389_s3 + $0x1b8] sm:$0xff] }
 0x1ff   :  { %3783 = vmatpush2.bf16.msra.mxu0 %v5442_v34  ;;  %v3877_v34 = vld [vmem:[%s7389_s3 + $0x138] sm:$0xff] }
 0x200   :  { %3824 = vmatpush2.bf16.msra.mxu1 %v5445_v41  ;;  %4594 = vmatprep.subr.mxu0 %v3869_v19  ;;  %v3841_v41 = vld [vmem:[%s7389_s3 + $0x18] sm:$0xff]  ;;  %v3876_v19 = vld [vmem:[%s7389_s3 + $0x130] sm:$0xff] }
 0x201   :  { %4629 = vmatprep.subr.mxu1 %v3901_v37  ;;  %v3871_v37 = vld [vmem:[%s7389_s3 + $0x108] sm:$0xff] }
 0x202   :  { %v3540_v48 = vpop.f32.mrf.mxu0  ;;  %3785 = vmatmul.mubr.bf16.vlgmr.msra.gmra.mxu0 %v6364_v63  ;;  %v3851_v63 = vld [vmem:[%s7389_s3 + $0x68] sm:$0xff] }
 0x203   :  { %v3581_v53 = vpop.f32.mrf.mxu1  ;;  %3826 = vmatmul.mubr.bf16.vlgmr.msra.gmra.mxu1 %v6368_v0  ;;  %v3541_v50 = vadd.f32 %v3540_v48, %v553_v45  ;;  %4595 = vmatpush3.msra.mxu0 %v3853_v42  ;;  %v3855_v45 = vld [vmem:[%s7389_s3 + $0x88] sm:$0xff]  ;;  %v3834_v48 = vmax.f32 %v7005_v18, 0.0  ;;  %v3889_v18 = vld [vmem:[%s7389_s3 + $0x198] sm:$0xff] }
 0x204   :  { %3973 = vmatprep.mubr.f32.mxu0 %v3835_v43  ;;  %v3542_v54 = vpop.f32.mrf.mxu0  ;;  %4596 = vmatprep.subr.mxu0 %v3868_v46  ;;  %v3875_v42 = vld [vmem:[%s7389_s3 + $0x128] sm:$0xff]  ;;  %v3838_v46 = vld [vmem:[%s7389_s3] sm:$0xff] }
 0x205   :  { %v3583_v55 = vpop.f32.mrf.mxu1  ;;  %v7199_v6 = vadd.f32 %v3581_v53, %v3541_v50  ;;  %v3543_v0 = vadd.f32 %v3542_v54, %v557_v33  ;;  %4597 = vmatpush3.msra.mxu0 %v3852_v49  ;;  %4630 = vmatpush3.msra.mxu1 %v3885_v1  ;;  %v3839_v43 = vld [vmem:[%s7389_s3 + $0x8] sm:$0xff]  ;;  %v3854_v33 = vld [vmem:[%s7389_s3 + $0x80] sm:$0xff] }
 0x206   :  { %v3544_v56 = vpop.f32.mrf.mxu0  ;;  %4598 = vmatprep.subr.mxu0 %v3867_v52  ;;  %4631 = vmatprep.subr.mxu1 %v3900_v2  ;;  %v3890_v53 = vld [vmem:[%s7389_s3 + $0x1a0] sm:$0xff] }
 0x207   :  { %v3585_v57 = vpop.f32.mrf.mxu1  ;;  %v7207_v60 = vadd.f32 %v3583_v55, %v3543_v0  ;;  %4599 = vmatpush3.msra.mxu0 %v3851_v63  ;;  %4632 = vmatpush3.msra.mxu1 %v3884_v35  ;;  %v3874_v52 = vld [vmem:[%s7389_s3 + $0x120] sm:$0xff]  ;;  %v3873_v0 = vld [vmem:[%s7389_s3 + $0x118] sm:$0xff] }
 0x208   :  { %v3545_v27 = vpop.f32.mrf.mxu0  ;;  %4600 = vmatprep.subr.mxu0 %v3866_v7  ;;  %4633 = vmatprep.subr.mxu1 %v3899_v4  ;;  %v3886_v1 = vld [vmem:[%s7389_s3 + $0x180] sm:$0xff] }
 0x209   :  { %v3586_v36 = vpop.f32.mrf.mxu1  ;;  %4601 = vmatpush3.msra.mxu0 %v3850_v58  ;;  %4634 = vmatpush3.msra.mxu1 %v3883_v8  ;;  %v3887_v27 = vld [vmem:[%s7389_s3 + $0x188] sm:$0xff]  ;;  %v3870_v2 = vld [vmem:[%s7389_s3 + $0x100] sm:$0xff] }
 0x20a   :  { %4602 = vmatprep.subr.mxu0 %v3865_v61  ;;  %4635 = vmatprep.subr.mxu1 %v3898_v10  ;;  %v3872_v61 = vld [vmem:[%s7389_s3 + $0x110] sm:$0xff] }
 0x20b   :  { %4603 = vmatpush3.msra.mxu0 %v3849_v62  ;;  %4636 = vmatpush3.msra.mxu1 %v3882_v12 }
 0x20c   :  { %4604 = vmatprep.subr.mxu0 %v3864_v3  ;;  %4637 = vmatprep.subr.mxu1 %v3897_v17 }
 0x20d   :  { %4605 = vmatpush3.msra.mxu0 %v3848_v40  ;;  %4638 = vmatpush3.msra.mxu1 %v3881_v14 }
 0x20e   :  { %4606 = vmatprep.subr.mxu0 %v3863_v5  ;;  %4639 = vmatprep.subr.mxu1 %v3896_v20 }
 0x20f   :  { %4607 = vmatpush3.msra.mxu0 %v3847_v9  ;;  %4640 = vmatpush3.msra.mxu1 %v3880_v26 }
 0x210   :  { %4608 = vmatprep.subr.mxu0 %v3862_v11  ;;  %4641 = vmatprep.subr.mxu1 %v3895_v24 }
 0x211   :  { %4609 = vmatpush3.msra.mxu0 %v3846_v16  ;;  %4642 = vmatpush3.msra.mxu1 %v3879_v28 }
 0x212   :  { %4610 = vmatprep.subr.mxu0 %v3861_v13  ;;  %4643 = vmatprep.subr.mxu1 %v3894_v30 }
 0x213   :  { %4611 = vmatpush3.msra.mxu0 %v3845_v15  ;;  %4644 = vmatpush3.msra.mxu1 %v3878_v51 }
 0x214   :  { %4612 = vmatprep.subr.mxu0 %v3860_v21  ;;  %4645 = vmatprep.subr.mxu1 %v3893_v38 }
 0x215   :  { %4613 = vmatpush3.msra.mxu0 %v3844_v59  ;;  %4646 = vmatpush3.msra.mxu1 %v3877_v34  ;;  %v4593_v34 = vld [vmem:[%s7390_s4] ss:$0 sm:$0xff] }
 0x216   :  { %4614 = vmatprep.subr.mxu0 %v3859_v25  ;;  %4647 = vmatprep.subr.mxu1 %v3892_v22 }
 0x217   :  { %4615 = vmatpush3.msra.mxu0 %v3843_v29  ;;  %4648 = vmatpush3.msra.mxu1 %v3876_v19 }
 0x218   :  { %4616 = vmatprep.subr.mxu0 %v3858_v47  ;;  %4649 = vmatprep.subr.mxu1 %v3891_v44 }
 0x219   :  { %4617 = vmatpush3.msra.mxu0 %v3842_v31  ;;  %4650 = vmatpush3.msra.mxu1 %v3875_v42 }
 0x21a   :  { %4618 = vmatprep.subr.mxu0 %v3857_v39  ;;  %4651 = vmatprep.subr.mxu1 %v3890_v53 }
 0x21b   :  { %4619 = vmatpush3.msra.mxu0 %v3841_v41  ;;  %4652 = vmatpush3.msra.mxu1 %v3874_v52 }
 0x21c   :  { %4620 = vmatprep.subr.mxu0 %v3856_v23  ;;  %4653 = vmatprep.subr.mxu1 %v3889_v18 }
 0x21d   :  { %4621 = vmatpush3.msra.mxu0 %v3840_v32  ;;  %4654 = vmatpush3.msra.mxu1 %v3873_v0 }
 0x21e   :  { %4622 = vmatprep.subr.mxu0 %v3855_v45 }
 0x21f   :  { %4623 = vmatpush3.msra.mxu0 %v3839_v43 }
 0x220   :  { %4624 = vmatprep.subr.mxu0 %v3854_v33 }
 0x221   :  { %4625 = vmatpush3.msra.mxu0 %v3838_v46 }
 0x222   :  { %3974 = vmatmul.mubr.f32.vlgmr.msra.gmra.mxu0 %v3834_v48 }
 0x242   :  { %v3622_v49 = vpop.f32.mrf.mxu0 }
 0x243   :  { %v3663_v50 = vpop.f32.mrf.mxu1  ;;  %v3623_v54 = vadd.f32 %v3622_v49, %v7199_v6  ;;  %v3888_v6 = vld [vmem:[%s7389_s3 + $0x190] sm:$0xff] }
 0x244   :  { %v3624_v55 = vpop.f32.mrf.mxu0  ;;  %4655 = vmatprep.subr.mxu1 %v3888_v6 }
 0x245   :  { %v3665_v63 = vpop.f32.mrf.mxu1  ;;  %v3664_v7 = vadd.f32 %v3663_v50, %v3623_v54  ;;  %v3625_v56 = vadd.f32 %v3624_v55, %v7207_v60  ;;  %4656 = vmatpush3.msra.mxu1 %v3872_v61 }
 0x246   :  { %v3626_v57 = vpop.f32.mrf.mxu0  ;;  %4657 = vmatprep.subr.mxu1 %v3887_v27 }
 0x247   :  { %v3667_v58 = vpop.f32.mrf.mxu1  ;;  %v3666_v62 = vadd.f32 %v3665_v63, %v3625_v56  ;;  %4658 = vmatpush3.msra.mxu1 %v3871_v37 }
 0x248   :  { %v3627_v36 = vpop.f32.mrf.mxu0  ;;  %4659 = vmatprep.subr.mxu1 %v3886_v1 }
 0x249   :  { %v3668_v60 = vpop.f32.mrf.mxu1  ;;  %4660 = vmatpush3.msra.mxu1 %v3870_v2 }
 0x282   :  { %v3704_v3 = vpop.f32.mrf.mxu0 }
 0x283   :  { %v3745_v35 = vpop.f32.mrf.mxu1  ;;  %v3705_v40 = vadd.f32 %v3704_v3, %v3664_v7 }
 0x284   :  { %v3706_v4 = vpop.f32.mrf.mxu0 }
 0x285   :  { %v3747_v5 = vpop.f32.mrf.mxu1  ;;  %v3746_v8 = vadd.f32 %v3745_v35, %v3705_v40  ;;  %v3707_v16 = vadd.f32 %v3706_v4, %v3666_v62 }
 0x286   :  { %v3708_v9 = vpop.f32.mrf.mxu0 }
 0x287   :  { %v3749_v10 = vpop.f32.mrf.mxu1  ;;  %v3748_v14 = vadd.f32 %v3747_v5, %v3707_v16 }
 0x288   :  { %v3709_v11 = vpop.f32.mrf.mxu0 }
 0x289   :  { %v3750_v12 = vpop.f32.mrf.mxu1 }
 0x2c2   :  { %v3786_v17 = vpop.f32.mrf.mxu0 }
 0x2c3   :  { %v3827_v13 = vpop.f32.mrf.mxu1  ;;  %v3787_v15 = vadd.f32 %v3786_v17, %v3746_v8 }
 0x2c4   :  { %v3788_v20 = vpop.f32.mrf.mxu0 }
 0x2c5   :  { %v3829_v21 = vpop.f32.mrf.mxu1  ;;  %v3789_v26 = vadd.f32 %v3788_v20, %v3748_v14  ;;  %v3828_v59 = vadd.f32 %v3827_v13, %v3787_v15 }
 0x2c6   :  { %v3790_v24 = vpop.f32.mrf.mxu0 }
 0x2c7   :  { %v3831_v25 = vpop.f32.mrf.mxu1  ;;  %v3830_v28 = vadd.f32 %v3829_v21, %v3789_v26  ;;  %v3836_v51 = vmax.f32 %v3828_v59, 0.0 }
 0x2c8   :  { %v3791_v29 = vpop.f32.mrf.mxu0 }
 0x2c9   :  { %v3832_v30 = vpop.f32.mrf.mxu1  ;;  %v3837_v47 = vmax.f32 %v3830_v28, 0.0 }
 0x2cb   :  { %4043 = vmatprep.mubr.f32.mxu1 %v3837_v47 }
 0x2cc   :  { %4044 = vmatmul.mubr.f32.vlgmr.msra.gmra.mxu1 %v3836_v51 }
 0x2e2   :  { %v4626_v31 = vpop.f32.mrf.mxu0 }
 0x2e4   :  { %v4627_v38 = vpop.f32.mrf.mxu0 }
 0x2e5   :  { %v4628_v39 = vadd.f32 %v4627_v38, %v4626_v31 }
 0x2e7   :  { %v3976_v23 = vadd.f32 %v4628_v39, %v4593_v34 }
 0x38c   :  { %v4661_v41 = vpop.f32.mrf.mxu1 }
 0x38e   :  { %v4662_v22 = vpop.f32.mrf.mxu1 }
 0x38f   :  { %v4663_v19 = vadd.f32 %v4662_v22, %v4661_v41 }
 0x391   :  { %v4046_v32 = vadd.f32 %v4663_v19, %v3976_v23 }
 0x393   :  { %4049 = vmax.xlane.f32.xlu0 %v4046_v32 }
 0x41c   :  { %v4050_v44 = vpop.xlane.xlu0 %4049 }
 0x41d   :  { %v4051_v45 = vsub.f32 %v4046_v32, %v4050_v44 }
 0x41f   :  { %v4052_v42 = vmul.f32 1.442695, %v4051_v45 }
 0x421   :  { %5448 = vpow2.f32 %v4052_v42 }
 0x42e   :  { %v5449_v43 = vpop.eup %5448 }
 0x42f   :  { %4054 = vadd.xlane.f32.xlu0 %v5449_v43 }
 0x4b8   :  { %v4055_v33 = vpop.xlane.xlu0 %4054 }
 0x4b9   :  { %5450 = vlog2.f32 %v4055_v33 }
 0x4c6   :  { %v5451_v46 = vpop.eup %5450 }
 0x4c7   :  { %v4057_v48 = vmul.f32 0.6931472, %v5451_v46 }
 0x4c9   :  { %v4058_v53 = vadd.f32 %v4057_v48, %v4050_v44 }
 0x4cb   :  { %v4059_v49 = vsub.f32 %v4046_v32, %v4058_v53 }
 0x4cd   :  { %4060 = vst [vmem:[%s7391_s5] sm:$0xff] %v4059_v49 }

// kernel: net_forward.2
= control target key start
LH: loop header
LB: loop body
LE: loop exit
PB: predicated region body
PF: predicated region fallthrough
CT: control target
= control target key end

     0   :  { %vm719_vm0 = vcmask 261120   ;;  %s12624_s1 = inlined_call_operand.vmem [shape: bf16[32,128], index: 1, kind: input, shape index: {}]   ;;  %s12625_s0 = inlined_call_operand.vmem [shape: bf16[2,768,32], index: 0, kind: input, shape index: {}]   ;;  %s12626_s3 = inlined_call_operand.vmem [shape: bf16[3200,128], index: 3, kind: input, shape index: {}]   ;;  %s12627_s2 = inlined_call_operand.vmem [shape: f32[1,128], index: 2, kind: input, shape index: {}]   ;;  %s12628_s4 = inlined_call_operand.vmem [shape: f32[1,128], index: 4, kind: input, shape index: {}]   ;;  %s12629_s5 = inlined_call_operand.vmem [shape: f32[32,32], index: 5, kind: input, shape index: {}]   ;;  %s12630_s6 = inlined_call_operand.vmem [shape: bf16[2,16,128], index: 6, kind: output, shape index: {}]  }
   0x1   :  { %v10140_v0 = vld [vmem:[%s12624_s1 + $0x8] sm:$0xff]   ;;  %v10141_v1 = vld [vmem:[%s12624_s1] sm:$0xff]   ;;  %v10144_v4 = vld [vmem:[%s12625_s0 + $0x10] sm:$0xff]  }
   0x2   :  { %9876 = vmatprep.subr.bf16.mxu0 %v10140_v0  ;;  %v10142_v2 = vld [vmem:[%s12625_s0] sm:$0xff]   ;;  %v10143_v3 = vld [vmem:[%s12625_s0 + $0x8] sm:$0xff]   ;;  %v10145_v5 = vld [vmem:[%s12625_s0 + $0x18] sm:$0xff]  }
   0x3   :  { %9877 = vmatpush3.bf16.msra.mxu0 %v10140_v0  ;;  %9880 = vmatprep.mubr.msk.bf16.mxu0 %vm719_vm0, %v10142_v2  ;;  %v10146_v6 = vld [vmem:[%s12625_s0 + $0x20] sm:$0xff]   ;;  %v10147_v7 = vld [vmem:[%s12625_s0 + $0x28] sm:$0xff]   ;;  %v10148_v8 = vld [vmem:[%s12625_s0 + $0x30] sm:$0xff]  }
   0x4   :  { %9878 = vmatprep.subr.bf16.mxu0 %v10141_v1  ;;  %v10149_v9 = vld [vmem:[%s12625_s0 + $0x38] sm:$0xff]   ;;  %v10150_v10 = vld [vmem:[%s12625_s0 + $0x40] sm:$0xff]   ;;  %v10151_v11 = vld [vmem:[%s12625_s0 + $0x48] sm:$0xff]  }
   0x5   :  { %v10152_v12 = vld [vmem:[%s12625_s0 + $0x50] sm:$0xff]   ;;  %v10153_v13 = vld [vmem:[%s12625_s0 + $0x58] sm:$0xff]   ;;  %v10154_v14 = vld [vmem:[%s12625_s0 + $0x60] sm:$0xff]  }
   0x6   :  { %v10155_v15 = vld [vmem:[%s12625_s0 + $0x68] sm:$0xff]   ;;  %v10156_v16 = vld [vmem:[%s12625_s0 + $0x70] sm:$0xff]   ;;  %v10157_v17 = vld [vmem:[%s12625_s0 + $0x78] sm:$0xff]  }
   0x7   :  { %9879 = vmatpush3.bf16.msra.mxu0 %v10141_v1  ;;  %v10158_v18 = vld [vmem:[%s12625_s0 + $0x80] sm:$0xff]   ;;  %v10159_v19 = vld [vmem:[%s12625_s0 + $0x88] sm:$0xff]   ;;  %v10160_v20 = vld [vmem:[%s12625_s0 + $0x90] sm:$0xff]  }
   0x8   :  { %v10161_v21 = vld [vmem:[%s12625_s0 + $0x98] sm:$0xff]   ;;  %v10162_v22 = vld [vmem:[%s12625_s0 + $0xa0] sm:$0xff]   ;;  %v10163_v23 = vld [vmem:[%s12625_s0 + $0xa8] sm:$0xff]  }
   0x9   :  { %v10164_v24 = vld [vmem:[%s12625_s0 + $0xb0] sm:$0xff]   ;;  %v10165_v25 = vld [vmem:[%s12625_s0 + $0xb8] sm:$0xff]   ;;  %v10166_v26 = vld [vmem:[%s12625_s0 + $0xc0] sm:$0xff]  }
   0xa   :  { %9881 = vmatmul.mubr.msk.bf16.vlgmr.msra.gmra.mxu0 %vm719_vm0, %v10143_v3  ;;  %v10198_v27 = vld [vmem:[%s12626_s3 + $0x78] sm:$0xff]   ;;  %v10167_v28 = vld [vmem:[%s12625_s0 + $0xc8] sm:$0xff]   ;;  %v10168_v30 = vld [vmem:[%s12625_s0 + $0xd0] sm:$0xff]  }
   0xb   :  { %9884 = vmatprep.mubr.msk.bf16.mxu0 %vm719_vm0, %v10144_v4  ;;  %v10199_v29 = vld [vmem:[%s12626_s3 + $0x38] sm:$0xff]   ;;  %9076 = vmatprep.subr.bf16.mxu1 %v10198_v27  ;;  %v10202_v31 = vld [vmem:[%s12626_s3 + $0x70] sm:$0xff]   ;;  %v10204_v33 = vld [vmem:[%s12626_s3 + $0x68] sm:$0xff]  }
   0xc   :  { %9077 = vmatpush3.bf16.msra.mxu1 %v10199_v29  ;;  %v10203_v32 = vld [vmem:[%s12626_s3 + $0x30] sm:$0xff]   ;;  %v10169_v34 = vld [vmem:[%s12625_s0 + $0xd8] sm:$0xff]   ;;  %v10205_v35 = vld [vmem:[%s12626_s3 + $0x28] sm:$0xff]  }
   0xd   :  { %9078 = vmatprep.subr.bf16.mxu1 %v10202_v31  ;;  %v10170_v36 = vld [vmem:[%s12625_s0 + $0xe0] sm:$0xff]   ;;  %v10210_v39 = vld [vmem:[%s12626_s3 + $0x58] sm:$0xff]   ;;  %v10171_v40 = vld [vmem:[%s12625_s0 + $0xe8] sm:$0xff]  }
   0xe   :  { %v10208_v37 = vld [vmem:[%s12626_s3 + $0x60] sm:$0xff]   ;;  %v10211_v41 = vld [vmem:[%s12626_s3 + $0x18] sm:$0xff]   ;;  %v10172_v42 = vld [vmem:[%s12625_s0 + $0xf0] sm:$0xff]  }
   0xf   :  { %v10209_v38 = vld [vmem:[%s12626_s3 + $0x20] sm:$0xff]   ;;  %v10214_v43 = vld [vmem:[%s12626_s3 + $0x50] sm:$0xff]   ;;  %v10173_v45 = vld [vmem:[%s12625_s0 + $0xf8] sm:$0xff]  }
  0x10   :  { %9079 = vmatpush3.bf16.msra.mxu1 %v10203_v32  ;;  %v10215_v44 = vld [vmem:[%s12626_s3 + $0x10] sm:$0xff]   ;;  %v10216_v46 = vld [vmem:[%s12626_s3 + $0x48] sm:$0xff]   ;;  %v10174_v47 = vld [vmem:[%s12625_s0 + $0x100] sm:$0xff]  }
  0x11   :  { %9080 = vmatprep.subr.bf16.mxu1 %v10204_v33  ;;  %v10217_v48 = vld [vmem:[%s12626_s3 + $0x8] sm:$0xff]   ;;  %v10220_v49 = vld [vmem:[%s12626_s3 + $0x40] sm:$0xff]   ;;  %v10176_v52 = vld [vmem:[%s12625_s0 + $0x110] sm:$0xff]  }
  0x12   :  { %9885 = vmatmul.mubr.msk.bf16.gmra.mxu0 %vm719_vm0, %v10145_v5  ;;  %v10221_v50 = vld [vmem:[%s12626_s3] sm:$0xff]   ;;  %v10175_v51 = vld [vmem:[%s12625_s0 + $0x108] sm:$0xff]   ;;  %v10177_v53 = vld [vmem:[%s12625_s0 + $0x118] sm:$0xff]  }
  0x13   :  { %9888 = vmatprep.mubr.msk.bf16.mxu0 %vm719_vm0, %v10146_v6  ;;  %v10178_v54 = vld [vmem:[%s12625_s0 + $0x120] sm:$0xff]   ;;  %v10179_v55 = vld [vmem:[%s12625_s0 + $0x128] sm:$0xff]   ;;  %v10180_v56 = vld [vmem:[%s12625_s0 + $0x130] sm:$0xff]  }
  0x14   :  { %9081 = vmatpush3.bf16.msra.mxu1 %v10205_v35  ;;  %v10181_v57 = vld [vmem:[%s12625_s0 + $0x138] sm:$0xff]   ;;  %v10182_v58 = vld [vmem:[%s12625_s0 + $0x140] sm:$0xff]   ;;  %v10183_v59 = vld [vmem:[%s12625_s0 + $0x148] sm:$0xff]  }
  0x15   :  { %9082 = vmatprep.subr.bf16.mxu1 %v10208_v37  ;;  %v10184_v60 = vld [vmem:[%s12625_s0 + $0x150] sm:$0xff]   ;;  %v10185_v61 = vld [vmem:[%s12625_s0 + $0x158] sm:$0xff]   ;;  %v10186_v62 = vld [vmem:[%s12625_s0 + $0x160] sm:$0xff]  }
  0x16   :  { %v10187_v63 = vld [vmem:[%s12625_s0 + $0x168] sm:$0xff]   ;;  %v10188_v0 = vld [vmem:[%s12625_s0 + $0x170] sm:$0xff]   ;;  %v10189_v1 = vld [vmem:[%s12625_s0 + $0x178] sm:$0xff]  }
  0x17   :  { %v10190_v2 = vld [vmem:[%s12625_s0 + $0x180] sm:$0xff]   ;;  %v10191_v3 = vld [vmem:[%s12625_s0 + $0x188] sm:$0xff]   ;;  %v10192_v4 = vld [vmem:[%s12625_s0 + $0x190] sm:$0xff]  }
  0x18   :  { %9083 = vmatpush3.bf16.msra.mxu1 %v10209_v38  ;;  %v11033_v6 = vld [vmem:[%s12627_s2] ss:$0 sm:$0xff] }
  0x19   :  { %9084 = vmatprep.subr.bf16.mxu1 %v10210_v39 }
  0x1a   :  { %9889 = vmatmul.mubr.msk.bf16.gmra.mxu0 %vm719_vm0, %v10147_v7 }
  0x1b   :  { %9892 = vmatprep.mubr.msk.bf16.mxu0 %vm719_vm0, %v10148_v8  ;;  %v10193_v8 = vld [vmem:[%s12625_s0 + $0x198] sm:$0xff]  }
  0x1c   :  { %9085 = vmatpush3.bf16.msra.mxu1 %v10211_v41  ;;  %v10197_v41 = vld [vmem:[%s12625_s0 + $0x1b8] sm:$0xff]  }
  0x1d   :  { %9086 = vmatprep.subr.bf16.mxu1 %v10214_v43 }
  0x20   :  { %9087 = vmatpush3.bf16.msra.mxu1 %v10215_v44 }
  0x21   :  { %9088 = vmatprep.subr.bf16.mxu1 %v10216_v46  ;;  %v10200_v46 = vld [vmem:[%s12625_s0 + $0x1c0] sm:$0xff]  }
  0x22   :  { %9893 = vmatmul.mubr.msk.bf16.gmra.mxu0 %vm719_vm0, %v10149_v9 }
  0x23   :  { %9896 = vmatprep.mubr.msk.bf16.mxu0 %vm719_vm0, %v10150_v10  ;;  %v10194_v10 = vld [vmem:[%s12625_s0 + $0x1a0] sm:$0xff]  }
  0x24   :  { %9089 = vmatpush3.bf16.msra.mxu1 %v10217_v48 }
  0x25   :  { %9090 = vmatprep.subr.bf16.mxu1 %v10220_v49 }
  0x28   :  { %9091 = vmatpush3.bf16.msra.mxu1 %v10221_v50 }
  0x2a   :  { %9897 = vmatmul.mubr.msk.bf16.gmra.mxu0 %vm719_vm0, %v10151_v11 }
  0x2b   :  { %9900 = vmatprep.mubr.msk.bf16.mxu0 %vm719_vm0, %v10152_v12 }
  0x32   :  { %9901 = vmatmul.mubr.msk.bf16.gmra.mxu0 %vm719_vm0, %v10153_v13 }
  0x33   :  { %9904 = vmatprep.mubr.msk.bf16.mxu0 %vm719_vm0, %v10154_v14 }
  0x3a   :  { %9905 = vmatmul.mubr.msk.bf16.gmra.mxu0 %vm719_vm0, %v10155_v15 }
  0x3b   :  { %9908 = vmatprep.mubr.msk.bf16.mxu0 %vm719_vm0, %v10156_v16 }
  0x42   :  { %9909 = vmatmul.mubr.msk.bf16.gmra.mxu0 %vm719_vm0, %v10157_v17  ;;  %v10195_v17 = vld [vmem:[%s12625_s0 + $0x1a8] sm:$0xff]  }
  0x43   :  { %9912 = vmatprep.mubr.msk.bf16.mxu0 %vm719_vm0, %v10158_v18 }
  0x4a   :  { %9913 = vmatmul.mubr.msk.bf16.gmra.mxu0 %vm719_vm0, %v10159_v19 }
  0x4b   :  { %9916 = vmatprep.mubr.msk.bf16.mxu0 %vm719_vm0, %v10160_v20 }
  0x52   :  { %9917 = vmatmul.mubr.msk.bf16.gmra.mxu0 %vm719_vm0, %v10161_v21 }
  0x53   :  { %9920 = vmatprep.mubr.msk.bf16.mxu0 %vm719_vm0, %v10162_v22  ;;  %v10196_v22 = vld [vmem:[%s12625_s0 + $0x1b0] sm:$0xff]  }
  0x5a   :  { %9921 = vmatmul.mubr.msk.bf16.gmra.mxu0 %vm719_vm0, %v10163_v23 }
  0x5b   :  { %9924 = vmatprep.mubr.msk.bf16.mxu0 %vm719_vm0, %v10164_v24 }
  0x62   :  { %9925 = vmatmul.mubr.msk.bf16.gmra.mxu0 %vm719_vm0, %v10165_v25 }
  0x63   :  { %9928 = vmatprep.mubr.msk.bf16.mxu0 %vm719_vm0, %v10166_v26 }
  0x6a   :  { %9929 = vmatmul.mubr.msk.bf16.gmra.mxu0 %vm719_vm0, %v10167_v28 }
  0x6b   :  { %9932 = vmatprep.mubr.msk.bf16.mxu0 %vm719_vm0, %v10168_v30 }
  0x72   :  { %9933 = vmatmul.mubr.msk.bf16.gmra.mxu0 %vm719_vm0, %v10169_v34 }
  0x73   :  { %9936 = vmatprep.mubr.msk.bf16.mxu0 %vm719_vm0, %v10170_v36 }
  0x7a   :  { %9937 = vmatmul.mubr.msk.bf16.gmra.mxu0 %vm719_vm0, %v10171_v40 }
  0x7b   :  { %9940 = vmatprep.mubr.msk.bf16.mxu0 %vm719_vm0, %v10172_v42 }
  0x82   :  { %9941 = vmatmul.mubr.msk.bf16.gmra.mxu0 %vm719_vm0, %v10173_v45 }
  0x83   :  { %9944 = vmatprep.mubr.msk.bf16.mxu0 %vm719_vm0, %v10174_v47 }
  0x8a   :  { %9945 = vmatmul.mubr.msk.bf16.gmra.mxu0 %vm719_vm0, %v10175_v51 }
  0x8b   :  { %9948 = vmatprep.mubr.msk.bf16.mxu0 %vm719_vm0, %v10176_v52 }
  0x92   :  { %9949 = vmatmul.mubr.msk.bf16.gmra.mxu0 %vm719_vm0, %v10177_v53 }
  0x93   :  { %9952 = vmatprep.mubr.msk.bf16.mxu0 %vm719_vm0, %v10178_v54  ;;  %v10201_v54 = vld [vmem:[%s12625_s0 + $0x1c8] sm:$0xff]  }
  0x9a   :  { %9953 = vmatmul.mubr.msk.bf16.gmra.mxu0 %vm719_vm0, %v10179_v55 }
  0x9b   :  { %9956 = vmatprep.mubr.msk.bf16.mxu0 %vm719_vm0, %v10180_v56 }
  0xa2   :  { %9957 = vmatmul.mubr.msk.bf16.gmra.mxu0 %vm719_vm0, %v10181_v57 }
  0xa3   :  { %9960 = vmatprep.mubr.msk.bf16.mxu0 %vm719_vm0, %v10182_v58  ;;  %v10206_v58 = vld [vmem:[%s12625_s0 + $0x1d0] sm:$0xff]  }
  0xaa   :  { %9961 = vmatmul.mubr.msk.bf16.gmra.mxu0 %vm719_vm0, %v10183_v59 }
  0xab   :  { %9964 = vmatprep.mubr.msk.bf16.mxu0 %vm719_vm0, %v10184_v60 }
  0xb2   :  { %9965 = vmatmul.mubr.msk.bf16.gmra.mxu0 %vm719_vm0, %v10185_v61 }
  0xb3   :  { %9968 = vmatprep.mubr.msk.bf16.mxu0 %vm719_vm0, %v10186_v62 }
  0xba   :  { %9969 = vmatmul.mubr.msk.bf16.gmra.mxu0 %vm719_vm0, %v10187_v63 }
  0xbb   :  { %9972 = vmatprep.mubr.msk.bf16.mxu0 %vm719_vm0, %v10188_v0 }
  0xc2   :  { %9973 = vmatmul.mubr.msk.bf16.gmra.mxu0 %vm719_vm0, %v10189_v1 }
  0xc3   :  { %9976 = vmatprep.mubr.msk.bf16.mxu0 %vm719_vm0, %v10190_v2 }
  0xca   :  { %v9882_v5 = vpop.f32.mrf.mxu0  ;;  %9977 = vmatmul.mubr.msk.bf16.gmra.mxu0 %vm719_vm0, %v10191_v3 }
  0xcb   :  { %9980 = vmatprep.mubr.msk.bf16.mxu0 %vm719_vm0, %v10192_v4  ;;  %v1051_v12 = vadd.f32 %v9882_v5, %v11033_v6 }
  0xcc   :  { %v1042_v7 = vpop.f32.mrf.mxu0 }
  0xcd   :  { %v1043_v13 = vadd.f32 %v11033_v6, %v1042_v7  ;;  %v1811_v18 = vmax.f32 %v1051_v12, 0.0 }
  0xce   :  { %v9883_v9 = vpop.f32.mrf.mxu0 }
  0xcf   :  { %v1809_v19 = vmax.f32 %v1043_v13, 0.0  ;;  %v1054_v23 = vadd.f32 %v9883_v9, %v11033_v6  ;;  %v10260_v13 = vld [vmem:[%s12626_s3 + $0x378] sm:$0xff]  }
  0xd0   :  { %v1045_v11 = vpop.f32.mrf.mxu0  ;;  %9460 = vmatprep.subr.bf16.mxu0 %v10260_v13  ;;  %v10225_v13 = vld [vmem:[%s12625_s0 + $0x200] sm:$0xff]  }
  0xd1   :  { %v1046_v20 = vadd.f32 %v11033_v6, %v1045_v11  ;;  %v2001_v29 = vmax.f32 %v1809_v19, %v1811_v18  ;;  %v1812_v33 = vmax.f32 %v1054_v23, 0.0  ;;  %v10261_v19 = vld [vmem:[%s12626_s3 + $0x338] sm:$0xff]  }
  0xd2   :  { %v9886_v14 = vpop.f32.mrf.mxu0  ;;  %9981 = vmatmul.mubr.msk.bf16.gmra.mxu0 %vm719_vm0, %v10193_v8 }
  0xd3   :  { %v1067_v15 = vadd.f32 %v9886_v14, %v11033_v6  ;;  %9984 = vmatprep.mubr.msk.bf16.mxu0 %vm719_vm0, %v10194_v10  ;;  %v1810_v30 = vmax.f32 %v1046_v20, 0.0  ;;  %9461 = vmatpush3.bf16.msra.mxu0 %v10261_v19 }
  0xd4   :  { %v1058_v16 = vpop.f32.mrf.mxu0 }
  0xd5   :  { %v1059_v21 = vadd.f32 %v11033_v6, %v1058_v16  ;;  %v1815_v25 = vmax.f32 %v1067_v15, 0.0  ;;  %v2002_v39 = vmax.f32 %v1810_v30, %v1812_v33  ;;  %v10263_v30 = vld [vmem:[%s12626_s3 + $0x330] sm:$0xff]  }
  0xd6   :  { %v9887_v24 = vpop.f32.mrf.mxu0 }
  0xd7   :  { %v1813_v26 = vmax.f32 %v1059_v21, 0.0  ;;  %v1070_v27 = vadd.f32 %v9887_v24, %v11033_v6  ;;  %v10207_v21 = vld [vmem:[%s12625_s0 + $0x1d8] sm:$0xff]   ;;  %v10212_v24 = vld [vmem:[%s12625_s0 + $0x1e0] sm:$0xff]  }
  0xd8   :  { %v1061_v28 = vpop.f32.mrf.mxu0 }
  0xd9   :  { %v2049_v31 = vmax.f32 %v1813_v26, %v1815_v25  ;;  %v1062_v32 = vadd.f32 %v11033_v6, %v1061_v28  ;;  %v1816_v36 = vmax.f32 %v1070_v27, 0.0  ;;  %v10262_v27 = vld [vmem:[%s12626_s3 + $0x370] sm:$0xff]  }
  0xda   :  { %v9890_v34 = vpop.f32.mrf.mxu0  ;;  %9985 = vmatmul.mubr.msk.bf16.gmra.mxu0 %vm719_vm0, %v10195_v17  ;;  %9462 = vmatprep.subr.bf16.mxu0 %v10262_v27 }
  0xdb   :  { %v2097_v35 = vmax.f32 %v2001_v29, %v2049_v31  ;;  %v1814_v37 = vmax.f32 %v1062_v32, 0.0  ;;  %9988 = vmatprep.mubr.msk.bf16.mxu0 %vm719_vm0, %v10196_v22  ;;  %v1083_v48 = vadd.f32 %v9890_v34, %v11033_v6  ;;  %9463 = vmatpush3.bf16.msra.mxu0 %v10263_v30  ;;  %v10266_v34 = vld [vmem:[%s12626_s3 + $0x368] sm:$0xff]  }
  0xdc   :  { %v1074_v38 = vpop.f32.mrf.mxu0  ;;  %9464 = vmatprep.subr.bf16.mxu0 %v10266_v34  ;;  %v10226_v34 = vld [vmem:[%s12625_s0 + $0x208] sm:$0xff]  }
  0xdd   :  { %2145 = vst [vmem:[#allocation2] sm:$0xff] %v2097_v35  ;;  %v2050_v40 = vmax.f32 %v1814_v37, %v1816_v36  ;;  %v8743_v42 = vpack.c.bf16 %v2097_v35, %v2097_v35  ;;  %v1075_v45 = vadd.f32 %v11033_v6, %v1074_v38  ;;  %v1819_v55 = vmax.f32 %v1083_v48, 0.0  ;;  %v10267_v37 = vld [vmem:[%s12626_s3 + $0x328] sm:$0xff]  }
  0xde   :  { %v9891_v43 = vpop.f32.mrf.mxu0 }
  0xdf   :  { %v2098_v44 = vmax.f32 %v2002_v39, %v2050_v40  ;;  %2281 = vst [vmem:[#allocation3] sm:$0xf] %v8743_v42  ;;  %v1817_v50 = vmax.f32 %v1075_v45, 0.0  ;;  %v1086_v52 = vadd.f32 %v9891_v43, %v11033_v6  ;;  %v10213_v40 = vld [vmem:[%s12625_s0 + $0x1e8] sm:$0xff]   ;;  %v10218_v43 = vld [vmem:[%s12625_s0 + $0x1f0] sm:$0xff]   ;;  %9465 = vmatpush3.bf16.msra.mxu0 %v10267_v37 }
  0xe0   :  { %v1077_v47 = vpop.f32.mrf.mxu0 }
  0xe1   :  { %2146 = vst [vmem:[#allocation2 + $0x8] sm:$0xff] %v2098_v44  ;;  %v1078_v56 = vadd.f32 %v11033_v6, %v1077_v47  ;;  %v2003_v63 = vmax.f32 %v1817_v50, %v1819_v55  ;;  %v1820_v0 = vmax.f32 %v1086_v52, 0.0  ;;  %v10268_v47 = vld [vmem:[%s12626_s3 + $0x360] sm:$0xff]  }
  0xe2   :  { %v9894_v49 = vpop.f32.mrf.mxu0  ;;  %9989 = vmatmul.mubr.msk.bf16.gmra.mxu0 %vm719_vm0, %v10197_v41  ;;  %v10269_v50 = vld [vmem:[%s12626_s3 + $0x320] sm:$0xff]   ;;  %9466 = vmatprep.subr.bf16.mxu0 %v10268_v47 }
  0xe3   :  { %v1099_v51 = vadd.f32 %v9894_v49, %v11033_v6  ;;  %9992 = vmatprep.mubr.msk.bf16.mxu0 %vm719_vm0, %v10200_v46  ;;  %v1818_v5 = vmax.f32 %v1078_v56, 0.0  ;;  %9467 = vmatpush3.bf16.msra.mxu0 %v10269_v50 }
  0xe4   :  { %v1090_v53 = vpop.f32.mrf.mxu0 }
  0xe5   :  { %v1091_v57 = vadd.f32 %v11033_v6, %v1090_v53  ;;  %v1823_v60 = vmax.f32 %v1099_v51, 0.0  ;;  %v2004_v22 = vmax.f32 %v1818_v5, %v1820_v0 }
  0xe6   :  { %v9895_v59 = vpop.f32.mrf.mxu0 }
  0xe7   :  { %v1821_v61 = vmax.f32 %v1091_v57, 0.0  ;;  %v1102_v62 = vadd.f32 %v9895_v59, %v11033_v6 }
  0xe8   :  { %v1093_v1 = vpop.f32.mrf.mxu0  ;;  %v2473_v2 = vld [vmem:[#allocation2 + $0x1] sm:$0xff] }
  0xe9   :  { %v2753_v3 = vld [vmem:[#allocation2 + $0x2] sm:$0xff]  ;;  %v2051_v7 = vmax.f32 %v1821_v61, %v1823_v60  ;;  %v1094_v8 = vadd.f32 %v11033_v6, %v1093_v1  ;;  %v8787_v9 = vpack.c.bf16 %v2473_v2, %v2473_v2  ;;  %v1824_v11 = vmax.f32 %v1102_v62, 0.0 }
  0xea   :  { %v3033_v4 = vld [vmem:[#allocation2 + $0x3] sm:$0xff]  ;;  %v9898_v12 = vpop.f32.mrf.mxu0  ;;  %9993 = vmatmul.mubr.msk.bf16.gmra.mxu0 %vm719_vm0, %v10201_v54  ;;  %v8831_v14 = vpack.c.bf16 %v2753_v3, %v2753_v3 }
  0xeb   :  { %v3313_v10 = vld [vmem:[#allocation2 + $0x4] sm:$0xff]  ;;  %v8875_v15 = vpack.c.bf16 %v3033_v4, %v3033_v4  ;;  %v2099_v17 = vmax.f32 %v2003_v63, %v2051_v7  ;;  %v1822_v18 = vmax.f32 %v1094_v8, 0.0  ;;  %9996 = vmatprep.mubr.msk.bf16.mxu0 %vm719_vm0, %v10206_v58  ;;  %2561 = vst [vmem:[#allocation3 + $0x4] sm:$0xf] %v8787_v9  ;;  %v1115_v32 = vadd.f32 %v9898_v12, %v11033_v6 }
  0xec   :  { %v8919_v16 = vpack.c.bf16 %v3313_v10, %v3313_v10  ;;  %v1106_v20 = vpop.f32.mrf.mxu0  ;;  %2841 = vst [vmem:[#allocation3 + $0x8] sm:$0xf] %v8831_v14  ;;  %v10272_v1 = vld [vmem:[%s12626_s3 + $0x358] sm:$0xff]  }
  0xed   :  { %3121 = vst [vmem:[#allocation3 + $0xc] sm:$0xf] %v8875_v15  ;;  %2147 = vst [vmem:[#allocation2 + $0x10] sm:$0xff] %v2099_v17  ;;  %v2052_v23 = vmax.f32 %v1822_v18, %v1824_v11  ;;  %v8744_v25 = vpack.c.bf16 %v2099_v17, %v2099_v17  ;;  %v1107_v29 = vadd.f32 %v11033_v6, %v1106_v20  ;;  %v1827_v44 = vmax.f32 %v1115_v32, 0.0  ;;  %v10273_v7 = vld [vmem:[%s12626_s3 + $0x318] sm:$0xff]   ;;  %v10274_v15 = vld [vmem:[%s12626_s3 + $0x350] sm:$0xff]  }
  0xee   :  { %3401 = vst [vmem:[#allocation3 + $0x10] sm:$0xf] %v8919_v16  ;;  %v9899_v26 = vpop.f32.mrf.mxu0  ;;  %v10219_v9 = vld [vmem:[%s12625_s0 + $0x1f8] sm:$0xff]   ;;  %9468 = vmatprep.subr.bf16.mxu0 %v10272_v1  ;;  %v10275_v17 = vld [vmem:[%s12626_s3 + $0x310] sm:$0xff]   ;;  %v10229_v1 = vld [vmem:[%s12625_s0 + $0x220] sm:$0xff]  }
  0xef   :  { %v2100_v28 = vmax.f32 %v2004_v22, %v2052_v23  ;;  %2282 = vst [vmem:[#allocation3 + $0x64] sm:$0xf] %v8744_v25  ;;  %2361 = vst [vmem:[#allocation3 + $0x14] sm:$0xf] %v8744_v25  ;;  %v1825_v35 = vmax.f32 %v1107_v29, 0.0  ;;  %v1118_v38 = vadd.f32 %v9899_v26, %v11033_v6  ;;  %9469 = vmatpush3.bf16.msra.mxu0 %v10273_v7  ;;  %v10278_v22 = vld [vmem:[%s12626_s3 + $0x348] sm:$0xff]  }
  0xf0   :  { %v1109_v31 = vpop.f32.mrf.mxu0  ;;  %9470 = vmatprep.subr.bf16.mxu0 %v10274_v15  ;;  %v10230_v15 = vld [vmem:[%s12625_s0 + $0x228] sm:$0xff]  }
  0xf1   :  { %2148 = vst [vmem:[#allocation2 + $0x18] sm:$0xff] %v2100_v28  ;;  %v1110_v41 = vadd.f32 %v11033_v6, %v1109_v31  ;;  %v2005_v54 = vmax.f32 %v1825_v35, %v1827_v44  ;;  %v1828_v55 = vmax.f32 %v1118_v38, 0.0  ;;  %v10279_v28 = vld [vmem:[%s12626_s3 + $0x308] sm:$0xff]   ;;  %v10283_v35 = vld [vmem:[%s12626_s3 + $0x340] sm:$0xff]   ;;  %v10227_v38 = vld [vmem:[%s12625_s0 + $0x210] sm:$0xff]  }
  0xf2   :  { %v9902_v33 = vpop.f32.mrf.mxu0  ;;  %9997 = vmatmul.mubr.msk.bf16.gmra.mxu0 %vm719_vm0, %v10207_v21 }
  0xf3   :  { %v1131_v36 = vadd.f32 %v9902_v33, %v11033_v6  ;;  %10000 = vmatprep.mubr.msk.bf16.mxu0 %vm719_vm0, %v10212_v24  ;;  %v1826_v57 = vmax.f32 %v1110_v41, 0.0  ;;  %9471 = vmatpush3.bf16.msra.mxu0 %v10275_v17 }
  0xf4   :  { %v1122_v39 = vpop.f32.mrf.mxu0  ;;  %9472 = vmatprep.subr.bf16.mxu0 %v10278_v22 }
  0xf5   :  { %v1123_v42 = vadd.f32 %v11033_v6, %v1122_v39  ;;  %v1831_v45 = vmax.f32 %v1131_v36, 0.0  ;;  %v2006_v10 = vmax.f32 %v1826_v57, %v1828_v55  ;;  %v10284_v39 = vld [vmem:[%s12626_s3 + $0x300] sm:$0xff]  }
  0xf6   :  { %v9903_v46 = vpop.f32.mrf.mxu0  ;;  %v10222_v24 = vld [vmem:[#allocation3] ss:$100 sps:$4 sm:$0xff]  }
  0xf7   :  { %v1829_v48 = vmax.f32 %v1123_v42, 0.0  ;;  %v1134_v49 = vadd.f32 %v9903_v46, %v11033_v6  ;;  %9473 = vmatpush3.bf16.msra.mxu0 %v10279_v28 }
  0xf8   :  { %v2754_v51 = vld [vmem:[#allocation2 + $0x12] sm:$0xff]  ;;  %v1125_v56 = vpop.f32.mrf.mxu0  ;;  %9474 = vmatprep.subr.bf16.mxu0 %v10283_v35 }
  0xf9   :  { %v3034_v52 = vld [vmem:[#allocation2 + $0x13] sm:$0xff]  ;;  %v2053_v58 = vmax.f32 %v1829_v48, %v1831_v45  ;;  %v1126_v59 = vadd.f32 %v11033_v6, %v1125_v56  ;;  %v8832_v61 = vpack.c.bf16 %v2754_v51, %v2754_v51  ;;  %v1832_v62 = vmax.f32 %v1134_v49, 0.0 }
  0xfa   :  { %v3314_v53 = vld [vmem:[#allocation2 + $0x14] sm:$0xff]  ;;  %v9906_v63 = vpop.f32.mrf.mxu0  ;;  %10001 = vmatmul.mubr.msk.bf16.gmra.mxu0 %vm719_vm0, %v10213_v40  ;;  %v8876_v2 = vpack.c.bf16 %v3034_v52, %v3034_v52 }
  0xfb   :  { %v2474_v60 = vld [vmem:[#allocation2 + $0x11] sm:$0xff]  ;;  %v8920_v3 = vpack.c.bf16 %v3314_v53, %v3314_v53  ;;  %v2101_v4 = vmax.f32 %v2005_v54, %v2053_v58  ;;  %v1830_v5 = vmax.f32 %v1126_v59, 0.0  ;;  %10004 = vmatprep.mubr.msk.bf16.mxu0 %vm719_vm0, %v10218_v43  ;;  %2842 = vst [vmem:[#allocation3 + $0x6c] sm:$0xf] %v8832_v61  ;;  %2921 = vst [vmem:[#allocation3 + $0x1c] sm:$0xf] %v8832_v61  ;;  %9475 = vmatpush3.bf16.msra.mxu0 %v10284_v39 }
  0xfc   :  { %v8788_v0 = vpack.c.bf16 %v2474_v60, %v2474_v60  ;;  %v1138_v8 = vpop.f32.mrf.mxu0  ;;  %3122 = vst [vmem:[#allocation3 + $0x70] sm:$0xf] %v8876_v2  ;;  %3201 = vst [vmem:[#allocation3 + $0x20] sm:$0xf] %v8876_v2  ;;  %v1147_v20 = vadd.f32 %v9906_v63, %v11033_v6 }
  0xfd   :  { %3402 = vst [vmem:[#allocation3 + $0x74] sm:$0xf] %v8920_v3  ;;  %3481 = vst [vmem:[#allocation3 + $0x24] sm:$0xf] %v8920_v3  ;;  %v8745_v11 = vpack.c.bf16 %v2101_v4, %v2101_v4  ;;  %v2054_v12 = vmax.f32 %v1830_v5, %v1832_v62  ;;  %v1139_v18 = vadd.f32 %v11033_v6, %v1138_v8 }
  0xfe   :  { %2562 = vst [vmem:[#allocation3 + $0x68] sm:$0xf] %v8788_v0  ;;  %2641 = vst [vmem:[#allocation3 + $0x18] sm:$0xf] %v8788_v0  ;;  %v9907_v14 = vpop.f32.mrf.mxu0  ;;  %v1835_v30 = vmax.f32 %v1147_v20, 0.0  ;;  %v10228_v0 = vld [vmem:[%s12625_s0 + $0x218] sm:$0xff]  }
  0xff   :  { %2149 = vst [vmem:[#allocation2 + $0x20] sm:$0xff] %v2101_v4  ;;  %2283 = vst [vmem:[#allocation3 + $0xc8] sm:$0xf] %v8745_v11  ;;  %v2102_v16 = vmax.f32 %v2006_v10, %v2054_v12  ;;  %v1833_v26 = vmax.f32 %v1139_v18, 0.0  ;;  %v1150_v31 = vadd.f32 %v9907_v14, %v11033_v6  ;;  %v10231_v20 = vld [vmem:[%s12625_s0 + $0x230] sm:$0xff]  }
 0x100   :  { %2362 = vst [vmem:[#allocation3 + $0x78] sm:$0xf] %v8745_v11  ;;  %2393 = vst [vmem:[#allocation3 + $0x28] sm:$0xf] %v8745_v11  ;;  %v1141_v19 = vpop.f32.mrf.mxu0 }
 0x101   :  { %2150 = vst [vmem:[#allocation2 + $0x28] sm:$0xff] %v2102_v16  ;;  %v1142_v32 = vadd.f32 %v11033_v6, %v1141_v19  ;;  %v2007_v43 = vmax.f32 %v1833_v26, %v1835_v30  ;;  %v1836_v52 = vmax.f32 %v1150_v31, 0.0 }
 0x102   :  { %v9910_v21 = vpop.f32.mrf.mxu0  ;;  %10005 = vmatmul.mubr.msk.bf16.gmra.mxu0 %vm719_vm0, %v10219_v9 }
 0x103   :  { %v1163_v23 = vadd.f32 %v9910_v21, %v11033_v6  ;;  %10008 = vmatprep.mubr.msk.bf16.mxu0 %vm719_vm0, %v10225_v13  ;;  %v1834_v53 = vmax.f32 %v1142_v32, 0.0 }
 0x104   :  { %v1154_v27 = vpop.f32.mrf.mxu0 }
 0x105   :  { %v10224_v25 = vld [vmem:[#allocation3 + $0x4] ss:$100 sps:$4 sm:$0xff]   ;;  %v1155_v29 = vadd.f32 %v11033_v6, %v1154_v27  ;;  %v1839_v36 = vmax.f32 %v1163_v23, 0.0  ;;  %v2008_v61 = vmax.f32 %v1834_v53, %v1836_v52 }
 0x106   :  { %6448 = vmatprep.mubr.bf16.mxu1 %v10224_v25  ;;  %v9911_v33 = vpop.f32.mrf.mxu0 }
 0x107   :  { %6449 = vmatmul.mubr.bf16.vlgmr.msra.gmra.mxu1 %v10222_v24  ;;  %v1837_v37 = vmax.f32 %v1155_v29, 0.0  ;;  %v1166_v44 = vadd.f32 %v9911_v33, %v11033_v6 }
 0x108   :  { %v2475_v40 = vld [vmem:[#allocation2 + $0x21] sm:$0xff]  ;;  %v1157_v45 = vpop.f32.mrf.mxu0 }
 0x109   :  { %v2755_v41 = vld [vmem:[#allocation2 + $0x22] sm:$0xff]  ;;  %v8789_v46 = vpack.c.bf16 %v2475_v40, %v2475_v40  ;;  %v2055_v50 = vmax.f32 %v1837_v37, %v1839_v36  ;;  %v1158_v54 = vadd.f32 %v11033_v6, %v1157_v45  ;;  %v1840_v57 = vmax.f32 %v1166_v44, 0.0 }
 0x10a   :  { %v3035_v42 = vld [vmem:[#allocation2 + $0x23] sm:$0xff]  ;;  %v8833_v47 = vpack.c.bf16 %v2755_v41, %v2755_v41  ;;  %v9914_v55 = vpop.f32.mrf.mxu0  ;;  %10009 = vmatmul.mubr.msk.bf16.gmra.mxu0 %vm719_vm0, %v10226_v34 }
 0x10b   :  { %v8877_v48 = vpack.c.bf16 %v3035_v42, %v3035_v42  ;;  %v3315_v49 = vld [vmem:[#allocation2 + $0x24] sm:$0xff]  ;;  %2563 = vst [vmem:[#allocation3 + $0xcc] sm:$0xf] %v8789_v46  ;;  %2642 = vst [vmem:[#allocation3 + $0x7c] sm:$0xf] %v8789_v46  ;;  %v2103_v56 = vmax.f32 %v2007_v43, %v2055_v50  ;;  %10012 = vmatprep.mubr.msk.bf16.mxu0 %vm719_vm0, %v10227_v38  ;;  %v1838_v58 = vmax.f32 %v1158_v54, 0.0 }
 0x10c   :  { %v8921_v51 = vpack.c.bf16 %v3315_v49, %v3315_v49  ;;  %2673 = vst [vmem:[#allocation3 + $0x2c] sm:$0xf] %v8789_v46  ;;  %2843 = vst [vmem:[#allocation3 + $0xd0] sm:$0xf] %v8833_v47  ;;  %v1170_v59 = vpop.f32.mrf.mxu0  ;;  %v1179_v7 = vadd.f32 %v9914_v55, %v11033_v6  ;;  %v10232_v44 = vld [vmem:[%s12625_s0 + $0x238] sm:$0xff]   ;;  %v10236_v46 = vld [vmem:[%s12625_s0 + $0x240] sm:$0xff]  }
 0x10d   :  { %2922 = vst [vmem:[#allocation3 + $0x80] sm:$0xf] %v8833_v47  ;;  %2953 = vst [vmem:[#allocation3 + $0x30] sm:$0xf] %v8833_v47  ;;  %v8746_v60 = vpack.c.bf16 %v2103_v56, %v2103_v56  ;;  %v2056_v62 = vmax.f32 %v1838_v58, %v1840_v57  ;;  %v1171_v4 = vadd.f32 %v11033_v6, %v1170_v59 }
 0x10e   :  { %3123 = vst [vmem:[#allocation3 + $0xd4] sm:$0xf] %v8877_v48  ;;  %3202 = vst [vmem:[#allocation3 + $0x84] sm:$0xf] %v8877_v48  ;;  %v9915_v63 = vpop.f32.mrf.mxu0  ;;  %v1843_v16 = vmax.f32 %v1179_v7, 0.0 }
 0x10f   :  { %3233 = vst [vmem:[#allocation3 + $0x34] sm:$0xf] %v8877_v48  ;;  %3403 = vst [vmem:[#allocation3 + $0xd8] sm:$0xf] %v8921_v51  ;;  %v2104_v2 = vmax.f32 %v2008_v61, %v2056_v62  ;;  %v1841_v10 = vmax.f32 %v1171_v4, 0.0  ;;  %v1182_v13 = vadd.f32 %v9915_v63, %v11033_v6  ;;  %v10238_v63 = vld [vmem:[%s12625_s0 + $0x250] sm:$0xff]  }
 0x110   :  { %3482 = vst [vmem:[#allocation3 + $0x88] sm:$0xf] %v8921_v51  ;;  %3513 = vst [vmem:[#allocation3 + $0x38] sm:$0xf] %v8921_v51  ;;  %v1173_v3 = vpop.f32.mrf.mxu0 }
 0x111   :  { %2151 = vst [vmem:[#allocation2 + $0x30] sm:$0xff] %v2103_v56  ;;  %2284 = vst [vmem:[#allocation3 + $0x12c] sm:$0xf] %v8746_v60  ;;  %v1174_v11 = vadd.f32 %v11033_v6, %v1173_v3  ;;  %v2009_v25 = vmax.f32 %v1841_v10, %v1843_v16  ;;  %v1844_v33 = vmax.f32 %v1182_v13, 0.0 }
 0x112   :  { %2363 = vst [vmem:[#allocation3 + $0xdc] sm:$0xf] %v8746_v60  ;;  %2394 = vst [vmem:[#allocation3 + $0x8c] sm:$0xf] %v8746_v60  ;;  %v9918_v5 = vpop.f32.mrf.mxu0  ;;  %10013 = vmatmul.mubr.msk.bf16.gmra.mxu0 %vm719_vm0, %v10228_v0 }
 0x113   :  { %2425 = vst [vmem:[#allocation3 + $0x3c] sm:$0xf] %v8746_v60  ;;  %2152 = vst [vmem:[#allocation2 + $0x38] sm:$0xff] %v2104_v2  ;;  %v1195_v8 = vadd.f32 %v9918_v5, %v11033_v6  ;;  %10016 = vmatprep.mubr.msk.bf16.mxu0 %vm719_vm0, %v10229_v1  ;;  %v1842_v26 = vmax.f32 %v1174_v11, 0.0  ;;  %v10237_v60 = vld [vmem:[%s12625_s0 + $0x248] sm:$0xff]  }
 0x114   :  { %v1186_v9 = vpop.f32.mrf.mxu0 }
 0x115   :  { %v1187_v12 = vadd.f32 %v11033_v6, %v1186_v9  ;;  %v1847_v17 = vmax.f32 %v1195_v8, 0.0  ;;  %v2010_v40 = vmax.f32 %v1842_v26, %v1844_v33  ;;  %v10239_v26 = vld [vmem:[%s12625_s0 + $0x258] sm:$0xff]  }
 0x116   :  { %v9919_v14 = vpop.f32.mrf.mxu0 }
 0x117   :  { %v1845_v18 = vmax.f32 %v1187_v12, 0.0  ;;  %v1198_v19 = vadd.f32 %v9919_v14, %v11033_v6 }
 0x118   :  { %v1189_v21 = vpop.f32.mrf.mxu0  ;;  %v10235_v53 = vld [vmem:[#allocation3 + $0xc8] ss:$100 sps:$4 sm:$0xff]  }
 0x119   :  { %v2057_v27 = vmax.f32 %v1845_v18, %v1847_v17  ;;  %v1190_v28 = vadd.f32 %v11033_v6, %v1189_v21  ;;  %v1848_v37 = vmax.f32 %v1198_v19, 0.0 }
 0x11a   :  { %v2476_v22 = vld [vmem:[#allocation2 + $0x31] sm:$0xff]  ;;  %v9922_v34 = vpop.f32.mrf.mxu0  ;;  %10017 = vmatmul.mubr.msk.bf16.gmra.mxu0 %vm719_vm0, %v10230_v15  ;;  %v11227_v15 = vld [vmem:[%s12627_s2] ss:$0 sm:$0xff] }
 0x11b   :  { %v2756_v23 = vld [vmem:[#allocation2 + $0x32] sm:$0xff]  ;;  %v8790_v29 = vpack.c.bf16 %v2476_v22, %v2476_v22  ;;  %v2105_v36 = vmax.f32 %v2009_v25, %v2057_v27  ;;  %v1846_v38 = vmax.f32 %v1190_v28, 0.0  ;;  %10020 = vmatprep.mubr.msk.bf16.mxu0 %vm719_vm0, %v10231_v20  ;;  %v1211_v49 = vadd.f32 %v9922_v34, %v11033_v6  ;;  %v10240_v27 = vld [vmem:[%s12625_s0 + $0x260] sm:$0xff]  }
 0x11c   :  { %v3036_v24 = vld [vmem:[#allocation2 + $0x33] sm:$0xff]  ;;  %v8834_v30 = vpack.c.bf16 %v2756_v23, %v2756_v23  ;;  %v1202_v39 = vpop.f32.mrf.mxu0 }
 0x11d   :  { %v8878_v31 = vpack.c.bf16 %v3036_v24, %v3036_v24  ;;  %v3316_v32 = vld [vmem:[#allocation2 + $0x34] sm:$0xff]  ;;  %2564 = vst [vmem:[#allocation3 + $0x130] sm:$0xf] %v8790_v29  ;;  %2643 = vst [vmem:[#allocation3 + $0xe0] sm:$0xf] %v8790_v29  ;;  %v8747_v41 = vpack.c.bf16 %v2105_v36, %v2105_v36  ;;  %v2058_v42 = vmax.f32 %v1846_v38, %v1848_v37  ;;  %v1851_v57 = vmax.f32 %v1211_v49, 0.0 }
 0x11e   :  { %v8922_v35 = vpack.c.bf16 %v3316_v32, %v3316_v32  ;;  %2674 = vst [vmem:[#allocation3 + $0x90] sm:$0xf] %v8790_v29  ;;  %2705 = vst [vmem:[#allocation3 + $0x40] sm:$0xf] %v8790_v29  ;;  %v9923_v43 = vpop.f32.mrf.mxu0  ;;  %v1203_v47 = vadd.f32 %v11033_v6, %v1202_v39 }
 0x11f   :  { %2844 = vst [vmem:[#allocation3 + $0x134] sm:$0xf] %v8834_v30  ;;  %2923 = vst [vmem:[#allocation3 + $0xe4] sm:$0xf] %v8834_v30  ;;  %v2106_v45 = vmax.f32 %v2010_v40, %v2058_v42  ;;  %v1214_v4 = vadd.f32 %v9923_v43, %v11033_v6  ;;  %v10241_v40 = vld [vmem:[%s12625_s0 + $0x268] sm:$0xff]  }
 0x120   :  { %2954 = vst [vmem:[#allocation3 + $0x94] sm:$0xf] %v8834_v30  ;;  %2985 = vst [vmem:[#allocation3 + $0x44] sm:$0xf] %v8834_v30  ;;  %v1205_v48 = vpop.f32.mrf.mxu0  ;;  %v1849_v54 = vmax.f32 %v1203_v47, 0.0 }
 0x121   :  { %3124 = vst [vmem:[#allocation3 + $0x138] sm:$0xf] %v8878_v31  ;;  %3203 = vst [vmem:[#allocation3 + $0xe8] sm:$0xf] %v8878_v31  ;;  %v1206_v58 = vadd.f32 %v11033_v6, %v1205_v48  ;;  %v1852_v18 = vmax.f32 %v1214_v4, 0.0 }
 0x122   :  { %3234 = vst [vmem:[#allocation3 + $0x98] sm:$0xf] %v8878_v31  ;;  %3265 = vst [vmem:[#allocation3 + $0x48] sm:$0xf] %v8878_v31  ;;  %v9926_v50 = vpop.f32.mrf.mxu0  ;;  %10021 = vmatmul.mubr.msk.bf16.gmra.mxu0 %vm719_vm0, %v10232_v44  ;;  %v2011_v3 = vmax.f32 %v1849_v54, %v1851_v57 }
 0x123   :  { %3404 = vst [vmem:[#allocation3 + $0x13c] sm:$0xf] %v8922_v35  ;;  %3483 = vst [vmem:[#allocation3 + $0xec] sm:$0xf] %v8922_v35  ;;  %v1227_v51 = vadd.f32 %v9926_v50, %v11033_v6  ;;  %10024 = vmatprep.mubr.msk.bf16.mxu0 %vm719_vm0, %v10236_v46  ;;  %v1850_v14 = vmax.f32 %v1206_v58, 0.0 }
 0x124   :  { %3514 = vst [vmem:[#allocation3 + $0x9c] sm:$0xf] %v8922_v35  ;;  %3545 = vst [vmem:[#allocation3 + $0x4c] sm:$0xf] %v8922_v35  ;;  %v10233_v52 = vld [vmem:[#allocation3 + $0xcc] ss:$100 sps:$4 sm:$0xff]   ;;  %v1218_v55 = vpop.f32.mrf.mxu0 }
 0x125   :  { %2153 = vst [vmem:[#allocation2 + $0x40] sm:$0xff] %v2105_v36  ;;  %2285 = vst [vmem:[#allocation3 + $0x190] sm:$0xf] %v8747_v41  ;;  %v1219_v56 = vadd.f32 %v11033_v6, %v1218_v55  ;;  %6456 = vmatprep.mubr.bf16.mxu1 %v10233_v52  ;;  %v1855_v61 = vmax.f32 %v1227_v51, 0.0  ;;  %v2012_v23 = vmax.f32 %v1850_v14, %v1852_v18 }
 0x126   :  { %2364 = vst [vmem:[#allocation3 + $0x140] sm:$0xf] %v8747_v41  ;;  %2395 = vst [vmem:[#allocation3 + $0xf0] sm:$0xf] %v8747_v41  ;;  %v9927_v59 = vpop.f32.mrf.mxu0  ;;  %6457 = vmatmul.mubr.bf16.gmra.mxu1 %v10235_v53 }
 0x127   :  { %2426 = vst [vmem:[#allocation3 + $0xa0] sm:$0xf] %v8747_v41  ;;  %2457 = vst [vmem:[#allocation3 + $0x50] sm:$0xf] %v8747_v41  ;;  %v1853_v62 = vmax.f32 %v1219_v56, 0.0  ;;  %v1230_v5 = vadd.f32 %v9927_v59, %v11033_v6  ;;  %v10242_v41 = vld [vmem:[%s12625_s0 + $0x270] sm:$0xff]  }
 0x128   :  { %2154 = vst [vmem:[#allocation2 + $0x48] sm:$0xff] %v2106_v45  ;;  %v1221_v7 = vpop.f32.mrf.mxu0 }
 0x129   :  { %v2059_v12 = vmax.f32 %v1853_v62, %v1855_v61  ;;  %v1222_v16 = vadd.f32 %v11227_v15, %v1221_v7  ;;  %v1856_v19 = vmax.f32 %v1230_v5, 0.0  ;;  %v10243_v5 = vld [vmem:[%s12625_s0 + $0x278] sm:$0xff]  }
 0x12a   :  { %v9930_v17 = vpop.f32.mrf.mxu0  ;;  %10025 = vmatmul.mubr.msk.bf16.gmra.mxu0 %vm719_vm0, %v10237_v60 }
 0x12b   :  { %v2107_v6 = vmax.f32 %v2011_v3, %v2059_v12  ;;  %10028 = vmatprep.mubr.msk.bf16.mxu0 %vm719_vm0, %v10238_v63  ;;  %v1854_v20 = vmax.f32 %v1222_v16, 0.0  ;;  %v1243_v32 = vadd.f32 %v11227_v15, %v9930_v17 }
 0x12c   :  { %v1234_v21 = vpop.f32.mrf.mxu0 }
 0x12d   :  { %2155 = vst [vmem:[#allocation2 + $0x50] sm:$0xff] %v2107_v6  ;;  %v8748_v22 = vpack.c.bf16 %v2107_v6, %v2107_v6  ;;  %v2060_v24 = vmax.f32 %v1854_v20, %v1856_v19  ;;  %v1235_v30 = vadd.f32 %v11227_v15, %v1234_v21  ;;  %v1859_v42 = vmax.f32 %v1243_v32, 0.0 }
 0x12e   :  { %v9931_v25 = vpop.f32.mrf.mxu0 }
 0x12f   :  { %v2477_v0 = vld [vmem:[#allocation2 + $0x41] sm:$0xff]  ;;  %2286 = vst [vmem:[#allocation3 + $0x1f4] sm:$0xf] %v8748_v22  ;;  %2365 = vst [vmem:[#allocation3 + $0x1a4] sm:$0xf] %v8748_v22  ;;  %v2108_v28 = vmax.f32 %v2012_v23, %v2060_v24  ;;  %v1857_v35 = vmax.f32 %v1235_v30, 0.0  ;;  %v1246_v38 = vadd.f32 %v11227_v15, %v9931_v25 }
 0x130   :  { %v2757_v1 = vld [vmem:[#allocation2 + $0x42] sm:$0xff]  ;;  %v8791_v8 = vpack.c.bf16 %v2477_v0, %v2477_v0  ;;  %2396 = vst [vmem:[#allocation3 + $0x154] sm:$0xf] %v8748_v22  ;;  %2427 = vst [vmem:[#allocation3 + $0x104] sm:$0xf] %v8748_v22  ;;  %v1237_v29 = vpop.f32.mrf.mxu0  ;;  %v10249_v25 = vld [vmem:[%s12625_s0 + $0x290] sm:$0xff]  }
 0x131   :  { %v3037_v2 = vld [vmem:[#allocation2 + $0x43] sm:$0xff]  ;;  %v8835_v9 = vpack.c.bf16 %v2757_v1, %v2757_v1  ;;  %2458 = vst [vmem:[#allocation3 + $0xb4] sm:$0xf] %v8748_v22  ;;  %2156 = vst [vmem:[#allocation2 + $0x58] sm:$0xff] %v2108_v28  ;;  %v1238_v36 = vadd.f32 %v11227_v15, %v1237_v29  ;;  %v2013_v50 = vmax.f32 %v1857_v35, %v1859_v42  ;;  %v1860_v58 = vmax.f32 %v1246_v38, 0.0  ;;  %v10248_v22 = vld [vmem:[%s12625_s0 + $0x288] sm:$0xff]  }
 0x132   :  { %v8879_v10 = vpack.c.bf16 %v3037_v2, %v3037_v2  ;;  %v3317_v11 = vld [vmem:[#allocation2 + $0x44] sm:$0xff]  ;;  %2565 = vst [vmem:[#allocation3 + $0x194] sm:$0xf] %v8791_v8  ;;  %2644 = vst [vmem:[#allocation3 + $0x144] sm:$0xf] %v8791_v8  ;;  %v9934_v31 = vpop.f32.mrf.mxu0  ;;  %10029 = vmatmul.mubr.msk.bf16.gmra.mxu0 %vm719_vm0, %v10239_v26 }
 0x133   :  { %v8923_v13 = vpack.c.bf16 %v3317_v11, %v3317_v11  ;;  %2675 = vst [vmem:[#allocation3 + $0xf4] sm:$0xf] %v8791_v8  ;;  %2706 = vst [vmem:[#allocation3 + $0xa4] sm:$0xf] %v8791_v8  ;;  %v1259_v33 = vadd.f32 %v11227_v15, %v9934_v31  ;;  %10032 = vmatprep.mubr.msk.bf16.mxu0 %vm719_vm0, %v10240_v27  ;;  %v1858_v51 = vmax.f32 %v1238_v36, 0.0 }
 0x134   :  { %2737 = vst [vmem:[#allocation3 + $0x54] sm:$0xf] %v8791_v8  ;;  %2845 = vst [vmem:[#allocation3 + $0x198] sm:$0xf] %v8835_v9  ;;  %v1250_v34 = vpop.f32.mrf.mxu0  ;;  %v10247_v8 = vld [vmem:[%s12625_s0 + $0x280] sm:$0xff]  }
 0x135   :  { %2924 = vst [vmem:[#allocation3 + $0x148] sm:$0xf] %v8835_v9  ;;  %2955 = vst [vmem:[#allocation3 + $0xf8] sm:$0xf] %v8835_v9  ;;  %v1251_v37 = vadd.f32 %v11227_v15, %v1250_v34  ;;  %v1863_v43 = vmax.f32 %v1259_v33, 0.0  ;;  %v2014_v1 = vmax.f32 %v1858_v51, %v1860_v58  ;;  %v10250_v51 = vld [vmem:[%s12625_s0 + $0x298] sm:$0xff]  }
 0x136   :  { %2986 = vst [vmem:[#allocation3 + $0xa8] sm:$0xf] %v8835_v9  ;;  %3017 = vst [vmem:[#allocation3 + $0x58] sm:$0xf] %v8835_v9  ;;  %v9935_v39 = vpop.f32.mrf.mxu0  ;;  %v10246_v16 = vld [vmem:[#allocation3 + $0x190] ss:$100 sps:$4 sm:$0xff]  }
 0x137   :  { %3125 = vst [vmem:[#allocation3 + $0x19c] sm:$0xf] %v8879_v10  ;;  %3204 = vst [vmem:[#allocation3 + $0x14c] sm:$0xf] %v8879_v10  ;;  %v1861_v44 = vmax.f32 %v1251_v37, 0.0  ;;  %v1262_v45 = vadd.f32 %v11227_v15, %v9935_v39 }
 0x138   :  { %3235 = vst [vmem:[#allocation3 + $0xfc] sm:$0xf] %v8879_v10  ;;  %3266 = vst [vmem:[#allocation3 + $0xac] sm:$0xf] %v8879_v10  ;;  %v1253_v46 = vpop.f32.mrf.mxu0  ;;  %v2478_v47 = vld [vmem:[#allocation2 + $0x51] sm:$0xff] }
 0x139   :  { %3297 = vst [vmem:[#allocation3 + $0x5c] sm:$0xf] %v8879_v10  ;;  %3405 = vst [vmem:[#allocation3 + $0x1a0] sm:$0xf] %v8923_v13  ;;  %v2758_v48 = vld [vmem:[#allocation2 + $0x52] sm:$0xff]  ;;  %v2061_v52 = vmax.f32 %v1861_v44, %v1863_v43  ;;  %v1254_v53 = vadd.f32 %v11227_v15, %v1253_v46  ;;  %v8792_v54 = vpack.c.bf16 %v2478_v47, %v2478_v47  ;;  %v1864_v62 = vmax.f32 %v1262_v45, 0.0 }
 0x13a   :  { %3484 = vst [vmem:[#allocation3 + $0x150] sm:$0xf] %v8923_v13  ;;  %3515 = vst [vmem:[#allocation3 + $0x100] sm:$0xf] %v8923_v13  ;;  %v3038_v49 = vld [vmem:[#allocation2 + $0x53] sm:$0xff]  ;;  %v8836_v55 = vpack.c.bf16 %v2758_v48, %v2758_v48  ;;  %v9938_v59 = vpop.f32.mrf.mxu0  ;;  %10033 = vmatmul.mubr.msk.bf16.gmra.mxu0 %vm719_vm0, %v10241_v40 }
 0x13b   :  { %3546 = vst [vmem:[#allocation3 + $0xb0] sm:$0xf] %v8923_v13  ;;  %3577 = vst [vmem:[#allocation3 + $0x60] sm:$0xf] %v8923_v13  ;;  %v8880_v56 = vpack.c.bf16 %v3038_v49, %v3038_v49  ;;  %v3318_v57 = vld [vmem:[#allocation2 + $0x54] sm:$0xff]  ;;  %v2109_v61 = vmax.f32 %v2013_v50, %v2061_v52  ;;  %v1862_v63 = vmax.f32 %v1254_v53, 0.0  ;;  %10036 = vmatprep.mubr.msk.bf16.mxu0 %vm719_vm0, %v10242_v41 }
 0x13c   :  { %v8924_v60 = vpack.c.bf16 %v3318_v57, %v3318_v57  ;;  %2566 = vst [vmem:[#allocation3 + $0x1f8] sm:$0xf] %v8792_v54  ;;  %2645 = vst [vmem:[#allocation3 + $0x1a8] sm:$0xf] %v8792_v54  ;;  %v1266_v0 = vpop.f32.mrf.mxu0  ;;  %v1275_v11 = vadd.f32 %v11227_v15, %v9938_v59  ;;  %v10251_v52 = vld [vmem:[%s12625_s0 + $0x2a0] sm:$0xff]  }
 0x13d   :  { %2676 = vst [vmem:[#allocation3 + $0x158] sm:$0xf] %v8792_v54  ;;  %2707 = vst [vmem:[#allocation3 + $0x108] sm:$0xf] %v8792_v54  ;;  %v8749_v2 = vpack.c.bf16 %v2109_v61, %v2109_v61  ;;  %v2062_v3 = vmax.f32 %v1862_v63, %v1864_v62  ;;  %v1267_v9 = vadd.f32 %v11227_v15, %v1266_v0 }
 0x13e   :  { %2738 = vst [vmem:[#allocation3 + $0xb8] sm:$0xf] %v8792_v54  ;;  %2846 = vst [vmem:[#allocation3 + $0x1fc] sm:$0xf] %v8836_v55  ;;  %v9939_v4 = vpop.f32.mrf.mxu0  ;;  %v1867_v19 = vmax.f32 %v1275_v11, 0.0 }
 0x13f   :  { %2925 = vst [vmem:[#allocation3 + $0x1ac] sm:$0xf] %v8836_v55  ;;  %2956 = vst [vmem:[#allocation3 + $0x15c] sm:$0xf] %v8836_v55  ;;  %v2110_v7 = vmax.f32 %v2014_v1, %v2062_v3  ;;  %v1865_v17 = vmax.f32 %v1267_v9, 0.0  ;;  %v1278_v30 = vadd.f32 %v11227_v15, %v9939_v4  ;;  %v10252_v1 = vld [vmem:[%s12625_s0 + $0x2a8] sm:$0xff]  }
 0x140   :  { %2987 = vst [vmem:[#allocation3 + $0x10c] sm:$0xf] %v8836_v55  ;;  %3018 = vst [vmem:[#allocation3 + $0xbc] sm:$0xf] %v8836_v55  ;;  %v1269_v10 = vpop.f32.mrf.mxu0 }
 0x141   :  { %3126 = vst [vmem:[#allocation3 + $0x200] sm:$0xf] %v8880_v56  ;;  %3205 = vst [vmem:[#allocation3 + $0x1b0] sm:$0xf] %v8880_v56  ;;  %v1270_v20 = vadd.f32 %v11227_v15, %v1269_v10  ;;  %v2015_v29 = vmax.f32 %v1865_v17, %v1867_v19  ;;  %v1868_v43 = vmax.f32 %v1278_v30, 0.0 }
 0x142   :  { %3236 = vst [vmem:[#allocation3 + $0x160] sm:$0xf] %v8880_v56  ;;  %3267 = vst [vmem:[#allocation3 + $0x110] sm:$0xf] %v8880_v56  ;;  %v9942_v12 = vpop.f32.mrf.mxu0  ;;  %10037 = vmatmul.mubr.msk.bf16.gmra.mxu0 %vm719_vm0, %v10243_v5 }
 0x143   :  { %3298 = vst [vmem:[#allocation3 + $0xc0] sm:$0xf] %v8880_v56  ;;  %3406 = vst [vmem:[#allocation3 + $0x204] sm:$0xf] %v8924_v60  ;;  %v1291_v13 = vadd.f32 %v11227_v15, %v9942_v12  ;;  %v10244_v14 = vld [vmem:[#allocation3 + $0x194] ss:$100 sps:$4 sm:$0xff]   ;;  %10040 = vmatprep.mubr.msk.bf16.mxu0 %vm719_vm0, %v10247_v8 }
 0x144   :  { %3485 = vst [vmem:[#allocation3 + $0x1b4] sm:$0xf] %v8924_v60  ;;  %3516 = vst [vmem:[#allocation3 + $0x164] sm:$0xf] %v8924_v60  ;;  %v1282_v6 = vpop.f32.mrf.mxu0  ;;  %6464 = vmatprep.mubr.bf16.mxu1 %v10244_v14  ;;  %v1866_v39 = vmax.f32 %v1270_v20, 0.0 }
 0x145   :  { %3547 = vst [vmem:[#allocation3 + $0x114] sm:$0xf] %v8924_v60  ;;  %3578 = vst [vmem:[#allocation3 + $0xc4] sm:$0xf] %v8924_v60  ;;  %v1283_v18 = vadd.f32 %v11227_v15, %v1282_v6  ;;  %6465 = vmatmul.mubr.bf16.gmra.mxu1 %v10246_v16  ;;  %v1871_v23 = vmax.f32 %v1291_v13, 0.0 }
 0x146   :  { %2157 = vst [vmem:[#allocation2 + $0x60] sm:$0xff] %v2109_v61  ;;  %2287 = vst [vmem:[#allocation3 + $0x258] sm:$0xf] %v8749_v2  ;;  %v9943_v21 = vpop.f32.mrf.mxu0  ;;  %v2016_v48 = vmax.f32 %v1866_v39, %v1868_v43 }
 0x147   :  { %2366 = vst [vmem:[#allocation3 + $0x208] sm:$0xf] %v8749_v2  ;;  %2397 = vst [vmem:[#allocation3 + $0x1b8] sm:$0xf] %v8749_v2  ;;  %v1869_v24 = vmax.f32 %v1283_v18, 0.0  ;;  %v1294_v31 = vadd.f32 %v11227_v15, %v9943_v21 }
 0x148   :  { %2428 = vst [vmem:[#allocation3 + $0x168] sm:$0xf] %v8749_v2  ;;  %2459 = vst [vmem:[#allocation3 + $0x118] sm:$0xf] %v8749_v2  ;;  %v1285_v32 = vpop.f32.mrf.mxu0  ;;  %v10253_v2 = vld [vmem:[%s12625_s0 + $0x2b0] sm:$0xff]  }
 0x149   :  { %2158 = vst [vmem:[#allocation2 + $0x68] sm:$0xff] %v2110_v7  ;;  %v2063_v37 = vmax.f32 %v1869_v24, %v1871_v23  ;;  %v1286_v40 = vadd.f32 %v11227_v15, %v1285_v32  ;;  %v1872_v44 = vmax.f32 %v1294_v31, 0.0  ;;  %v10254_v31 = vld [vmem:[%s12625_s0 + $0x2b8] sm:$0xff]  }
 0x14a   :  { %v9946_v41 = vpop.f32.mrf.mxu0  ;;  %10041 = vmatmul.mubr.msk.bf16.gmra.mxu0 %vm719_vm0, %v10248_v22 }
 0x14b   :  { %v2111_v42 = vmax.f32 %v2015_v29, %v2063_v37  ;;  %10044 = vmatprep.mubr.msk.bf16.mxu0 %vm719_vm0, %v10249_v25  ;;  %v1870_v45 = vmax.f32 %v1286_v40, 0.0  ;;  %v1307_v57 = vadd.f32 %v11227_v15, %v9946_v41 }
 0x14c   :  { %v1298_v46 = vpop.f32.mrf.mxu0 }
 0x14d   :  { %2159 = vst [vmem:[#allocation2 + $0x70] sm:$0xff] %v2111_v42  ;;  %v8750_v47 = vpack.c.bf16 %v2111_v42, %v2111_v42  ;;  %v2064_v49 = vmax.f32 %v1870_v45, %v1872_v44  ;;  %v1299_v55 = vadd.f32 %v11227_v15, %v1298_v46  ;;  %v1875_v3 = vmax.f32 %v1307_v57, 0.0 }
 0x14e   :  { %v9947_v50 = vpop.f32.mrf.mxu0 }
 0x14f   :  { %2288 = vst [vmem:[#allocation3 + $0x2bc] sm:$0xf] %v8750_v47  ;;  %2367 = vst [vmem:[#allocation3 + $0x26c] sm:$0xf] %v8750_v47  ;;  %v2112_v53 = vmax.f32 %v2016_v48, %v2064_v49  ;;  %v1873_v60 = vmax.f32 %v1299_v55, 0.0  ;;  %v1310_v63 = vadd.f32 %v11227_v15, %v9947_v50  ;;  %v10264_v50 = vld [vmem:[%s12625_s0 + $0x2d0] sm:$0xff]  }
 0x150   :  { %v2479_v26 = vld [vmem:[#allocation2 + $0x61] sm:$0xff]  ;;  %2398 = vst [vmem:[#allocation3 + $0x21c] sm:$0xf] %v8750_v47  ;;  %2429 = vst [vmem:[#allocation3 + $0x1cc] sm:$0xf] %v8750_v47  ;;  %v1301_v54 = vpop.f32.mrf.mxu0 }
 0x151   :  { %v2759_v27 = vld [vmem:[#allocation2 + $0x62] sm:$0xff]  ;;  %v8793_v33 = vpack.c.bf16 %v2479_v26, %v2479_v26  ;;  %2460 = vst [vmem:[#allocation3 + $0x17c] sm:$0xf] %v8750_v47  ;;  %2160 = vst [vmem:[#allocation2 + $0x78] sm:$0xff] %v2112_v53  ;;  %v1302_v61 = vadd.f32 %v11227_v15, %v1301_v54  ;;  %v2017_v12 = vmax.f32 %v1873_v60, %v1875_v3  ;;  %v1876_v20 = vmax.f32 %v1310_v63, 0.0  ;;  %v10259_v47 = vld [vmem:[%s12625_s0 + $0x2c8] sm:$0xff]  }
 0x152   :  { %v3039_v28 = vld [vmem:[#allocation2 + $0x63] sm:$0xff]  ;;  %v8837_v34 = vpack.c.bf16 %v2759_v27, %v2759_v27  ;;  %v9950_v56 = vpop.f32.mrf.mxu0  ;;  %10045 = vmatmul.mubr.msk.bf16.gmra.mxu0 %vm719_vm0, %v10250_v51 }
 0x153   :  { %v8881_v35 = vpack.c.bf16 %v3039_v28, %v3039_v28  ;;  %v3319_v36 = vld [vmem:[#allocation2 + $0x64] sm:$0xff]  ;;  %2567 = vst [vmem:[#allocation3 + $0x25c] sm:$0xf] %v8793_v33  ;;  %2646 = vst [vmem:[#allocation3 + $0x20c] sm:$0xf] %v8793_v33  ;;  %v1323_v58 = vadd.f32 %v11227_v15, %v9950_v56  ;;  %10048 = vmatprep.mubr.msk.bf16.mxu0 %vm719_vm0, %v10251_v52  ;;  %v1874_v13 = vmax.f32 %v1302_v61, 0.0 }
 0x154   :  { %v8925_v38 = vpack.c.bf16 %v3319_v36, %v3319_v36  ;;  %2677 = vst [vmem:[#allocation3 + $0x1bc] sm:$0xf] %v8793_v33  ;;  %2708 = vst [vmem:[#allocation3 + $0x16c] sm:$0xf] %v8793_v33  ;;  %v1314_v59 = vpop.f32.mrf.mxu0 }
 0x155   :  { %2739 = vst [vmem:[#allocation3 + $0x11c] sm:$0xf] %v8793_v33  ;;  %2847 = vst [vmem:[#allocation3 + $0x260] sm:$0xf] %v8837_v34  ;;  %v1315_v62 = vadd.f32 %v11227_v15, %v1314_v59  ;;  %v1879_v4 = vmax.f32 %v1323_v58, 0.0  ;;  %v2018_v27 = vmax.f32 %v1874_v13, %v1876_v20  ;;  %v10258_v33 = vld [vmem:[%s12625_s0 + $0x2c0] sm:$0xff]  }
 0x156   :  { %2926 = vst [vmem:[#allocation3 + $0x210] sm:$0xf] %v8837_v34  ;;  %2957 = vst [vmem:[#allocation3 + $0x1c0] sm:$0xf] %v8837_v34  ;;  %v9951_v0 = vpop.f32.mrf.mxu0  ;;  %v10257_v40 = vld [vmem:[#allocation3 + $0x258] ss:$100 sps:$4 sm:$0xff]  }
 0x157   :  { %2988 = vst [vmem:[#allocation3 + $0x170] sm:$0xf] %v8837_v34  ;;  %3019 = vst [vmem:[#allocation3 + $0x120] sm:$0xf] %v8837_v34  ;;  %v1877_v5 = vmax.f32 %v1315_v62, 0.0  ;;  %v1326_v7 = vadd.f32 %v11227_v15, %v9951_v0  ;;  %v10265_v13 = vld [vmem:[%s12625_s0 + $0x2d8] sm:$0xff]  }
 0x158   :  { %3127 = vst [vmem:[#allocation3 + $0x264] sm:$0xf] %v8881_v35  ;;  %3206 = vst [vmem:[#allocation3 + $0x214] sm:$0xf] %v8881_v35  ;;  %v1317_v8 = vpop.f32.mrf.mxu0  ;;  %v2480_v9 = vld [vmem:[#allocation2 + $0x71] sm:$0xff] }
 0x159   :  { %3237 = vst [vmem:[#allocation3 + $0x1c4] sm:$0xf] %v8881_v35  ;;  %3268 = vst [vmem:[#allocation3 + $0x174] sm:$0xf] %v8881_v35  ;;  %v2760_v10 = vld [vmem:[#allocation2 + $0x72] sm:$0xff]  ;;  %v2065_v14 = vmax.f32 %v1877_v5, %v1879_v4  ;;  %v1318_v16 = vadd.f32 %v11227_v15, %v1317_v8  ;;  %v8794_v17 = vpack.c.bf16 %v2480_v9, %v2480_v9  ;;  %v1880_v24 = vmax.f32 %v1326_v7, 0.0 }
 0x15a   :  { %3299 = vst [vmem:[#allocation3 + $0x124] sm:$0xf] %v8881_v35  ;;  %3407 = vst [vmem:[#allocation3 + $0x268] sm:$0xf] %v8925_v38  ;;  %v3040_v11 = vld [vmem:[#allocation2 + $0x73] sm:$0xff]  ;;  %v8838_v6 = vpack.c.bf16 %v2760_v10, %v2760_v10  ;;  %v9954_v21 = vpop.f32.mrf.mxu0  ;;  %10049 = vmatmul.mubr.msk.bf16.gmra.mxu0 %vm719_vm0, %v10252_v1 }
 0x15b   :  { %3486 = vst [vmem:[#allocation3 + $0x218] sm:$0xf] %v8925_v38  ;;  %3517 = vst [vmem:[#allocation3 + $0x1c8] sm:$0xf] %v8925_v38  ;;  %v8882_v18 = vpack.c.bf16 %v3040_v11, %v3040_v11  ;;  %v3320_v19 = vld [vmem:[#allocation2 + $0x74] sm:$0xff]  ;;  %v2113_v23 = vmax.f32 %v2017_v12, %v2065_v14  ;;  %v1878_v25 = vmax.f32 %v1318_v16, 0.0  ;;  %10052 = vmatprep.mubr.msk.bf16.mxu0 %vm719_vm0, %v10253_v2 }
 0x15c   :  { %3548 = vst [vmem:[#allocation3 + $0x178] sm:$0xf] %v8925_v38  ;;  %3579 = vst [vmem:[#allocation3 + $0x128] sm:$0xf] %v8925_v38  ;;  %v8926_v22 = vpack.c.bf16 %v3320_v19, %v3320_v19  ;;  %v1330_v26 = vpop.f32.mrf.mxu0  ;;  %v1339_v36 = vadd.f32 %v11227_v15, %v9954_v21  ;;  %v10270_v14 = vld [vmem:[%s12625_s0 + $0x2e0] sm:$0xff]  }
 0x15d   :  { %2568 = vst [vmem:[#allocation3 + $0x2c0] sm:$0xf] %v8794_v17  ;;  %2647 = vst [vmem:[#allocation3 + $0x270] sm:$0xf] %v8794_v17  ;;  %v8766_v28 = vpack.c.bf16 %v2113_v23, %v2113_v23  ;;  %v2066_v29 = vmax.f32 %v1878_v25, %v1880_v24  ;;  %v1331_v34 = vadd.f32 %v11227_v15, %v1330_v26  ;;  %v10271_v25 = vld [vmem:[%s12625_s0 + $0x2e8] sm:$0xff]  }
 0x15e   :  { %2678 = vst [vmem:[#allocation3 + $0x220] sm:$0xf] %v8794_v17  ;;  %2709 = vst [vmem:[#allocation3 + $0x1d0] sm:$0xf] %v8794_v17  ;;  %v9955_v30 = vpop.f32.mrf.mxu0  ;;  %v1883_v44 = vmax.f32 %v1339_v36, 0.0 }
 0x15f   :  { %2740 = vst [vmem:[#allocation3 + $0x180] sm:$0xf] %v8794_v17  ;;  %2848 = vst [vmem:[#allocation3 + $0x2c4] sm:$0xf] %v8838_v6  ;;  %v2114_v32 = vmax.f32 %v2018_v27, %v2066_v29  ;;  %v1881_v41 = vmax.f32 %v1331_v34, 0.0  ;;  %v1342_v55 = vadd.f32 %v11227_v15, %v9955_v30 }
 0x160   :  { %2927 = vst [vmem:[#allocation3 + $0x274] sm:$0xf] %v8838_v6  ;;  %2958 = vst [vmem:[#allocation3 + $0x224] sm:$0xf] %v8838_v6  ;;  %v1333_v35 = vpop.f32.mrf.mxu0 }
 0x161   :  { %2989 = vst [vmem:[#allocation3 + $0x1d4] sm:$0xf] %v8838_v6  ;;  %3020 = vst [vmem:[#allocation3 + $0x184] sm:$0xf] %v8838_v6  ;;  %v1334_v45 = vadd.f32 %v11227_v15, %v1333_v35  ;;  %v2019_v54 = vmax.f32 %v1881_v41, %v1883_v44  ;;  %v1884_v4 = vmax.f32 %v1342_v55, 0.0 }
 0x162   :  { %3128 = vst [vmem:[#allocation3 + $0x2c8] sm:$0xf] %v8882_v18  ;;  %3207 = vst [vmem:[#allocation3 + $0x278] sm:$0xf] %v8882_v18  ;;  %v9958_v37 = vpop.f32.mrf.mxu0  ;;  %10053 = vmatmul.mubr.msk.bf16.gmra.mxu0 %vm719_vm0, %v10254_v31 }
 0x163   :  { %3238 = vst [vmem:[#allocation3 + $0x228] sm:$0xf] %v8882_v18  ;;  %3269 = vst [vmem:[#allocation3 + $0x1d8] sm:$0xf] %v8882_v18  ;;  %v1355_v38 = vadd.f32 %v11227_v15, %v9958_v37  ;;  %10056 = vmatprep.mubr.msk.bf16.mxu0 %vm719_vm0, %v10258_v33  ;;  %v1882_v0 = vmax.f32 %v1334_v45, 0.0 }
 0x164   :  { %3300 = vst [vmem:[#allocation3 + $0x188] sm:$0xf] %v8882_v18  ;;  %3408 = vst [vmem:[#allocation3 + $0x2cc] sm:$0xf] %v8926_v22  ;;  %v10255_v39 = vld [vmem:[#allocation3 + $0x25c] ss:$100 sps:$4 sm:$0xff]   ;;  %v1346_v42 = vpop.f32.mrf.mxu0 }
 0x165   :  { %3487 = vst [vmem:[#allocation3 + $0x27c] sm:$0xf] %v8926_v22  ;;  %3518 = vst [vmem:[#allocation3 + $0x22c] sm:$0xf] %v8926_v22  ;;  %v1347_v43 = vadd.f32 %v11227_v15, %v1346_v42  ;;  %6472 = vmatprep.mubr.bf16.mxu1 %v10255_v39  ;;  %v1887_v48 = vmax.f32 %v1355_v38, 0.0  ;;  %v2020_v10 = vmax.f32 %v1882_v0, %v1884_v4 }
 0x166   :  { %3549 = vst [vmem:[#allocation3 + $0x1dc] sm:$0xf] %v8926_v22  ;;  %3580 = vst [vmem:[#allocation3 + $0x18c] sm:$0xf] %v8926_v22  ;;  %v9959_v46 = vpop.f32.mrf.mxu0  ;;  %6473 = vmatmul.mubr.bf16.gmra.mxu1 %v10257_v40 }
 0x167   :  { %2161 = vst [vmem:[#allocation2 + $0x80] sm:$0xff] %v2113_v23  ;;  %2368 = vst [vmem:[#allocation3 + $0x2d0] sm:$0xf] %v8766_v28  ;;  %v1885_v49 = vmax.f32 %v1347_v43, 0.0  ;;  %v1358_v56 = vadd.f32 %v11227_v15, %v9959_v46 }
 0x168   :  { %2399 = vst [vmem:[#allocation3 + $0x280] sm:$0xf] %v8766_v28  ;;  %2430 = vst [vmem:[#allocation3 + $0x230] sm:$0xf] %v8766_v28  ;;  %v1349_v57 = vpop.f32.mrf.mxu0 }
 0x169   :  { %2461 = vst [vmem:[#allocation3 + $0x1e0] sm:$0xf] %v8766_v28  ;;  %2162 = vst [vmem:[#allocation2 + $0x88] sm:$0xff] %v2114_v32  ;;  %v2067_v62 = vmax.f32 %v1885_v49, %v1887_v48  ;;  %v1350_v1 = vadd.f32 %v11227_v15, %v1349_v57  ;;  %v1888_v5 = vmax.f32 %v1358_v56, 0.0  ;;  %v10276_v32 = vld [vmem:[%s12625_s0 + $0x2f0] sm:$0xff]   ;;  %v10277_v56 = vld [vmem:[%s12625_s0 + $0x2f8] sm:$0xff]  }
 0x16a   :  { %v9962_v2 = vpop.f32.mrf.mxu0  ;;  %10057 = vmatmul.mubr.msk.bf16.gmra.mxu0 %vm719_vm0, %v10259_v47 }
 0x16b   :  { %v2115_v3 = vmax.f32 %v2019_v54, %v2067_v62  ;;  %10060 = vmatprep.mubr.msk.bf16.mxu0 %vm719_vm0, %v10264_v50  ;;  %v1886_v7 = vmax.f32 %v1350_v1, 0.0  ;;  %v1371_v19 = vadd.f32 %v11227_v15, %v9962_v2 }
 0x16c   :  { %v1362_v8 = vpop.f32.mrf.mxu0 }
 0x16d   :  { %2163 = vst [vmem:[#allocation2 + $0x90] sm:$0xff] %v2115_v3  ;;  %v8776_v9 = vpack.c.bf16 %v2115_v3, %v2115_v3  ;;  %v2068_v11 = vmax.f32 %v1886_v7, %v1888_v5  ;;  %v1363_v6 = vadd.f32 %v11227_v15, %v1362_v8  ;;  %v1891_v28 = vmax.f32 %v1371_v19, 0.0  ;;  %v10280_v5 = vld [vmem:[#allocation3 + $0x30] ss:$100 sps:$4 sm:$0xff]  }
 0x16e   :  { %v9963_v12 = vpop.f32.mrf.mxu0 }
 0x16f   :  { %2400 = vst [vmem:[#allocation3 + $0x2e4] sm:$0xf] %v8776_v9  ;;  %2431 = vst [vmem:[#allocation3 + $0x294] sm:$0xf] %v8776_v9  ;;  %v2116_v16 = vmax.f32 %v2020_v10, %v2068_v11  ;;  %v1889_v22 = vmax.f32 %v1363_v6, 0.0  ;;  %v1374_v26 = vadd.f32 %v11227_v15, %v9963_v12 }
 0x170   :  { %v2481_v51 = vld [vmem:[#allocation2 + $0x81] sm:$0xff]  ;;  %2462 = vst [vmem:[#allocation3 + $0x244] sm:$0xf] %v8776_v9  ;;  %v1365_v17 = vpop.f32.mrf.mxu0 }
 0x171   :  { %v2761_v52 = vld [vmem:[#allocation2 + $0x82] sm:$0xff]  ;;  %v8810_v58 = vpack.c.bf16 %v2481_v51, %v2481_v51  ;;  %2164 = vst [vmem:[#allocation2 + $0x98] sm:$0xff] %v2116_v16  ;;  %v1366_v23 = vadd.f32 %v11227_v15, %v1365_v17  ;;  %v2021_v37 = vmax.f32 %v1889_v22, %v1891_v28  ;;  %v1892_v45 = vmax.f32 %v1374_v26, 0.0 }
 0x172   :  { %v3041_v53 = vld [vmem:[#allocation2 + $0x83] sm:$0xff]  ;;  %v8854_v59 = vpack.c.bf16 %v2761_v52, %v2761_v52  ;;  %v9966_v18 = vpop.f32.mrf.mxu0  ;;  %10061 = vmatmul.mubr.msk.bf16.gmra.mxu0 %vm719_vm0, %v10265_v13 }
 0x173   :  { %v8898_v60 = vpack.c.bf16 %v3041_v53, %v3041_v53  ;;  %v3321_v61 = vld [vmem:[#allocation2 + $0x84] sm:$0xff]  ;;  %2648 = vst [vmem:[#allocation3 + $0x2d4] sm:$0xf] %v8810_v58  ;;  %2679 = vst [vmem:[#allocation3 + $0x284] sm:$0xf] %v8810_v58  ;;  %v1387_v20 = vadd.f32 %v11227_v15, %v9966_v18  ;;  %10064 = vmatprep.mubr.msk.bf16.mxu0 %vm719_vm0, %v10270_v14  ;;  %v1890_v38 = vmax.f32 %v1366_v23, 0.0 }
 0x174   :  { %v8942_v63 = vpack.c.bf16 %v3321_v61, %v3321_v61  ;;  %2710 = vst [vmem:[#allocation3 + $0x234] sm:$0xf] %v8810_v58  ;;  %2741 = vst [vmem:[#allocation3 + $0x1e4] sm:$0xf] %v8810_v58  ;;  %v1378_v21 = vpop.f32.mrf.mxu0  ;;  %v10287_v12 = vld [vmem:[#allocation3 + $0xfc] ss:$100 sps:$4 sm:$0xff]  }
 0x175   :  { %2928 = vst [vmem:[#allocation3 + $0x2d8] sm:$0xf] %v8854_v59  ;;  %2959 = vst [vmem:[#allocation3 + $0x288] sm:$0xf] %v8854_v59  ;;  %v1379_v24 = vadd.f32 %v11227_v15, %v1378_v21  ;;  %v1895_v29 = vmax.f32 %v1387_v20, 0.0  ;;  %v2022_v52 = vmax.f32 %v1890_v38, %v1892_v45 }
 0x176   :  { %2990 = vst [vmem:[#allocation3 + $0x238] sm:$0xf] %v8854_v59  ;;  %3021 = vst [vmem:[#allocation3 + $0x1e8] sm:$0xf] %v8854_v59  ;;  %v9967_v27 = vpop.f32.mrf.mxu0  ;;  %v10285_v38 = vld [vmem:[#allocation3 + $0xf8] ss:$100 sps:$4 sm:$0xff]  }
 0x177   :  { %3208 = vst [vmem:[#allocation3 + $0x2dc] sm:$0xf] %v8898_v60  ;;  %3239 = vst [vmem:[#allocation3 + $0x28c] sm:$0xf] %v8898_v60  ;;  %v1893_v30 = vmax.f32 %v1379_v24, 0.0  ;;  %v1390_v31 = vadd.f32 %v11227_v15, %v9967_v27 }
 0x178   :  { %3270 = vst [vmem:[#allocation3 + $0x23c] sm:$0xf] %v8898_v60  ;;  %3301 = vst [vmem:[#allocation3 + $0x1ec] sm:$0xf] %v8898_v60  ;;  %v1381_v33 = vpop.f32.mrf.mxu0  ;;  %v2482_v34 = vld [vmem:[#allocation2 + $0x91] sm:$0xff] }
 0x179   :  { %3488 = vst [vmem:[#allocation3 + $0x2e0] sm:$0xf] %v8942_v63  ;;  %3519 = vst [vmem:[#allocation3 + $0x290] sm:$0xf] %v8942_v63  ;;  %v2762_v35 = vld [vmem:[#allocation2 + $0x92] sm:$0xff]  ;;  %v2069_v39 = vmax.f32 %v1893_v30, %v1895_v29  ;;  %v1382_v40 = vadd.f32 %v11227_v15, %v1381_v33  ;;  %v8820_v41 = vpack.c.bf16 %v2482_v34, %v2482_v34  ;;  %v1896_v49 = vmax.f32 %v1390_v31, 0.0 }
 0x17a   :  { %3550 = vst [vmem:[#allocation3 + $0x240] sm:$0xf] %v8942_v63  ;;  %3581 = vst [vmem:[#allocation3 + $0x1f0] sm:$0xf] %v8942_v63  ;;  %v3042_v36 = vld [vmem:[#allocation2 + $0x93] sm:$0xff]  ;;  %v8864_v42 = vpack.c.bf16 %v2762_v35, %v2762_v35  ;;  %v9970_v46 = vpop.f32.mrf.mxu0  ;;  %10065 = vmatmul.mubr.msk.bf16.gmra.mxu0 %vm719_vm0, %v10271_v25  ;;  %v10309_v33 = vld [vmem:[%s12626_s3 + $0xf8] sm:$0xff]  }
 0x17b   :  { %v8908_v43 = vpack.c.bf16 %v3042_v36, %v3042_v36  ;;  %v3322_v44 = vld [vmem:[#allocation2 + $0x94] sm:$0xff]  ;;  %v2117_v48 = vmax.f32 %v2021_v37, %v2069_v39  ;;  %v1894_v50 = vmax.f32 %v1382_v40, 0.0  ;;  %10068 = vmatprep.mubr.msk.bf16.mxu0 %vm719_vm0, %v10276_v32  ;;  %2680 = vst [vmem:[#allocation3 + $0x2e8] sm:$0xf] %v8820_v41  ;;  %2711 = vst [vmem:[#allocation3 + $0x298] sm:$0xf] %v8820_v41  ;;  %9140 = vmatprep.subr.bf16.mxu1 %v10309_v33 }
 0x17c   :  { %v8952_v47 = vpack.c.bf16 %v3322_v44, %v3322_v44  ;;  %2742 = vst [vmem:[#allocation3 + $0x248] sm:$0xf] %v8820_v41  ;;  %2960 = vst [vmem:[#allocation3 + $0x2ec] sm:$0xf] %v8864_v42  ;;  %v1394_v51 = vpop.f32.mrf.mxu0  ;;  %v10282_v60 = vld [vmem:[#allocation3 + $0x34] ss:$100 sps:$4 sm:$0xff]   ;;  %v1403_v61 = vadd.f32 %v11227_v15, %v9970_v46 }
 0x17d   :  { %2991 = vst [vmem:[#allocation3 + $0x29c] sm:$0xf] %v8864_v42  ;;  %3022 = vst [vmem:[#allocation3 + $0x24c] sm:$0xf] %v8864_v42  ;;  %v8780_v53 = vpack.c.bf16 %v2117_v48, %v2117_v48  ;;  %v2070_v54 = vmax.f32 %v1894_v50, %v1896_v49  ;;  %v1395_v58 = vadd.f32 %v11227_v15, %v1394_v51  ;;  %v10310_v36 = vld [vmem:[%s12626_s3 + $0xb8] sm:$0xff]   ;;  %v10312_v46 = vld [vmem:[%s12626_s3 + $0xb0] sm:$0xff]  }
 0x17e   :  { %3240 = vst [vmem:[#allocation3 + $0x2f0] sm:$0xf] %v8908_v43  ;;  %3271 = vst [vmem:[#allocation3 + $0x2a0] sm:$0xf] %v8908_v43  ;;  %v9971_v55 = vpop.f32.mrf.mxu0  ;;  %v1899_v4 = vmax.f32 %v1403_v61, 0.0  ;;  %9141 = vmatpush3.bf16.msra.mxu1 %v10310_v36 }
 0x17f   :  { %3302 = vst [vmem:[#allocation3 + $0x250] sm:$0xf] %v8908_v43  ;;  %3520 = vst [vmem:[#allocation3 + $0x2f4] sm:$0xf] %v8952_v47  ;;  %v2118_v57 = vmax.f32 %v2022_v52, %v2070_v54  ;;  %v1897_v0 = vmax.f32 %v1395_v58, 0.0  ;;  %v1406_v8 = vadd.f32 %v11227_v15, %v9971_v55  ;;  %v10311_v43 = vld [vmem:[%s12626_s3 + $0xf0] sm:$0xff]  }
 0x180   :  { %3551 = vst [vmem:[#allocation3 + $0x2a4] sm:$0xf] %v8952_v47  ;;  %3582 = vst [vmem:[#allocation3 + $0x254] sm:$0xf] %v8952_v47  ;;  %v1397_v59 = vpop.f32.mrf.mxu0  ;;  %v11373_v39 = vld [vmem:[%s12627_s2] ss:$0 sm:$0xff]  ;;  %9142 = vmatprep.subr.bf16.mxu1 %v10311_v43 }
 0x181   :  { %2165 = vst [vmem:[#allocation2 + $0xa0] sm:$0xff] %v2117_v48  ;;  %2432 = vst [vmem:[#allocation3 + $0x2f8] sm:$0xf] %v8780_v53  ;;  %v1398_v2 = vadd.f32 %v11227_v15, %v1397_v59  ;;  %v2023_v17 = vmax.f32 %v1897_v0, %v1899_v4  ;;  %v1900_v27 = vmax.f32 %v1406_v8, 0.0  ;;  %v10290_v42 = vld [vmem:[#allocation3 + $0x1c4] ss:$100 sps:$4 sm:$0xff]  }
 0x182   :  { %2463 = vst [vmem:[#allocation3 + $0x2a8] sm:$0xf] %v8780_v53  ;;  %2166 = vst [vmem:[#allocation2 + $0xa8] sm:$0xff] %v2118_v57  ;;  %v9974_v62 = vpop.f32.mrf.mxu0  ;;  %10069 = vmatmul.mubr.msk.bf16.gmra.mxu0 %vm719_vm0, %v10277_v56  ;;  %9143 = vmatpush3.bf16.msra.mxu1 %v10312_v46  ;;  %v10313_v52 = vld [vmem:[%s12626_s3 + $0xe8] sm:$0xff]   ;;  %v10288_v58 = vld [vmem:[#allocation3 + $0x1c0] ss:$100 sps:$4 sm:$0xff]  }
 0x183   :  { %v1419_v63 = vadd.f32 %v11227_v15, %v9974_v62  ;;  %7030 = vmatprep.mubr.bf16.mxu0 %v10282_v60  ;;  %v1898_v19 = vmax.f32 %v1398_v2, 0.0  ;;  %v10314_v55 = vld [vmem:[%s12626_s3 + $0xa8] sm:$0xff]   ;;  %9144 = vmatprep.subr.bf16.mxu1 %v10313_v52  ;;  %v10315_v8 = vld [vmem:[%s12626_s3 + $0xe0] sm:$0xff]  }
 0x184   :  { %v1410_v1 = vpop.f32.mrf.mxu0 }
 0x185   :  { %v1411_v3 = vadd.f32 %v11227_v15, %v1410_v1  ;;  %v1903_v9 = vmax.f32 %v1419_v63, 0.0 }
 0x186   :  { %v9975_v7 = vpop.f32.mrf.mxu0  ;;  %9145 = vmatpush3.bf16.msra.mxu1 %v10314_v55 }
 0x187   :  { %v1901_v10 = vmax.f32 %v1411_v3, 0.0  ;;  %v1422_v11 = vadd.f32 %v11227_v15, %v9975_v7  ;;  %v10293_v7 = vld [vmem:[#allocation3 + $0x28c] ss:$100 sps:$4 sm:$0xff]   ;;  %9146 = vmatprep.subr.bf16.mxu1 %v10315_v8 }
 0x188   :  { %v1413_v6 = vpop.f32.mrf.mxu0 }
 0x189   :  { %v2483_v13 = vld [vmem:[#allocation2 + $0xa1] sm:$0xff]  ;;  %v2071_v20 = vmax.f32 %v1901_v10, %v1903_v9  ;;  %v1414_v21 = vadd.f32 %v11227_v15, %v1413_v6  ;;  %v1904_v29 = vmax.f32 %v1422_v11, 0.0  ;;  %v2024_v15 = vmax.f32 %v1898_v19, %v1900_v27 }
 0x18a   :  { %v2763_v14 = vld [vmem:[#allocation2 + $0xa2] sm:$0xff]  ;;  %v8824_v22 = vpack.c.bf16 %v2483_v13, %v2483_v13  ;;  %v9978_v24 = vpop.f32.mrf.mxu0  ;;  %7031 = vmatmul.mubr.bf16.vlgmr.msra.gmra.mxu0 %v10280_v5 }
 0x18b   :  { %v3043_v16 = vld [vmem:[#allocation2 + $0xa3] sm:$0xff]  ;;  %v8868_v25 = vpack.c.bf16 %v2763_v14, %v2763_v14  ;;  %v2119_v28 = vmax.f32 %v2023_v17, %v2071_v20  ;;  %v1902_v30 = vmax.f32 %v1414_v21, 0.0  ;;  %7038 = vmatprep.mubr.bf16.mxu0 %v10287_v12  ;;  %v1435_v44 = vadd.f32 %v11373_v39, %v9978_v24 }
 0x18c   :  { %v3323_v18 = vld [vmem:[#allocation2 + $0xa4] sm:$0xff]  ;;  %v8912_v26 = vpack.c.bf16 %v3043_v16, %v3043_v16  ;;  %2712 = vst [vmem:[#allocation3 + $0x2fc] sm:$0xf] %v8824_v22  ;;  %2743 = vst [vmem:[#allocation3 + $0x2ac] sm:$0xf] %v8824_v22  ;;  %v1426_v31 = vpop.f32.mrf.mxu0 }
 0x18d   :  { %v8956_v23 = vpack.c.bf16 %v3323_v18, %v3323_v18  ;;  %2992 = vst [vmem:[#allocation3 + $0x300] sm:$0xf] %v8868_v25  ;;  %3023 = vst [vmem:[#allocation3 + $0x2b0] sm:$0xf] %v8868_v25  ;;  %v2072_v32 = vmax.f32 %v1902_v30, %v1904_v29  ;;  %v8784_v34 = vpack.c.bf16 %v2119_v28, %v2119_v28  ;;  %v1907_v53 = vmax.f32 %v1435_v44, 0.0  ;;  %v10316_v11 = vld [vmem:[%s12626_s3 + $0xa0] sm:$0xff]  }
 0x18e   :  { %3272 = vst [vmem:[#allocation3 + $0x304] sm:$0xf] %v8912_v26  ;;  %3303 = vst [vmem:[#allocation3 + $0x2b4] sm:$0xf] %v8912_v26  ;;  %v9979_v35 = vpop.f32.mrf.mxu0  ;;  %v1427_v40 = vadd.f32 %v11373_v39, %v1426_v31  ;;  %9147 = vmatpush3.bf16.msra.mxu1 %v10316_v11  ;;  %v10318_v25 = vld [vmem:[%s12626_s3 + $0x98] sm:$0xff]   ;;  %v10319_v30 = vld [vmem:[%s12626_s3 + $0xd0] sm:$0xff]  }
 0x18f   :  { %3552 = vst [vmem:[#allocation3 + $0x308] sm:$0xf] %v8956_v23  ;;  %3583 = vst [vmem:[#allocation3 + $0x2b8] sm:$0xf] %v8956_v23  ;;  %v2120_v37 = vmax.f32 %v2024_v15, %v2072_v32  ;;  %v1438_v56 = vadd.f32 %v11373_v39, %v9979_v35  ;;  %v10317_v23 = vld [vmem:[%s12626_s3 + $0xd8] sm:$0xff]   ;;  %v10320_v32 = vld [vmem:[%s12626_s3 + $0x90] sm:$0xff]  }
 0x190   :  { %2167 = vst [vmem:[#allocation2 + $0xb0] sm:$0xff] %v2119_v28  ;;  %2464 = vst [vmem:[#allocation3 + $0x30c] sm:$0xf] %v8784_v34  ;;  %v1429_v41 = vpop.f32.mrf.mxu0  ;;  %v1905_v48 = vmax.f32 %v1427_v40, 0.0  ;;  %9148 = vmatprep.subr.bf16.mxu1 %v10317_v23  ;;  %v10291_v27 = vld [vmem:[#allocation3 + $0x288] ss:$100 sps:$4 sm:$0xff]  }
 0x191   :  { %2168 = vst [vmem:[#allocation2 + $0xb8] sm:$0xff] %v2120_v37  ;;  %v1430_v50 = vadd.f32 %v11373_v39, %v1429_v41  ;;  %v1908_v16 = vmax.f32 %v1438_v56, 0.0  ;;  %v10337_v11 = vld [vmem:[%s12626_s3 + $0x438] sm:$0xff]  }
 0x192   :  { %v9982_v45 = vpop.f32.mrf.mxu0  ;;  %7039 = vmatmul.mubr.bf16.gmra.mxu0 %v10285_v38  ;;  %v2025_v62 = vmax.f32 %v1905_v48, %v1907_v53  ;;  %9149 = vmatpush3.bf16.msra.mxu1 %v10318_v25  ;;  %v10327_v38 = vld [vmem:[%s12626_s3 + $0xc8] sm:$0xff]  }
 0x193   :  { %v1451_v47 = vadd.f32 %v11373_v39, %v9982_v45  ;;  %7046 = vmatprep.mubr.bf16.mxu0 %v10290_v42  ;;  %v1906_v3 = vmax.f32 %v1430_v50, 0.0  ;;  %9150 = vmatprep.subr.bf16.mxu1 %v10319_v30  ;;  %v10328_v42 = vld [vmem:[%s12626_s3 + $0x88] sm:$0xff]  }
 0x194   :  { %v1442_v49 = vpop.f32.mrf.mxu0  ;;  %v10341_v25 = vld [vmem:[%s12626_s3 + $0x468] sm:$0xff]  }
 0x195   :  { %v1443_v51 = vadd.f32 %v11373_v39, %v1442_v49  ;;  %v1911_v57 = vmax.f32 %v1451_v47, 0.0  ;;  %v2026_v20 = vmax.f32 %v1906_v3, %v1908_v16  ;;  %v10344_v30 = vld [vmem:[%s12626_s3 + $0x428] sm:$0xff]  }
 0x196   :  { %v9983_v54 = vpop.f32.mrf.mxu0  ;;  %9151 = vmatpush3.bf16.msra.mxu1 %v10320_v32 }
 0x197   :  { %v1909_v59 = vmax.f32 %v1443_v51, 0.0  ;;  %v1454_v60 = vadd.f32 %v11373_v39, %v9983_v54  ;;  %9152 = vmatprep.subr.bf16.mxu1 %v10327_v38 }
 0x198   :  { %v3324_v61 = vld [vmem:[#allocation2 + $0xb4] sm:$0xff]  ;;  %v1445_v63 = vpop.f32.mrf.mxu0 }
 0x199   :  { %v2484_v0 = vld [vmem:[#allocation2 + $0xb1] sm:$0xff]  ;;  %v8960_v2 = vpack.c.bf16 %v3324_v61, %v3324_v61  ;;  %v2073_v4 = vmax.f32 %v1909_v59, %v1911_v57  ;;  %v1446_v5 = vadd.f32 %v11373_v39, %v1445_v63  ;;  %v1912_v6 = vmax.f32 %v1454_v60, 0.0 }
 0x19a   :  { %v2764_v1 = vld [vmem:[#allocation2 + $0xb2] sm:$0xff]  ;;  %v9986_v10 = vpop.f32.mrf.mxu0  ;;  %7047 = vmatmul.mubr.bf16.gmra.mxu0 %v10288_v58  ;;  %v8828_v12 = vpack.c.bf16 %v2484_v0, %v2484_v0  ;;  %9153 = vmatpush3.bf16.msra.mxu1 %v10328_v42  ;;  %v10332_v58 = vld [vmem:[%s12626_s3 + $0xc0] sm:$0xff]  }
 0x19b   :  { %v3044_v9 = vld [vmem:[#allocation2 + $0xb3] sm:$0xff]  ;;  %v8872_v13 = vpack.c.bf16 %v2764_v1, %v2764_v1  ;;  %3584 = vst [vmem:[#allocation3 + $0x31c] sm:$0xf] %v8960_v2  ;;  %v2121_v17 = vmax.f32 %v2025_v62, %v2073_v4  ;;  %v1910_v18 = vmax.f32 %v1446_v5, 0.0  ;;  %7054 = vmatprep.mubr.bf16.mxu0 %v10293_v7  ;;  %v1467_v31 = vadd.f32 %v11373_v39, %v9986_v10  ;;  %v10333_v2 = vld [vmem:[%s12626_s3 + $0x80] sm:$0xff]  }
 0x19c   :  { %v8916_v14 = vpack.c.bf16 %v3044_v9, %v3044_v9  ;;  %v1458_v19 = vpop.f32.mrf.mxu0  ;;  %2744 = vst [vmem:[#allocation3 + $0x310] sm:$0xf] %v8828_v12  ;;  %9154 = vmatprep.subr.bf16.mxu1 %v10332_v58  ;;  %v10334_v9 = vld [vmem:[%s12626_s3 + $0x478] sm:$0xff]   ;;  %v10345_v42 = vld [vmem:[%s12626_s3 + $0x460] sm:$0xff]  }
 0x19d   :  { %3024 = vst [vmem:[#allocation3 + $0x314] sm:$0xf] %v8872_v13  ;;  %2169 = vst [vmem:[#allocation2 + $0xc0] sm:$0xff] %v2121_v17  ;;  %v2074_v21 = vmax.f32 %v1910_v18, %v1912_v6  ;;  %v8751_v22 = vpack.c.bf16 %v2121_v17, %v2121_v17  ;;  %v1459_v28 = vadd.f32 %v11373_v39, %v1458_v19  ;;  %v1915_v40 = vmax.f32 %v1467_v31, 0.0  ;;  %v10338_v17 = vld [vmem:[%s12626_s3 + $0x470] sm:$0xff]   ;;  %v10351_v58 = vld [vmem:[%s12626_s3 + $0x418] sm:$0xff]  }
 0x19e   :  { %3304 = vst [vmem:[#allocation3 + $0x318] sm:$0xf] %v8916_v14  ;;  %v9987_v24 = vpop.f32.mrf.mxu0  ;;  %9155 = vmatpush3.bf16.msra.mxu1 %v10333_v2  ;;  %9588 = vmatprep.subr.bf16.mxu0 %v10334_v9  ;;  %v10339_v18 = vld [vmem:[%s12626_s3 + $0x430] sm:$0xff]  }
 0x19f   :  { %v2122_v26 = vmax.f32 %v2026_v20, %v2074_v21  ;;  %2289 = vst [vmem:[#allocation3 + $0x320] sm:$0xf] %v8751_v22  ;;  %v1913_v34 = vmax.f32 %v1459_v28, 0.0  ;;  %v1470_v43 = vadd.f32 %v11373_v39, %v9987_v24  ;;  %9589 = vmatpush3.bf16.msra.mxu0 %v10337_v11  ;;  %v10352_v2 = vld [vmem:[%s12626_s3 + $0x450] sm:$0xff]  }
 0x1a0   :  { %v1461_v29 = vpop.f32.mrf.mxu0  ;;  %9590 = vmatprep.subr.bf16.mxu0 %v10338_v17 }
 0x1a1   :  { %2170 = vst [vmem:[#allocation2 + $0xc8] sm:$0xff] %v2122_v26  ;;  %v1462_v36 = vadd.f32 %v11373_v39, %v1461_v29  ;;  %v2027_v47 = vmax.f32 %v1913_v34, %v1915_v40  ;;  %v1916_v62 = vmax.f32 %v1470_v43, 0.0 }
 0x1a2   :  { %v9990_v15 = vpop.f32.mrf.mxu0  ;;  %7055 = vmatmul.mubr.bf16.gmra.mxu0 %v10291_v27 }
 0x1a3   :  { %v1483_v33 = vadd.f32 %v11373_v39, %v9990_v15  ;;  %v1914_v52 = vmax.f32 %v1462_v36, 0.0  ;;  %9591 = vmatpush3.bf16.msra.mxu0 %v10339_v18 }
 0x1a4   :  { %v1474_v35 = vpop.f32.mrf.mxu0  ;;  %9592 = vmatprep.subr.bf16.mxu0 %v10341_v25 }
 0x1a5   :  { %v1475_v37 = vadd.f32 %v11373_v39, %v1474_v35  ;;  %v1919_v44 = vmax.f32 %v1483_v33, 0.0  ;;  %v2028_v4 = vmax.f32 %v1914_v52, %v1916_v62 }
 0x1a6   :  { %v9991_v41 = vpop.f32.mrf.mxu0 }
 0x1a7   :  { %v1917_v45 = vmax.f32 %v1475_v37, 0.0  ;;  %v1486_v46 = vadd.f32 %v11373_v39, %v9991_v41  ;;  %9593 = vmatpush3.bf16.msra.mxu0 %v10344_v30 }
 0x1a8   :  { %v1477_v48 = vpop.f32.mrf.mxu0  ;;  %v2485_v49 = vld [vmem:[#allocation2 + $0xc1] sm:$0xff]  ;;  %9594 = vmatprep.subr.bf16.mxu0 %v10345_v42 }
 0x1a9   :  { %v2765_v50 = vld [vmem:[#allocation2 + $0xc2] sm:$0xff]  ;;  %v2075_v53 = vmax.f32 %v1917_v45, %v1919_v44  ;;  %v1478_v54 = vadd.f32 %v11373_v39, %v1477_v48  ;;  %v8795_v55 = vpack.c.bf16 %v2485_v49, %v2485_v49  ;;  %v1920_v0 = vmax.f32 %v1486_v46, 0.0 }
 0x1aa   :  { %v3045_v51 = vld [vmem:[#allocation2 + $0xc3] sm:$0xff]  ;;  %v9994_v57 = vpop.f32.mrf.mxu0  ;;  %v8839_v59 = vpack.c.bf16 %v2765_v50, %v2765_v50 }
 0x1ab   :  { %v3325_v56 = vld [vmem:[#allocation2 + $0xc4] sm:$0xff]  ;;  %v8883_v60 = vpack.c.bf16 %v3045_v51, %v3045_v51  ;;  %v2123_v63 = vmax.f32 %v2027_v47, %v2075_v53  ;;  %v1918_v1 = vmax.f32 %v1478_v54, 0.0  ;;  %2569 = vst [vmem:[#allocation3 + $0x324] sm:$0xf] %v8795_v55  ;;  %v1499_v14 = vadd.f32 %v11373_v39, %v9994_v57 }
 0x1ac   :  { %v8927_v61 = vpack.c.bf16 %v3325_v56, %v3325_v56  ;;  %v1490_v3 = vpop.f32.mrf.mxu0  ;;  %2849 = vst [vmem:[#allocation3 + $0x328] sm:$0xf] %v8839_v59  ;;  %v10346_v50 = vld [vmem:[%s12626_s3 + $0x420] sm:$0xff]   ;;  %v10348_v56 = vld [vmem:[%s12626_s3 + $0x458] sm:$0xff]  }
 0x1ad   :  { %3129 = vst [vmem:[#allocation3 + $0x32c] sm:$0xf] %v8883_v60  ;;  %2171 = vst [vmem:[#allocation2 + $0xd0] sm:$0xff] %v2123_v63  ;;  %v8752_v5 = vpack.c.bf16 %v2123_v63, %v2123_v63  ;;  %v2076_v7 = vmax.f32 %v1918_v1, %v1920_v0  ;;  %v1491_v12 = vadd.f32 %v11373_v39, %v1490_v3  ;;  %v1923_v23 = vmax.f32 %v1499_v14, 0.0  ;;  %v10353_v3 = vld [vmem:[%s12626_s3 + $0x410] sm:$0xff]  }
 0x1ae   :  { %3409 = vst [vmem:[#allocation3 + $0x330] sm:$0xf] %v8927_v61  ;;  %v9995_v8 = vpop.f32.mrf.mxu0  ;;  %9595 = vmatpush3.bf16.msra.mxu0 %v10346_v50 }
 0x1af   :  { %2290 = vst [vmem:[#allocation3 + $0x384] sm:$0xf] %v8752_v5  ;;  %2369 = vst [vmem:[#allocation3 + $0x334] sm:$0xf] %v8752_v5  ;;  %v2124_v10 = vmax.f32 %v2028_v4, %v2076_v7  ;;  %v1921_v19 = vmax.f32 %v1491_v12, 0.0  ;;  %v1502_v26 = vadd.f32 %v11373_v39, %v9995_v8  ;;  %9596 = vmatprep.subr.bf16.mxu0 %v10348_v56  ;;  %v10358_v12 = vld [vmem:[%s12626_s3 + $0x448] sm:$0xff]  }
 0x1b0   :  { %v1493_v13 = vpop.f32.mrf.mxu0 }
 0x1b1   :  { %2172 = vst [vmem:[#allocation2 + $0xd8] sm:$0xff] %v2124_v10  ;;  %v1494_v21 = vadd.f32 %v11373_v39, %v1493_v13  ;;  %v2029_v33 = vmax.f32 %v1921_v19, %v1923_v23  ;;  %v1924_v46 = vmax.f32 %v1502_v26, 0.0 }
 0x1b2   :  { %v9998_v16 = vpop.f32.mrf.mxu0  ;;  %9597 = vmatpush3.bf16.msra.mxu0 %v10351_v58 }
 0x1b3   :  { %v1515_v6 = vadd.f32 %v11373_v39, %v9998_v16  ;;  %v1922_v36 = vmax.f32 %v1494_v21, 0.0  ;;  %9598 = vmatprep.subr.bf16.mxu0 %v10352_v2  ;;  %v10361_v16 = vld [vmem:[%s12626_s3 + $0x408] sm:$0xff]  }
 0x1b4   :  { %v1506_v20 = vpop.f32.mrf.mxu0 }
 0x1b5   :  { %v1507_v22 = vadd.f32 %v11373_v39, %v1506_v20  ;;  %v1927_v27 = vmax.f32 %v1515_v6, 0.0  ;;  %v2030_v52 = vmax.f32 %v1922_v36, %v1924_v46 }
 0x1b6   :  { %v9999_v24 = vpop.f32.mrf.mxu0  ;;  %v10296_v0 = vld [vmem:[#allocation3 + $0x320] ss:$100 sps:$4 sm:$0xff]   ;;  %9599 = vmatpush3.bf16.msra.mxu0 %v10353_v3 }
 0x1b7   :  { %v1925_v28 = vmax.f32 %v1507_v22, 0.0  ;;  %v1518_v29 = vadd.f32 %v11373_v39, %v9999_v24  ;;  %9600 = vmatprep.subr.bf16.mxu0 %v10358_v12 }
 0x1b8   :  { %v2486_v31 = vld [vmem:[#allocation2 + $0xd1] sm:$0xff]  ;;  %v1509_v34 = vpop.f32.mrf.mxu0 }
 0x1b9   :  { %v2766_v15 = vld [vmem:[#allocation2 + $0xd2] sm:$0xff]  ;;  %v2077_v37 = vmax.f32 %v1925_v28, %v1927_v27  ;;  %v1510_v38 = vadd.f32 %v11373_v39, %v1509_v34  ;;  %v8796_v40 = vpack.c.bf16 %v2486_v31, %v2486_v31  ;;  %v1928_v48 = vmax.f32 %v1518_v29, 0.0  ;;  %v10365_v34 = vld [vmem:[%s12626_s3 + $0x440] sm:$0xff]  }
 0x1ba   :  { %v3046_v32 = vld [vmem:[#allocation2 + $0xd3] sm:$0xff]  ;;  %v10002_v41 = vpop.f32.mrf.mxu0  ;;  %v8840_v43 = vpack.c.bf16 %v2766_v15, %v2766_v15  ;;  %9601 = vmatpush3.bf16.msra.mxu0 %v10361_v16 }
 0x1bb   :  { %v3326_v35 = vld [vmem:[#allocation2 + $0xd4] sm:$0xff]  ;;  %v8884_v44 = vpack.c.bf16 %v3046_v32, %v3046_v32  ;;  %v2125_v47 = vmax.f32 %v2029_v33, %v2077_v37  ;;  %v1926_v49 = vmax.f32 %v1510_v38, 0.0  ;;  %2570 = vst [vmem:[#allocation3 + $0x388] sm:$0xf] %v8796_v40  ;;  %2649 = vst [vmem:[#allocation3 + $0x338] sm:$0xf] %v8796_v40  ;;  %v1531_v61 = vadd.f32 %v11373_v39, %v10002_v41 }
 0x1bc   :  { %v8928_v45 = vpack.c.bf16 %v3326_v35, %v3326_v35  ;;  %v1522_v51 = vpop.f32.mrf.mxu0  ;;  %2850 = vst [vmem:[#allocation3 + $0x38c] sm:$0xf] %v8840_v43  ;;  %2929 = vst [vmem:[#allocation3 + $0x33c] sm:$0xf] %v8840_v43  ;;  %v10366_v40 = vld [vmem:[%s12626_s3 + $0x400] sm:$0xff]   ;;  %9602 = vmatprep.subr.bf16.mxu0 %v10365_v34 }
 0x1bd   :  { %3130 = vst [vmem:[#allocation3 + $0x390] sm:$0xf] %v8884_v44  ;;  %3209 = vst [vmem:[#allocation3 + $0x340] sm:$0xf] %v8884_v44  ;;  %v8753_v53 = vpack.c.bf16 %v2125_v47, %v2125_v47  ;;  %v2078_v54 = vmax.f32 %v1926_v49, %v1928_v48  ;;  %v1523_v59 = vadd.f32 %v11373_v39, %v1522_v51  ;;  %v1931_v8 = vmax.f32 %v1531_v61, 0.0 }
 0x1be   :  { %3410 = vst [vmem:[#allocation3 + $0x394] sm:$0xf] %v8928_v45  ;;  %3489 = vst [vmem:[#allocation3 + $0x344] sm:$0xf] %v8928_v45  ;;  %v10003_v55 = vpop.f32.mrf.mxu0  ;;  %9603 = vmatpush3.bf16.msra.mxu0 %v10366_v40  ;;  %v10368_v45 = vld [vmem:[%s12626_s3 + $0x178] sm:$0xff]  }
 0x1bf   :  { %2173 = vst [vmem:[#allocation2 + $0xe0] sm:$0xff] %v2125_v47  ;;  %2291 = vst [vmem:[#allocation3 + $0x3e8] sm:$0xf] %v8753_v53  ;;  %v2126_v57 = vmax.f32 %v2030_v52, %v2078_v54  ;;  %v1929_v4 = vmax.f32 %v1523_v59, 0.0  ;;  %v1534_v20 = vadd.f32 %v11373_v39, %v10003_v55  ;;  %9204 = vmatprep.subr.bf16.mxu1 %v10368_v45 }
 0x1c0   :  { %2370 = vst [vmem:[#allocation3 + $0x398] sm:$0xf] %v8753_v53  ;;  %2401 = vst [vmem:[#allocation3 + $0x348] sm:$0xf] %v8753_v53  ;;  %v1525_v60 = vpop.f32.mrf.mxu0 }
 0x1c1   :  { %2174 = vst [vmem:[#allocation2 + $0xe8] sm:$0xff] %v2126_v57  ;;  %v1526_v9 = vadd.f32 %v11373_v39, %v1525_v60  ;;  %v2031_v19 = vmax.f32 %v1929_v4, %v1931_v8  ;;  %v1932_v35 = vmax.f32 %v1534_v20, 0.0 }
 0x1c2   :  { %v10006_v62 = vpop.f32.mrf.mxu0  ;;  %v10294_v63 = vld [vmem:[#allocation3 + $0x324] ss:$100 sps:$4 sm:$0xff]  }
 0x1c3   :  { %v1547_v1 = vadd.f32 %v11373_v39, %v10006_v62  ;;  %6480 = vmatprep.mubr.bf16.mxu1 %v10294_v63  ;;  %v1930_v30 = vmax.f32 %v1526_v9, 0.0 }
 0x1c4   :  { %v1538_v5 = vpop.f32.mrf.mxu0  ;;  %6481 = vmatmul.mubr.bf16.gmra.mxu1 %v10296_v0 }
 0x1c5   :  { %v1539_v7 = vadd.f32 %v11373_v39, %v1538_v5  ;;  %v1935_v13 = vmax.f32 %v1547_v1, 0.0  ;;  %v2032_v42 = vmax.f32 %v1930_v30, %v1932_v35 }
 0x1c6   :  { %v10007_v10 = vpop.f32.mrf.mxu0 }
 0x1c7   :  { %v9092_v11 = vpop.f32.mrf.mxu1  ;;  %v1933_v14 = vmax.f32 %v1539_v7, 0.0  ;;  %v1550_v21 = vadd.f32 %v11373_v39, %v10007_v10 }
 0x1c8   :  { %v2487_v17 = vld [vmem:[#allocation2 + $0xe1] sm:$0xff]  ;;  %v1541_v22 = vpop.f32.mrf.mxu0 }
 0x1c9   :  { %v2767_v6 = vld [vmem:[#allocation2 + $0xe2] sm:$0xff]  ;;  %v9093_v23 = vpop.f32.mrf.mxu1  ;;  %v8797_v24 = vpack.c.bf16 %v2487_v17, %v2487_v17  ;;  %v2079_v28 = vmax.f32 %v1933_v14, %v1935_v13  ;;  %v1542_v31 = vadd.f32 %v11373_v39, %v1541_v22  ;;  %v1936_v36 = vmax.f32 %v1550_v21, 0.0 }
 0x1ca   :  { %v3047_v18 = vld [vmem:[#allocation2 + $0xe3] sm:$0xff]  ;;  %v8841_v25 = vpack.c.bf16 %v2767_v6, %v2767_v6  ;;  %v11491_v15 = vadd.f32 %v9093_v23, %v9092_v11  ;;  %v10010_v32 = vpop.f32.mrf.mxu0 }
 0x1cb   :  { %v8885_v26 = vpack.c.bf16 %v3047_v18, %v3047_v18  ;;  %v3327_v27 = vld [vmem:[#allocation2 + $0xe4] sm:$0xff]  ;;  %2571 = vst [vmem:[#allocation3 + $0x3ec] sm:$0xf] %v8797_v24  ;;  %2650 = vst [vmem:[#allocation3 + $0x39c] sm:$0xf] %v8797_v24  ;;  %v2127_v33 = vmax.f32 %v2031_v19, %v2079_v28  ;;  %v1934_v37 = vmax.f32 %v1542_v31, 0.0  ;;  %v1563_v50 = vadd.f32 %v11373_v39, %v10010_v32 }
 0x1cc   :  { %v8929_v29 = vpack.c.bf16 %v3327_v27, %v3327_v27  ;;  %2681 = vst [vmem:[#allocation3 + $0x34c] sm:$0xf] %v8797_v24  ;;  %2851 = vst [vmem:[#allocation3 + $0x3f0] sm:$0xf] %v8841_v25  ;;  %v1554_v38 = vpop.f32.mrf.mxu0  ;;  %v11511_v24 = vpop.f32.mrf.mxu1 }
 0x1cd   :  { %2930 = vst [vmem:[#allocation3 + $0x3a0] sm:$0xf] %v8841_v25  ;;  %2961 = vst [vmem:[#allocation3 + $0x350] sm:$0xf] %v8841_v25  ;;  %v8754_v41 = vpack.c.bf16 %v2127_v33, %v2127_v33  ;;  %v2080_v43 = vmax.f32 %v1934_v37, %v1936_v36  ;;  %v1555_v48 = vadd.f32 %v11373_v39, %v1554_v38  ;;  %v1939_v58 = vmax.f32 %v1563_v50, 0.0 }
 0x1ce   :  { %3131 = vst [vmem:[#allocation3 + $0x3f4] sm:$0xf] %v8885_v26  ;;  %3210 = vst [vmem:[#allocation3 + $0x3a4] sm:$0xf] %v8885_v26  ;;  %v10011_v44 = vpop.f32.mrf.mxu0  ;;  %v11515_v31 = vpop.f32.mrf.mxu1 }
 0x1cf   :  { %3241 = vst [vmem:[#allocation3 + $0x354] sm:$0xf] %v8885_v26  ;;  %3411 = vst [vmem:[#allocation3 + $0x3f8] sm:$0xf] %v8929_v29  ;;  %v2128_v46 = vmax.f32 %v2032_v42, %v2080_v43  ;;  %v1937_v53 = vmax.f32 %v1555_v48, 0.0  ;;  %v1566_v56 = vadd.f32 %v11373_v39, %v10011_v44 }
 0x1d0   :  { %3490 = vst [vmem:[#allocation3 + $0x3a8] sm:$0xf] %v8929_v29  ;;  %3521 = vst [vmem:[#allocation3 + $0x358] sm:$0xf] %v8929_v29  ;;  %v1557_v47 = vpop.f32.mrf.mxu0 }
 0x1d1   :  { %2175 = vst [vmem:[#allocation2 + $0xf0] sm:$0xff] %v2127_v33  ;;  %2292 = vst [vmem:[#allocation3 + $0x44c] sm:$0xf] %v8754_v41  ;;  %v1558_v54 = vadd.f32 %v11373_v39, %v1557_v47  ;;  %v2033_v2 = vmax.f32 %v1937_v53, %v1939_v58  ;;  %v1940_v11 = vmax.f32 %v1566_v56, 0.0 }
 0x1d2   :  { %2371 = vst [vmem:[#allocation3 + $0x3fc] sm:$0xf] %v8754_v41  ;;  %2402 = vst [vmem:[#allocation3 + $0x3ac] sm:$0xf] %v8754_v41  ;;  %v10014_v49 = vpop.f32.mrf.mxu0 }
 0x1d3   :  { %2433 = vst [vmem:[#allocation3 + $0x35c] sm:$0xf] %v8754_v41  ;;  %2176 = vst [vmem:[#allocation2 + $0xf8] sm:$0xff] %v2128_v46  ;;  %v1579_v51 = vadd.f32 %v11373_v39, %v10014_v49  ;;  %v1938_v3 = vmax.f32 %v1558_v54, 0.0 }
 0x1d4   :  { %v1570_v52 = vpop.f32.mrf.mxu0 }
 0x1d5   :  { %v1571_v55 = vadd.f32 %v11373_v39, %v1570_v52  ;;  %v1943_v59 = vmax.f32 %v1579_v51, 0.0  ;;  %v2034_v18 = vmax.f32 %v1938_v3, %v1940_v11 }
 0x1d6   :  { %v10015_v57 = vpop.f32.mrf.mxu0 }
 0x1d7   :  { %v1941_v60 = vmax.f32 %v1571_v55, 0.0  ;;  %v1582_v61 = vadd.f32 %v11373_v39, %v10015_v57 }
 0x1d8   :  { %v1573_v62 = vpop.f32.mrf.mxu0  ;;  %v10302_v35 = vld [vmem:[#allocation3 + $0x3e8] ss:$100 sps:$4 sm:$0xff]  }
 0x1d9   :  { %v2081_v4 = vmax.f32 %v1941_v60, %v1943_v59  ;;  %v1574_v5 = vadd.f32 %v11373_v39, %v1573_v62  ;;  %v1944_v16 = vmax.f32 %v1582_v61, 0.0 }
 0x1da   :  { %v2488_v63 = vld [vmem:[#allocation2 + $0xf1] sm:$0xff]  ;;  %v10018_v12 = vpop.f32.mrf.mxu0 }
 0x1db   :  { %v2768_v0 = vld [vmem:[#allocation2 + $0xf2] sm:$0xff]  ;;  %v8798_v7 = vpack.c.bf16 %v2488_v63, %v2488_v63  ;;  %v2129_v14 = vmax.f32 %v2033_v2, %v2081_v4  ;;  %v1942_v17 = vmax.f32 %v1574_v5, 0.0  ;;  %v1595_v26 = vadd.f32 %v11373_v39, %v10018_v12 }
 0x1dc   :  { %v3048_v1 = vld [vmem:[#allocation2 + $0xf3] sm:$0xff]  ;;  %v8842_v8 = vpack.c.bf16 %v2768_v0, %v2768_v0  ;;  %v1586_v6 = vpop.f32.mrf.mxu0 }
 0x1dd   :  { %v8886_v9 = vpack.c.bf16 %v3048_v1, %v3048_v1  ;;  %v3328_v10 = vld [vmem:[#allocation2 + $0xf4] sm:$0xff]  ;;  %2572 = vst [vmem:[#allocation3 + $0x450] sm:$0xf] %v8798_v7  ;;  %2651 = vst [vmem:[#allocation3 + $0x400] sm:$0xf] %v8798_v7  ;;  %v8755_v19 = vpack.c.bf16 %v2129_v14, %v2129_v14  ;;  %v2082_v20 = vmax.f32 %v1942_v17, %v1944_v16  ;;  %v1947_v37 = vmax.f32 %v1595_v26, 0.0 }
 0x1de   :  { %v8930_v13 = vpack.c.bf16 %v3328_v10, %v3328_v10  ;;  %2682 = vst [vmem:[#allocation3 + $0x3b0] sm:$0xf] %v8798_v7  ;;  %2713 = vst [vmem:[#allocation3 + $0x360] sm:$0xf] %v8798_v7  ;;  %v10019_v21 = vpop.f32.mrf.mxu0  ;;  %v1587_v23 = vadd.f32 %v11373_v39, %v1586_v6 }
 0x1df   :  { %2852 = vst [vmem:[#allocation3 + $0x454] sm:$0xf] %v8842_v8  ;;  %2931 = vst [vmem:[#allocation3 + $0x404] sm:$0xf] %v8842_v8  ;;  %v2130_v22 = vmax.f32 %v2034_v18, %v2082_v20  ;;  %v1598_v48 = vadd.f32 %v11373_v39, %v10019_v21 }
 0x1e0   :  { %2962 = vst [vmem:[#allocation3 + $0x3b4] sm:$0xf] %v8842_v8  ;;  %2993 = vst [vmem:[#allocation3 + $0x364] sm:$0xf] %v8842_v8  ;;  %v1589_v25 = vpop.f32.mrf.mxu0  ;;  %v1945_v28 = vmax.f32 %v1587_v23, 0.0  ;;  %v10408_v8 = vld [vmem:[%s12626_s3 + $0x578] sm:$0xff]  }
 0x1e1   :  { %3132 = vst [vmem:[#allocation3 + $0x458] sm:$0xf] %v8886_v9  ;;  %3211 = vst [vmem:[#allocation3 + $0x408] sm:$0xf] %v8886_v9  ;;  %v1590_v38 = vadd.f32 %v11373_v39, %v1589_v25  ;;  %v1948_v63 = vmax.f32 %v1598_v48, 0.0  ;;  %9716 = vmatprep.subr.bf16.mxu0 %v10408_v8 }
 0x1e2   :  { %3242 = vst [vmem:[#allocation3 + $0x3b8] sm:$0xf] %v8886_v9  ;;  %3273 = vst [vmem:[#allocation3 + $0x368] sm:$0xf] %v8886_v9  ;;  %v10022_v27 = vpop.f32.mrf.mxu0  ;;  %v2035_v47 = vmax.f32 %v1945_v28, %v1947_v37 }
 0x1e3   :  { %3412 = vst [vmem:[#allocation3 + $0x45c] sm:$0xf] %v8930_v13  ;;  %3491 = vst [vmem:[#allocation3 + $0x40c] sm:$0xf] %v8930_v13  ;;  %v1611_v29 = vadd.f32 %v11373_v39, %v10022_v27  ;;  %v1946_v58 = vmax.f32 %v1590_v38, 0.0 }
 0x1e4   :  { %3522 = vst [vmem:[#allocation3 + $0x3bc] sm:$0xf] %v8930_v13  ;;  %3553 = vst [vmem:[#allocation3 + $0x36c] sm:$0xf] %v8930_v13  ;;  %v10297_v30 = vld [vmem:[#allocation3 + $0x3ec] ss:$100 sps:$4 sm:$0xff]   ;;  %v1602_v32 = vpop.f32.mrf.mxu0 }
 0x1e5   :  { %2177 = vst [vmem:[#allocation2 + $0x100] sm:$0xff] %v2129_v14  ;;  %2293 = vst [vmem:[#allocation3 + $0x4b0] sm:$0xf] %v8755_v19  ;;  %v1603_v36 = vadd.f32 %v11373_v39, %v1602_v32  ;;  %6488 = vmatprep.mubr.bf16.mxu1 %v10297_v30  ;;  %v1951_v42 = vmax.f32 %v1611_v29, 0.0  ;;  %v2036_v4 = vmax.f32 %v1946_v58, %v1948_v63 }
 0x1e6   :  { %2372 = vst [vmem:[#allocation3 + $0x460] sm:$0xf] %v8755_v19  ;;  %2403 = vst [vmem:[#allocation3 + $0x410] sm:$0xf] %v8755_v19  ;;  %v10023_v40 = vpop.f32.mrf.mxu0  ;;  %v9098_v41 = vpop.f32.mrf.mxu1  ;;  %6489 = vmatmul.mubr.bf16.gmra.mxu1 %v10302_v35 }
 0x1e7   :  { %2434 = vst [vmem:[#allocation3 + $0x3c0] sm:$0xf] %v8755_v19  ;;  %2465 = vst [vmem:[#allocation3 + $0x370] sm:$0xf] %v8755_v19  ;;  %v10299_v33 = vld [vmem:[#allocation3 + $0x350] ss:$100 sps:$4 sm:$0xff]   ;;  %v1614_v49 = vadd.f32 %v11373_v39, %v10023_v40 }
 0x1e8   :  { %2178 = vst [vmem:[#allocation2 + $0x108] sm:$0xff] %v2130_v22  ;;  %v1949_v43 = vmax.f32 %v1603_v36, 0.0  ;;  %v1605_v50 = vpop.f32.mrf.mxu0  ;;  %v9099_v51 = vpop.f32.mrf.mxu1 }
 0x1e9   :  { %v10301_v34 = vld [vmem:[#allocation3 + $0x354] ss:$100 sps:$4 sm:$0xff]   ;;  %v1606_v59 = vadd.f32 %v11373_v39, %v1605_v50  ;;  %v11522_v60 = vadd.f32 %v9099_v51, %v9098_v41  ;;  %v1952_v0 = vmax.f32 %v1614_v49, 0.0  ;;  %v11538_v51 = vld [vmem:[%s12627_s2] ss:$0 sm:$0xff] }
 0x1ea   :  { %7062 = vmatprep.mubr.bf16.mxu0 %v10301_v34  ;;  %v2083_v56 = vmax.f32 %v1949_v43, %v1951_v42  ;;  %v10026_v61 = vpop.f32.mrf.mxu0 }
 0x1eb   :  { %7063 = vmatmul.mubr.bf16.gmra.mxu0 %v10299_v33  ;;  %v1950_v1 = vmax.f32 %v1606_v59, 0.0  ;;  %v1627_v13 = vadd.f32 %v11373_v39, %v10026_v61 }
 0x1ec   :  { %v2131_v62 = vmax.f32 %v2035_v47, %v2083_v56  ;;  %v1618_v2 = vpop.f32.mrf.mxu0 }
 0x1ed   :  { %v2084_v5 = vmax.f32 %v1950_v1, %v1952_v0  ;;  %v1619_v11 = vadd.f32 %v11373_v39, %v1618_v2  ;;  %v1955_v21 = vmax.f32 %v1627_v13, 0.0 }
 0x1ee   :  { %2179 = vst [vmem:[#allocation2 + $0x110] sm:$0xff] %v2131_v62  ;;  %v8756_v3 = vpack.c.bf16 %v2131_v62, %v2131_v62  ;;  %v10027_v7 = vpop.f32.mrf.mxu0 }
 0x1ef   :  { %v2489_v44 = vld [vmem:[#allocation2 + $0x101] sm:$0xff]  ;;  %v2132_v9 = vmax.f32 %v2036_v4, %v2084_v5  ;;  %v1953_v17 = vmax.f32 %v1619_v11, 0.0  ;;  %v1630_v19 = vadd.f32 %v11373_v39, %v10027_v7 }
 0x1f0   :  { %v2769_v45 = vld [vmem:[#allocation2 + $0x102] sm:$0xff]  ;;  %v8799_v52 = vpack.c.bf16 %v2489_v44, %v2489_v44  ;;  %2294 = vst [vmem:[#allocation3 + $0x514] sm:$0xf] %v8756_v3  ;;  %2373 = vst [vmem:[#allocation3 + $0x4c4] sm:$0xf] %v8756_v3  ;;  %v1621_v10 = vpop.f32.mrf.mxu0 }
 0x1f1   :  { %v3049_v46 = vld [vmem:[#allocation2 + $0x103] sm:$0xff]  ;;  %v8843_v53 = vpack.c.bf16 %v2769_v45, %v2769_v45  ;;  %2404 = vst [vmem:[#allocation3 + $0x474] sm:$0xf] %v8756_v3  ;;  %2435 = vst [vmem:[#allocation3 + $0x424] sm:$0xf] %v8756_v3  ;;  %v1622_v6 = vadd.f32 %v11373_v39, %v1621_v10  ;;  %v2037_v30 = vmax.f32 %v1953_v17, %v1955_v21  ;;  %v1956_v40 = vmax.f32 %v1630_v19, 0.0 }
 0x1f2   :  { %v8887_v54 = vpack.c.bf16 %v3049_v46, %v3049_v46  ;;  %v3329_v55 = vld [vmem:[#allocation2 + $0x104] sm:$0xff]  ;;  %2573 = vst [vmem:[#allocation3 + $0x4b4] sm:$0xf] %v8799_v52  ;;  %2652 = vst [vmem:[#allocation3 + $0x464] sm:$0xf] %v8799_v52  ;;  %v10030_v12 = vpop.f32.mrf.mxu0 }
 0x1f3   :  { %v8931_v57 = vpack.c.bf16 %v3329_v55, %v3329_v55  ;;  %2683 = vst [vmem:[#allocation3 + $0x414] sm:$0xf] %v8799_v52  ;;  %2714 = vst [vmem:[#allocation3 + $0x3c4] sm:$0xf] %v8799_v52  ;;  %v1643_v14 = vadd.f32 %v11373_v39, %v10030_v12  ;;  %v1954_v32 = vmax.f32 %v1622_v6, 0.0 }
 0x1f4   :  { %2745 = vst [vmem:[#allocation3 + $0x374] sm:$0xf] %v8799_v52  ;;  %2853 = vst [vmem:[#allocation3 + $0x4b8] sm:$0xf] %v8843_v53  ;;  %v1634_v16 = vpop.f32.mrf.mxu0 }
 0x1f5   :  { %2932 = vst [vmem:[#allocation3 + $0x468] sm:$0xf] %v8843_v53  ;;  %2963 = vst [vmem:[#allocation3 + $0x418] sm:$0xf] %v8843_v53  ;;  %v1635_v18 = vadd.f32 %v11373_v39, %v1634_v16  ;;  %v1959_v22 = vmax.f32 %v1643_v14, 0.0  ;;  %v2038_v46 = vmax.f32 %v1954_v32, %v1956_v40 }
 0x1f6   :  { %2994 = vst [vmem:[#allocation3 + $0x3c8] sm:$0xf] %v8843_v53  ;;  %3025 = vst [vmem:[#allocation3 + $0x378] sm:$0xf] %v8843_v53  ;;  %v10031_v20 = vpop.f32.mrf.mxu0  ;;  %v11541_v53 = vpop.f32.mrf.mxu1 }
 0x1f7   :  { %3133 = vst [vmem:[#allocation3 + $0x4bc] sm:$0xf] %v8887_v54  ;;  %3212 = vst [vmem:[#allocation3 + $0x46c] sm:$0xf] %v8887_v54  ;;  %v1957_v23 = vmax.f32 %v1635_v18, 0.0  ;;  %v1646_v25 = vadd.f32 %v11373_v39, %v10031_v20 }
 0x1f8   :  { %3243 = vst [vmem:[#allocation3 + $0x41c] sm:$0xf] %v8887_v54  ;;  %3274 = vst [vmem:[#allocation3 + $0x3cc] sm:$0xf] %v8887_v54  ;;  %v1637_v26 = vpop.f32.mrf.mxu0  ;;  %v11545_v61 = vpop.f32.mrf.mxu1  ;;  %v10308_v1 = vld [vmem:[#allocation3 + $0x4b0] ss:$100 sps:$4 sm:$0xff]  }
 0x1f9   :  { %3305 = vst [vmem:[#allocation3 + $0x37c] sm:$0xf] %v8887_v54  ;;  %3413 = vst [vmem:[#allocation3 + $0x4c0] sm:$0xf] %v8931_v57  ;;  %v2085_v33 = vmax.f32 %v1957_v23, %v1959_v22  ;;  %v1638_v34 = vadd.f32 %v11373_v39, %v1637_v26  ;;  %v1960_v44 = vmax.f32 %v1646_v25, 0.0 }
 0x1fa   :  { %3492 = vst [vmem:[#allocation3 + $0x470] sm:$0xf] %v8931_v57  ;;  %3523 = vst [vmem:[#allocation3 + $0x420] sm:$0xf] %v8931_v57  ;;  %v10034_v41 = vpop.f32.mrf.mxu0 }
 0x1fb   :  { %3554 = vst [vmem:[#allocation3 + $0x3d0] sm:$0xf] %v8931_v57  ;;  %3585 = vst [vmem:[#allocation3 + $0x380] sm:$0xf] %v8931_v57  ;;  %v2133_v43 = vmax.f32 %v2037_v30, %v2085_v33  ;;  %v1958_v45 = vmax.f32 %v1638_v34, 0.0  ;;  %v1659_v55 = vadd.f32 %v11538_v51, %v10034_v41 }
 0x1fc   :  { %2466 = vst [vmem:[#allocation3 + $0x3d4] sm:$0xf] %v8756_v3  ;;  %2180 = vst [vmem:[#allocation2 + $0x118] sm:$0xff] %v2132_v9  ;;  %v1650_v39 = vpop.f32.mrf.mxu0 }
 0x1fd   :  { %2181 = vst [vmem:[#allocation2 + $0x120] sm:$0xff] %v2133_v43  ;;  %v8757_v47 = vpack.c.bf16 %v2133_v43, %v2133_v43  ;;  %v2086_v48 = vmax.f32 %v1958_v45, %v1960_v44  ;;  %v1651_v52 = vadd.f32 %v11538_v51, %v1650_v39  ;;  %v1963_v3 = vmax.f32 %v1659_v55, 0.0 }
 0x1fe   :  { %v10035_v49 = vpop.f32.mrf.mxu0 }
 0x1ff   :  { %2295 = vst [vmem:[#allocation3 + $0x578] sm:$0xf] %v8757_v47  ;;  %2374 = vst [vmem:[#allocation3 + $0x528] sm:$0xf] %v8757_v47  ;;  %v2134_v50 = vmax.f32 %v2038_v46, %v2086_v48  ;;  %v1961_v57 = vmax.f32 %v1651_v52, 0.0  ;;  %v1662_v14 = vadd.f32 %v11538_v51, %v10035_v49 }
 0x200   :  { %2405 = vst [vmem:[#allocation3 + $0x4d8] sm:$0xf] %v8757_v47  ;;  %2436 = vst [vmem:[#allocation3 + $0x488] sm:$0xf] %v8757_v47  ;;  %v1653_v54 = vpop.f32.mrf.mxu0 }
 0x201   :  { %2467 = vst [vmem:[#allocation3 + $0x438] sm:$0xf] %v8757_v47  ;;  %2182 = vst [vmem:[#allocation2 + $0x128] sm:$0xff] %v2134_v50  ;;  %v1654_v4 = vadd.f32 %v11538_v51, %v1653_v54  ;;  %v2039_v13 = vmax.f32 %v1961_v57, %v1963_v3  ;;  %v1964_v30 = vmax.f32 %v1662_v14, 0.0 }
 0x202   :  { %v10038_v56 = vpop.f32.mrf.mxu0 }
 0x203   :  { %v2490_v27 = vld [vmem:[#allocation2 + $0x111] sm:$0xff]  ;;  %v1675_v58 = vadd.f32 %v11538_v51, %v10038_v56  ;;  %v1962_v25 = vmax.f32 %v1654_v4, 0.0 }
 0x204   :  { %v2770_v28 = vld [vmem:[#allocation2 + $0x112] sm:$0xff]  ;;  %v8800_v35 = vpack.c.bf16 %v2490_v27, %v2490_v27  ;;  %v1666_v62 = vpop.f32.mrf.mxu0 }
 0x205   :  { %v3050_v29 = vld [vmem:[#allocation2 + $0x113] sm:$0xff]  ;;  %v8844_v36 = vpack.c.bf16 %v2770_v28, %v2770_v28  ;;  %v1667_v2 = vadd.f32 %v11538_v51, %v1666_v62  ;;  %v9104_v7 = vpop.f32.mrf.mxu1  ;;  %v1967_v8 = vmax.f32 %v1675_v58, 0.0 }
 0x206   :  { %v8888_v37 = vpack.c.bf16 %v3050_v29, %v3050_v29  ;;  %v3330_v38 = vld [vmem:[#allocation2 + $0x114] sm:$0xff]  ;;  %2574 = vst [vmem:[#allocation3 + $0x518] sm:$0xf] %v8800_v35  ;;  %2653 = vst [vmem:[#allocation3 + $0x4c8] sm:$0xf] %v8800_v35  ;;  %v10039_v5 = vpop.f32.mrf.mxu0 }
 0x207   :  { %v8932_v42 = vpack.c.bf16 %v3330_v38, %v3330_v38  ;;  %2684 = vst [vmem:[#allocation3 + $0x478] sm:$0xf] %v8800_v35  ;;  %2715 = vst [vmem:[#allocation3 + $0x428] sm:$0xf] %v8800_v35  ;;  %v1965_v9 = vmax.f32 %v1667_v2, 0.0  ;;  %v1678_v16 = vadd.f32 %v11538_v51, %v10039_v5  ;;  %v9105_v6 = vpop.f32.mrf.mxu1 }
 0x208   :  { %2746 = vst [vmem:[#allocation3 + $0x3d8] sm:$0xf] %v8800_v35  ;;  %2854 = vst [vmem:[#allocation3 + $0x51c] sm:$0xf] %v8844_v36  ;;  %v2491_v10 = vld [vmem:[#allocation2 + $0x121] sm:$0xff]  ;;  %v1669_v17 = vpop.f32.mrf.mxu0  ;;  %v11552_v27 = vadd.f32 %v9105_v6, %v9104_v7 }
 0x209   :  { %2933 = vst [vmem:[#allocation3 + $0x4cc] sm:$0xf] %v8844_v36  ;;  %2964 = vst [vmem:[#allocation3 + $0x47c] sm:$0xf] %v8844_v36  ;;  %v2771_v11 = vld [vmem:[#allocation2 + $0x122] sm:$0xff]  ;;  %v8801_v18 = vpack.c.bf16 %v2491_v10, %v2491_v10  ;;  %v2087_v22 = vmax.f32 %v1965_v9, %v1967_v8  ;;  %v1670_v26 = vadd.f32 %v11538_v51, %v1669_v17  ;;  %v1968_v32 = vmax.f32 %v1678_v16, 0.0 }
 0x20a   :  { %2995 = vst [vmem:[#allocation3 + $0x42c] sm:$0xf] %v8844_v36  ;;  %3026 = vst [vmem:[#allocation3 + $0x3dc] sm:$0xf] %v8844_v36  ;;  %v3051_v12 = vld [vmem:[#allocation2 + $0x123] sm:$0xff]  ;;  %v8845_v19 = vpack.c.bf16 %v2771_v11, %v2771_v11  ;;  %v10042_v28 = vpop.f32.mrf.mxu0  ;;  %v2040_v36 = vmax.f32 %v1962_v25, %v1964_v30 }
 0x20b   :  { %3134 = vst [vmem:[#allocation3 + $0x520] sm:$0xf] %v8888_v37  ;;  %3213 = vst [vmem:[#allocation3 + $0x4d0] sm:$0xf] %v8888_v37  ;;  %v8889_v20 = vpack.c.bf16 %v3051_v12, %v3051_v12  ;;  %v3331_v21 = vld [vmem:[#allocation2 + $0x124] sm:$0xff]  ;;  %v2135_v29 = vmax.f32 %v2039_v13, %v2087_v22  ;;  %v1966_v33 = vmax.f32 %v1670_v26, 0.0  ;;  %v1691_v38 = vadd.f32 %v11538_v51, %v10042_v28  ;;  %v11564_v22 = vpop.f32.mrf.mxu1 }
 0x20c   :  { %3244 = vst [vmem:[#allocation3 + $0x480] sm:$0xf] %v8888_v37  ;;  %3275 = vst [vmem:[#allocation3 + $0x430] sm:$0xf] %v8888_v37  ;;  %v8933_v23 = vpack.c.bf16 %v3331_v21, %v3331_v21  ;;  %v1682_v34 = vpop.f32.mrf.mxu0 }
 0x20d   :  { %3306 = vst [vmem:[#allocation3 + $0x3e0] sm:$0xf] %v8888_v37  ;;  %3414 = vst [vmem:[#allocation3 + $0x524] sm:$0xf] %v8932_v42  ;;  %v10303_v59 = vld [vmem:[#allocation3 + $0x4b4] ss:$100 sps:$4 sm:$0xff]   ;;  %v8758_v35 = vpack.c.bf16 %v2135_v29, %v2135_v29  ;;  %v2088_v37 = vmax.f32 %v1966_v33, %v1968_v32  ;;  %v1683_v40 = vadd.f32 %v11538_v51, %v1682_v34  ;;  %v11567_v32 = vpop.f32.mrf.mxu1 }
 0x20e   :  { %3493 = vst [vmem:[#allocation3 + $0x4d4] sm:$0xf] %v8932_v42  ;;  %3524 = vst [vmem:[#allocation3 + $0x484] sm:$0xf] %v8932_v42  ;;  %6496 = vmatprep.mubr.bf16.mxu1 %v10303_v59  ;;  %v10043_v41 = vpop.f32.mrf.mxu0  ;;  %v1971_v44 = vmax.f32 %v1691_v38, 0.0 }
 0x20f   :  { %3555 = vst [vmem:[#allocation3 + $0x434] sm:$0xf] %v8932_v42  ;;  %3586 = vst [vmem:[#allocation3 + $0x3e4] sm:$0xf] %v8932_v42  ;;  %6497 = vmatmul.mubr.bf16.gmra.mxu1 %v10308_v1  ;;  %v2136_v42 = vmax.f32 %v2040_v36, %v2088_v37  ;;  %v1969_v45 = vmax.f32 %v1683_v40, 0.0  ;;  %v1694_v46 = vadd.f32 %v11538_v51, %v10043_v41 }
 0x210   :  { %v10305_v63 = vld [vmem:[#allocation3 + $0x418] ss:$100 sps:$4 sm:$0xff]   ;;  %2575 = vst [vmem:[#allocation3 + $0x57c] sm:$0xf] %v8801_v18  ;;  %2654 = vst [vmem:[#allocation3 + $0x52c] sm:$0xf] %v8801_v18  ;;  %v1685_v43 = vpop.f32.mrf.mxu0 }
 0x211   :  { %2685 = vst [vmem:[#allocation3 + $0x4dc] sm:$0xf] %v8801_v18  ;;  %2716 = vst [vmem:[#allocation3 + $0x48c] sm:$0xf] %v8801_v18  ;;  %v1686_v47 = vadd.f32 %v11538_v51, %v1685_v43  ;;  %v2041_v54 = vmax.f32 %v1969_v45, %v1971_v44  ;;  %v1972_v56 = vmax.f32 %v1694_v46, 0.0 }
 0x212   :  { %2747 = vst [vmem:[#allocation3 + $0x43c] sm:$0xf] %v8801_v18  ;;  %2855 = vst [vmem:[#allocation3 + $0x580] sm:$0xf] %v8845_v19  ;;  %v10046_v39 = vpop.f32.mrf.mxu0 }
 0x213   :  { %v10307_v0 = vld [vmem:[#allocation3 + $0x41c] ss:$100 sps:$4 sm:$0xff]   ;;  %2934 = vst [vmem:[#allocation3 + $0x530] sm:$0xf] %v8845_v19  ;;  %2965 = vst [vmem:[#allocation3 + $0x4e0] sm:$0xf] %v8845_v19  ;;  %v1707_v48 = vadd.f32 %v11538_v51, %v10046_v39 }
 0x214   :  { %7070 = vmatprep.mubr.bf16.mxu0 %v10307_v0  ;;  %2996 = vst [vmem:[#allocation3 + $0x490] sm:$0xf] %v8845_v19  ;;  %3027 = vst [vmem:[#allocation3 + $0x440] sm:$0xf] %v8845_v19  ;;  %v1698_v49 = vpop.f32.mrf.mxu0  ;;  %v1970_v57 = vmax.f32 %v1686_v47, 0.0 }
 0x215   :  { %7071 = vmatmul.mubr.bf16.gmra.mxu0 %v10305_v63  ;;  %3135 = vst [vmem:[#allocation3 + $0x584] sm:$0xf] %v8889_v20  ;;  %3214 = vst [vmem:[#allocation3 + $0x534] sm:$0xf] %v8889_v20  ;;  %v1975_v50 = vmax.f32 %v1707_v48, 0.0  ;;  %v1699_v52 = vadd.f32 %v11538_v51, %v1698_v49 }
 0x216   :  { %3245 = vst [vmem:[#allocation3 + $0x4e4] sm:$0xf] %v8889_v20  ;;  %3276 = vst [vmem:[#allocation3 + $0x494] sm:$0xf] %v8889_v20  ;;  %v10047_v55 = vpop.f32.mrf.mxu0  ;;  %v2042_v12 = vmax.f32 %v1970_v57, %v1972_v56 }
 0x217   :  { %3307 = vst [vmem:[#allocation3 + $0x444] sm:$0xf] %v8889_v20  ;;  %3415 = vst [vmem:[#allocation3 + $0x588] sm:$0xf] %v8933_v23  ;;  %v1973_v58 = vmax.f32 %v1699_v52, 0.0  ;;  %v1710_v59 = vadd.f32 %v11538_v51, %v10047_v55 }
 0x218   :  { %3494 = vst [vmem:[#allocation3 + $0x538] sm:$0xf] %v8933_v23  ;;  %3525 = vst [vmem:[#allocation3 + $0x4e8] sm:$0xf] %v8933_v23  ;;  %v1701_v62 = vpop.f32.mrf.mxu0 }
 0x219   :  { %3556 = vst [vmem:[#allocation3 + $0x498] sm:$0xf] %v8933_v23  ;;  %3587 = vst [vmem:[#allocation3 + $0x448] sm:$0xf] %v8933_v23  ;;  %v2089_v2 = vmax.f32 %v1973_v58, %v1975_v50  ;;  %v1976_v3 = vmax.f32 %v1710_v59, 0.0  ;;  %v1702_v4 = vadd.f32 %v11538_v51, %v1701_v62 }
 0x21a   :  { %2183 = vst [vmem:[#allocation2 + $0x130] sm:$0xff] %v2135_v29  ;;  %2296 = vst [vmem:[#allocation3 + $0x5dc] sm:$0xf] %v8758_v35  ;;  %v10050_v10 = vpop.f32.mrf.mxu0 }
 0x21b   :  { %2375 = vst [vmem:[#allocation3 + $0x58c] sm:$0xf] %v8758_v35  ;;  %2406 = vst [vmem:[#allocation3 + $0x53c] sm:$0xf] %v8758_v35  ;;  %v2137_v13 = vmax.f32 %v2041_v54, %v2089_v2  ;;  %v1974_v14 = vmax.f32 %v1702_v4, 0.0  ;;  %v1723_v20 = vadd.f32 %v11538_v51, %v10050_v10 }
 0x21c   :  { %2437 = vst [vmem:[#allocation3 + $0x4ec] sm:$0xf] %v8758_v35  ;;  %2468 = vst [vmem:[#allocation3 + $0x49c] sm:$0xf] %v8758_v35  ;;  %v1714_v16 = vpop.f32.mrf.mxu0 }
 0x21d   :  { %2184 = vst [vmem:[#allocation2 + $0x138] sm:$0xff] %v2136_v42  ;;  %2185 = vst [vmem:[#allocation2 + $0x140] sm:$0xff] %v2137_v13  ;;  %v8774_v17 = vpack.c.bf16 %v2137_v13, %v2137_v13  ;;  %v2090_v6 = vmax.f32 %v1974_v14, %v1976_v3  ;;  %v1715_v21 = vadd.f32 %v11538_v51, %v1714_v16  ;;  %v1979_v26 = vmax.f32 %v1723_v20, 0.0  ;;  %v10331_v42 = vld [vmem:[#allocation3 + $0xc] ss:$100 sps:$4 sm:$0xff]  }
 0x21e   :  { %v10051_v18 = vpop.f32.mrf.mxu0  ;;  %v10335_v13 = vld [vmem:[#allocation3 + $0xd4] ss:$100 sps:$4 sm:$0xff]  }
 0x21f   :  { %2376 = vst [vmem:[#allocation3 + $0x5f0] sm:$0xf] %v8774_v17  ;;  %2407 = vst [vmem:[#allocation3 + $0x5a0] sm:$0xf] %v8774_v17  ;;  %v2138_v19 = vmax.f32 %v2042_v12, %v2090_v6  ;;  %v1977_v28 = vmax.f32 %v1715_v21, 0.0  ;;  %v1726_v33 = vadd.f32 %v11538_v51, %v10051_v18  ;;  %v10376_v18 = vld [vmem:[%s12626_s3 + $0x130] sm:$0xff]  }
 0x220   :  { %2438 = vst [vmem:[#allocation3 + $0x550] sm:$0xf] %v8774_v17  ;;  %2469 = vst [vmem:[#allocation3 + $0x500] sm:$0xf] %v8774_v17  ;;  %v1717_v23 = vpop.f32.mrf.mxu0  ;;  %v10378_v21 = vld [vmem:[%s12626_s3 + $0x168] sm:$0xff]  }
 0x221   :  { %2186 = vst [vmem:[#allocation2 + $0x148] sm:$0xff] %v2138_v19  ;;  %v1718_v34 = vadd.f32 %v11538_v51, %v1717_v23  ;;  %v10326_v38 = vld [vmem:[#allocation3 + $0x578] ss:$100 sps:$4 sm:$0xff]   ;;  %v2043_v45 = vmax.f32 %v1977_v28, %v1979_v26  ;;  %v1980_v50 = vmax.f32 %v1726_v33, 0.0  ;;  %v10381_v33 = vld [vmem:[%s12626_s3 + $0x128] sm:$0xff]  }
 0x222   :  { %v10054_v25 = vpop.f32.mrf.mxu0 }
 0x223   :  { %v1739_v29 = vadd.f32 %v11538_v51, %v10054_v25  ;;  %v1978_v52 = vmax.f32 %v1718_v34, 0.0 }
 0x224   :  { %v2492_v63 = vld [vmem:[#allocation2 + $0x131] sm:$0xff]  ;;  %v1730_v35 = vpop.f32.mrf.mxu0 }
 0x225   :  { %v2772_v0 = vld [vmem:[#allocation2 + $0x132] sm:$0xff]  ;;  %v8802_v5 = vpack.c.bf16 %v2492_v63, %v2492_v63  ;;  %v1983_v40 = vmax.f32 %v1739_v29, 0.0  ;;  %v1731_v41 = vadd.f32 %v11538_v51, %v1730_v35 }
 0x226   :  { %v3052_v1 = vld [vmem:[#allocation2 + $0x133] sm:$0xff]  ;;  %v8846_v7 = vpack.c.bf16 %v2772_v0, %v2772_v0  ;;  %v10055_v43 = vpop.f32.mrf.mxu0  ;;  %v9110_v44 = vpop.f32.mrf.mxu1 }
 0x227   :  { %v8890_v8 = vpack.c.bf16 %v3052_v1, %v3052_v1  ;;  %v3332_v9 = vld [vmem:[#allocation2 + $0x134] sm:$0xff]  ;;  %2576 = vst [vmem:[#allocation3 + $0x5e0] sm:$0xf] %v8802_v5  ;;  %2655 = vst [vmem:[#allocation3 + $0x590] sm:$0xf] %v8802_v5  ;;  %v1981_v39 = vmax.f32 %v1731_v41, 0.0  ;;  %v1742_v46 = vadd.f32 %v11538_v51, %v10055_v43 }
 0x228   :  { %v8934_v11 = vpack.c.bf16 %v3332_v9, %v3332_v9  ;;  %2686 = vst [vmem:[#allocation3 + $0x540] sm:$0xf] %v8802_v5  ;;  %2717 = vst [vmem:[#allocation3 + $0x4f0] sm:$0xf] %v8802_v5  ;;  %v2493_v47 = vld [vmem:[#allocation2 + $0x141] sm:$0xff]  ;;  %v1733_v54 = vpop.f32.mrf.mxu0  ;;  %v9111_v55 = vpop.f32.mrf.mxu1 }
 0x229   :  { %2748 = vst [vmem:[#allocation3 + $0x4a0] sm:$0xf] %v8802_v5  ;;  %2856 = vst [vmem:[#allocation3 + $0x5e4] sm:$0xf] %v8846_v7  ;;  %v2773_v48 = vld [vmem:[#allocation2 + $0x142] sm:$0xff]  ;;  %v8818_v56 = vpack.c.bf16 %v2493_v47, %v2493_v47  ;;  %v2091_v62 = vmax.f32 %v1981_v39, %v1983_v40  ;;  %v1984_v0 = vmax.f32 %v1742_v46, 0.0  ;;  %v1734_v1 = vadd.f32 %v11538_v51, %v1733_v54 }
 0x22a   :  { %2935 = vst [vmem:[#allocation3 + $0x594] sm:$0xf] %v8846_v7  ;;  %2966 = vst [vmem:[#allocation3 + $0x544] sm:$0xf] %v8846_v7  ;;  %v3053_v49 = vld [vmem:[#allocation2 + $0x143] sm:$0xff]  ;;  %v8862_v57 = vpack.c.bf16 %v2773_v48, %v2773_v48  ;;  %v11574_v2 = vadd.f32 %v9111_v55, %v9110_v44  ;;  %v10058_v3 = vpop.f32.mrf.mxu0 }
 0x22b   :  { %2997 = vst [vmem:[#allocation3 + $0x4f4] sm:$0xf] %v8846_v7  ;;  %3028 = vst [vmem:[#allocation3 + $0x4a4] sm:$0xf] %v8846_v7  ;;  %v8906_v58 = vpack.c.bf16 %v3053_v49, %v3053_v49  ;;  %v3333_v59 = vld [vmem:[#allocation2 + $0x144] sm:$0xff]  ;;  %v2139_v4 = vmax.f32 %v2043_v45, %v2091_v62  ;;  %v1982_v9 = vmax.f32 %v1734_v1, 0.0  ;;  %v1755_v16 = vadd.f32 %v11538_v51, %v10058_v3 }
 0x22c   :  { %3136 = vst [vmem:[#allocation3 + $0x5e8] sm:$0xf] %v8890_v8  ;;  %3215 = vst [vmem:[#allocation3 + $0x598] sm:$0xf] %v8890_v8  ;;  %v8950_v63 = vpack.c.bf16 %v3333_v59, %v3333_v59  ;;  %v10329_v5 = vld [vmem:[#allocation3 + $0x8] ss:$100 sps:$4 sm:$0xff]   ;;  %v1746_v10 = vpop.f32.mrf.mxu0 }
 0x22d   :  { %3246 = vst [vmem:[#allocation3 + $0x548] sm:$0xf] %v8890_v8  ;;  %3277 = vst [vmem:[#allocation3 + $0x4f8] sm:$0xf] %v8890_v8  ;;  %v10371_v7 = vld [vmem:[%s12626_s3 + $0x138] sm:$0xff]   ;;  %v8778_v12 = vpack.c.bf16 %v2139_v4, %v2139_v4  ;;  %v2092_v14 = vmax.f32 %v1982_v9, %v1984_v0  ;;  %v1747_v17 = vadd.f32 %v11538_v51, %v1746_v10  ;;  %v1987_v23 = vmax.f32 %v1755_v16, 0.0 }
 0x22e   :  { %3308 = vst [vmem:[#allocation3 + $0x4a8] sm:$0xf] %v8890_v8  ;;  %3416 = vst [vmem:[#allocation3 + $0x5ec] sm:$0xf] %v8934_v11  ;;  %v10321_v30 = vld [vmem:[#allocation3 + $0x57c] ss:$100 sps:$4 sm:$0xff]   ;;  %v2044_v8 = vmax.f32 %v1978_v52, %v1980_v50  ;;  %v10059_v6 = vpop.f32.mrf.mxu0 }
 0x22f   :  { %3495 = vst [vmem:[#allocation3 + $0x59c] sm:$0xf] %v8934_v11  ;;  %3526 = vst [vmem:[#allocation3 + $0x54c] sm:$0xf] %v8934_v11  ;;  %6504 = vmatprep.mubr.bf16.mxu1 %v10321_v30  ;;  %v1985_v25 = vmax.f32 %v1747_v17, 0.0  ;;  %v1758_v28 = vadd.f32 %v11538_v51, %v10059_v6  ;;  %v10386_v46 = vld [vmem:[%s12626_s3 + $0x120] sm:$0xff]  }
 0x230   :  { %3557 = vst [vmem:[#allocation3 + $0x4fc] sm:$0xf] %v8934_v11  ;;  %3588 = vst [vmem:[#allocation3 + $0x4ac] sm:$0xf] %v8934_v11  ;;  %6505 = vmatmul.mubr.bf16.gmra.mxu1 %v10326_v38  ;;  %v10375_v11 = vld [vmem:[%s12626_s3 + $0x170] sm:$0xff]   ;;  %v2140_v19 = vmax.f32 %v2044_v8, %v2092_v14  ;;  %v1749_v20 = vpop.f32.mrf.mxu0  ;;  %v10388_v48 = vld [vmem:[%s12626_s3 + $0x158] sm:$0xff]  }
 0x231   :  { %v10323_v36 = vld [vmem:[#allocation3 + $0x4e0] ss:$100 sps:$4 sm:$0xff]   ;;  %6545 = vmatprep.mubr.bf16.mxu1 %v10331_v42  ;;  %2656 = vst [vmem:[#allocation3 + $0x5f4] sm:$0xf] %v8818_v56  ;;  %2687 = vst [vmem:[#allocation3 + $0x5a4] sm:$0xf] %v8818_v56  ;;  %v1750_v29 = vadd.f32 %v11538_v51, %v1749_v20  ;;  %v2045_v41 = vmax.f32 %v1985_v25, %v1987_v23 }
 0x232   :  { %2718 = vst [vmem:[#allocation3 + $0x554] sm:$0xf] %v8818_v56  ;;  %2749 = vst [vmem:[#allocation3 + $0x504] sm:$0xf] %v8818_v56  ;;  %v10062_v26 = vpop.f32.mrf.mxu0  ;;  %v10340_v35 = vld [vmem:[#allocation3 + $0xd0] ss:$100 sps:$4 sm:$0xff]  }
 0x233   :  { %2936 = vst [vmem:[#allocation3 + $0x5f8] sm:$0xf] %v8862_v57  ;;  %2967 = vst [vmem:[#allocation3 + $0x5a8] sm:$0xf] %v8862_v57  ;;  %v1771_v30 = vadd.f32 %v11538_v51, %v10062_v26  ;;  %v10342_v40 = vld [vmem:[#allocation3 + $0x19c] ss:$100 sps:$4 sm:$0xff]  }
 0x234   :  { %v10325_v37 = vld [vmem:[#allocation3 + $0x4e4] ss:$100 sps:$4 sm:$0xff]   ;;  %2998 = vst [vmem:[#allocation3 + $0x558] sm:$0xf] %v8862_v57  ;;  %3029 = vst [vmem:[#allocation3 + $0x508] sm:$0xf] %v8862_v57  ;;  %v1762_v34 = vpop.f32.mrf.mxu0 }
 0x235   :  { %7078 = vmatprep.mubr.bf16.mxu0 %v10325_v37  ;;  %3216 = vst [vmem:[#allocation3 + $0x5fc] sm:$0xf] %v8906_v58  ;;  %3247 = vst [vmem:[#allocation3 + $0x5ac] sm:$0xf] %v8906_v58  ;;  %v1991_v37 = vmax.f32 %v1771_v30, 0.0  ;;  %v1763_v38 = vadd.f32 %v11538_v51, %v1762_v34  ;;  %v1988_v43 = vmax.f32 %v1758_v28, 0.0 }
 0x236   :  { %7079 = vmatmul.mubr.bf16.gmra.mxu0 %v10323_v36  ;;  %3278 = vst [vmem:[#allocation3 + $0x55c] sm:$0xf] %v8906_v58  ;;  %3309 = vst [vmem:[#allocation3 + $0x50c] sm:$0xf] %v8906_v58  ;;  %v10385_v36 = vld [vmem:[%s12626_s3 + $0x160] sm:$0xff]   ;;  %v10063_v42 = vpop.f32.mrf.mxu0  ;;  %v1986_v44 = vmax.f32 %v1750_v29, 0.0 }
 0x237   :  { %3496 = vst [vmem:[#allocation3 + $0x600] sm:$0xf] %v8950_v63  ;;  %3527 = vst [vmem:[#allocation3 + $0x5b0] sm:$0xf] %v8950_v63  ;;  %v1989_v45 = vmax.f32 %v1763_v38, 0.0  ;;  %v1774_v39 = vadd.f32 %v11538_v51, %v10063_v42  ;;  %v10395_v9 = vld [vmem:[%s12626_s3 + $0x150] sm:$0xff]  }
 0x238   :  { %3558 = vst [vmem:[#allocation3 + $0x560] sm:$0xf] %v8950_v63  ;;  %3589 = vst [vmem:[#allocation3 + $0x510] sm:$0xf] %v8950_v63  ;;  %6546 = vmatmul.mubr.bf16.vlgmr.msra.gmra.mxu1 %v10329_v5  ;;  %v1765_v47 = vpop.f32.mrf.mxu0  ;;  %v2046_v1 = vmax.f32 %v1986_v44, %v1988_v43  ;;  %v10391_v5 = vld [vmem:[%s12626_s3 + $0x118] sm:$0xff]   ;;  %v10396_v6 = vld [vmem:[%s12626_s3 + $0x110] sm:$0xff]  }
 0x239   :  { %2187 = vst [vmem:[#allocation2 + $0x150] sm:$0xff] %v2139_v4  ;;  %2408 = vst [vmem:[#allocation3 + $0x604] sm:$0xf] %v8778_v12  ;;  %6553 = vmatprep.mubr.bf16.mxu1 %v10335_v13  ;;  %9205 = vmatpush3.bf16.msra.mxu1 %v10371_v7  ;;  %v2093_v54 = vmax.f32 %v1989_v45, %v1991_v37  ;;  %v1992_v55 = vmax.f32 %v1774_v39, 0.0  ;;  %v1766_v56 = vadd.f32 %v11538_v51, %v1765_v47  ;;  %v10347_v8 = vld [vmem:[#allocation3 + $0x198] ss:$100 sps:$4 sm:$0xff]  }
 0x23a   :  { %2439 = vst [vmem:[#allocation3 + $0x5b4] sm:$0xf] %v8778_v12  ;;  %2470 = vst [vmem:[#allocation3 + $0x564] sm:$0xf] %v8778_v12  ;;  %9206 = vmatprep.subr.bf16.mxu1 %v10375_v11  ;;  %v10066_v63 = vpop.f32.mrf.mxu0  ;;  %v10349_v12 = vld [vmem:[#allocation3 + $0x264] ss:$100 sps:$4 sm:$0xff]  }
 0x23b   :  { %2188 = vst [vmem:[#allocation2 + $0x158] sm:$0xff] %v2140_v19  ;;  %v2141_v3 = vmax.f32 %v2045_v41, %v2093_v54  ;;  %v1990_v4 = vmax.f32 %v1766_v56, 0.0  ;;  %v1787_v13 = vadd.f32 %v11538_v51, %v10066_v63  ;;  %v10398_v19 = vld [vmem:[%s12626_s3 + $0x148] sm:$0xff]   ;;  %v10357_v25 = vld [vmem:[#allocation3 + $0x260] ss:$100 sps:$4 sm:$0xff]   ;;  %v10406_v41 = vld [vmem:[%s12626_s3 + $0x140] sm:$0xff]  }
 0x23c   :  { %v1778_v7 = vpop.f32.mrf.mxu0  ;;  %v10359_v34 = vld [vmem:[#allocation3 + $0x32c] ss:$100 sps:$4 sm:$0xff]  }
 0x23d   :  { %9207 = vmatpush3.bf16.msra.mxu1 %v10376_v18  ;;  %2189 = vst [vmem:[#allocation2 + $0x160] sm:$0xff] %v2141_v3  ;;  %v8782_v10 = vpack.c.bf16 %v2141_v3, %v2141_v3  ;;  %v2094_v11 = vmax.f32 %v1990_v4, %v1992_v55  ;;  %v1779_v14 = vadd.f32 %v11538_v51, %v1778_v7  ;;  %v1995_v20 = vmax.f32 %v1787_v13, 0.0  ;;  %v10399_v37 = vld [vmem:[%s12626_s3 + $0x108] sm:$0xff]   ;;  %v10362_v4 = vld [vmem:[#allocation3 + $0x40] ss:$100 sps:$4 sm:$0xff]  }
 0x23e   :  { %9208 = vmatprep.subr.bf16.mxu1 %v10378_v21  ;;  %v10067_v16 = vpop.f32.mrf.mxu0  ;;  %v10414_v7 = vld [vmem:[%s12626_s3 + $0x538] sm:$0xff]  }
 0x23f   :  { %2440 = vst [vmem:[#allocation3 + $0x618] sm:$0xf] %v8782_v10  ;;  %2471 = vst [vmem:[#allocation3 + $0x5c8] sm:$0xf] %v8782_v10  ;;  %v2142_v17 = vmax.f32 %v2046_v1, %v2094_v11  ;;  %v1993_v21 = vmax.f32 %v1779_v14, 0.0  ;;  %v1790_v26 = vadd.f32 %v11538_v51, %v10067_v16  ;;  %v10415_v11 = vld [vmem:[%s12626_s3 + $0x570] sm:$0xff]  }
 0x240   :  { %6554 = vmatmul.mubr.bf16.gmra.mxu1 %v10340_v35  ;;  %v1781_v18 = vpop.f32.mrf.mxu0  ;;  %v10364_v35 = vld [vmem:[#allocation3 + $0x44] ss:$100 sps:$4 sm:$0xff]   ;;  %v10374_v10 = vld [vmem:[#allocation3 + $0x10c] ss:$100 sps:$4 sm:$0xff]  }
 0x241   :  { %6561 = vmatprep.mubr.bf16.mxu1 %v10342_v40  ;;  %9209 = vmatpush3.bf16.msra.mxu1 %v10381_v33  ;;  %2190 = vst [vmem:[#allocation2 + $0x168] sm:$0xff] %v2142_v17  ;;  %v1782_v28 = vadd.f32 %v11538_v51, %v1781_v18  ;;  %v2047_v42 = vmax.f32 %v1993_v21, %v1995_v20  ;;  %v1996_v44 = vmax.f32 %v1790_v26, 0.0  ;;  %v10416_v17 = vld [vmem:[%s12626_s3 + $0x530] sm:$0xff]   ;;  %v10418_v18 = vld [vmem:[%s12626_s3 + $0x568] sm:$0xff]   ;;  %v10372_v20 = vld [vmem:[#allocation3 + $0x108] ss:$100 sps:$4 sm:$0xff]  }
 0x242   :  { %9210 = vmatprep.subr.bf16.mxu1 %v10385_v36  ;;  %v2494_v49 = vld [vmem:[#allocation2 + $0x151] sm:$0xff]  ;;  %v10070_v23 = vpop.f32.mrf.mxu0 }
 0x243   :  { %v2774_v50 = vld [vmem:[#allocation2 + $0x152] sm:$0xff]  ;;  %v8822_v57 = vpack.c.bf16 %v2494_v49, %v2494_v49  ;;  %v1803_v29 = vadd.f32 %v11538_v51, %v10070_v23  ;;  %v1994_v45 = vmax.f32 %v1782_v28, 0.0  ;;  %v10379_v28 = vld [vmem:[#allocation3 + $0x4bc] ss:$100 sps:$4 sm:$0xff]  }
 0x244   :  { %v3054_v52 = vld [vmem:[#allocation2 + $0x153] sm:$0xff]  ;;  %v8866_v58 = vpack.c.bf16 %v2774_v50, %v2774_v50  ;;  %v1794_v36 = vpop.f32.mrf.mxu0  ;;  %v10407_v50 = vld [vmem:[%s12626_s3 + $0x100] sm:$0xff]  }
 0x245   :  { %v8910_v59 = vpack.c.bf16 %v3054_v52, %v3054_v52  ;;  %v3334_v62 = vld [vmem:[#allocation2 + $0x154] sm:$0xff]  ;;  %9211 = vmatpush3.bf16.msra.mxu1 %v10386_v46  ;;  %2688 = vst [vmem:[#allocation3 + $0x608] sm:$0xf] %v8822_v57  ;;  %2719 = vst [vmem:[#allocation3 + $0x5b8] sm:$0xf] %v8822_v57  ;;  %v1999_v38 = vmax.f32 %v1803_v29, 0.0  ;;  %v1795_v40 = vadd.f32 %v11538_v51, %v1794_v36 }
 0x246   :  { %v8954_v0 = vpack.c.bf16 %v3334_v62, %v3334_v62  ;;  %2750 = vst [vmem:[#allocation3 + $0x568] sm:$0xf] %v8822_v57  ;;  %2968 = vst [vmem:[#allocation3 + $0x60c] sm:$0xf] %v8866_v58  ;;  %9212 = vmatprep.subr.bf16.mxu1 %v10388_v48  ;;  %v10071_v43 = vpop.f32.mrf.mxu0  ;;  %v10377_v23 = vld [vmem:[#allocation3 + $0x3f0] ss:$100 sps:$4 sm:$0xff]  }
 0x247   :  { %2999 = vst [vmem:[#allocation3 + $0x5bc] sm:$0xf] %v8866_v58  ;;  %3030 = vst [vmem:[#allocation3 + $0x56c] sm:$0xf] %v8866_v58  ;;  %v1997_v39 = vmax.f32 %v1795_v40, 0.0  ;;  %v1806_v46 = vadd.f32 %v11538_v51, %v10071_v43  ;;  %v10448_v58 = vld [vmem:[%s12626_s3 + $0x1f8] sm:$0xff]  }
 0x248   :  { %3248 = vst [vmem:[#allocation3 + $0x610] sm:$0xf] %v8910_v59  ;;  %3279 = vst [vmem:[#allocation3 + $0x5c0] sm:$0xf] %v8910_v59  ;;  %6562 = vmatmul.mubr.bf16.gmra.mxu1 %v10347_v8  ;;  %v2495_v47 = vld [vmem:[#allocation2 + $0x161] sm:$0xff]  ;;  %v1797_v49 = vpop.f32.mrf.mxu0 }
 0x249   :  { %3310 = vst [vmem:[#allocation3 + $0x570] sm:$0xf] %v8910_v59  ;;  %3528 = vst [vmem:[#allocation3 + $0x614] sm:$0xf] %v8954_v0  ;;  %6569 = vmatprep.mubr.bf16.mxu1 %v10349_v12  ;;  %9213 = vmatpush3.bf16.msra.mxu1 %v10391_v5  ;;  %v2775_v48 = vld [vmem:[#allocation2 + $0x162] sm:$0xff]  ;;  %v2095_v54 = vmax.f32 %v1997_v39, %v1999_v38  ;;  %v2000_v55 = vmax.f32 %v1806_v46, 0.0  ;;  %v1798_v56 = vadd.f32 %v11538_v51, %v1797_v49 }
 0x24a   :  { %3559 = vst [vmem:[#allocation3 + $0x5c4] sm:$0xf] %v8954_v0  ;;  %3590 = vst [vmem:[#allocation3 + $0x574] sm:$0xf] %v8954_v0  ;;  %9214 = vmatprep.subr.bf16.mxu1 %v10395_v9  ;;  %v3335_v52 = vld [vmem:[#allocation2 + $0x164] sm:$0xff]  ;;  %v8826_v57 = vpack.c.bf16 %v2495_v47, %v2495_v47  ;;  %v11640_v62 = vpop.f32.mrf.mxu0  ;;  %v8870_v63 = vpack.c.bf16 %v2775_v48, %v2775_v48  ;;  %v2048_v0 = vmax.f32 %v1994_v45, %v1996_v44 }
 0x24b   :  { %v8958_v59 = vpack.c.bf16 %v3335_v52, %v3335_v52  ;;  %v2143_v1 = vmax.f32 %v2047_v42, %v2095_v54  ;;  %v1998_v3 = vmax.f32 %v1798_v56, 0.0  ;;  %v10367_v51 = vld [vmem:[#allocation3 + $0x328] ss:$100 sps:$4 sm:$0xff]   ;;  %v10369_v9 = vld [vmem:[#allocation3 + $0x3f4] ss:$100 sps:$4 sm:$0xff]   ;;  %v10431_v46 = vld [vmem:[%s12626_s3 + $0x518] sm:$0xff]  }
 0x24c   :  { %2720 = vst [vmem:[#allocation3 + $0x61c] sm:$0xf] %v8826_v57  ;;  %2751 = vst [vmem:[#allocation3 + $0x5cc] sm:$0xf] %v8826_v57  ;;  %v11642_v5 = vpop.f32.mrf.mxu0  ;;  %v10384_v29 = vld [vmem:[#allocation3 + $0x1d4] ss:$100 sps:$4 sm:$0xff]  }
 0x24d   :  { %v10354_v30 = vld [vmem:[#allocation3 + $0x5a8] ss:$100 sps:$4 sm:$0xff]   ;;  %9215 = vmatpush3.bf16.msra.mxu1 %v10396_v6  ;;  %3560 = vst [vmem:[#allocation3 + $0x628] sm:$0xf] %v8958_v59  ;;  %3591 = vst [vmem:[#allocation3 + $0x5d8] sm:$0xf] %v8958_v59  ;;  %v2096_v8 = vmax.f32 %v1998_v3, %v2000_v55  ;;  %v8786_v12 = vpack.c.bf16 %v2143_v1, %v2143_v1 }
 0x24e   :  { %9216 = vmatprep.subr.bf16.mxu1 %v10398_v19  ;;  %3000 = vst [vmem:[#allocation3 + $0x620] sm:$0xf] %v8870_v63  ;;  %3031 = vst [vmem:[#allocation3 + $0x5d0] sm:$0xf] %v8870_v63  ;;  %v9479_v13 = vpop.f32.mrf.mxu0  ;;  %v10426_v36 = vld [vmem:[%s12626_s3 + $0x520] sm:$0xff]   ;;  %v10433_v55 = vld [vmem:[%s12626_s3 + $0x510] sm:$0xff]  }
 0x24f   :  { %v10356_v33 = vld [vmem:[#allocation3 + $0x5ac] ss:$100 sps:$4 sm:$0xff]   ;;  %2191 = vst [vmem:[#allocation2 + $0x170] sm:$0xff] %v2143_v1  ;;  %v2144_v14 = vmax.f32 %v2048_v0, %v2096_v8  ;;  %2472 = vst [vmem:[#allocation3 + $0x62c] sm:$0xf] %v8786_v12  ;;  %v11706_v12 = vld [vmem:[%s12626_s3 + $0x638] sm:$0xff]  }
 0x250   :  { %7086 = vmatprep.mubr.bf16.mxu0 %v10356_v33  ;;  %6570 = vmatmul.mubr.bf16.gmra.mxu1 %v10357_v25  ;;  %v9480_v16 = vpop.f32.mrf.mxu0  ;;  %v10424_v25 = vld [vmem:[%s12626_s3 + $0x528] sm:$0xff]   ;;  %v10387_v39 = vld [vmem:[#allocation3 + $0x4b8] ss:$100 sps:$4 sm:$0xff]   ;;  %v10389_v48 = vld [vmem:[#allocation3 + $0x584] ss:$100 sps:$4 sm:$0xff]  }
 0x251   :  { %7087 = vmatmul.mubr.bf16.gmra.mxu0 %v10354_v30  ;;  %6577 = vmatprep.mubr.bf16.mxu1 %v10359_v34  ;;  %2192 = vst [vmem:[#allocation2 + $0x178] sm:$0xff] %v2144_v14  ;;  %v11653_v6 = vadd.f32 %v9480_v16, %v9479_v13  ;;  %v10425_v30 = vld [vmem:[%s12626_s3 + $0x560] sm:$0xff]   ;;  %v10382_v44 = vld [vmem:[#allocation3 + $0x1d0] ss:$100 sps:$4 sm:$0xff]   ;;  %v10394_v49 = vld [vmem:[#allocation3 + $0x29c] ss:$100 sps:$4 sm:$0xff]  }
 0x252   :  { %7224 = vmatprep.mubr.bf16.mxu0 %v10364_v35  ;;  %9217 = vmatpush3.bf16.msra.mxu1 %v10399_v37  ;;  %v9482_v19 = vpop.f32.mrf.mxu0  ;;  %v10438_v57 = vld [vmem:[%s12626_s3 + $0x548] sm:$0xff]   ;;  %v10392_v59 = vld [vmem:[#allocation3 + $0x298] ss:$100 sps:$4 sm:$0xff]   ;;  %v10397_v0 = vld [vmem:[#allocation3 + $0x580] ss:$100 sps:$4 sm:$0xff]  }
 0x253   :  { %9218 = vmatprep.subr.bf16.mxu1 %v10406_v41  ;;  %v10428_v41 = vld [vmem:[%s12626_s3 + $0x558] sm:$0xff]   ;;  %v10441_v1 = vld [vmem:[%s12626_s3 + $0x508] sm:$0xff]  }
 0x254   :  { %v9483_v21 = vpop.f32.mrf.mxu0  ;;  %v10400_v13 = vld [vmem:[#allocation3 + $0x10] ss:$100 sps:$4 sm:$0xff]   ;;  %v10403_v14 = vld [vmem:[#allocation3 + $0x360] ss:$100 sps:$4 sm:$0xff]  }
 0x255   :  { %v11661_v26 = vadd.f32 %v9483_v21, %v9482_v19  ;;  %v10451_v16 = vld [vmem:[%s12626_s3 + $0x1b8] sm:$0xff]   ;;  %v10455_v19 = vld [vmem:[%s12626_s3 + $0x1f0] sm:$0xff]   ;;  %v10458_v21 = vld [vmem:[%s12626_s3 + $0x1e8] sm:$0xff]  }
 0x256   :  { %9219 = vmatpush3.bf16.msra.mxu1 %v10407_v50  ;;  %v9485_v33 = vpop.f32.mrf.mxu0  ;;  %v10432_v50 = vld [vmem:[%s12626_s3 + $0x550] sm:$0xff]  }
 0x257   :  { %9268 = vmatprep.subr.bf16.mxu1 %v10448_v58 }
 0x258   :  { %6578 = vmatmul.mubr.bf16.gmra.mxu1 %v10367_v51  ;;  %v3336_v34 = vld [vmem:[#allocation2 + $0x174] sm:$0xff]  ;;  %v9486_v35 = vpop.f32.mrf.mxu0  ;;  %v10405_v51 = vld [vmem:[#allocation3 + $0x364] ss:$100 sps:$4 sm:$0xff]  }
 0x259   :  { %7225 = vmatmul.mubr.bf16.vlgmr.msra.gmra.mxu0 %v10362_v4  ;;  %6585 = vmatprep.mubr.bf16.mxu1 %v10369_v9  ;;  %v2496_v37 = vld [vmem:[#allocation2 + $0x171] sm:$0xff]  ;;  %v8962_v38 = vpack.c.bf16 %v3336_v34, %v3336_v34  ;;  %v11669_v40 = vadd.f32 %v9486_v35, %v9485_v33  ;;  %v10465_v33 = vld [vmem:[%s12626_s3 + $0x1e0] sm:$0xff]   ;;  %v10468_v35 = vld [vmem:[%s12626_s3 + $0x1d8] sm:$0xff]  }
 0x25a   :  { %7232 = vmatprep.mubr.bf16.mxu0 %v10374_v10  ;;  %9717 = vmatpush3.bf16.msra.mxu0 %v10414_v7  ;;  %v8830_v42 = vpack.c.bf16 %v2496_v37, %v2496_v37  ;;  %v9488_v43 = vpop.f32.mrf.mxu0  ;;  %v10402_v4 = vld [vmem:[#allocation3 + $0x14] ss:$100 sps:$4 sm:$0xff]   ;;  %v10445_v7 = vld [vmem:[%s12626_s3 + $0x540] sm:$0xff]  }
 0x25b   :  { %9718 = vmatprep.subr.bf16.mxu0 %v10415_v11  ;;  %3592 = vst [vmem:[#allocation3 + $0x63c] sm:$0xf] %v8962_v38  ;;  %v10446_v10 = vld [vmem:[%s12626_s3 + $0x500] sm:$0xff]   ;;  %v10421_v37 = vld [vmem:[#allocation3 + $0x4f0] ss:$100 sps:$4 sm:$0xff]  }
 0x25c   :  { %2752 = vst [vmem:[#allocation3 + $0x630] sm:$0xf] %v8830_v42  ;;  %v9489_v45 = vpop.f32.mrf.mxu0  ;;  %v10466_v34 = vld [vmem:[%s12626_s3 + $0x1a0] sm:$0xff]   ;;  %v10427_v38 = vld [vmem:[#allocation3 + $0x1a0] ss:$100 sps:$4 sm:$0xff]  }
 0x25d   :  { %v11677_v47 = vadd.f32 %v9489_v45, %v9488_v43  ;;  %v10429_v42 = vld [vmem:[#allocation3 + $0x26c] ss:$100 sps:$4 sm:$0xff]   ;;  %v10475_v43 = vld [vmem:[%s12626_s3 + $0x1d0] sm:$0xff]  }
 0x25e   :  { %9719 = vmatpush3.bf16.msra.mxu0 %v10416_v17  ;;  %v9491_v52 = vpop.f32.mrf.mxu0  ;;  %v10409_v17 = vld [vmem:[#allocation3 + $0xdc] ss:$100 sps:$4 sm:$0xff]  }
 0x25f   :  { %9720 = vmatprep.subr.bf16.mxu0 %v10418_v18  ;;  %v10413_v18 = vld [vmem:[#allocation3 + $0x42c] ss:$100 sps:$4 sm:$0xff]   ;;  %v10476_v45 = vld [vmem:[%s12626_s3 + $0x190] sm:$0xff]  }
 0x260   :  { %6586 = vmatmul.mubr.bf16.gmra.mxu1 %v10377_v23  ;;  %v9492_v54 = vpop.f32.mrf.mxu0  ;;  %v10411_v23 = vld [vmem:[#allocation3 + $0x428] ss:$100 sps:$4 sm:$0xff]  }
 0x261   :  { %7233 = vmatmul.mubr.bf16.gmra.mxu0 %v10372_v20  ;;  %6593 = vmatprep.mubr.bf16.mxu1 %v10379_v28  ;;  %v11685_v56 = vadd.f32 %v9492_v54, %v9491_v52  ;;  %v10456_v20 = vld [vmem:[%s12626_s3 + $0x1b0] sm:$0xff]   ;;  %v10461_v28 = vld [vmem:[%s12626_s3 + $0x1a8] sm:$0xff]  }
 0x262   :  { %7240 = vmatprep.mubr.bf16.mxu0 %v10384_v29  ;;  %9721 = vmatpush3.bf16.msra.mxu0 %v10424_v25  ;;  %v9494_v58 = vpop.f32.mrf.mxu0  ;;  %v10417_v25 = vld [vmem:[#allocation3 + $0xd8] ss:$100 sps:$4 sm:$0xff]   ;;  %v10419_v29 = vld [vmem:[#allocation3 + $0x1a4] ss:$100 sps:$4 sm:$0xff]  }
 0x263   :  { %9722 = vmatprep.subr.bf16.mxu0 %v10425_v30  ;;  %v10423_v30 = vld [vmem:[#allocation3 + $0x4f4] ss:$100 sps:$4 sm:$0xff]  }
 0x264   :  { %v9495_v63 = vpop.f32.mrf.mxu0  ;;  %v10439_v54 = vld [vmem:[#allocation3 + $0x334] ss:$100 sps:$4 sm:$0xff]  }
 0x265   :  { %v11693_v3 = vadd.f32 %v9495_v63, %v9494_v58  ;;  %v10487_v63 = vld [vmem:[%s12626_s3 + $0x180] sm:$0xff]  }
 0x266   :  { %9723 = vmatpush3.bf16.msra.mxu0 %v10426_v36  ;;  %v9497_v8 = vpop.f32.mrf.mxu0  ;;  %v10436_v36 = vld [vmem:[#allocation3 + $0x5bc] ss:$100 sps:$4 sm:$0xff]  }
 0x267   :  { %9724 = vmatprep.subr.bf16.mxu0 %v10428_v41  ;;  %v10471_v41 = vld [vmem:[%s12626_s3 + $0x198] sm:$0xff]  }
 0x268   :  { %6594 = vmatmul.mubr.bf16.gmra.mxu1 %v10387_v39  ;;  %v9498_v9 = vpop.f32.mrf.mxu0  ;;  %v10478_v39 = vld [vmem:[%s12626_s3 + $0x1c8] sm:$0xff]  }
 0x269   :  { %7241 = vmatmul.mubr.bf16.gmra.mxu0 %v10382_v44  ;;  %6601 = vmatprep.mubr.bf16.mxu1 %v10389_v48  ;;  %v11701_v11 = vadd.f32 %v9498_v9, %v9497_v8  ;;  %v11739_v44 = vpop.f32.mrf.mxu1  ;;  %v10494_v8 = vld [vmem:[%s12626_s3 + $0x630] sm:$0xff]   ;;  %v10496_v9 = vld [vmem:[%s12626_s3 + $0x628] sm:$0xff]  }
 0x26a   :  { %7248 = vmatprep.mubr.bf16.mxu0 %v10394_v49  ;;  %9725 = vmatpush3.bf16.msra.mxu0 %v10431_v46  ;;  %v10434_v46 = vld [vmem:[#allocation3 + $0x5b8] ss:$100 sps:$4 sm:$0xff]   ;;  %v10437_v49 = vld [vmem:[#allocation3 + $0x268] ss:$100 sps:$4 sm:$0xff]  }
 0x26b   :  { %9726 = vmatprep.subr.bf16.mxu0 %v10432_v50  ;;  %v11747_v48 = vpop.f32.mrf.mxu1  ;;  %v10479_v50 = vld [vmem:[%s12626_s3 + $0x188] sm:$0xff]  }
 0x26e   :  { %9727 = vmatpush3.bf16.msra.mxu0 %v10433_v55  ;;  %v10444_v55 = vld [vmem:[#allocation3 + $0x54] ss:$100 sps:$4 sm:$0xff]  }
 0x26f   :  { %9728 = vmatprep.subr.bf16.mxu0 %v10438_v57  ;;  %v10486_v57 = vld [vmem:[%s12626_s3 + $0x1c0] sm:$0xff]  }
 0x270   :  { %6602 = vmatmul.mubr.bf16.gmra.mxu1 %v10397_v0  ;;  %v10518_v0 = vld [vmem:[%s12626_s3 + $0x278] sm:$0xff]  }
 0x271   :  { %7249 = vmatmul.mubr.bf16.gmra.mxu0 %v10392_v59  ;;  %6642 = vmatprep.mubr.bf16.mxu1 %v10402_v4  ;;  %v10447_v4 = vld [vmem:[#allocation3 + $0x330] ss:$100 sps:$4 sm:$0xff]  }
 0x272   :  { %7256 = vmatprep.mubr.bf16.mxu0 %v10405_v51  ;;  %9729 = vmatpush3.bf16.msra.mxu0 %v10441_v1  ;;  %v10442_v1 = vld [vmem:[#allocation3 + $0x50] ss:$100 sps:$4 sm:$0xff]   ;;  %v10449_v51 = vld [vmem:[#allocation3 + $0x3fc] ss:$100 sps:$4 sm:$0xff]  }
 0x273   :  { %9730 = vmatprep.subr.bf16.mxu0 %v10445_v7  ;;  %v10454_v7 = vld [vmem:[#allocation3 + $0x11c] ss:$100 sps:$4 sm:$0xff]  }
 0x276   :  { %9731 = vmatpush3.bf16.msra.mxu0 %v10446_v10  ;;  %v10452_v10 = vld [vmem:[#allocation3 + $0x118] ss:$100 sps:$4 sm:$0xff]  }
 0x277   :  { %10072 = vmatprep.subr.bf16.mxu0 %v11706_v12 }
 0x278   :  { %6643 = vmatmul.mubr.bf16.vlgmr.msra.gmra.mxu1 %v10400_v13  ;;  %v10457_v13 = vld [vmem:[#allocation3 + $0x3f8] ss:$100 sps:$4 sm:$0xff]  }
 0x279   :  { %7257 = vmatmul.mubr.bf16.gmra.mxu0 %v10403_v14  ;;  %6650 = vmatprep.mubr.bf16.mxu1 %v10409_v17  ;;  %v10459_v14 = vld [vmem:[#allocation3 + $0x4c4] ss:$100 sps:$4 sm:$0xff]  }
 0x27a   :  { %7264 = vmatprep.mubr.bf16.mxu0 %v10413_v18  ;;  %9269 = vmatpush3.bf16.msra.mxu1 %v10451_v16  ;;  %v10464_v16 = vld [vmem:[#allocation3 + $0x1e4] ss:$100 sps:$4 sm:$0xff]  }
 0x27b   :  { %9270 = vmatprep.subr.bf16.mxu1 %v10455_v19  ;;  %v10502_v17 = vld [vmem:[%s12626_s3 + $0x620] sm:$0xff]   ;;  %v10462_v18 = vld [vmem:[#allocation3 + $0x1e0] ss:$100 sps:$4 sm:$0xff]  }
 0x27c   :  { %v10467_v19 = vld [vmem:[#allocation3 + $0x4c0] ss:$100 sps:$4 sm:$0xff]  }
 0x27e   :  { %9271 = vmatpush3.bf16.msra.mxu1 %v10456_v20  ;;  %v10469_v20 = vld [vmem:[#allocation3 + $0x58c] ss:$100 sps:$4 sm:$0xff]  }
 0x27f   :  { %9272 = vmatprep.subr.bf16.mxu1 %v10458_v21  ;;  %v10474_v21 = vld [vmem:[#allocation3 + $0x2ac] ss:$100 sps:$4 sm:$0xff]  }
 0x280   :  { %6651 = vmatmul.mubr.bf16.gmra.mxu1 %v10417_v25 }
 0x281   :  { %7265 = vmatmul.mubr.bf16.gmra.mxu0 %v10411_v23  ;;  %6658 = vmatprep.mubr.bf16.mxu1 %v10419_v29  ;;  %v10507_v23 = vld [vmem:[%s12626_s3 + $0x610] sm:$0xff]  }
 0x282   :  { %7272 = vmatprep.mubr.bf16.mxu0 %v10423_v30  ;;  %9273 = vmatpush3.bf16.msra.mxu1 %v10461_v28  ;;  %v10512_v28 = vld [vmem:[%s12626_s3 + $0x608] sm:$0xff]   ;;  %v10472_v30 = vld [vmem:[#allocation3 + $0x2a8] ss:$100 sps:$4 sm:$0xff]  }
 0x283   :  { %9274 = vmatprep.subr.bf16.mxu1 %v10465_v33  ;;  %v10477_v33 = vld [vmem:[#allocation3 + $0x588] ss:$100 sps:$4 sm:$0xff]  }
 0x284   :  { %v9116_v52 = vpop.f32.mrf.mxu1 }
 0x286   :  { %9275 = vmatpush3.bf16.msra.mxu1 %v10466_v34  ;;  %v9117_v58 = vpop.f32.mrf.mxu1  ;;  %v10482_v34 = vld [vmem:[#allocation3 + $0x1c] ss:$100 sps:$4 sm:$0xff]  }
 0x287   :  { %9276 = vmatprep.subr.bf16.mxu1 %v10468_v35  ;;  %v11755_v59 = vadd.f32 %v9117_v58, %v9116_v52  ;;  %v10485_v35 = vld [vmem:[#allocation3 + $0x374] ss:$100 sps:$4 sm:$0xff]  }
 0x288   :  { %6659 = vmatmul.mubr.bf16.gmra.mxu1 %v10427_v38  ;;  %v11779_v25 = vpop.f32.mrf.mxu1 }
 0x289   :  { %7273 = vmatmul.mubr.bf16.gmra.mxu0 %v10421_v37  ;;  %6666 = vmatprep.mubr.bf16.mxu1 %v10429_v42 }
 0x28a   :  { %7280 = vmatprep.mubr.bf16.mxu0 %v10436_v36  ;;  %9277 = vmatpush3.bf16.msra.mxu1 %v10471_v41  ;;  %v11784_v29 = vpop.f32.mrf.mxu1  ;;  %v10517_v36 = vld [vmem:[%s12626_s3 + $0x600] sm:$0xff]  }
 0x28b   :  { %9278 = vmatprep.subr.bf16.mxu1 %v10475_v43 }
 0x28e   :  { %9279 = vmatpush3.bf16.msra.mxu1 %v10476_v45 }
 0x28f   :  { %9280 = vmatprep.subr.bf16.mxu1 %v10478_v39 }
 0x290   :  { %6667 = vmatmul.mubr.bf16.gmra.mxu1 %v10437_v49  ;;  %v10483_v49 = vld [vmem:[#allocation3 + $0x370] ss:$100 sps:$4 sm:$0xff]  }
 0x291   :  { %7281 = vmatmul.mubr.bf16.gmra.mxu0 %v10434_v46  ;;  %6674 = vmatprep.mubr.bf16.mxu1 %v10439_v54  ;;  %v10480_v46 = vld [vmem:[#allocation3 + $0x18] ss:$100 sps:$4 sm:$0xff]   ;;  %v10489_v54 = vld [vmem:[#allocation3 + $0xe4] ss:$100 sps:$4 sm:$0xff]  }
 0x292   :  { %7418 = vmatprep.mubr.bf16.mxu0 %v10444_v55  ;;  %9281 = vmatpush3.bf16.msra.mxu1 %v10479_v50  ;;  %v10523_v50 = vld [vmem:[%s12626_s3 + $0x238] sm:$0xff]  }
 0x293   :  { %9282 = vmatprep.subr.bf16.mxu1 %v10486_v57  ;;  %v10493_v55 = vld [vmem:[#allocation3 + $0x43c] ss:$100 sps:$4 sm:$0xff]  }
 0x294   :  { %v10525_v57 = vld [vmem:[%s12626_s3 + $0x270] sm:$0xff]  }
 0x296   :  { %9283 = vmatpush3.bf16.msra.mxu1 %v10487_v63  ;;  %v10526_v63 = vld [vmem:[%s12626_s3 + $0x230] sm:$0xff]  }
 0x297   :  { %9332 = vmatprep.subr.bf16.mxu1 %v10518_v0  ;;  %v10527_v0 = vld [vmem:[%s12626_s3 + $0x268] sm:$0xff]  }
 0x298   :  { %6675 = vmatmul.mubr.bf16.gmra.mxu1 %v10447_v4  ;;  %v10495_v4 = vld [vmem:[#allocation3 + $0xe0] ss:$100 sps:$4 sm:$0xff]  }
 0x299   :  { %7419 = vmatmul.mubr.bf16.vlgmr.msra.gmra.mxu0 %v10442_v1  ;;  %6682 = vmatprep.mubr.bf16.mxu1 %v10449_v51  ;;  %v10491_v1 = vld [vmem:[#allocation3 + $0x438] ss:$100 sps:$4 sm:$0xff]   ;;  %v10532_v51 = vld [vmem:[%s12626_s3 + $0x228] sm:$0xff]  }
 0x29a   :  { %7426 = vmatprep.mubr.bf16.mxu0 %v10454_v7  ;;  %10073 = vmatpush3.bf16.msra.mxu0 %v11706_v12  ;;  %v10504_v12 = vld [vmem:[%s12626_s3 + $0x618] sm:$0xff]   ;;  %v10497_v7 = vld [vmem:[#allocation3 + $0x1ac] ss:$100 sps:$4 sm:$0xff]  }
 0x29b   :  { %10074 = vmatprep.subr.bf16.mxu0 %v10494_v8 }
 0x29e   :  { %10075 = vmatpush3.bf16.msra.mxu0 %v10494_v8  ;;  %v10501_v8 = vld [vmem:[#allocation3 + $0x504] ss:$100 sps:$4 sm:$0xff]  }
 0x29f   :  { %10076 = vmatprep.subr.bf16.mxu0 %v10496_v9 }
 0x2a0   :  { %6683 = vmatmul.mubr.bf16.gmra.mxu1 %v10457_v13  ;;  %v10536_v13 = vld [vmem:[%s12626_s3 + $0x258] sm:$0xff]  }
 0x2a1   :  { %7427 = vmatmul.mubr.bf16.gmra.mxu0 %v10452_v10  ;;  %6690 = vmatprep.mubr.bf16.mxu1 %v10459_v14  ;;  %v10535_v10 = vld [vmem:[%s12626_s3 + $0x220] sm:$0xff]  }
 0x2a2   :  { %7434 = vmatprep.mubr.bf16.mxu0 %v10464_v16  ;;  %10077 = vmatpush3.bf16.msra.mxu0 %v10496_v9  ;;  %v10534_v9 = vld [vmem:[%s12626_s3 + $0x260] sm:$0xff]   ;;  %v10499_v16 = vld [vmem:[#allocation3 + $0x500] ss:$100 sps:$4 sm:$0xff]  }
 0x2a3   :  { %10078 = vmatprep.subr.bf16.mxu0 %v10502_v17  ;;  %v10510_v14 = vld [vmem:[#allocation3 + $0x5cc] ss:$100 sps:$4 sm:$0xff]  }
 0x2a6   :  { %10079 = vmatpush3.bf16.msra.mxu0 %v10502_v17  ;;  %v9122_v37 = vpop.f32.mrf.mxu1  ;;  %v10503_v17 = vld [vmem:[#allocation3 + $0x1a8] ss:$100 sps:$4 sm:$0xff]  }
 0x2a7   :  { %10080 = vmatprep.subr.bf16.mxu0 %v10504_v12 }
 0x2a8   :  { %6691 = vmatmul.mubr.bf16.gmra.mxu1 %v10467_v19  ;;  %v9123_v41 = vpop.f32.mrf.mxu1  ;;  %v10543_v19 = vld [vmem:[%s12626_s3 + $0x250] sm:$0xff]  }
 0x2a9   :  { %7435 = vmatmul.mubr.bf16.gmra.mxu0 %v10462_v18  ;;  %6698 = vmatprep.mubr.bf16.mxu1 %v10469_v20  ;;  %v11789_v42 = vadd.f32 %v9123_v41, %v9122_v37  ;;  %v10505_v18 = vld [vmem:[#allocation3 + $0x274] ss:$100 sps:$4 sm:$0xff]   ;;  %v10550_v37 = vld [vmem:[%s12626_s3 + $0x240] sm:$0xff]  }
 0x2aa   :  { %7442 = vmatprep.mubr.bf16.mxu0 %v10474_v21  ;;  %10081 = vmatpush3.bf16.msra.mxu0 %v10504_v12  ;;  %v10541_v12 = vld [vmem:[%s12626_s3 + $0x218] sm:$0xff]   ;;  %v11825_v20 = vpop.f32.mrf.mxu1  ;;  %v10544_v21 = vld [vmem:[%s12626_s3 + $0x210] sm:$0xff]  }
 0x2ab   :  { %10082 = vmatprep.subr.bf16.mxu0 %v10507_v23  ;;  %v9500_v38 = vpop.f32.mrf.mxu0 }
 0x2ad   :  { %v9501_v43 = vpop.f32.mrf.mxu0 }
 0x2ae   :  { %10083 = vmatpush3.bf16.msra.mxu0 %v10507_v23  ;;  %v11791_v45 = vadd.f32 %v9501_v43, %v9500_v38  ;;  %v10545_v23 = vld [vmem:[%s12626_s3 + $0x248] sm:$0xff]  }
 0x2af   :  { %10084 = vmatprep.subr.bf16.mxu0 %v10512_v28  ;;  %v9503_v39 = vpop.f32.mrf.mxu0 }
 0x2b0   :  { %6699 = vmatmul.mubr.bf16.gmra.mxu1 %v10477_v33  ;;  %v10511_v33 = vld [vmem:[#allocation3 + $0x270] ss:$100 sps:$4 sm:$0xff]  }
 0x2b1   :  { %7443 = vmatmul.mubr.bf16.gmra.mxu0 %v10472_v30  ;;  %6739 = vmatprep.mubr.bf16.mxu1 %v10482_v34  ;;  %v9504_v52 = vpop.f32.mrf.mxu0  ;;  %v11833_v30 = vpop.f32.mrf.mxu1  ;;  %v10546_v34 = vld [vmem:[%s12626_s3 + $0x208] sm:$0xff]  }
 0x2b2   :  { %7450 = vmatprep.mubr.bf16.mxu0 %v10485_v35  ;;  %10085 = vmatpush3.bf16.msra.mxu0 %v10512_v28  ;;  %v11799_v58 = vadd.f32 %v9504_v52, %v9503_v39  ;;  %v10508_v28 = vld [vmem:[#allocation3 + $0x5c8] ss:$100 sps:$4 sm:$0xff]   ;;  %v10515_v35 = vld [vmem:[#allocation3 + $0x33c] ss:$100 sps:$4 sm:$0xff]  }
 0x2b3   :  { %10086 = vmatprep.subr.bf16.mxu0 %v10517_v36  ;;  %v10551_v39 = vld [vmem:[%s12626_s3 + $0x200] sm:$0xff]  }
 0x2b6   :  { %10087 = vmatpush3.bf16.msra.mxu0 %v10517_v36  ;;  %v10516_v36 = vld [vmem:[#allocation3 + $0x60] ss:$100 sps:$4 sm:$0xff]  }
 0x2b8   :  { %6740 = vmatmul.mubr.bf16.vlgmr.msra.gmra.mxu1 %v10480_v46 }
 0x2b9   :  { %7451 = vmatmul.mubr.bf16.gmra.mxu0 %v10483_v49  ;;  %6747 = vmatprep.mubr.bf16.mxu1 %v10489_v54 }
 0x2ba   :  { %7458 = vmatprep.mubr.bf16.mxu0 %v10493_v55  ;;  %9333 = vmatpush3.bf16.msra.mxu1 %v10523_v50  ;;  %v10564_v50 = vld [vmem:[%s12626_s3 + $0x2f8] sm:$0xff]  }
 0x2bb   :  { %9334 = vmatprep.subr.bf16.mxu1 %v10525_v57  ;;  %v10513_v57 = vld [vmem:[#allocation3 + $0x338] ss:$100 sps:$4 sm:$0xff]  }
 0x2be   :  { %9335 = vmatpush3.bf16.msra.mxu1 %v10526_v63 }
 0x2bf   :  { %9336 = vmatprep.subr.bf16.mxu1 %v10527_v0  ;;  %v10519_v0 = vld [vmem:[#allocation3 + $0x128] ss:$100 sps:$4 sm:$0xff]  }
 0x2c0   :  { %6748 = vmatmul.mubr.bf16.gmra.mxu1 %v10495_v4 }
 0x2c1   :  { %7459 = vmatmul.mubr.bf16.gmra.mxu0 %v10491_v1  ;;  %6755 = vmatprep.mubr.bf16.mxu1 %v10497_v7  ;;  %v10524_v7 = vld [vmem:[#allocation3 + $0x1f0] ss:$100 sps:$4 sm:$0xff]  }
 0x2c2   :  { %7466 = vmatprep.mubr.bf16.mxu0 %v10501_v8  ;;  %9337 = vmatpush3.bf16.msra.mxu1 %v10532_v51  ;;  %v10522_v51 = vld [vmem:[#allocation3 + $0x404] ss:$100 sps:$4 sm:$0xff]  }
 0x2c3   :  { %9338 = vmatprep.subr.bf16.mxu1 %v10534_v9  ;;  %v3055_v9 = vld [vmem:[#allocation2 + $0x163] sm:$0xff] }
 0x2c6   :  { %9339 = vmatpush3.bf16.msra.mxu1 %v10535_v10  ;;  %v10520_v10 = vld [vmem:[#allocation3 + $0x400] ss:$100 sps:$4 sm:$0xff]  }
 0x2c7   :  { %9340 = vmatprep.subr.bf16.mxu1 %v10536_v13  ;;  %v10528_v13 = vld [vmem:[#allocation3 + $0x2b8] ss:$100 sps:$4 sm:$0xff]  }
 0x2c8   :  { %6756 = vmatmul.mubr.bf16.gmra.mxu1 %v10503_v17  ;;  %v8914_v17 = vpack.c.bf16 %v3055_v9, %v3055_v9 }
 0x2c9   :  { %7467 = vmatmul.mubr.bf16.gmra.mxu0 %v10499_v16  ;;  %6763 = vmatprep.mubr.bf16.mxu1 %v10505_v18  ;;  %v10533_v16 = vld [vmem:[#allocation3 + $0x380] ss:$100 sps:$4 sm:$0xff]   ;;  %v10537_v18 = vld [vmem:[#allocation3 + $0x448] ss:$100 sps:$4 sm:$0xff]  }
 0x2ca   :  { %7474 = vmatprep.mubr.bf16.mxu0 %v10510_v14  ;;  %9341 = vmatpush3.bf16.msra.mxu1 %v10541_v12  ;;  %v10531_v14 = vld [vmem:[#allocation3 + $0x4cc] ss:$100 sps:$4 sm:$0xff]   ;;  %3280 = vst [vmem:[#allocation3 + $0x624] sm:$0xf] %v8914_v17  ;;  %3311 = vst [vmem:[#allocation3 + $0x5d4] sm:$0xf] %v8914_v17 }
 0x2cb   :  { %9342 = vmatprep.subr.bf16.mxu1 %v10543_v19  ;;  %v10529_v12 = vld [vmem:[#allocation3 + $0x4c8] ss:$100 sps:$4 sm:$0xff]   ;;  %v10540_v19 = vld [vmem:[#allocation3 + $0x594] ss:$100 sps:$4 sm:$0xff]  }
 0x2ce   :  { %9343 = vmatpush3.bf16.msra.mxu1 %v10544_v21  ;;  %v10542_v21 = vld [vmem:[#allocation3 + $0x510] ss:$100 sps:$4 sm:$0xff]  }
 0x2cf   :  { %9344 = vmatprep.subr.bf16.mxu1 %v10545_v23  ;;  %v9128_v38 = vpop.f32.mrf.mxu1  ;;  %v10538_v23 = vld [vmem:[#allocation3 + $0x590] ss:$100 sps:$4 sm:$0xff]  }
 0x2d0   :  { %6764 = vmatmul.mubr.bf16.gmra.mxu1 %v10511_v33 }
 0x2d1   :  { %7475 = vmatmul.mubr.bf16.gmra.mxu0 %v10508_v28  ;;  %6771 = vmatprep.mubr.bf16.mxu1 %v10515_v35  ;;  %v9129_v43 = vpop.f32.mrf.mxu1  ;;  %v10549_v28 = vld [vmem:[#allocation3 + $0x24] ss:$100 sps:$4 sm:$0xff]  }
 0x2d2   :  { %10088 = vmatprep.mubr.bf16.mxu0 %v10516_v36  ;;  %9345 = vmatpush3.bf16.msra.mxu1 %v10546_v34  ;;  %v11844_v46 = vadd.f32 %v9129_v43, %v9128_v38 }
 0x2d3   :  { %9346 = vmatprep.subr.bf16.mxu1 %v10550_v37  ;;  %v9131_v54 = vpop.f32.mrf.mxu1 }
 0x2d5   :  { %v9506_v41 = vpop.f32.mrf.mxu0  ;;  %v9132_v63 = vpop.f32.mrf.mxu1 }
 0x2d6   :  { %9347 = vmatpush3.bf16.msra.mxu1 %v10551_v39  ;;  %v11851_v1 = vadd.f32 %v9132_v63, %v9131_v54  ;;  %v10568_v39 = vld [vmem:[%s12626_s3 + $0x2b8] sm:$0xff]   ;;  %v10569_v54 = vld [vmem:[%s12626_s3 + $0x2f0] sm:$0xff]   ;;  %v10554_v63 = vld [vmem:[#allocation3 + $0xec] ss:$100 sps:$4 sm:$0xff]  }
 0x2d7   :  { %v9507_v49 = vpop.f32.mrf.mxu0  ;;  %9396 = vmatprep.subr.bf16.mxu1 %v10564_v50 }
 0x2d8   :  { %v11849_v52 = vadd.f32 %v9507_v49, %v9506_v41  ;;  %6772 = vmatmul.mubr.bf16.gmra.mxu1 %v10513_v57  ;;  %v10547_v49 = vld [vmem:[#allocation3 + $0x20] ss:$100 sps:$4 sm:$0xff]  }
 0x2d9   :  { %v9509_v55 = vpop.f32.mrf.mxu0  ;;  %10089 = vmatmul.mubr.bf16.vlgmr.msra.gmra.mxu0 %v10519_v0  ;;  %6779 = vmatprep.mubr.bf16.mxu1 %v10522_v51  ;;  %v11870_v0 = vld [vmem:[%s12628_s4] ss:$0 sm:$0xff] }
 0x2da   :  { %10092 = vmatprep.mubr.bf16.mxu0 %v10524_v7  ;;  %v10570_v7 = vld [vmem:[%s12626_s3 + $0x2b0] sm:$0xff]  }
 0x2db   :  { %v9510_v4 = vpop.f32.mrf.mxu0 }
 0x2dc   :  { %v11853_v8 = vadd.f32 %v9510_v4, %v9509_v55 }
 0x2e0   :  { %6780 = vmatmul.mubr.bf16.gmra.mxu1 %v10520_v10  ;;  %v10571_v10 = vld [vmem:[%s12626_s3 + $0x2e8] sm:$0xff]  }
 0x2e1   :  { %10093 = vmatmul.mubr.bf16.gmra.mxu0 %v10528_v13  ;;  %6787 = vmatprep.mubr.bf16.mxu1 %v10531_v14  ;;  %v6451_v13 = vadd.f32 %v11491_v15, %v11870_v0  ;;  %v9097_v14 = vadd.f32 %v11515_v31, %v11511_v24  ;;  %v10557_v24 = vld [vmem:[#allocation3 + $0x1b4] ss:$100 sps:$4 sm:$0xff]  }
 0x2e2   :  { %10096 = vmatprep.mubr.bf16.mxu0 %v10533_v16 }
 0x2e3   :  { %v6454_v15 = vadd.f32 %v9097_v14, %v11870_v0  ;;  %v10585_v14 = vld [vmem:[%s12626_s3 + $0x2c8] sm:$0xff]  }
 0x2e8   :  { %6788 = vmatmul.mubr.bf16.gmra.mxu1 %v10529_v12 }
 0x2e9   :  { %10097 = vmatmul.mubr.bf16.gmra.mxu0 %v10537_v18  ;;  %6795 = vmatprep.mubr.bf16.mxu1 %v10540_v19  ;;  %v10575_v18 = vld [vmem:[%s12626_s3 + $0x2a8] sm:$0xff]   ;;  %v10552_v19 = vld [vmem:[#allocation3 + $0xe8] ss:$100 sps:$4 sm:$0xff]  }
 0x2ea   :  { %10100 = vmatprep.mubr.bf16.mxu0 %v10542_v21 }
 0x2f0   :  { %v9134_v33 = vpop.f32.mrf.mxu1  ;;  %6796 = vmatmul.mubr.bf16.gmra.mxu1 %v10538_v23  ;;  %v10576_v23 = vld [vmem:[%s12626_s3 + $0x2e0] sm:$0xff]  }
 0x2f1   :  { %6836 = vmatprep.mubr.bf16.mxu1 %v10549_v28 }
 0x2f2   :  { %v9135_v35 = vpop.f32.mrf.mxu1 }
 0x2f3   :  { %v11855_v36 = vadd.f32 %v9135_v35, %v9134_v33 }
 0x2f4   :  { %v9137_v41 = vpop.f32.mrf.mxu1 }
 0x2f6   :  { %v9512_v34 = vpop.f32.mrf.mxu0  ;;  %v9138_v50 = vpop.f32.mrf.mxu1 }
 0x2f7   :  { %v11865_v55 = vadd.f32 %v9138_v50, %v9137_v41  ;;  %v6459_v41 = vadd.f32 %v11522_v60, %v11870_v0 }
 0x2f8   :  { %v9513_v37 = vpop.f32.mrf.mxu0  ;;  %v9156_v51 = vpop.f32.mrf.mxu1  ;;  %6837 = vmatmul.mubr.bf16.vlgmr.msra.gmra.mxu1 %v10547_v49 }
 0x2f9   :  { %v11857_v38 = vadd.f32 %v9513_v37, %v9512_v34  ;;  %6844 = vmatprep.mubr.bf16.mxu1 %v10554_v63  ;;  %9397 = vmatpush3.bf16.msra.mxu1 %v10568_v39  ;;  %v10577_v34 = vld [vmem:[%s12626_s3 + $0x2a0] sm:$0xff]   ;;  %v10578_v37 = vld [vmem:[%s12626_s3 + $0x2d8] sm:$0xff]  }
 0x2fa   :  { %v9515_v43 = vpop.f32.mrf.mxu0  ;;  %v9157_v9 = vpop.f32.mrf.mxu1  ;;  %9398 = vmatprep.subr.bf16.mxu1 %v10569_v54  ;;  %v10582_v54 = vld [vmem:[%s12626_s3 + $0x298] sm:$0xff]  }
 0x2fb   :  { %v9158_v16 = vadd.f32 %v9157_v9, %v9156_v51  ;;  %v10583_v51 = vld [vmem:[%s12626_s3 + $0x2d0] sm:$0xff]  }
 0x2fc   :  { %v9516_v57 = vpop.f32.mrf.mxu0  ;;  %v9159_v17 = vpop.f32.mrf.mxu1 }
 0x2fd   :  { %v11872_v4 = vadd.f32 %v9516_v57, %v9515_v43  ;;  %v11884_v12 = vadd.f32 %v9158_v16, %v6451_v13  ;;  %9399 = vmatpush3.bf16.msra.mxu1 %v10570_v7  ;;  %v9103_v43 = vadd.f32 %v11545_v61, %v11541_v53  ;;  %v10555_v57 = vld [vmem:[#allocation3 + $0x1b0] ss:$100 sps:$4 sm:$0xff]   ;;  %v10560_v53 = vld [vmem:[#allocation3 + $0x27c] ss:$100 sps:$4 sm:$0xff]   ;;  %v6467_v16 = vadd.f32 %v11552_v27, %v11870_v0 }
 0x2fe   :  { %v9160_v21 = vpop.f32.mrf.mxu1  ;;  %9400 = vmatprep.subr.bf16.mxu1 %v10571_v10  ;;  %v10584_v10 = vld [vmem:[%s12626_s3 + $0x290] sm:$0xff]  }
 0x2ff   :  { %v9161_v28 = vadd.f32 %v9160_v21, %v9159_v17  ;;  %v6462_v60 = vadd.f32 %v9103_v43, %v11870_v0  ;;  %v9109_v17 = vadd.f32 %v11567_v32, %v11564_v22  ;;  %v10563_v22 = vld [vmem:[#allocation3 + $0x344] ss:$100 sps:$4 sm:$0xff]  }
 0x300   :  { %v9162_v31 = vpop.f32.mrf.mxu1  ;;  %6845 = vmatmul.mubr.bf16.gmra.mxu1 %v10552_v19 }
 0x301   :  { %v11893_v33 = vadd.f32 %v9161_v28, %v6454_v15  ;;  %6852 = vmatprep.mubr.bf16.mxu1 %v10557_v24  ;;  %9401 = vmatpush3.bf16.msra.mxu1 %v10575_v18  ;;  %v10558_v15 = vld [vmem:[#allocation3 + $0x278] ss:$100 sps:$4 sm:$0xff]   ;;  %v10590_v24 = vld [vmem:[%s12626_s3 + $0x2c0] sm:$0xff]   ;;  %v6470_v27 = vadd.f32 %v9109_v17, %v11870_v0 }
 0x302   :  { %v9163_v35 = vpop.f32.mrf.mxu1  ;;  %9402 = vmatprep.subr.bf16.mxu1 %v10576_v23  ;;  %v10586_v23 = vld [vmem:[%s12626_s3 + $0x288] sm:$0xff]  }
 0x303   :  { %v9164_v39 = vadd.f32 %v9163_v35, %v9162_v31 }
 0x304   :  { %v9165_v49 = vpop.f32.mrf.mxu1 }
 0x305   :  { %v11905_v50 = vadd.f32 %v9164_v39, %v6459_v41  ;;  %9403 = vmatpush3.bf16.msra.mxu1 %v10577_v34  ;;  %v10604_v39 = vld [vmem:[%s12626_s3 + $0x3f8] sm:$0xff]  }
 0x306   :  { %v9166_v63 = vpop.f32.mrf.mxu1  ;;  %9404 = vmatprep.subr.bf16.mxu1 %v10578_v37  ;;  %v10591_v37 = vld [vmem:[%s12626_s3 + $0x280] sm:$0xff]  }
 0x307   :  { %v9167_v7 = vadd.f32 %v9166_v63, %v9165_v49  ;;  %v6475_v49 = vadd.f32 %v11574_v2, %v11870_v0  ;;  %v10567_v2 = vld [vmem:[#allocation3 + $0x40c] ss:$100 sps:$4 sm:$0xff]  }
 0x308   :  { %v9168_v61 = vpop.f32.mrf.mxu1  ;;  %6853 = vmatmul.mubr.bf16.gmra.mxu1 %v10555_v57 }
 0x309   :  { %v11914_v9 = vadd.f32 %v9167_v7, %v6462_v60  ;;  %6860 = vmatprep.mubr.bf16.mxu1 %v10560_v53  ;;  %9405 = vmatpush3.bf16.msra.mxu1 %v10582_v54  ;;  %v9115_v54 = vadd.f32 %v11747_v48, %v11739_v44  ;;  %v10561_v53 = vld [vmem:[#allocation3 + $0x340] ss:$100 sps:$4 sm:$0xff]  }
 0x30a   :  { %v9169_v13 = vpop.f32.mrf.mxu1  ;;  %9406 = vmatprep.subr.bf16.mxu1 %v10583_v51 }
 0x30b   :  { %v9170_v18 = vadd.f32 %v9169_v13, %v9168_v61  ;;  %v6478_v13 = vadd.f32 %v9115_v54, %v11870_v0 }
 0x30c   :  { %v9171_v19 = vpop.f32.mrf.mxu1 }
 0x30d   :  { %v11926_v21 = vadd.f32 %v9170_v18, %v6467_v16  ;;  %9407 = vmatpush3.bf16.msra.mxu1 %v10584_v10 }
 0x30e   :  { %v9172_v28 = vpop.f32.mrf.mxu1  ;;  %9408 = vmatprep.subr.bf16.mxu1 %v10585_v14 }
 0x30f   :  { %v9173_v31 = vadd.f32 %v9172_v28, %v9171_v19 }
 0x310   :  { %v9174_v32 = vpop.f32.mrf.mxu1  ;;  %6861 = vmatmul.mubr.bf16.gmra.mxu1 %v10558_v15  ;;  %v9121_v15 = vadd.f32 %v11784_v29, %v11779_v25  ;;  %v10651_v29 = vld [vmem:[#allocation3 + $0x5d8] ss:$100 sps:$4 sm:$0xff]  }
 0x311   :  { %v9518_v34 = vpop.f32.mrf.mxu0  ;;  %v11935_v35 = vadd.f32 %v9173_v31, %v6470_v27  ;;  %6868 = vmatprep.mubr.bf16.mxu1 %v10563_v22  ;;  %9409 = vmatpush3.bf16.msra.mxu1 %v10586_v23  ;;  %v6483_v23 = vadd.f32 %v11755_v59, %v11870_v0 }
 0x312   :  { %v9175_v41 = vpop.f32.mrf.mxu1  ;;  %9410 = vmatprep.subr.bf16.mxu1 %v10590_v24  ;;  %10101 = vmatmul.mubr.bf16.gmra.mxu0 %v10651_v29 }
 0x313   :  { %v9519_v43 = vpop.f32.mrf.mxu0  ;;  %v9176_v57 = vadd.f32 %v9175_v41, %v9174_v32  ;;  %v10565_v32 = vld [vmem:[#allocation3 + $0x408] ss:$100 sps:$4 sm:$0xff]   ;;  %v6486_v41 = vadd.f32 %v9121_v15, %v11870_v0 }
 0x314   :  { %v11947_v63 = vadd.f32 %v9519_v43, %v9518_v34  ;;  %v9177_v51 = vpop.f32.mrf.mxu1 }
 0x315   :  { %v9521_v60 = vpop.f32.mrf.mxu0  ;;  %v11949_v7 = vadd.f32 %v9176_v57, %v6475_v49  ;;  %9411 = vmatpush3.bf16.msra.mxu1 %v10591_v37  ;;  %v10574_v49 = vld [vmem:[#allocation3 + $0x4d4] ss:$100 sps:$4 sm:$0xff]  }
 0x316   :  { %v9178_v61 = vpop.f32.mrf.mxu1  ;;  %9524 = vmatprep.subr.bf16.mxu1 %v10604_v39 }
 0x317   :  { %v9522_v10 = vpop.f32.mrf.mxu0  ;;  %v9179_v14 = vadd.f32 %v9178_v61, %v9177_v51 }
 0x318   :  { %v11952_v16 = vadd.f32 %v9522_v10, %v9521_v60  ;;  %v9180_v17 = vpop.f32.mrf.mxu1  ;;  %6869 = vmatmul.mubr.bf16.gmra.mxu1 %v10561_v53  ;;  %v6491_v60 = vadd.f32 %v11789_v42, %v11870_v0  ;;  %v9127_v53 = vadd.f32 %v11833_v30, %v11825_v20  ;;  %v10581_v42 = vld [vmem:[#allocation3 + $0x59c] ss:$100 sps:$4 sm:$0xff]  }
 0x319   :  { %v9604_v44 = vpop.f32.mrf.mxu0  ;;  %v11954_v48 = vadd.f32 %v9179_v14, %v6478_v13  ;;  %6876 = vmatprep.mubr.bf16.mxu1 %v10567_v2 }
 0x31a   :  { %v9181_v18 = vpop.f32.mrf.mxu1 }
 0x31b   :  { %v9605_v19 = vpop.f32.mrf.mxu0  ;;  %v9182_v28 = vadd.f32 %v9181_v18, %v9180_v17  ;;  %v10572_v17 = vld [vmem:[#allocation3 + $0x4d0] ss:$100 sps:$4 sm:$0xff]  }
 0x31c   :  { %v11960_v24 = vadd.f32 %v9605_v19, %v9604_v44  ;;  %v9183_v27 = vpop.f32.mrf.mxu1  ;;  %v6494_v19 = vadd.f32 %v9127_v53, %v11870_v0 }
 0x31d   :  { %v9607_v31 = vpop.f32.mrf.mxu0  ;;  %v11962_v22 = vadd.f32 %v9182_v28, %v6483_v23 }
 0x31e   :  { %v9184_v34 = vpop.f32.mrf.mxu1 }
 0x31f   :  { %v9608_v37 = vpop.f32.mrf.mxu0  ;;  %v9185_v43 = vadd.f32 %v9184_v34, %v9183_v27 }
 0x320   :  { %v11965_v39 = vadd.f32 %v9608_v37, %v9607_v31  ;;  %v9186_v59 = vpop.f32.mrf.mxu1  ;;  %6877 = vmatmul.mubr.bf16.gmra.mxu1 %v10565_v32  ;;  %v6499_v32 = vadd.f32 %v11844_v46, %v11870_v0 }
 0x321   :  { %v9610_v54 = vpop.f32.mrf.mxu0  ;;  %v11967_v25 = vadd.f32 %v9185_v43, %v6486_v41  ;;  %6884 = vmatprep.mubr.bf16.mxu1 %v10574_v49 }
 0x322   :  { %v9187_v57 = vpop.f32.mrf.mxu1 }
 0x323   :  { %v9611_v51 = vpop.f32.mrf.mxu0  ;;  %v9188_v61 = vadd.f32 %v9187_v57, %v9186_v59  ;;  %v6502_v59 = vadd.f32 %v11851_v1, %v11870_v0 }
 0x324   :  { %v11973_v10 = vadd.f32 %v9611_v51, %v9610_v54  ;;  %v9189_v13 = vpop.f32.mrf.mxu1  ;;  %v10579_v54 = vld [vmem:[#allocation3 + $0x598] ss:$100 sps:$4 sm:$0xff]  }
 0x325   :  { %v9613_v14 = vpop.f32.mrf.mxu0  ;;  %v11975_v2 = vadd.f32 %v9188_v61, %v6491_v60  ;;  %v2776_v51 = vld [vmem:[#allocation2 + $0x172] sm:$0xff] }
 0x326   :  { %v9190_v44 = vpop.f32.mrf.mxu1  ;;  %v3056_v60 = vld [vmem:[#allocation2 + $0x173] sm:$0xff]  ;;  %v8874_v46 = vpack.c.bf16 %v2776_v51, %v2776_v51 }
 0x327   :  { %v9614_v18 = vpop.f32.mrf.mxu0  ;;  %v9191_v23 = vadd.f32 %v9190_v44, %v9189_v13  ;;  %v10589_v13 = vld [vmem:[#allocation3 + $0x2c] ss:$100 sps:$4 sm:$0xff]  }
 0x328   :  { %v11978_v15 = vadd.f32 %v9614_v18, %v9613_v14  ;;  %v9192_v28 = vpop.f32.mrf.mxu1  ;;  %6885 = vmatmul.mubr.bf16.gmra.mxu1 %v10572_v17  ;;  %v8918_v14 = vpack.c.bf16 %v3056_v60, %v3056_v60  ;;  %3032 = vst [vmem:[#allocation3 + $0x634] sm:$0xf] %v8874_v46 }
 0x329   :  { %v9616_v20 = vpop.f32.mrf.mxu0  ;;  %v11980_v30 = vadd.f32 %v9191_v23, %v6494_v19  ;;  %6892 = vmatprep.mubr.bf16.mxu1 %v10581_v42  ;;  %v6507_v23 = vadd.f32 %v11855_v36, %v11870_v0  ;;  %v6510_v36 = vadd.f32 %v11865_v55, %v11870_v0  ;;  %v10611_v55 = vld [vmem:[%s12626_s3 + $0x3e8] sm:$0xff]  }
 0x32a   :  { %v9193_v27 = vpop.f32.mrf.mxu1  ;;  %3312 = vst [vmem:[#allocation3 + $0x638] sm:$0xf] %v8918_v14 }
 0x32b   :  { %v9617_v31 = vpop.f32.mrf.mxu0  ;;  %v9194_v34 = vadd.f32 %v9193_v27, %v9192_v28 }
 0x32c   :  { %v11984_v37 = vadd.f32 %v9617_v31, %v9616_v20  ;;  %v9195_v41 = vpop.f32.mrf.mxu1 }
 0x32d   :  { %v9619_v43 = vpop.f32.mrf.mxu0  ;;  %v11986_v49 = vadd.f32 %v9194_v34, %v6499_v32  ;;  %v10608_v32 = vld [vmem:[%s12626_s3 + $0x3b8] sm:$0xff]   ;;  %v10587_v34 = vld [vmem:[#allocation3 + $0x28] ss:$100 sps:$4 sm:$0xff]  }
 0x32e   :  { %v9196_v29 = vpop.f32.mrf.mxu1 }
 0x32f   :  { %v9620_v57 = vpop.f32.mrf.mxu0  ;;  %v9197_v53 = vadd.f32 %v9196_v29, %v9195_v41 }
 0x330   :  { %v11990_v61 = vadd.f32 %v9620_v57, %v9619_v43  ;;  %v9198_v17 = vpop.f32.mrf.mxu1  ;;  %6893 = vmatmul.mubr.bf16.gmra.mxu1 %v10579_v54  ;;  %v10594_v57 = vld [vmem:[#allocation3 + $0xf4] ss:$100 sps:$4 sm:$0xff]  }
 0x331   :  { %v9622_v44 = vpop.f32.mrf.mxu0  ;;  %v11992_v18 = vadd.f32 %v9197_v53, %v6502_v59  ;;  %6933 = vmatprep.mubr.bf16.mxu1 %v10589_v13  ;;  %v10609_v59 = vld [vmem:[%s12626_s3 + $0x3f0] sm:$0xff]  }
 0x332   :  { %v9199_v1 = vpop.f32.mrf.mxu1  ;;  %v10610_v13 = vld [vmem:[%s12626_s3 + $0x3b0] sm:$0xff]  }
 0x333   :  { %v9623_v19 = vpop.f32.mrf.mxu0  ;;  %v9200_v42 = vadd.f32 %v9199_v1, %v9198_v17 }
 0x334   :  { %v11996_v28 = vadd.f32 %v9623_v19, %v9622_v44  ;;  %v9201_v20 = vpop.f32.mrf.mxu1 }
 0x335   :  { %v9625_v27 = vpop.f32.mrf.mxu0  ;;  %v11998_v31 = vadd.f32 %v9200_v42, %v6507_v23  ;;  %v10615_v23 = vld [vmem:[%s12626_s3 + $0x3a8] sm:$0xff]  }
 0x336   :  { %v9202_v41 = vpop.f32.mrf.mxu1  ;;  %v10592_v42 = vld [vmem:[#allocation3 + $0xf0] ss:$100 sps:$4 sm:$0xff]  }
 0x337   :  { %v9626_v43 = vpop.f32.mrf.mxu0  ;;  %v9203_v54 = vadd.f32 %v9202_v41, %v9201_v20 }
 0x338   :  { %v12008_v29 = vadd.f32 %v9626_v43, %v9625_v27  ;;  %v9220_v51 = vpop.f32.mrf.mxu1  ;;  %6934 = vmatmul.mubr.bf16.vlgmr.msra.gmra.mxu1 %v10587_v34  ;;  %v10597_v43 = vld [vmem:[#allocation3 + $0x1bc] ss:$100 sps:$4 sm:$0xff]  }
 0x339   :  { %v9628_v60 = vpop.f32.mrf.mxu0  ;;  %v12010_v53 = vadd.f32 %v9203_v54, %v6510_v36  ;;  %6941 = vmatprep.mubr.bf16.mxu1 %v10594_v57  ;;  %9525 = vmatpush3.bf16.msra.mxu1 %v10608_v32  ;;  %v10616_v32 = vld [vmem:[%s12626_s3 + $0x3e0] sm:$0xff]  }
 0x33a   :  { %v9221_v46 = vpop.f32.mrf.mxu1  ;;  %9526 = vmatprep.subr.bf16.mxu1 %v10609_v59  ;;  %v10617_v54 = vld [vmem:[%s12626_s3 + $0x3a0] sm:$0xff]  }
 0x33b   :  { %v9629_v14 = vpop.f32.mrf.mxu0  ;;  %v9222_v0 = vadd.f32 %v9221_v46, %v9220_v51 }
 0x33c   :  { %v12018_v17 = vadd.f32 %v9629_v14, %v9628_v60  ;;  %v9223_v44 = vpop.f32.mrf.mxu1  ;;  %v10618_v60 = vld [vmem:[%s12626_s3 + $0x3d8] sm:$0xff]  }
 0x33d   :  { %v9631_v1 = vpop.f32.mrf.mxu0  ;;  %v12021_v19 = vadd.f32 %v9222_v0, %v11884_v12  ;;  %9527 = vmatpush3.bf16.msra.mxu1 %v10610_v13  ;;  %v10622_v0 = vld [vmem:[%s12626_s3 + $0x398] sm:$0xff]  }
 0x33e   :  { %v9224_v20 = vpop.f32.mrf.mxu1  ;;  %9528 = vmatprep.subr.bf16.mxu1 %v10611_v55 }
 0x33f   :  { %v9632_v27 = vpop.f32.mrf.mxu0  ;;  %v9225_v34 = vadd.f32 %v9224_v20, %v9223_v44  ;;  %v10595_v44 = vld [vmem:[#allocation3 + $0x1b8] ss:$100 sps:$4 sm:$0xff]  }
 0x340   :  { %v12029_v41 = vadd.f32 %v9632_v27, %v9631_v1  ;;  %v9226_v59 = vpop.f32.mrf.mxu1  ;;  %6942 = vmatmul.mubr.bf16.gmra.mxu1 %v10592_v42  ;;  %v10623_v42 = vld [vmem:[%s12626_s3 + $0x3d0] sm:$0xff]  }
 0x341   :  { %v9634_v12 = vpop.f32.mrf.mxu0  ;;  %v12032_v36 = vadd.f32 %v9225_v34, %v11893_v33  ;;  %6949 = vmatprep.mubr.bf16.mxu1 %v10597_v43  ;;  %9529 = vmatpush3.bf16.msra.mxu1 %v10615_v23 }
 0x342   :  { %v9227_v57 = vpop.f32.mrf.mxu1  ;;  %9530 = vmatprep.subr.bf16.mxu1 %v10616_v32  ;;  %v10600_v32 = vld [vmem:[#allocation3 + $0x284] ss:$100 sps:$4 sm:$0xff]  }
 0x343   :  { %v9635_v51 = vpop.f32.mrf.mxu0  ;;  %v9228_v13 = vadd.f32 %v9227_v57, %v9226_v59  ;;  %v10624_v59 = vld [vmem:[%s12626_s3 + $0x390] sm:$0xff]   ;;  %v10625_v57 = vld [vmem:[%s12626_s3 + $0x3c8] sm:$0xff]  }
 0x344   :  { %v12040_v46 = vadd.f32 %v9635_v51, %v9634_v12  ;;  %v9229_v14 = vpop.f32.mrf.mxu1 }
 0x345   :  { %v9637_v55 = vpop.f32.mrf.mxu0  ;;  %v12043_v33 = vadd.f32 %v9228_v13, %v11905_v50  ;;  %9531 = vmatpush3.bf16.msra.mxu1 %v10617_v54 }
 0x346   :  { %v9230_v1 = vpop.f32.mrf.mxu1  ;;  %9532 = vmatprep.subr.bf16.mxu1 %v10618_v60 }
 0x347   :  { %v9638_v23 = vpop.f32.mrf.mxu0  ;;  %v9231_v20 = vadd.f32 %v9230_v1, %v9229_v14 }
 0x348   :  { %v12051_v27 = vadd.f32 %v9638_v23, %v9637_v55  ;;  %v9232_v34 = vpop.f32.mrf.mxu1  ;;  %6950 = vmatmul.mubr.bf16.gmra.mxu1 %v10595_v44  ;;  %v10626_v55 = vld [vmem:[%s12626_s3 + $0x388] sm:$0xff]   ;;  %v10630_v23 = vld [vmem:[%s12626_s3 + $0x3c0] sm:$0xff]  }
 0x349   :  { %v9640_v50 = vpop.f32.mrf.mxu0  ;;  %v12054_v43 = vadd.f32 %v9231_v20, %v11914_v9  ;;  %6957 = vmatprep.mubr.bf16.mxu1 %v10600_v32  ;;  %9533 = vmatpush3.bf16.msra.mxu1 %v10622_v0  ;;  %v10598_v0 = vld [vmem:[#allocation3 + $0x280] ss:$100 sps:$4 sm:$0xff]   ;;  %v10603_v32 = vld [vmem:[#allocation3 + $0x34c] ss:$100 sps:$4 sm:$0xff]  }
 0x34a   :  { %v9233_v12 = vpop.f32.mrf.mxu1  ;;  %9534 = vmatprep.subr.bf16.mxu1 %v10623_v42 }
 0x34b   :  { %v9641_v54 = vpop.f32.mrf.mxu0  ;;  %v9234_v51 = vadd.f32 %v9233_v12, %v9232_v34 }
 0x34c   :  { %v12062_v60 = vadd.f32 %v9641_v54, %v9640_v50  ;;  %v9235_v13 = vpop.f32.mrf.mxu1 }
 0x34d   :  { %v9643_v14 = vpop.f32.mrf.mxu0  ;;  %v12065_v9 = vadd.f32 %v9234_v51, %v11926_v21  ;;  %9535 = vmatpush3.bf16.msra.mxu1 %v10624_v59  ;;  %v10631_v59 = vld [vmem:[%s12626_s3 + $0x380] sm:$0xff]  }
 0x34e   :  { %12631 = vst [vmem:[#allocation4_spill] sm:$0xff] %v12062_v60  ;;  %v9236_v44 = vpop.f32.mrf.mxu1  ;;  %9536 = vmatprep.subr.bf16.mxu1 %v10625_v57  ;;  %v10644_v57 = vld [vmem:[%s12626_s3 + $0x4f8] sm:$0xff]  }
 0x34f   :  { %v9644_v1 = vpop.f32.mrf.mxu0  ;;  %v9237_v42 = vadd.f32 %v9236_v44, %v9235_v13 }
 0x350   :  { %v12073_v20 = vadd.f32 %v9644_v1, %v9643_v14  ;;  %v9238_v34 = vpop.f32.mrf.mxu1  ;;  %6958 = vmatmul.mubr.bf16.gmra.mxu1 %v10598_v0 }
 0x351   :  { %v9646_v21 = vpop.f32.mrf.mxu0  ;;  %v12076_v50 = vadd.f32 %v9237_v42, %v11935_v35  ;;  %6965 = vmatprep.mubr.bf16.mxu1 %v10603_v32  ;;  %9537 = vmatpush3.bf16.msra.mxu1 %v10626_v55  ;;  %v10601_v55 = vld [vmem:[#allocation3 + $0x348] ss:$100 sps:$4 sm:$0xff]  }
 0x352   :  { %12632 = vst [vmem:[#allocation5_spill] sm:$0xff] %v12073_v20  ;;  %v9239_v12 = vpop.f32.mrf.mxu1  ;;  %9538 = vmatprep.subr.bf16.mxu1 %v10630_v23  ;;  %v10607_v23 = vld [vmem:[#allocation3 + $0x414] ss:$100 sps:$4 sm:$0xff]  }
 0x353   :  { %v9647_v54 = vpop.f32.mrf.mxu0  ;;  %v9240_v51 = vadd.f32 %v9239_v12, %v9238_v34 }
 0x354   :  { %v12084_v13 = vadd.f32 %v9647_v54, %v9646_v21  ;;  %v9241_v14 = vpop.f32.mrf.mxu1 }
 0x355   :  { %v9649_v0 = vpop.f32.mrf.mxu0  ;;  %v12087_v35 = vadd.f32 %v9240_v51, %v11949_v7  ;;  %9539 = vmatpush3.bf16.msra.mxu1 %v10631_v59 }
 0x356   :  { %v9242_v44 = vpop.f32.mrf.mxu1  ;;  %9652 = vmatprep.subr.bf16.mxu1 %v10644_v57 }
 0x357   :  { %v9650_v1 = vpop.f32.mrf.mxu0  ;;  %v9243_v42 = vadd.f32 %v9242_v44, %v9241_v14  ;;  %v10605_v14 = vld [vmem:[#allocation3 + $0x410] ss:$100 sps:$4 sm:$0xff]  }
 0x358   :  { %v12089_v32 = vadd.f32 %v9650_v1, %v9649_v0  ;;  %v9244_v20 = vpop.f32.mrf.mxu1  ;;  %6966 = vmatmul.mubr.bf16.gmra.mxu1 %v10601_v55 }
 0x359   :  { %v9732_v60 = vpop.f32.mrf.mxu0  ;;  %v12092_v34 = vadd.f32 %v9243_v42, %v11954_v48  ;;  %6973 = vmatprep.mubr.bf16.mxu1 %v10607_v23 }
 0x35a   :  { %12633 = vst [vmem:[#allocation6_spill] sm:$0xff] %v12089_v32  ;;  %v9245_v21 = vpop.f32.mrf.mxu1  ;;  %v10614_v32 = vld [vmem:[#allocation3 + $0x4dc] ss:$100 sps:$4 sm:$0xff]  }
 0x35b   :  { %v9733_v12 = vpop.f32.mrf.mxu0  ;;  %v9246_v7 = vadd.f32 %v9245_v21, %v9244_v20 }
 0x35c   :  { %v12094_v54 = vadd.f32 %v9733_v12, %v9732_v60  ;;  %v9247_v59 = vpop.f32.mrf.mxu1 }
 0x35d   :  { %v9735_v51 = vpop.f32.mrf.mxu0  ;;  %v12097_v57 = vadd.f32 %v9246_v7, %v11962_v22 }
 0x35e   :  { %v9248_v0 = vpop.f32.mrf.mxu1 }
 0x35f   :  { %v9736_v44 = vpop.f32.mrf.mxu0  ;;  %v9249_v1 = vadd.f32 %v9248_v0, %v9247_v59 }
 0x360   :  { %v12099_v55 = vadd.f32 %v9736_v44, %v9735_v51  ;;  %v9250_v48 = vpop.f32.mrf.mxu1  ;;  %6974 = vmatmul.mubr.bf16.gmra.mxu1 %v10605_v14  ;;  %v10612_v51 = vld [vmem:[#allocation3 + $0x4d8] ss:$100 sps:$4 sm:$0xff]  }
 0x361   :  { %v9738_v42 = vpop.f32.mrf.mxu0  ;;  %v12102_v23 = vadd.f32 %v9249_v1, %v11967_v25  ;;  %6981 = vmatprep.mubr.bf16.mxu1 %v10614_v32 }
 0x362   :  { %12634 = vst [vmem:[#allocation7_spill] sm:$0xff] %v12099_v55  ;;  %v9251_v60 = vpop.f32.mrf.mxu1  ;;  %v10621_v55 = vld [vmem:[#allocation3 + $0x5a4] ss:$100 sps:$4 sm:$0xff]  }
 0x363   :  { %v9739_v20 = vpop.f32.mrf.mxu0  ;;  %v9252_v21 = vadd.f32 %v9251_v60, %v9250_v48 }
 0x364   :  { %v12104_v12 = vadd.f32 %v9739_v20, %v9738_v42  ;;  %v9253_v22 = vpop.f32.mrf.mxu1 }
 0x365   :  { %v12106_v7 = vpop.f32.mrf.mxu0  ;;  %v12109_v59 = vadd.f32 %v9252_v21, %v11975_v2 }
 0x366   :  { %12635 = vst [vmem:[#allocation8_spill] sm:$0xff] %v12104_v12  ;;  %12636 = vst [vmem:[#allocation9_spill] sm:$0xff] %v12106_v7  ;;  %v9254_v0 = vpop.f32.mrf.mxu1 }
 0x367   :  { %v12111_v44 = vpop.f32.mrf.mxu0  ;;  %v9255_v14 = vadd.f32 %v9254_v0, %v9253_v22  ;;  %v10619_v22 = vld [vmem:[#allocation3 + $0x5a0] ss:$100 sps:$4 sm:$0xff]  }
 0x368   :  { %12637 = vst [vmem:[#allocation10_spill] sm:$0xff] %v12111_v44  ;;  %v9256_v25 = vpop.f32.mrf.mxu1  ;;  %6982 = vmatmul.mubr.bf16.gmra.mxu1 %v10612_v51 }
 0x369   :  { %v12113_v32 = vpop.f32.mrf.mxu0  ;;  %v12116_v1 = vadd.f32 %v9255_v14, %v11980_v30  ;;  %6989 = vmatprep.mubr.bf16.mxu1 %v10621_v55 }
 0x36a   :  { %12638 = vst [vmem:[#allocation11_spill] sm:$0xff] %v12113_v32  ;;  %v9257_v48 = vpop.f32.mrf.mxu1  ;;  %v10629_v32 = vld [vmem:[#allocation3 + $0x3c] ss:$100 sps:$4 sm:$0xff]  }
 0x36b   :  { %v12118_v42 = vpop.f32.mrf.mxu0  ;;  %v9258_v60 = vadd.f32 %v9257_v48, %v9256_v25 }
 0x36c   :  { %12639 = vst [vmem:[#allocation12_spill] sm:$0xff] %v12118_v42  ;;  %v9259_v2 = vpop.f32.mrf.mxu1 }
 0x36d   :  { %v12120_v20 = vpop.f32.mrf.mxu0  ;;  %v12123_v21 = vadd.f32 %v9258_v60, %v11986_v49 }
 0x36e   :  { %12640 = vst [vmem:[#allocation13_spill] sm:$0xff] %v12120_v20  ;;  %v9260_v0 = vpop.f32.mrf.mxu1 }
 0x36f   :  { %v12125_v44 = vpop.f32.mrf.mxu0  ;;  %v9261_v51 = vadd.f32 %v9260_v0, %v9259_v2  ;;  %v10648_v2 = vld [vmem:[%s12626_s3 + $0x4b8] sm:$0xff]  }
 0x370   :  { %12641 = vst [vmem:[#allocation14_spill] sm:$0xff] %v12125_v44  ;;  %v9262_v7 = vpop.f32.mrf.mxu1  ;;  %6990 = vmatmul.mubr.bf16.gmra.mxu1 %v10619_v22  ;;  %v10627_v22 = vld [vmem:[#allocation3 + $0x38] ss:$100 sps:$4 sm:$0xff]  }
 0x371   :  { %v12127_v30 = vpop.f32.mrf.mxu0  ;;  %v12130_v55 = vadd.f32 %v9261_v51, %v11992_v18  ;;  %7127 = vmatprep.mubr.bf16.mxu1 %v10629_v32  ;;  %v10649_v18 = vld [vmem:[%s12626_s3 + $0x4f0] sm:$0xff]  }
 0x372   :  { %12642 = vst [vmem:[#allocation15_spill] sm:$0xff] %v12127_v30  ;;  %v9263_v14 = vpop.f32.mrf.mxu1 }
 0x373   :  { %v12132_v25 = vpop.f32.mrf.mxu0  ;;  %v9264_v48 = vadd.f32 %v9263_v14, %v9262_v7  ;;  %v10634_v7 = vld [vmem:[#allocation3 + $0x104] ss:$100 sps:$4 sm:$0xff]  }
 0x374   :  { %12643 = vst [vmem:[#allocation16_spill] sm:$0xff] %v12132_v25  ;;  %v9265_v49 = vpop.f32.mrf.mxu1 }
 0x375   :  { %v12134_v60 = vpop.f32.mrf.mxu0  ;;  %v12137_v20 = vadd.f32 %v9264_v48, %v11998_v31  ;;  %v10650_v48 = vld [vmem:[%s12626_s3 + $0x4b0] sm:$0xff]  }
 0x376   :  { %12644 = vst [vmem:[#allocation17_spill] sm:$0xff] %v12134_v60  ;;  %v9266_v0 = vpop.f32.mrf.mxu1 }
 0x377   :  { %v12142_v30 = vpop.f32.mrf.mxu0  ;;  %v9267_v32 = vadd.f32 %v9266_v0, %v9265_v49  ;;  %v10652_v49 = vld [vmem:[%s12626_s3 + $0x4e8] sm:$0xff]  }
 0x378   :  { %12645 = vst [vmem:[#allocation18_spill] sm:$0xff] %v12142_v30  ;;  %v9284_v51 = vpop.f32.mrf.mxu1  ;;  %7128 = vmatmul.mubr.bf16.vlgmr.msra.gmra.mxu1 %v10627_v22 }
 0x379   :  { %v9756_v14 = vpop.f32.mrf.mxu0  ;;  %v12148_v31 = vadd.f32 %v9267_v32, %v12010_v53  ;;  %7135 = vmatprep.mubr.bf16.mxu1 %v10634_v7  ;;  %9653 = vmatpush3.bf16.msra.mxu1 %v10648_v2  ;;  %v10656_v2 = vld [vmem:[%s12626_s3 + $0x4a8] sm:$0xff]   ;;  %v10632_v32 = vld [vmem:[#allocation3 + $0x100] ss:$100 sps:$4 sm:$0xff]  }
 0x37a   :  { %v9285_v60 = vpop.f32.mrf.mxu1  ;;  %9654 = vmatprep.subr.bf16.mxu1 %v10649_v18 }
 0x37b   :  { %v9757_v30 = vpop.f32.mrf.mxu0  ;;  %v9286_v0 = vadd.f32 %v9285_v60, %v9284_v51  ;;  %v10657_v60 = vld [vmem:[%s12626_s3 + $0x4e0] sm:$0xff]  }
 0x37c   :  { %v12156_v25 = vadd.f32 %v9757_v30, %v9756_v14  ;;  %v9287_v22 = vpop.f32.mrf.mxu1  ;;  %v10637_v14 = vld [vmem:[#allocation3 + $0x1cc] ss:$100 sps:$4 sm:$0xff]  }
 0x37d   :  { %v9759_v44 = vpop.f32.mrf.mxu0  ;;  %v12159_v53 = vadd.f32 %v9286_v0, %v12021_v19  ;;  %9655 = vmatpush3.bf16.msra.mxu1 %v10650_v48 }
 0x37e   :  { %12646 = vst [vmem:[#allocation19_spill] sm:$0xff] %v12156_v25  ;;  %v9288_v7 = vpop.f32.mrf.mxu1  ;;  %9656 = vmatprep.subr.bf16.mxu1 %v10652_v49  ;;  %v10658_v49 = vld [vmem:[%s12626_s3 + $0x4a0] sm:$0xff]  }
 0x37f   :  { %v9760_v18 = vpop.f32.mrf.mxu0  ;;  %v9289_v30 = vadd.f32 %v9288_v7, %v9287_v22 }
 0x380   :  { %v12167_v51 = vadd.f32 %v9760_v18, %v9759_v44  ;;  %v9290_v42 = vpop.f32.mrf.mxu1  ;;  %7136 = vmatmul.mubr.bf16.gmra.mxu1 %v10632_v32  ;;  %v10659_v44 = vld [vmem:[%s12626_s3 + $0x4d8] sm:$0xff]   ;;  %v10635_v18 = vld [vmem:[#allocation3 + $0x1c8] ss:$100 sps:$4 sm:$0xff]  }
 0x381   :  { %v9762_v19 = vpop.f32.mrf.mxu0  ;;  %v12170_v48 = vadd.f32 %v9289_v30, %v12032_v36  ;;  %7143 = vmatprep.mubr.bf16.mxu1 %v10637_v14  ;;  %9657 = vmatpush3.bf16.msra.mxu1 %v10656_v2  ;;  %v10663_v2 = vld [vmem:[%s12626_s3 + $0x498] sm:$0xff]  }
 0x382   :  { %12647 = vst [vmem:[#allocation20_spill] sm:$0xff] %v12167_v51  ;;  %v9291_v0 = vpop.f32.mrf.mxu1  ;;  %9658 = vmatprep.subr.bf16.mxu1 %v10657_v60  ;;  %v10664_v60 = vld [vmem:[%s12626_s3 + $0x4d0] sm:$0xff]  }
 0x383   :  { %v9763_v25 = vpop.f32.mrf.mxu0  ;;  %v9292_v22 = vadd.f32 %v9291_v0, %v9290_v42  ;;  %v10640_v42 = vld [vmem:[#allocation3 + $0x294] ss:$100 sps:$4 sm:$0xff]  }
 0x384   :  { %v12178_v7 = vadd.f32 %v9763_v25, %v9762_v19  ;;  %v9293_v32 = vpop.f32.mrf.mxu1  ;;  %v10666_v0 = vld [vmem:[%s12626_s3 + $0x4c8] sm:$0xff]  }
 0x385   :  { %v12181_v36 = vadd.f32 %v9292_v22, %v12043_v33  ;;  %9659 = vmatpush3.bf16.msra.mxu1 %v10658_v49  ;;  %v10665_v33 = vld [vmem:[%s12626_s3 + $0x490] sm:$0xff]  }
 0x386   :  { %12648 = vst [vmem:[#allocation21_spill] sm:$0xff] %v12178_v7  ;;  %v9294_v30 = vpop.f32.mrf.mxu1  ;;  %9660 = vmatprep.subr.bf16.mxu1 %v10659_v44 }
 0x387   :  { %v9295_v14 = vadd.f32 %v9294_v30, %v9293_v32  ;;  %v10671_v30 = vld [vmem:[%s12626_s3 + $0x4c0] sm:$0xff]  }
 0x388   :  { %v9296_v25 = vpop.f32.mrf.mxu1  ;;  %7144 = vmatmul.mubr.bf16.gmra.mxu1 %v10635_v18 }
 0x389   :  { %v12190_v19 = vadd.f32 %v9295_v14, %v12054_v43  ;;  %7151 = vmatprep.mubr.bf16.mxu1 %v10640_v42  ;;  %9661 = vmatpush3.bf16.msra.mxu1 %v10663_v2  ;;  %v10667_v43 = vld [vmem:[%s12626_s3 + $0x488] sm:$0xff]   ;;  %v10643_v14 = vld [vmem:[#allocation3 + $0x35c] ss:$100 sps:$4 sm:$0xff]  }
 0x38a   :  { %v9297_v49 = vpop.f32.mrf.mxu1  ;;  %9662 = vmatprep.subr.bf16.mxu1 %v10664_v60  ;;  %v10638_v2 = vld [vmem:[#allocation3 + $0x290] ss:$100 sps:$4 sm:$0xff]  }
 0x38b   :  { %v9298_v44 = vadd.f32 %v9297_v49, %v9296_v25  ;;  %v10685_v49 = vld [vmem:[%s12626_s3 + $0x5f8] sm:$0xff]  }
 0x38c   :  { %v9299_v22 = vpop.f32.mrf.mxu1 }
 0x38d   :  { %v12199_v32 = vadd.f32 %v9298_v44, %v12065_v9  ;;  %9663 = vmatpush3.bf16.msra.mxu1 %v10665_v33  ;;  %v10672_v9 = vld [vmem:[%s12626_s3 + $0x480] sm:$0xff]  }
 0x38e   :  { %v9300_v18 = vpop.f32.mrf.mxu1  ;;  %9664 = vmatprep.subr.bf16.mxu1 %v10666_v0 }
 0x38f   :  { %v9301_v60 = vadd.f32 %v9300_v18, %v9299_v22  ;;  %v10647_v18 = vld [vmem:[#allocation3 + $0x424] ss:$100 sps:$4 sm:$0xff]  }
 0x390   :  { %v9302_v42 = vpop.f32.mrf.mxu1  ;;  %7152 = vmatmul.mubr.bf16.gmra.mxu1 %v10638_v2 }
 0x391   :  { %v12208_v25 = vadd.f32 %v9301_v60, %v12076_v50  ;;  %7159 = vmatprep.mubr.bf16.mxu1 %v10643_v14  ;;  %9665 = vmatpush3.bf16.msra.mxu1 %v10667_v43  ;;  %v10641_v50 = vld [vmem:[#allocation3 + $0x358] ss:$100 sps:$4 sm:$0xff]  }
 0x392   :  { %v9303_v33 = vpop.f32.mrf.mxu1  ;;  %9666 = vmatprep.subr.bf16.mxu1 %v10671_v30 }
 0x393   :  { %v9304_v0 = vadd.f32 %v9303_v33, %v9302_v42 }
 0x394   :  { %v9305_v44 = vpop.f32.mrf.mxu1 }
 0x395   :  { %v12217_v22 = vadd.f32 %v9304_v0, %v12087_v35  ;;  %9667 = vmatpush3.bf16.msra.mxu1 %v10672_v9  ;;  %v10645_v35 = vld [vmem:[#allocation3 + $0x420] ss:$100 sps:$4 sm:$0xff]   ;;  %v10655_v0 = vld [vmem:[#allocation3 + $0x4ec] ss:$100 sps:$4 sm:$0xff]  }
 0x396   :  { %v9306_v2 = vpop.f32.mrf.mxu1  ;;  %9780 = vmatprep.subr.bf16.mxu1 %v10685_v49 }
 0x397   :  { %v9307_v43 = vadd.f32 %v9306_v2, %v9305_v44 }
 0x398   :  { %v9308_v60 = vpop.f32.mrf.mxu1  ;;  %7160 = vmatmul.mubr.bf16.gmra.mxu1 %v10641_v50 }
 0x399   :  { %v12220_v14 = vadd.f32 %v9307_v43, %v12092_v34  ;;  %7167 = vmatprep.mubr.bf16.mxu1 %v10647_v18  ;;  %v10653_v43 = vld [vmem:[#allocation3 + $0x4e8] ss:$100 sps:$4 sm:$0xff]  }
 0x39a   :  { %v9309_v30 = vpop.f32.mrf.mxu1 }
 0x39b   :  { %v9310_v7 = vadd.f32 %v9309_v30, %v9308_v60 }
 0x39c   :  { %v9311_v51 = vpop.f32.mrf.mxu1 }
 0x39d   :  { %v12223_v42 = vadd.f32 %v9310_v7, %v12097_v57  ;;  %v10662_v7 = vld [vmem:[#allocation3 + $0x5b4] ss:$100 sps:$4 sm:$0xff]  }
 0x39e   :  { %v9312_v33 = vpop.f32.mrf.mxu1 }
 0x39f   :  { %v9313_v9 = vadd.f32 %v9312_v33, %v9311_v51 }
 0x3a0   :  { %v9314_v12 = vpop.f32.mrf.mxu1  ;;  %7168 = vmatmul.mubr.bf16.gmra.mxu1 %v10645_v35 }
 0x3a1   :  { %v12226_v49 = vadd.f32 %v9313_v9, %v12102_v23  ;;  %7175 = vmatprep.mubr.bf16.mxu1 %v10655_v0  ;;  %v10670_v0 = vld [vmem:[#allocation3 + $0x4c] ss:$100 sps:$4 sm:$0xff]  }
 0x3a2   :  { %v9315_v44 = vpop.f32.mrf.mxu1 }
 0x3a3   :  { %v9316_v34 = vadd.f32 %v9315_v44, %v9314_v12  ;;  %v10660_v12 = vld [vmem:[#allocation3 + $0x5b0] ss:$100 sps:$4 sm:$0xff]  }
 0x3a4   :  { %v9317_v50 = vpop.f32.mrf.mxu1 }
 0x3a5   :  { %v12229_v2 = vadd.f32 %v9316_v34, %v12109_v59 }
 0x3a6   :  { %v9318_v18 = vpop.f32.mrf.mxu1 }
 0x3a7   :  { %v9319_v57 = vadd.f32 %v9318_v18, %v9317_v50 }
 0x3a8   :  { %v9320_v60 = vpop.f32.mrf.mxu1  ;;  %7176 = vmatmul.mubr.bf16.gmra.mxu1 %v10653_v43 }
 0x3a9   :  { %v12232_v51 = vadd.f32 %v9319_v57, %v12116_v1  ;;  %7183 = vmatprep.mubr.bf16.mxu1 %v10662_v7  ;;  %v10668_v57 = vld [vmem:[#allocation3 + $0x48] ss:$100 sps:$4 sm:$0xff]  }
 0x3aa   :  { %v9321_v30 = vpop.f32.mrf.mxu1 }
 0x3ab   :  { %v9322_v23 = vadd.f32 %v9321_v30, %v9320_v60  ;;  %v10690_v60 = vld [vmem:[%s12626_s3 + $0x5f0] sm:$0xff]  }
 0x3ac   :  { %v9323_v35 = vpop.f32.mrf.mxu1 }
 0x3ad   :  { %v12235_v33 = vadd.f32 %v9322_v23, %v12123_v21  ;;  %v10689_v21 = vld [vmem:[%s12626_s3 + $0x5b8] sm:$0xff]  }
 0x3ae   :  { %v9324_v9 = vpop.f32.mrf.mxu1 }
 0x3af   :  { %v9325_v59 = vadd.f32 %v9324_v9, %v9323_v35  ;;  %v10692_v9 = vld [vmem:[%s12626_s3 + $0x5e8] sm:$0xff]  }
 0x3b0   :  { %v9326_v44 = vpop.f32.mrf.mxu1  ;;  %7184 = vmatmul.mubr.bf16.gmra.mxu1 %v10660_v12 }
 0x3b1   :  { %v12238_v34 = vadd.f32 %v9325_v59, %v12130_v55  ;;  %7321 = vmatprep.mubr.bf16.mxu1 %v10670_v0  ;;  %v10675_v55 = vld [vmem:[#allocation3 + $0x114] ss:$100 sps:$4 sm:$0xff]  }
 0x3b2   :  { %v9327_v50 = vpop.f32.mrf.mxu1 }
 0x3b3   :  { %v9328_v1 = vadd.f32 %v9327_v50, %v9326_v44  ;;  %v10673_v50 = vld [vmem:[#allocation3 + $0x110] ss:$100 sps:$4 sm:$0xff]  }
 0x3b4   :  { %v9329_v43 = vpop.f32.mrf.mxu1 }
 0x3b5   :  { %v12241_v18 = vadd.f32 %v9328_v1, %v12137_v20  ;;  %v10691_v20 = vld [vmem:[%s12626_s3 + $0x5b0] sm:$0xff]  }
 0x3b6   :  { %v9330_v7 = vpop.f32.mrf.mxu1 }
 0x3b7   :  { %v9331_v30 = vadd.f32 %v9330_v7, %v9329_v43  ;;  %v10697_v43 = vld [vmem:[%s12626_s3 + $0x5e0] sm:$0xff]  }
 0x3b8   :  { %v9348_v23 = vpop.f32.mrf.mxu1  ;;  %7322 = vmatmul.mubr.bf16.vlgmr.msra.gmra.mxu1 %v10668_v57  ;;  %v10678_v57 = vld [vmem:[#allocation3 + $0x1dc] ss:$100 sps:$4 sm:$0xff]  }
 0x3b9   :  { %v12250_v35 = vadd.f32 %v9331_v30, %v12148_v31  ;;  %7329 = vmatprep.mubr.bf16.mxu1 %v10675_v55  ;;  %9781 = vmatpush3.bf16.msra.mxu1 %v10689_v21  ;;  %v10696_v31 = vld [vmem:[%s12626_s3 + $0x5a8] sm:$0xff]   ;;  %v10699_v55 = vld [vmem:[%s12626_s3 + $0x5d8] sm:$0xff]  }
 0x3ba   :  { %v9349_v12 = vpop.f32.mrf.mxu1  ;;  %9782 = vmatprep.subr.bf16.mxu1 %v10690_v60 }
 0x3bb   :  { %v9350_v59 = vadd.f32 %v9349_v12, %v9348_v23 }
 0x3bc   :  { %v9351_v0 = vpop.f32.mrf.mxu1 }
 0x3bd   :  { %v12259_v44 = vadd.f32 %v9350_v59, %v12159_v53  ;;  %9783 = vmatpush3.bf16.msra.mxu1 %v10691_v20  ;;  %v10698_v53 = vld [vmem:[%s12626_s3 + $0x5a0] sm:$0xff]  }
 0x3be   :  { %v9352_v1 = vpop.f32.mrf.mxu1  ;;  %9784 = vmatprep.subr.bf16.mxu1 %v10692_v9  ;;  %v10676_v9 = vld [vmem:[#allocation3 + $0x1d8] ss:$100 sps:$4 sm:$0xff]  }
 0x3bf   :  { %v9353_v21 = vadd.f32 %v9352_v1, %v9351_v0  ;;  %v10704_v0 = vld [vmem:[%s12626_s3 + $0x5d0] sm:$0xff]  }
 0x3c0   :  { %v9354_v7 = vpop.f32.mrf.mxu1  ;;  %7330 = vmatmul.mubr.bf16.gmra.mxu1 %v10673_v50  ;;  %v10681_v50 = vld [vmem:[#allocation3 + $0x2a4] ss:$100 sps:$4 sm:$0xff]  }
 0x3c1   :  { %v12268_v60 = vadd.f32 %v9353_v21, %v12170_v48  ;;  %7337 = vmatprep.mubr.bf16.mxu1 %v10678_v57  ;;  %9785 = vmatpush3.bf16.msra.mxu1 %v10696_v31  ;;  %v10703_v48 = vld [vmem:[%s12626_s3 + $0x598] sm:$0xff]   ;;  %v10706_v57 = vld [vmem:[%s12626_s3 + $0x5c8] sm:$0xff]  }
 0x3c2   :  { %v9355_v30 = vpop.f32.mrf.mxu1  ;;  %9786 = vmatprep.subr.bf16.mxu1 %v10697_v43 }
 0x3c3   :  { %v9356_v23 = vadd.f32 %v9355_v30, %v9354_v7 }
 0x3c4   :  { %v9357_v20 = vpop.f32.mrf.mxu1 }
 0x3c5   :  { %v12277_v12 = vadd.f32 %v9356_v23, %v12181_v36  ;;  %9787 = vmatpush3.bf16.msra.mxu1 %v10698_v53  ;;  %v10705_v36 = vld [vmem:[%s12626_s3 + $0x590] sm:$0xff]  }
 0x3c6   :  { %v9358_v59 = vpop.f32.mrf.mxu1  ;;  %9788 = vmatprep.subr.bf16.mxu1 %v10699_v55  ;;  %v10679_v55 = vld [vmem:[#allocation3 + $0x2a0] ss:$100 sps:$4 sm:$0xff]  }
 0x3c7   :  { %v9359_v31 = vadd.f32 %v9358_v59, %v9357_v20  ;;  %v10711_v20 = vld [vmem:[%s12626_s3 + $0x5c0] sm:$0xff]  }
 0x3c8   :  { %v9360_v1 = vpop.f32.mrf.mxu1  ;;  %7338 = vmatmul.mubr.bf16.gmra.mxu1 %v10676_v9  ;;  %v10684_v9 = vld [vmem:[#allocation3 + $0x36c] ss:$100 sps:$4 sm:$0xff]  }
 0x3c9   :  { %v12286_v43 = vadd.f32 %v9359_v31, %v12190_v19  ;;  %7345 = vmatprep.mubr.bf16.mxu1 %v10681_v50  ;;  %9789 = vmatpush3.bf16.msra.mxu1 %v10703_v48  ;;  %v10707_v19 = vld [vmem:[%s12626_s3 + $0x588] sm:$0xff]  }
 0x3ca   :  { %v9361_v21 = vpop.f32.mrf.mxu1  ;;  %9790 = vmatprep.subr.bf16.mxu1 %v10704_v0 }
 0x3cb   :  { %v9362_v7 = vadd.f32 %v9361_v21, %v9360_v1  ;;  %v10682_v21 = vld [vmem:[#allocation3 + $0x368] ss:$100 sps:$4 sm:$0xff]  }
 0x3cc   :  { %v9363_v53 = vpop.f32.mrf.mxu1 }
 0x3cd   :  { %v12295_v30 = vadd.f32 %v9362_v7, %v12199_v32  ;;  %9791 = vmatpush3.bf16.msra.mxu1 %v10705_v36  ;;  %v10712_v32 = vld [vmem:[%s12626_s3 + $0x580] sm:$0xff]  }
 0x3ce   :  { %v9364_v23 = vpop.f32.mrf.mxu1  ;;  %9792 = vmatprep.subr.bf16.mxu1 %v10706_v57 }
 0x3cf   :  { %v9365_v48 = vadd.f32 %v9364_v23, %v9363_v53  ;;  %v10688_v53 = vld [vmem:[#allocation3 + $0x434] ss:$100 sps:$4 sm:$0xff]  }
 0x3d0   :  { %v9366_v59 = vpop.f32.mrf.mxu1  ;;  %7346 = vmatmul.mubr.bf16.gmra.mxu1 %v10679_v55 }
 0x3d1   :  { %v12304_v0 = vadd.f32 %v9365_v48, %v12208_v25  ;;  %7353 = vmatprep.mubr.bf16.mxu1 %v10684_v9  ;;  %9793 = vmatpush3.bf16.msra.mxu1 %v10707_v19  ;;  %v10686_v9 = vld [vmem:[#allocation3 + $0x430] ss:$100 sps:$4 sm:$0xff]  }
 0x3d2   :  { %v9367_v31 = vpop.f32.mrf.mxu1  ;;  %9794 = vmatprep.subr.bf16.mxu1 %v10711_v20 }
 0x3d3   :  { %v9368_v50 = vadd.f32 %v9367_v31, %v9366_v59 }
 0x3d4   :  { %v9369_v1 = vpop.f32.mrf.mxu1 }
 0x3d5   :  { %v12310_v36 = vadd.f32 %v9368_v50, %v12217_v22  ;;  %9795 = vmatpush3.bf16.msra.mxu1 %v10712_v32  ;;  %v10695_v32 = vld [vmem:[#allocation3 + $0x4fc] ss:$100 sps:$4 sm:$0xff]  }
 0x3d6   :  { %v9370_v57 = vpop.f32.mrf.mxu1 }
 0x3d7   :  { %v9371_v7 = vadd.f32 %v9370_v57, %v9369_v1 }
 0x3d8   :  { %v9372_v25 = vpop.f32.mrf.mxu1  ;;  %7354 = vmatmul.mubr.bf16.gmra.mxu1 %v10682_v21 }
 0x3d9   :  { %v12313_v19 = vadd.f32 %v9371_v7, %v12220_v14  ;;  %7361 = vmatprep.mubr.bf16.mxu1 %v10688_v53  ;;  %v10693_v7 = vld [vmem:[#allocation3 + $0x4f8] ss:$100 sps:$4 sm:$0xff]  }
 0x3da   :  { %v9373_v55 = vpop.f32.mrf.mxu1 }
 0x3db   :  { %v9374_v23 = vadd.f32 %v9373_v55, %v9372_v25  ;;  %v10702_v25 = vld [vmem:[#allocation3 + $0x5c4] ss:$100 sps:$4 sm:$0xff]  }
 0x3dc   :  { %v9375_v48 = vpop.f32.mrf.mxu1 }
 0x3dd   :  { %v12316_v20 = vadd.f32 %v9374_v23, %v12223_v42 }
 0x3de   :  { %v9376_v22 = vpop.f32.mrf.mxu1 }
 0x3df   :  { %v9377_v59 = vadd.f32 %v9376_v22, %v9375_v48 }
 0x3e0   :  { %v9378_v31 = vpop.f32.mrf.mxu1  ;;  %7362 = vmatmul.mubr.bf16.gmra.mxu1 %v10686_v9 }
 0x3e1   :  { %v12319_v50 = vadd.f32 %v9377_v59, %v12226_v49  ;;  %7369 = vmatprep.mubr.bf16.mxu1 %v10695_v32  ;;  %v10700_v59 = vld [vmem:[#allocation3 + $0x5c0] ss:$100 sps:$4 sm:$0xff]  }
 0x3e2   :  { %v9379_v1 = vpop.f32.mrf.mxu1 }
 0x3e3   :  { %v9380_v14 = vadd.f32 %v9379_v1, %v9378_v31  ;;  %v10710_v31 = vld [vmem:[#allocation3 + $0x5c] ss:$100 sps:$4 sm:$0xff]  }
 0x3e4   :  { %v9381_v21 = vpop.f32.mrf.mxu1 }
 0x3e5   :  { %v12322_v57 = vadd.f32 %v9380_v14, %v12229_v2 }
 0x3e6   :  { %v9382_v53 = vpop.f32.mrf.mxu1 }
 0x3e7   :  { %v9383_v42 = vadd.f32 %v9382_v53, %v9381_v21 }
 0x3e8   :  { %v9384_v55 = vpop.f32.mrf.mxu1  ;;  %7370 = vmatmul.mubr.bf16.gmra.mxu1 %v10693_v7 }
 0x3e9   :  { %v12325_v23 = vadd.f32 %v9383_v42, %v12232_v51  ;;  %7377 = vmatprep.mubr.bf16.mxu1 %v10702_v25  ;;  %v10708_v42 = vld [vmem:[#allocation3 + $0x58] ss:$100 sps:$4 sm:$0xff]  }
 0x3ea   :  { %v9385_v48 = vpop.f32.mrf.mxu1 }
 0x3eb   :  { %v9386_v49 = vadd.f32 %v9385_v48, %v9384_v55  ;;  %v10715_v55 = vld [vmem:[#allocation3 + $0x124] ss:$100 sps:$4 sm:$0xff]  }
 0x3ec   :  { %v9387_v9 = vpop.f32.mrf.mxu1 }
 0x3ed   :  { %v12328_v22 = vadd.f32 %v9386_v49, %v12235_v33 }
 0x3ee   :  { %v9388_v32 = vpop.f32.mrf.mxu1 }
 0x3ef   :  { %v9389_v2 = vadd.f32 %v9388_v32, %v9387_v9  ;;  %v9478_v32 = vadd.f32 %v11642_v5, %v11640_v62  ;;  %v10716_v5 = vld [vmem:[#allocation3 + $0x1e8] ss:$100 sps:$4 sm:$0xff]  }
 0x3f0   :  { %v9390_v1 = vpop.f32.mrf.mxu1  ;;  %7378 = vmatmul.mubr.bf16.gmra.mxu1 %v10700_v59 }
 0x3f1   :  { %v12331_v14 = vadd.f32 %v9389_v2, %v12238_v34  ;;  %7515 = vmatprep.mubr.bf16.mxu1 %v10710_v31 }
 0x3f2   :  { %v9391_v21 = vpop.f32.mrf.mxu1 }
 0x3f3   :  { %v9392_v51 = vadd.f32 %v9391_v21, %v9390_v1  ;;  %v10718_v21 = vld [vmem:[#allocation3 + $0x1ec] ss:$100 sps:$4 sm:$0xff]  }
 0x3f4   :  { %v9393_v7 = vpop.f32.mrf.mxu1 }
 0x3f5   :  { %v12334_v53 = vadd.f32 %v9392_v51, %v12241_v18  ;;  %v10713_v18 = vld [vmem:[#allocation3 + $0x120] ss:$100 sps:$4 sm:$0xff]  }
 0x3f6   :  { %v9394_v25 = vpop.f32.mrf.mxu1 }
 0x3f7   :  { %v9395_v33 = vadd.f32 %v9394_v25, %v9393_v7 }
 0x3f8   :  { %v9412_v48 = vpop.f32.mrf.mxu1  ;;  %7516 = vmatmul.mubr.bf16.vlgmr.msra.gmra.mxu1 %v10708_v42 }
 0x3f9   :  { %v12337_v49 = vadd.f32 %v9395_v33, %v12250_v35  ;;  %7523 = vmatprep.mubr.bf16.mxu1 %v10715_v55 }
 0x3fa   :  { %v9413_v9 = vpop.f32.mrf.mxu1 }
 0x3fb   :  { %v9414_v34 = vadd.f32 %v9413_v9, %v9412_v48  ;;  %v10721_v9 = vld [vmem:[#allocation3 + $0x2b4] ss:$100 sps:$4 sm:$0xff]  }
 0x3fc   :  { %v9415_v59 = vpop.f32.mrf.mxu1 }
 0x3fd   :  { %v6936_v2 = vadd.f32 %v9414_v34, %v12259_v44 }
 0x3fe   :  { %v9416_v31 = vpop.f32.mrf.mxu1 }
 0x3ff   :  { %v9417_v1 = vadd.f32 %v9416_v31, %v9415_v59  ;;  %v12342_v51 = vadd.f32 %v9478_v32, %v6936_v2  ;;  %v10719_v31 = vld [vmem:[#allocation3 + $0x2b0] ss:$100 sps:$4 sm:$0xff]  }
 0x400   :  { %v9418_v7 = vpop.f32.mrf.mxu1  ;;  %7524 = vmatmul.mubr.bf16.gmra.mxu1 %v10713_v18 }
 0x401   :  { %v6939_v35 = vadd.f32 %v9417_v1, %v12268_v60  ;;  %7531 = vmatprep.mubr.bf16.mxu1 %v10718_v21 }
 0x402   :  { %v9419_v42 = vpop.f32.mrf.mxu1 }
 0x403   :  { %v9420_v25 = vadd.f32 %v9419_v42, %v9418_v7  ;;  %v12346_v33 = vadd.f32 %v11653_v6, %v6939_v35  ;;  %v10724_v7 = vld [vmem:[#allocation3 + $0x37c] ss:$100 sps:$4 sm:$0xff]  }
 0x404   :  { %v9421_v55 = vpop.f32.mrf.mxu1 }
 0x405   :  { %v6944_v62 = vadd.f32 %v9420_v25, %v12277_v12 }
 0x406   :  { %v9422_v44 = vpop.f32.mrf.mxu1 }
 0x407   :  { %v9423_v48 = vadd.f32 %v9422_v44, %v9421_v55  ;;  %v12350_v34 = vadd.f32 %v11661_v26, %v6944_v62  ;;  %v10722_v62 = vld [vmem:[#allocation3 + $0x378] ss:$100 sps:$4 sm:$0xff]  }
 0x408   :  { %v9424_v59 = vpop.f32.mrf.mxu1  ;;  %7532 = vmatmul.mubr.bf16.gmra.mxu1 %v10716_v5 }
 0x409   :  { %v6947_v60 = vadd.f32 %v9423_v48, %v12286_v43  ;;  %7539 = vmatprep.mubr.bf16.mxu1 %v10721_v9  ;;  %v10727_v48 = vld [vmem:[#allocation3 + $0x444] ss:$100 sps:$4 sm:$0xff]  }
 0x40a   :  { %v9425_v32 = vpop.f32.mrf.mxu1 }
 0x40b   :  { %v9426_v2 = vadd.f32 %v9425_v32, %v9424_v59  ;;  %v12354_v6 = vadd.f32 %v11669_v40, %v6947_v60 }
 0x40c   :  { %v9427_v18 = vpop.f32.mrf.mxu1 }
 0x40d   :  { %v6952_v12 = vadd.f32 %v9426_v2, %v12295_v30  ;;  %v10725_v2 = vld [vmem:[#allocation3 + $0x440] ss:$100 sps:$4 sm:$0xff]  }
 0x40e   :  { %v9428_v1 = vpop.f32.mrf.mxu1 }
 0x40f   :  { %v9429_v21 = vadd.f32 %v9428_v1, %v9427_v18  ;;  %v12358_v26 = vadd.f32 %v11677_v47, %v6952_v12 }
 0x410   :  { %v9430_v35 = vpop.f32.mrf.mxu1  ;;  %7540 = vmatmul.mubr.bf16.gmra.mxu1 %v10719_v31  ;;  %v10730_v31 = vld [vmem:[#allocation3 + $0x50c] ss:$100 sps:$4 sm:$0xff]  }
 0x411   :  { %v6955_v43 = vadd.f32 %v9429_v21, %v12304_v0  ;;  %7547 = vmatprep.mubr.bf16.mxu1 %v10724_v7 }
 0x412   :  { %v9431_v42 = vpop.f32.mrf.mxu1 }
 0x413   :  { %v9432_v25 = vadd.f32 %v9431_v42, %v9430_v35  ;;  %v12362_v40 = vadd.f32 %v11685_v56, %v6955_v43  ;;  %v10728_v43 = vld [vmem:[#allocation3 + $0x508] ss:$100 sps:$4 sm:$0xff]  }
 0x414   :  { %v9433_v55 = vpop.f32.mrf.mxu1 }
 0x415   :  { %v6960_v30 = vadd.f32 %v9432_v25, %v12310_v36 }
 0x416   :  { %v9434_v5 = vpop.f32.mrf.mxu1 }
 0x417   :  { %v9435_v44 = vadd.f32 %v9434_v5, %v9433_v55  ;;  %v12366_v47 = vadd.f32 %v11693_v3, %v6960_v30  ;;  %v10733_v55 = vld [vmem:[#allocation3 + $0x5d4] ss:$100 sps:$4 sm:$0xff]  }
 0x418   :  { %v9436_v9 = vpop.f32.mrf.mxu1  ;;  %7548 = vmatmul.mubr.bf16.gmra.mxu1 %v10722_v62 }
 0x419   :  { %v6963_v0 = vadd.f32 %v9435_v44, %v12313_v19  ;;  %7555 = vmatprep.mubr.bf16.mxu1 %v10727_v48  ;;  %v10731_v48 = vld [vmem:[#allocation3 + $0x5d0] ss:$100 sps:$4 sm:$0xff]  }
 0x41a   :  { %v9437_v59 = vpop.f32.mrf.mxu1 }
 0x41b   :  { %v9438_v60 = vadd.f32 %v9437_v59, %v9436_v9  ;;  %v12370_v56 = vadd.f32 %v11701_v11, %v6963_v0 }
 0x41c   :  { %v9439_v32 = vpop.f32.mrf.mxu1 }
 0x41d   :  { %v6968_v36 = vadd.f32 %v9438_v60, %v12316_v20 }
 0x41e   :  { %v9440_v18 = vpop.f32.mrf.mxu1 }
 0x41f   :  { %v9441_v12 = vadd.f32 %v9440_v18, %v9439_v32  ;;  %v12374_v3 = vadd.f32 %v11791_v45, %v6968_v36 }
 0x420   :  { %v9442_v1 = vpop.f32.mrf.mxu1  ;;  %7556 = vmatmul.mubr.bf16.gmra.mxu1 %v10725_v2 }
 0x421   :  { %v6971_v19 = vadd.f32 %v9441_v12, %v12319_v50  ;;  %7563 = vmatprep.mubr.bf16.mxu1 %v10730_v31 }
 0x422   :  { %v9443_v21 = vpop.f32.mrf.mxu1 }
 0x423   :  { %v9444_v7 = vadd.f32 %v9443_v21, %v9442_v1  ;;  %v12378_v11 = vadd.f32 %v11799_v58, %v6971_v19 }
 0x424   :  { %v9445_v35 = vpop.f32.mrf.mxu1 }
 0x425   :  { %v6976_v20 = vadd.f32 %v9444_v7, %v12322_v57 }
 0x426   :  { %v9446_v42 = vpop.f32.mrf.mxu1 }
 0x427   :  { %v9447_v25 = vadd.f32 %v9446_v42, %v9445_v35  ;;  %v12382_v45 = vadd.f32 %v11849_v52, %v6976_v20 }
 0x428   :  { %v9448_v30 = vpop.f32.mrf.mxu1  ;;  %7564 = vmatmul.mubr.bf16.gmra.mxu1 %v10728_v43 }
 0x429   :  { %v6979_v50 = vadd.f32 %v9447_v25, %v12325_v23  ;;  %7571 = vmatprep.mubr.bf16.mxu1 %v10733_v55 }
 0x42a   :  { %v9449_v62 = vpop.f32.mrf.mxu1 }
 0x42b   :  { %v9450_v5 = vadd.f32 %v9449_v62, %v9448_v30  ;;  %v12386_v58 = vadd.f32 %v11853_v8, %v6979_v50 }
 0x42c   :  { %v9451_v44 = vpop.f32.mrf.mxu1 }
 0x42d   :  { %v6984_v57 = vadd.f32 %v9450_v5, %v12328_v22 }
 0x42e   :  { %v9452_v9 = vpop.f32.mrf.mxu1 }
 0x42f   :  { %v9453_v0 = vadd.f32 %v9452_v9, %v9451_v44  ;;  %v12390_v59 = vadd.f32 %v11857_v38, %v6984_v57 }
 0x430   :  { %v9454_v52 = vpop.f32.mrf.mxu1  ;;  %7572 = vmatmul.mubr.bf16.gmra.mxu1 %v10731_v48 }
 0x431   :  { %v6987_v60 = vadd.f32 %v9453_v0, %v12331_v14 }
 0x432   :  { %v9455_v23 = vpop.f32.mrf.mxu1 }
 0x433   :  { %v9456_v32 = vadd.f32 %v9455_v23, %v9454_v52  ;;  %v12394_v36 = vadd.f32 %v11872_v4, %v6987_v60 }
 0x434   :  { %v9457_v8 = vpop.f32.mrf.mxu1 }
 0x435   :  { %v6992_v2 = vadd.f32 %v9456_v32, %v12334_v53 }
 0x436   :  { %v9458_v18 = vpop.f32.mrf.mxu1 }
 0x437   :  { %v9459_v22 = vadd.f32 %v9458_v18, %v9457_v8  ;;  %v12398_v12 = vadd.f32 %v11947_v63, %v6992_v2 }
 0x438   :  { %v9540_v31 = vpop.f32.mrf.mxu1 }
 0x439   :  { %v6995_v38 = vadd.f32 %v9459_v22, %v12337_v49 }
 0x43a   :  { %v9541_v1 = vpop.f32.mrf.mxu1 }
 0x43b   :  { %v9542_v19 = vadd.f32 %v9541_v1, %v9540_v31  ;;  %v12402_v14 = vadd.f32 %v11952_v16, %v6995_v38 }
 0x43c   :  { %v9543_v21 = vpop.f32.mrf.mxu1 }
 0x43d   :  { %v7130_v4 = vadd.f32 %v9542_v19, %v12342_v51 }
 0x43e   :  { %v9544_v7 = vpop.f32.mrf.mxu1 }
 0x43f   :  { %v9545_v35 = vadd.f32 %v9544_v7, %v9543_v21  ;;  %v12406_v53 = vadd.f32 %v11960_v24, %v7130_v4 }
 0x440   :  { %v9546_v20 = vpop.f32.mrf.mxu1 }
 0x441   :  { %v7133_v63 = vadd.f32 %v9545_v35, %v12346_v33 }
 0x442   :  { %v9547_v43 = vpop.f32.mrf.mxu1 }
 0x443   :  { %v9548_v42 = vadd.f32 %v9547_v43, %v9546_v20  ;;  %v12410_v49 = vadd.f32 %v11965_v39, %v7133_v63 }
 0x444   :  { %v9549_v25 = vpop.f32.mrf.mxu1 }
 0x445   :  { %v7138_v16 = vadd.f32 %v9548_v42, %v12350_v34 }
 0x446   :  { %v9550_v55 = vpop.f32.mrf.mxu1 }
 0x447   :  { %v9551_v30 = vadd.f32 %v9550_v55, %v9549_v25  ;;  %v12414_v51 = vadd.f32 %v11973_v10, %v7138_v16  ;;  %v12649_v55 = vld [vmem:[#allocation4_spill] sm:$0xff] }
 0x448   :  { %v9552_v50 = vpop.f32.mrf.mxu1 }
 0x449   :  { %v7141_v24 = vadd.f32 %v9551_v30, %v12354_v6 }
 0x44a   :  { %v9553_v62 = vpop.f32.mrf.mxu1 }
 0x44b   :  { %v9554_v5 = vadd.f32 %v9553_v62, %v9552_v50  ;;  %v12418_v33 = vadd.f32 %v11978_v15, %v7141_v24  ;;  %v12650_v62 = vld [vmem:[#allocation5_spill] sm:$0xff] }
 0x44c   :  { %v9555_v44 = vpop.f32.mrf.mxu1 }
 0x44d   :  { %v7146_v39 = vadd.f32 %v9554_v5, %v12358_v26 }
 0x44e   :  { %v9556_v57 = vpop.f32.mrf.mxu1 }
 0x44f   :  { %v9557_v48 = vadd.f32 %v9556_v57, %v9555_v44  ;;  %v12422_v34 = vadd.f32 %v11984_v37, %v7146_v39 }
 0x450   :  { %v9558_v9 = vpop.f32.mrf.mxu1 }
 0x451   :  { %v7149_v10 = vadd.f32 %v9557_v48, %v12362_v40 }
 0x452   :  { %v9559_v0 = vpop.f32.mrf.mxu1 }
 0x453   :  { %v9560_v52 = vadd.f32 %v9559_v0, %v9558_v9  ;;  %v12426_v6 = vadd.f32 %v11990_v61, %v7149_v10  ;;  %v12651_v0 = vld [vmem:[#allocation6_spill] sm:$0xff] }
 0x454   :  { %v9561_v60 = vpop.f32.mrf.mxu1 }
 0x455   :  { %v7154_v15 = vadd.f32 %v9560_v52, %v12366_v47 }
 0x456   :  { %v9562_v23 = vpop.f32.mrf.mxu1 }
 0x457   :  { %v9563_v32 = vadd.f32 %v9562_v23, %v9561_v60  ;;  %v12430_v26 = vadd.f32 %v11996_v28, %v7154_v15 }
 0x458   :  { %v9564_v8 = vpop.f32.mrf.mxu1 }
 0x459   :  { %v7157_v37 = vadd.f32 %v9563_v32, %v12370_v56 }
 0x45a   :  { %v9565_v2 = vpop.f32.mrf.mxu1 }
 0x45b   :  { %v9566_v18 = vadd.f32 %v9565_v2, %v9564_v8  ;;  %v12434_v40 = vadd.f32 %v12008_v29, %v7157_v37  ;;  %v12652_v2 = vld [vmem:[#allocation7_spill] sm:$0xff] }
 0x45c   :  { %v9567_v22 = vpop.f32.mrf.mxu1 }
 0x45d   :  { %v7162_v61 = vadd.f32 %v9566_v18, %v12374_v3 }
 0x45e   :  { %v9568_v31 = vpop.f32.mrf.mxu1 }
 0x45f   :  { %v9569_v38 = vadd.f32 %v9568_v31, %v9567_v22  ;;  %v12438_v47 = vadd.f32 %v12018_v17, %v7162_v61  ;;  %v12653_v31 = vld [vmem:[#allocation8_spill] sm:$0xff] }
 0x460   :  { %v9570_v1 = vpop.f32.mrf.mxu1 }
 0x461   :  { %v7165_v28 = vadd.f32 %v9569_v38, %v12378_v11 }
 0x462   :  { %v9571_v19 = vpop.f32.mrf.mxu1 }
 0x463   :  { %v9572_v21 = vadd.f32 %v9571_v19, %v9570_v1  ;;  %v12442_v56 = vadd.f32 %v12029_v41, %v7165_v28 }
 0x464   :  { %v9573_v4 = vpop.f32.mrf.mxu1 }
 0x465   :  { %v7170_v29 = vadd.f32 %v9572_v21, %v12382_v45 }
 0x466   :  { %v9574_v7 = vpop.f32.mrf.mxu1 }
 0x467   :  { %v9575_v35 = vadd.f32 %v9574_v7, %v9573_v4  ;;  %v12446_v3 = vadd.f32 %v12040_v46, %v7170_v29  ;;  %v12491_v29 = vpop.f32.mrf.mxu0 }
 0x468   :  { %v9576_v20 = vpop.f32.mrf.mxu1 }
 0x469   :  { %v7173_v17 = vadd.f32 %v9575_v35, %v12386_v58 }
 0x46a   :  { %v9577_v63 = vpop.f32.mrf.mxu1 }
 0x46b   :  { %v9578_v43 = vadd.f32 %v9577_v63, %v9576_v20  ;;  %v12450_v11 = vadd.f32 %v12051_v27, %v7173_v17  ;;  %v12496_v17 = vpop.f32.mrf.mxu0 }
 0x46c   :  { %v9579_v42 = vpop.f32.mrf.mxu1 }
 0x46d   :  { %v7178_v41 = vadd.f32 %v9578_v43, %v12390_v59 }
 0x46e   :  { %v9580_v25 = vpop.f32.mrf.mxu1 }
 0x46f   :  { %v9581_v16 = vadd.f32 %v9580_v25, %v9579_v42  ;;  %v12454_v45 = vadd.f32 %v12649_v55, %v7178_v41  ;;  %v12503_v41 = vpop.f32.mrf.mxu0 }
 0x470   :  { %v9582_v30 = vpop.f32.mrf.mxu1 }
 0x471   :  { %v7181_v46 = vadd.f32 %v9581_v16, %v12394_v36  ;;  %v12507_v16 = vpop.f32.mrf.mxu0 }
 0x472   :  { %v9583_v50 = vpop.f32.mrf.mxu1 }
 0x473   :  { %v9584_v24 = vadd.f32 %v9583_v50, %v9582_v30  ;;  %v12458_v58 = vadd.f32 %v12650_v62, %v7181_v46  ;;  %v12510_v50 = vpop.f32.mrf.mxu0 }
 0x474   :  { %v9585_v5 = vpop.f32.mrf.mxu1 }
 0x475   :  { %v7186_v27 = vadd.f32 %v9584_v24, %v12398_v12 }
 0x476   :  { %v9586_v44 = vpop.f32.mrf.mxu1 }
 0x477   :  { %v9587_v39 = vadd.f32 %v9586_v44, %v9585_v5  ;;  %v12462_v59 = vadd.f32 %v12084_v13, %v7186_v27  ;;  %v7701_v13 = vld [vmem:[%s12629_s5] sm:$0xff]  ;;  %v12654_v5 = vld [vmem:[#allocation19_spill] sm:$0xff] }
 0x478   :  { %v9668_v57 = vpop.f32.mrf.mxu1  ;;  %10112 = vmatprep.mubr.msk.f32.mxu1 %vm719_vm0, %v7701_v13  ;;  %10126 = vmatprep.mubr.msk.f32.mxu0 %vm719_vm0, %v7701_v13 }
 0x479   :  { %v7189_v48 = vadd.f32 %v9587_v39, %v12402_v14  ;;  %v12516_v39 = vpop.f32.mrf.mxu0 }
 0x47a   :  { %v9669_v9 = vpop.f32.mrf.mxu1 }
 0x47b   :  { %v9670_v10 = vadd.f32 %v9669_v9, %v9668_v57  ;;  %v12466_v36 = vadd.f32 %v12651_v0, %v7189_v48  ;;  %v12655_v9 = vld [vmem:[#allocation20_spill] sm:$0xff] }
 0x47c   :  { %v9671_v52 = vpop.f32.mrf.mxu1 }
 0x47d   :  { %v7324_v60 = vadd.f32 %v9670_v10, %v12406_v53 }
 0x47e   :  { %v9672_v15 = vpop.f32.mrf.mxu1 }
 0x47f   :  { %v9673_v23 = vadd.f32 %v9672_v15, %v9671_v52  ;;  %v12470_v12 = vadd.f32 %v12094_v54, %v7324_v60  ;;  %v12522_v52 = vpop.f32.mrf.mxu0 }
 0x480   :  { %v9674_v32 = vpop.f32.mrf.mxu1 }
 0x481   :  { %v7327_v14 = vadd.f32 %v9673_v23, %v12410_v49  ;;  %v12656_v23 = vld [vmem:[#allocation21_spill] sm:$0xff] }
 0x482   :  { %v9675_v8 = vpop.f32.mrf.mxu1 }
 0x483   :  { %v9676_v37 = vadd.f32 %v9675_v8, %v9674_v32  ;;  %v12479_v53 = vadd.f32 %v12652_v2, %v7327_v14  ;;  %v12530_v14 = vpop.f32.mrf.mxu0 }
 0x484   :  { %v9677_v18 = vpop.f32.mrf.mxu1 }
 0x485   :  { %v7332_v54 = vadd.f32 %v9676_v37, %v12414_v51 }
 0x486   :  { %v9678_v22 = vpop.f32.mrf.mxu1 }
 0x487   :  { %v9679_v61 = vadd.f32 %v9678_v22, %v9677_v18  ;;  %v12483_v38 = vadd.f32 %v12653_v31, %v7332_v54 }
 0x488   :  { %v9680_v1 = vpop.f32.mrf.mxu1 }
 0x489   :  { %v12486_v49 = vadd.f32 %v9679_v61, %v12418_v33 }
 0x48a   :  { %v9681_v28 = vpop.f32.mrf.mxu1 }
 0x48b   :  { %v9682_v19 = vadd.f32 %v9681_v28, %v9680_v1 }
 0x48c   :  { %v9683_v21 = vpop.f32.mrf.mxu1 }
 0x48d   :  { %v12489_v4 = vadd.f32 %v9682_v19, %v12422_v34 }
 0x48e   :  { %v9684_v7 = vpop.f32.mrf.mxu1 }
 0x48f   :  { %v9685_v35 = vadd.f32 %v9684_v7, %v9683_v21 }
 0x490   :  { %v9686_v51 = vpop.f32.mrf.mxu1 }
 0x491   :  { %v12494_v20 = vadd.f32 %v9685_v35, %v12426_v6 }
 0x492   :  { %v9687_v63 = vpop.f32.mrf.mxu1 }
 0x493   :  { %v9688_v43 = vadd.f32 %v9687_v63, %v9686_v51 }
 0x494   :  { %v12498_v33 = vpop.f32.mrf.mxu1 }
 0x495   :  { %v12501_v42 = vadd.f32 %v9688_v43, %v12430_v26 }
 0x496   :  { %v12505_v34 = vpop.f32.mrf.mxu1 }
 0x498   :  { %v9692_v25 = vpop.f32.mrf.mxu1 }
 0x49a   :  { %v9693_v55 = vpop.f32.mrf.mxu1 }
 0x49b   :  { %v9694_v30 = vadd.f32 %v9693_v55, %v9692_v25 }
 0x49c   :  { %v9695_v6 = vpop.f32.mrf.mxu1 }
 0x49d   :  { %v7356_v46 = vadd.f32 %v9694_v30, %v12438_v47 }
 0x49e   :  { %v9696_v24 = vpop.f32.mrf.mxu1 }
 0x49f   :  { %v9697_v62 = vadd.f32 %v9696_v24, %v9695_v6  ;;  %v12513_v27 = vadd.f32 %v12654_v5, %v7356_v46 }
 0x4a0   :  { %v9698_v26 = vpop.f32.mrf.mxu1 }
 0x4a1   :  { %v7359_v44 = vadd.f32 %v9697_v62, %v12442_v56 }
 0x4a2   :  { %v9699_v57 = vpop.f32.mrf.mxu1 }
 0x4a3   :  { %v9700_v48 = vadd.f32 %v9699_v57, %v9698_v26  ;;  %v12519_v10 = vadd.f32 %v12655_v9, %v7359_v44  ;;  %v12658_v9 = vld [vmem:[#allocation10_spill] sm:$0xff] }
 0x4a4   :  { %v9701_v0 = vpop.f32.mrf.mxu1 }
 0x4a5   :  { %v7364_v47 = vadd.f32 %v9700_v48, %v12446_v3  ;;  %v12535_v3 = vpop.f32.mrf.mxu0  ;;  %v12657_v48 = vld [vmem:[#allocation9_spill] sm:$0xff] }
 0x4a6   :  { %v9702_v60 = vpop.f32.mrf.mxu1 }
 0x4a7   :  { %v9703_v15 = vadd.f32 %v9702_v60, %v9701_v0  ;;  %v12525_v32 = vadd.f32 %v12656_v23, %v7364_v47  ;;  %v12540_v1 = vpop.f32.mrf.mxu0  ;;  %v9743_v0 = vadd.f32 %v12658_v9, %v12657_v48 }
 0x4a8   :  { %v9704_v13 = vpop.f32.mrf.mxu1 }
 0x4a9   :  { %v12528_v56 = vadd.f32 %v9703_v15, %v12450_v11  ;;  %v10090_v7 = vpop.f32.mrf.mxu0 }
 0x4aa   :  { %v9705_v8 = vpop.f32.mrf.mxu1 }
 0x4ab   :  { %v9706_v37 = vadd.f32 %v9705_v8, %v9704_v13  ;;  %v7614_v51 = vpop.f32.mrf.mxu0  ;;  %v7432_v13 = vadd.f32 %v9743_v0, %v12486_v49 }
 0x4ac   :  { %v9707_v2 = vpop.f32.mrf.mxu1 }
 0x4ad   :  { %v12533_v18 = vadd.f32 %v9706_v37, %v12454_v45  ;;  %v10091_v55 = vpop.f32.mrf.mxu0 }
 0x4ae   :  { %v9708_v54 = vpop.f32.mrf.mxu1 }
 0x4af   :  { %v9709_v22 = vadd.f32 %v9708_v54, %v9707_v2  ;;  %v7617_v5 = vpop.f32.mrf.mxu0  ;;  %v12659_v2 = vld [vmem:[#allocation11_spill] sm:$0xff]  ;;  %v12660_v54 = vld [vmem:[#allocation12_spill] sm:$0xff] }
 0x4b0   :  { %v9710_v61 = vpop.f32.mrf.mxu1 }
 0x4b1   :  { %v12538_v31 = vadd.f32 %v9709_v22, %v12458_v58  ;;  %v9746_v22 = vadd.f32 %v12660_v54, %v12659_v2 }
 0x4b2   :  { %v9711_v11 = vpop.f32.mrf.mxu1 }
 0x4b3   :  { %v9712_v28 = vadd.f32 %v9711_v11, %v9710_v61 }
 0x4b4   :  { %v12542_v19 = vpop.f32.mrf.mxu1 }
 0x4b5   :  { %v12545_v21 = vadd.f32 %v9712_v28, %v12462_v59 }
 0x4b6   :  { %v12547_v45 = vpop.f32.mrf.mxu1 }
 0x4b8   :  { %v9796_v35 = vpop.f32.mrf.mxu1 }
 0x4ba   :  { %v9797_v63 = vpop.f32.mrf.mxu1 }
 0x4bb   :  { %v9798_v43 = vadd.f32 %v9797_v63, %v9796_v35  ;;  %v7437_v63 = vadd.f32 %v9746_v22, %v12489_v4  ;;  %v12664_v4 = vld [vmem:[#allocation16_spill] sm:$0xff] }
 0x4bc   :  { %v9799_v25 = vpop.f32.mrf.mxu1 }
 0x4bd   :  { %v7518_v58 = vadd.f32 %v9798_v43, %v12470_v12  ;;  %v10094_v12 = vpop.f32.mrf.mxu0 }
 0x4be   :  { %v9800_v30 = vpop.f32.mrf.mxu1 }
 0x4bf   :  { %v9801_v6 = vadd.f32 %v9800_v30, %v9799_v25  ;;  %v7615_v24 = vadd.f32 %v7614_v51, %v7518_v58  ;;  %v7630_v28 = vpop.f32.mrf.mxu0  ;;  %v12661_v25 = vld [vmem:[#allocation13_spill] sm:$0xff]  ;;  %v12662_v58 = vld [vmem:[#allocation14_spill] sm:$0xff] }
 0x4c0   :  { %v9802_v46 = vpop.f32.mrf.mxu1  ;;  %v9749_v30 = vadd.f32 %v12662_v58, %v12661_v25 }
 0x4c1   :  { %v7521_v62 = vadd.f32 %v9801_v6, %v12479_v53  ;;  %v7677_v47 = vmax.f32 %v7615_v24, 0.0  ;;  %v10095_v24 = vpop.f32.mrf.mxu0 }
 0x4c2   :  { %v9803_v59 = vpop.f32.mrf.mxu1 }
 0x4c3   :  { %v7618_v26 = vadd.f32 %v7617_v5, %v7521_v62  ;;  %v9804_v44 = vadd.f32 %v9803_v59, %v9802_v46  ;;  %v9691_v5 = vadd.f32 %v12505_v34, %v12498_v33  ;;  %v7633_v0 = vpop.f32.mrf.mxu0  ;;  %v12665_v33 = vld [vmem:[#allocation17_spill] sm:$0xff]  ;;  %v12666_v34 = vld [vmem:[#allocation18_spill] sm:$0xff] }
 0x4c4   :  { %v9805_v57 = vpop.f32.mrf.mxu1 }
 0x4c5   :  { %v7678_v60 = vmax.f32 %v7618_v26, 0.0  ;;  %v7526_v15 = vadd.f32 %v9804_v44, %v12483_v38  ;;  %v12663_v44 = vld [vmem:[#allocation15_spill] sm:$0xff]  ;;  %v10098_v22 = vpop.f32.mrf.mxu0 }
 0x4c6   :  { %v9806_v23 = vpop.f32.mrf.mxu1 }
 0x4c7   :  { %v9807_v8 = vadd.f32 %v9806_v23, %v9805_v57  ;;  %v12555_v37 = vmax.f32 %v7677_v47, %v7678_v60  ;;  %v7623_v61 = vadd.f32 %v10090_v7, %v7526_v15  ;;  %v7440_v7 = vadd.f32 %v9749_v30, %v12494_v20 }
 0x4c8   :  { %v9808_v53 = vpop.f32.mrf.mxu1  ;;  %v9752_v57 = vadd.f32 %v12664_v4, %v12663_v44  ;;  %v7351_v60 = vadd.f32 %v9691_v5, %v12434_v40  ;;  %v9755_v20 = vadd.f32 %v12666_v34, %v12665_v33  ;;  %v7646_v40 = vpop.f32.mrf.mxu0 }
 0x4c9   :  { %v7529_v11 = vadd.f32 %v9807_v8, %v7432_v13  ;;  %v7679_v49 = vmax.f32 %v7623_v61, 0.0 }
 0x4ca   :  { %v9809_v35 = vpop.f32.mrf.mxu1  ;;  %v7445_v23 = vadd.f32 %v9752_v57, %v12501_v42 }
 0x4cb   :  { %v7626_v51 = vadd.f32 %v10091_v55, %v7529_v11  ;;  %v9810_v43 = vadd.f32 %v9809_v35, %v9808_v53  ;;  %v7448_v11 = vadd.f32 %v9755_v20, %v7351_v60  ;;  %v7704_v20 = vld [vmem:[%s12629_s5 + $0x18] sm:$0xff] }
 0x4cc   :  { %v9811_v38 = vpop.f32.mrf.mxu1 }
 0x4cd   :  { %v7680_v6 = vmax.f32 %v7626_v51, 0.0  ;;  %v7534_v46 = vadd.f32 %v9810_v43, %v7437_v63 }
 0x4ce   :  { %v9812_v62 = vpop.f32.mrf.mxu1 }
 0x4cf   :  { %v9813_v59 = vadd.f32 %v9812_v62, %v9811_v38  ;;  %v7694_v26 = vmax.f32 %v7679_v49, %v7680_v6  ;;  %v7631_v48 = vadd.f32 %v7630_v28, %v7534_v46  ;;  %v10099_v46 = vpop.f32.mrf.mxu0 }
 0x4d0   :  { %v9814_v55 = vpop.f32.mrf.mxu1 }
 0x4d1   :  { %v7537_v9 = vadd.f32 %v9813_v59, %v7440_v7  ;;  %v7681_v53 = vmax.f32 %v7631_v48, 0.0 }
 0x4d2   :  { %v9815_v47 = vpop.f32.mrf.mxu1 }
 0x4d3   :  { %v7634_v15 = vadd.f32 %v7633_v0, %v7537_v9  ;;  %v9816_v13 = vadd.f32 %v9815_v47, %v9814_v55 }
 0x4d4   :  { %v9817_v8 = vpop.f32.mrf.mxu1 }
 0x4d5   :  { %v7682_v2 = vmax.f32 %v7634_v15, 0.0  ;;  %v7542_v54 = vadd.f32 %v9816_v13, %v7445_v23 }
 0x4d6   :  { %v9818_v61 = vpop.f32.mrf.mxu1 }
 0x4d7   :  { %v9819_v28 = vadd.f32 %v9818_v61, %v9817_v8  ;;  %v7695_v35 = vmax.f32 %v7681_v53, %v7682_v2  ;;  %v7639_v63 = vadd.f32 %v10094_v12, %v7542_v54  ;;  %v7649_v12 = vpop.f32.mrf.mxu0 }
 0x4d8   :  { %v9820_v51 = vpop.f32.mrf.mxu1 }
 0x4d9   :  { %v7545_v43 = vadd.f32 %v9819_v28, %v7448_v11  ;;  %v7683_v30 = vmax.f32 %v7639_v63, 0.0  ;;  %v10102_v60 = vpop.f32.mrf.mxu0 }
 0x4da   :  { %v9821_v38 = vpop.f32.mrf.mxu1 }
 0x4db   :  { %v7642_v25 = vadd.f32 %v10095_v24, %v7545_v43  ;;  %v9822_v42 = vadd.f32 %v9821_v38, %v9820_v51  ;;  %v7662_v34 = vpop.f32.mrf.mxu0 }
 0x4dc   :  { %v9823_v58 = vpop.f32.mrf.mxu1 }
 0x4dd   :  { %v7684_v49 = vmax.f32 %v7642_v25, 0.0  ;;  %v7550_v6 = vadd.f32 %v9822_v42, %v12513_v27  ;;  %v9767_v27 = vadd.f32 %v12496_v17, %v12491_v29  ;;  %v7703_v29 = vld [vmem:[%s12629_s5 + $0x10] sm:$0xff]  ;;  %v10103_v11 = vpop.f32.mrf.mxu0 }
 0x4de   :  { %v9824_v62 = vpop.f32.mrf.mxu1 }
 0x4df   :  { %v9825_v5 = vadd.f32 %v9824_v62, %v9823_v58  ;;  %v7696_v7 = vmax.f32 %v7683_v30, %v7684_v49  ;;  %v7647_v55 = vadd.f32 %v7646_v40, %v7550_v6  ;;  %v7464_v13 = vadd.f32 %v9767_v27, %v12528_v56  ;;  %v7665_v38 = vpop.f32.mrf.mxu0 }
 0x4e0   :  { %v9826_v59 = vpop.f32.mrf.mxu1 }
 0x4e1   :  { %v7553_v44 = vadd.f32 %v9825_v5, %v12519_v10  ;;  %10104 = vmatprep.subr.mxu1 %v7696_v7  ;;  %v7685_v9 = vmax.f32 %v7647_v55, 0.0  ;;  %v12579_v10 = vld [vmem:[%s12629_s5 + $0x8] sm:$0xff] }
 0x4e2   :  { %v9827_v4 = vpop.f32.mrf.mxu1  ;;  %10105 = vmatpush3.msra.mxu1 %v7696_v7 }
 0x4e3   :  { %v7650_v57 = vadd.f32 %v7649_v12, %v7553_v44  ;;  %v9828_v24 = vadd.f32 %v9827_v4, %v9826_v59  ;;  %10106 = vmatprep.subr.mxu1 %v7695_v35 }
 0x4e4   :  { %v9829_v48 = vpop.f32.mrf.mxu1  ;;  %10107 = vmatpush3.msra.mxu1 %v7695_v35  ;;  %v9715_v35 = vadd.f32 %v12547_v45, %v12542_v19  ;;  %v9779_v19 = vadd.f32 %v12540_v1, %v12535_v3 }
 0x4e5   :  { %v7686_v0 = vmax.f32 %v7650_v57, 0.0  ;;  %v7558_v47 = vadd.f32 %v9828_v24, %v12525_v32  ;;  %10108 = vmatprep.subr.mxu1 %v7694_v26  ;;  %v9770_v32 = vadd.f32 %v12507_v16, %v12503_v41  ;;  %v9773_v41 = vadd.f32 %v12516_v39, %v12510_v50 }
 0x4e6   :  { %v9830_v15 = vpop.f32.mrf.mxu1  ;;  %10109 = vmatpush3.msra.mxu1 %v7694_v26  ;;  %v9776_v50 = vadd.f32 %v12530_v14, %v12522_v52  ;;  %v7383_v42 = vadd.f32 %v9715_v35, %v12466_v36 }
 0x4e7   :  { %v12581_v23 = vmax.f32 %v7685_v9, %v7686_v0  ;;  %v9831_v8 = vadd.f32 %v9830_v15, %v9829_v48  ;;  %10110 = vmatprep.subr.mxu1 %v12555_v37  ;;  %v7655_v26 = vadd.f32 %v10098_v22, %v7558_v47  ;;  %v7469_v2 = vadd.f32 %v9770_v32, %v12533_v18 }
 0x4e8   :  { %v9832_v17 = vpop.f32.mrf.mxu1  ;;  %10111 = vmatpush3.msra.mxu1 %v12555_v37  ;;  %v7472_v18 = vadd.f32 %v9773_v41, %v12538_v31  ;;  %v7477_v30 = vadd.f32 %v9776_v50, %v12545_v21  ;;  %v7480_v52 = vadd.f32 %v9779_v19, %v7383_v42 }
 0x4e9   :  { %v7561_v33 = vadd.f32 %v9831_v8, %v7464_v13  ;;  %10113 = vmatmul.mubr.msk.f32.vlgmr.msra.gmra.mxu1 %vm719_vm0, %v12579_v10  ;;  %v7687_v16 = vmax.f32 %v7655_v26, 0.0 }
 0x4ea   :  { %v9833_v56 = vpop.f32.mrf.mxu1  ;;  %10115 = vmatprep.mubr.msk.f32.mxu1 %vm719_vm0, %v7703_v29 }
 0x4eb   :  { %v7658_v53 = vadd.f32 %v10099_v46, %v7561_v33  ;;  %v9834_v37 = vadd.f32 %v9833_v56, %v9832_v17 }
 0x4ec   :  { %v9835_v54 = vpop.f32.mrf.mxu1 }
 0x4ed   :  { %v7688_v22 = vmax.f32 %v7658_v53, 0.0  ;;  %v7566_v61 = vadd.f32 %v9834_v37, %v7469_v2  ;;  %10116 = vmatmul.mubr.msk.f32.gmra.mxu1 %vm719_vm0, %v7704_v20 }
 0x4ee   :  { %v9836_v28 = vpop.f32.mrf.mxu1  ;;  %10129 = vmatprep.mubr.msk.f32.mxu1 %vm719_vm0, %v7703_v29 }
 0x4ef   :  { %v7698_v51 = vmax.f32 %v7687_v16, %v7688_v22  ;;  %v9837_v63 = vadd.f32 %v9836_v28, %v9835_v54  ;;  %v7663_v39 = vadd.f32 %v7662_v34, %v7566_v61 }
 0x4f0   :  { %v9838_v43 = vpop.f32.mrf.mxu1 }
 0x4f1   :  { %v7569_v40 = vadd.f32 %v9837_v63, %v7472_v18  ;;  %v7689_v31 = vmax.f32 %v7663_v39, 0.0 }
 0x4f2   :  { %v9839_v25 = vpop.f32.mrf.mxu1 }
 0x4f3   :  { %v7666_v58 = vadd.f32 %v7665_v38, %v7569_v40  ;;  %v9840_v49 = vadd.f32 %v9839_v25, %v9838_v43 }
 0x4f4   :  { %v9841_v6 = vpop.f32.mrf.mxu1 }
 0x4f5   :  { %v7690_v45 = vmax.f32 %v7666_v58, 0.0  ;;  %v7574_v46 = vadd.f32 %v9840_v49, %v7477_v30 }
 0x4f6   :  { %v9842_v62 = vpop.f32.mrf.mxu1 }
 0x4f7   :  { %v7699_v5 = vmax.f32 %v7689_v31, %v7690_v45  ;;  %v9843_v14 = vadd.f32 %v9842_v62, %v9841_v6  ;;  %v7671_v7 = vadd.f32 %v10102_v60, %v7574_v46 }
 0x4f9   :  { %v7577_v59 = vadd.f32 %v9843_v14, %v7480_v52  ;;  %v7691_v44 = vmax.f32 %v7671_v7, 0.0 }
 0x4fb   :  { %v7674_v55 = vadd.f32 %v10103_v11, %v7577_v59 }
 0x4fd   :  { %v7692_v36 = vmax.f32 %v7674_v55, 0.0 }
 0x4ff   :  { %v7700_v12 = vmax.f32 %v7691_v44, %v7692_v36 }
 0x501   :  { %10118 = vmatprep.subr.mxu0 %v7700_v12  ;;  %10132 = vmatprep.subr.mxu1 %v7700_v12 }
 0x502   :  { %10119 = vmatpush3.msra.mxu0 %v7700_v12  ;;  %10136 = vmatpush3.msra.mxu1 %v7700_v12 }
 0x503   :  { %10120 = vmatprep.subr.mxu0 %v7699_v5  ;;  %10133 = vmatprep.subr.mxu1 %v7699_v5 }
 0x504   :  { %10121 = vmatpush3.msra.mxu0 %v7699_v5  ;;  %10137 = vmatpush3.msra.mxu1 %v7699_v5 }
 0x505   :  { %10122 = vmatprep.subr.mxu0 %v7698_v51  ;;  %10134 = vmatprep.subr.mxu1 %v7698_v51 }
 0x506   :  { %10123 = vmatpush3.msra.mxu0 %v7698_v51  ;;  %10138 = vmatpush3.msra.mxu1 %v7698_v51 }
 0x507   :  { %10124 = vmatprep.subr.mxu0 %v12581_v23  ;;  %10135 = vmatprep.subr.mxu1 %v12581_v23 }
 0x508   :  { %10125 = vmatpush3.msra.mxu0 %v12581_v23  ;;  %10139 = vmatpush3.msra.mxu1 %v12581_v23 }
 0x509   :  { %10127 = vmatmul.mubr.msk.f32.vlgmr.msra.gmra.mxu0 %vm719_vm0, %v12579_v10  ;;  %10130 = vmatmul.mubr.msk.f32.vlgmr.msra.gmra.mxu1 %vm719_vm0, %v7704_v20 }
 0x5a9   :  { %v10114_v3 = vpop.f32.mrf.mxu1 }
 0x5ab   :  { %v7783_v1 = vpop.f32.mrf.mxu1 }
 0x5ad   :  { %v10117_v21 = vpop.f32.mrf.mxu1 }
 0x5ae   :  { %v7888_v4 = vmax.f32 %v10114_v3, %v10117_v21 }
 0x5af   :  { %v7793_v57 = vpop.f32.mrf.mxu1 }
 0x5b0   :  { %v7887_v24 = vmax.f32 %v7783_v1, %v7793_v57 }
 0x5b2   :  { %v8970_v48 = vpack.c.bf16 %v7888_v4, %v7887_v24 }
 0x5b4   :  { %8971 = vst [vmem:[%s12630_s6] sm:$0xff] %v8970_v48  }
 0x5c9   :  { %v10128_v27 = vpop.f32.mrf.mxu0  ;;  %v10131_v9 = vpop.f32.mrf.mxu1 }
 0x5ca   :  { %v7890_v60 = vmax.f32 %v10128_v27, %v10131_v9 }
 0x5cb   :  { %v7868_v0 = vpop.f32.mrf.mxu0  ;;  %v7878_v47 = vpop.f32.mrf.mxu1 }
 0x5cc   :  { %v7889_v15 = vmax.f32 %v7868_v0, %v7878_v47 }
 0x5ce   :  { %v8975_v10 = vpack.c.bf16 %v7890_v60, %v7889_v15 }
 0x5d0   :  { %8977 = vst [vmem:[%s12630_s6 + $0x8] sm:$0xff] %v8975_v10  }

</bundles_post_ra>
